<compile_context>
chip_gen: v7x
topology: tpu7x:2x2x1
jax: 0.10.0
libtpu: 0.0.40
codegen_flags: <defaults>
</compile_context>

<pallas_src>
import jax
import jax.numpy as jnp
from jax.experimental import pallas as pl
from jax.experimental.pallas import tpu as pltpu

# ---------------- configuration (small, consistent with the module) ----------------
B = 16                    # batch of jets (must be a multiple of TILE_B)
TILE_B = 8                # jets per grid step -> TILE_B * SCALES[0] = 128 rows / lanes
F_IN = 4                  # leaf features per particle
HIDDEN = 32               # hidden size
ITERS = 2                 # message-passing iterations per scale
SCALES = (16, 8, 4)       # node counts; pools: 16 -> 8 -> 4
OUT_DIM = 1               # readout output (classifier logit)
N_STAGES = len(SCALES) - 1  # (mpnn, pool) pairs actually executed (zip truncation)

NEG_PAD = -1e9            # sentinel: padded-leaf pair inside a jet (first scale only)
NEG_XJET = -2e9           # sentinel: cross-jet pair (block-diagonal packing of the tile)


def stacked_mpnn_kernel(
    jets_ref, adj0_ref, adj1_ref,
    w_emb_ref, b_emb_ref,
    w_h_ref, b_h_ref,          # fused [Wa | Whh | Wm] / [ba | bhh | bm]   (S, T, H, 5H)
    w_ih_ref, b_ih_ref,        # GRU input->gates weights                  (S, T, H, 3H)
    w_pool0_ref, b_pool0_ref,
    w_pool1_ref, b_pool1_ref,
    w_r1_ref, b_r1_ref,
    w_r2_ref, b_r2_ref,
    out_ref,
):
    H = HIDDEN
    TB = TILE_B
    inv_sqrt_h = jnp.float32(1.0 / float(H) ** 0.5)

    # ---- embedding + tanh: one (TB*N0, F) x (F, H) matmul ----
    h = jnp.tanh(
        jnp.dot(jets_ref[...], w_emb_ref[...], preferred_element_type=jnp.float32)
        + b_emb_ref[...]
    )  # (TB*N0, H)

    pool_w = (w_pool0_ref, w_pool1_ref)
    pool_b = (b_pool0_ref, b_pool1_ref)

    for s in range(N_STAGES):
        N = SCALES[s]
        R = TB * N

        # sentinel matrix (hoisted out of the t-loop, precomputed on host):
        #   0        -> pair participates in this jet's softmax (keep raw logit)
        #   NEG_PAD  -> padded-leaf pair within a jet (first scale only)
        #   NEG_XJET -> cross-jet pair (block-diagonal packing of the tile)
        adj_fill = adj0_ref[0] if s == 0 else adj1_ref[...]          # (R, R)

        # -------- MultipleIterationMessagePassingLayer: ITERS iterations --------
        for t in range(ITERS):
            # everything consuming h in one fused matmul: [Wa | Whh | Wm]
            hp = (jnp.dot(h, w_h_ref[s, t], preferred_element_type=jnp.float32)
                  + b_h_ref[s, t])                                   # (R, 5H)
            e = hp[:, 0:H]                                           # adjacency embedding
            gh = hp[:, H:4 * H]                                      # GRU hidden gates (3H)
            hm = hp[:, 4 * H:5 * H]                                  # message pre-activation

            # block-diagonal adjacency over the whole tile: one (R,H)x(H,R) NT matmul
            raw = jax.lax.dot_general(e, e, (((1,), (1,)), ((), ())),
                                      preferred_element_type=jnp.float32)
            logits = jnp.where(adj_fill == 0.0, raw * inv_sqrt_h, adj_fill)
            mx = jnp.max(logits, axis=-1, keepdims=True)
            ex = jnp.exp(logits - mx)
            A = ex * pl.reciprocal(jnp.sum(ex, axis=-1, keepdims=True), approx=True)

            # message = tanh(A @ (h Wm + bm)); cross-jet weights are exactly 0
            msg = jnp.tanh(jnp.dot(A, hm, preferred_element_type=jnp.float32))  # (R, H)

            # GRUCell vertex update (torch gate order r, z, n; r applied inside candidate)
            gi = (jnp.dot(msg, w_ih_ref[s, t], preferred_element_type=jnp.float32)
                  + b_ih_ref[s, t])                                  # (R, 3H)
            r = jax.nn.sigmoid(gi[:, 0:H] + gh[:, 0:H])
            z = jax.nn.sigmoid(gi[:, H:2 * H] + gh[:, H:2 * H])
            n = jnp.tanh(gi[:, 2 * H:3 * H] + r * gh[:, 2 * H:3 * H])
            h = (1.0 - z) * n + z * h

        # -------- AttentionPooling: SCALES[s] -> SCALES[s+1] nodes --------
        n_out = SCALES[s + 1]
        att_logits = (jnp.dot(h, pool_w[s][...], preferred_element_type=jnp.float32)
                      + pool_b[s][...]).reshape(TB, N, n_out)
        att_t = jnp.swapaxes(att_logits, 1, 2)                       # (TB, n_out, N)
        mx = jnp.max(att_t, axis=-1, keepdims=True)
        ex = jnp.exp(att_t - mx)
        att = ex * pl.reciprocal(jnp.sum(ex, axis=-1, keepdims=True), approx=True)
        h3 = h.reshape(TB, N, H)
        h = jnp.einsum("bon,bnh->boh", att, h3,
                       preferred_element_type=jnp.float32).reshape(TB * n_out, H)

    # -------- readout: DTNN-style, sum over remaining nodes --------
    n_last = SCALES[-1]
    r1 = jnp.tanh(jnp.dot(h, w_r1_ref[...], preferred_element_type=jnp.float32)
                  + b_r1_ref[...])
    r2 = (jnp.dot(r1, w_r2_ref[...], preferred_element_type=jnp.float32)
          + b_r2_ref[...])
    out_ref[...] = jnp.sum(r2.reshape(TB, n_last, OUT_DIM), axis=1)  # (TB, OUT_DIM)


# ---------------- host-side parameter construction / fusion ----------------
def make_params(key):
    H = HIDDEN
    S, T = N_STAGES, ITERS
    ks = iter(jax.random.split(key, 20))
    scale = 0.1

    def nrm(shape):
        return (scale * jax.random.normal(next(ks), shape)).astype(jnp.float32)

    return dict(
        w_emb=nrm((F_IN, H)), b_emb=nrm((1, H)),
        w_a=nrm((S, T, H, H)), b_a=nrm((S, T, 1, H)),
        w_m=nrm((S, T, H, H)), b_m=nrm((S, T, 1, H)),
        w_ih=nrm((S, T, H, 3 * H)), b_ih=nrm((S, T, 1, 3 * H)),
        w_hh=nrm((S, T, H, 3 * H)), b_hh=nrm((S, T, 1, 3 * H)),
        w_pool0=nrm((H, SCALES[1])), b_pool0=nrm((1, SCALES[1])),
        w_pool1=nrm((H, SCALES[2])), b_pool1=nrm((1, SCALES[2])),
        w_r1=nrm((H, H)), b_r1=nrm((1, H)),
        w_r2=nrm((H, OUT_DIM)), b_r2=nrm((1, OUT_DIM)),
    )


def fuse_params(p):
    # [Wa | Whh | Wm]: one matmul per iteration for everything that consumes h.
    w_h = jnp.concatenate([p["w_a"], p["w_hh"], p["w_m"]], axis=-1)   # (S, T, H, 5H)
    b_h = jnp.concatenate([p["b_a"], p["b_hh"], p["b_m"]], axis=-1)   # (S, T, 1, 5H)
    fused = dict(p)
    fused["w_h"] = w_h
    fused["b_h"] = b_h
    return fused


def build_adj_sentinels(mask):
    """Host-side: block-diagonal / padded-leaf sentinel matrices per jet tile."""
    num_tiles = B // TILE_B
    n0 = SCALES[0]
    r0 = TILE_B * n0
    m = mask.astype(jnp.float32).reshape(num_tiles, r0)               # jet-major rows
    pair_valid = m[:, :, None] * m[:, None, :]                        # (tiles, R0, R0)
    jet0 = jnp.arange(r0) // n0
    same0 = jet0[:, None] == jet0[None, :]
    adj0 = jnp.where(same0[None],
                     jnp.where(pair_valid > 0.0, 0.0, NEG_PAD),
                     NEG_XJET).astype(jnp.float32)                    # (tiles, R0, R0)

    n1 = SCALES[1]
    r1 = TILE_B * n1
    jet1 = jnp.arange(r1) // n1
    adj1 = jnp.where(jet1[:, None] == jet1[None, :], 0.0,
                     NEG_XJET).astype(jnp.float32)                    # (R1, R1)
    return adj0, adj1


def _resident_spec(x):
    """Full-array block with a constant index_map: stays VMEM-resident across steps."""
    zeros = (0,) * x.ndim
    return pl.BlockSpec(x.shape, lambda i: zeros)


def stacked_mpnn_transform(jets, mask, params):
    # TODO(synk): batch_leaves (ragged jet list -> padded jets + mask) stays host-side.
    assert B % TILE_B == 0
    num_tiles = B // TILE_B
    n0 = SCALES[0]
    r0 = TILE_B * n0

    p = fuse_params(params)
    adj0, adj1 = build_adj_sentinels(mask)
    jets_flat = jets.reshape(B * n0, F_IN)                            # jet-major rows

    weights = (
        p["w_emb"], p["b_emb"],
        p["w_h"], p["b_h"],
        p["w_ih"], p["b_ih"],
        p["w_pool0"], p["b_pool0"],
        p["w_pool1"], p["b_pool1"],
        p["w_r1"], p["b_r1"],
        p["w_r2"], p["b_r2"],
    )

    in_specs = (
        [pl.BlockSpec((r0, F_IN), lambda i: (i, 0)),                  # jets tile (flattened)
         pl.BlockSpec((1, r0, r0), lambda i: (i, 0, 0)),              # stage-0 sentinels
         _resident_spec(adj1)]                                        # stage-1 sentinels
        + [_resident_spec(w) for w in weights]
    )

    grid_spec = pltpu.PrefetchScalarGridSpec(
        num_scalar_prefetch=0,
        grid=(num_tiles,),
        in_specs=in_specs,
        out_specs=pl.BlockSpec((TILE_B, OUT_DIM), lambda i: (i, 0)),
    )

    return pl.pallas_call(
        stacked_mpnn_kernel,
        out_shape=jax.ShapeDtypeStruct((B, OUT_DIM), jnp.float32),
        grid_spec=grid_spec,
        compiler_params=pltpu.CompilerParams(dimension_semantics=("parallel",)),
    )(jets_flat, adj0, adj1, *weights)


if __name__ == "__main__":
    key = jax.random.PRNGKey(0)
    k_jets, k_params = jax.random.split(key)

    # synthetic, already-batched jets ("batch_leaves" output) + per-node validity mask
    jets = jax.random.normal(k_jets, (B, SCALES[0], F_IN), dtype=jnp.float32)
    mask = jnp.ones((B, SCALES[0]), dtype=jnp.float32)
    mask = mask.at[1, -4:].set(0.0)    # some jets have padded leaves
    mask = mask.at[5, -7:].set(0.0)
    mask = mask.at[10, -2:].set(0.0)

    params = make_params(k_params)

    out = stacked_mpnn_transform(jets, mask, params)
    out = jax.block_until_ready(out)
    assert out.shape == (B, OUT_DIM)
    assert bool(jnp.all(jnp.isfinite(out)))
    print("KERNEL_OK")
</pallas_src>

<mosaic_0001>
module attributes {stable_mosaic.version = 11 : i64} {
  func.func @stacked_mpnn_kernel(%arg0: i32, %arg1: memref<128x4xf32, #tpu.memory_space<vmem>>, %arg2: memref<1x128x128xf32, #tpu.memory_space<vmem>>, %arg3: memref<64x64xf32, #tpu.memory_space<vmem>>, %arg4: memref<4x32xf32, #tpu.memory_space<vmem>>, %arg5: memref<1x32xf32, #tpu.memory_space<vmem>>, %arg6: memref<2x2x32x160xf32, #tpu.memory_space<vmem>>, %arg7: memref<2x2x1x160xf32, #tpu.memory_space<vmem>>, %arg8: memref<2x2x32x96xf32, #tpu.memory_space<vmem>>, %arg9: memref<2x2x1x96xf32, #tpu.memory_space<vmem>>, %arg10: memref<32x8xf32, #tpu.memory_space<vmem>>, %arg11: memref<1x8xf32, #tpu.memory_space<vmem>>, %arg12: memref<32x4xf32, #tpu.memory_space<vmem>>, %arg13: memref<1x4xf32, #tpu.memory_space<vmem>>, %arg14: memref<32x32xf32, #tpu.memory_space<vmem>>, %arg15: memref<1x32xf32, #tpu.memory_space<vmem>>, %arg16: memref<32x1xf32, #tpu.memory_space<vmem>>, %arg17: memref<1x1xf32, #tpu.memory_space<vmem>>, %arg18: memref<8x1xf32, #tpu.memory_space<vmem>>) attributes {dimension_semantics = [#tpu.dimension_semantics<parallel>], iteration_bounds = array<i64: 2>, scalar_prefetch = 0 : i64, scratch_operands = 0 : i64, tpu.core_type = #tpu.core_type<tc>, window_params = [{transform_indices = @transform_0, window_bounds = array<i64: 128, 4>}, {transform_indices = @transform_1, window_bounds = array<i64: 1, 128, 128>}, {pipeline_mode = #tpu.pipeline_mode<synchronous>, transform_indices = @transform_2, window_bounds = array<i64: 64, 64>}, {pipeline_mode = #tpu.pipeline_mode<synchronous>, transform_indices = @transform_3, window_bounds = array<i64: 4, 32>}, {pipeline_mode = #tpu.pipeline_mode<synchronous>, transform_indices = @transform_4, window_bounds = array<i64: 1, 32>}, {pipeline_mode = #tpu.pipeline_mode<synchronous>, transform_indices = @transform_5, window_bounds = array<i64: 2, 2, 32, 160>}, {pipeline_mode = #tpu.pipeline_mode<synchronous>, transform_indices = @transform_6, window_bounds = array<i64: 2, 2, 1, 160>}, {pipeline_mode = #tpu.pipeline_mode<synchronous>, transform_indices = @transform_7, window_bounds = array<i64: 2, 2, 32, 96>}, {pipeline_mode = #tpu.pipeline_mode<synchronous>, transform_indices = @transform_8, window_bounds = array<i64: 2, 2, 1, 96>}, {pipeline_mode = #tpu.pipeline_mode<synchronous>, transform_indices = @transform_9, window_bounds = array<i64: 32, 8>}, {pipeline_mode = #tpu.pipeline_mode<synchronous>, transform_indices = @transform_10, window_bounds = array<i64: 1, 8>}, {pipeline_mode = #tpu.pipeline_mode<synchronous>, transform_indices = @transform_11, window_bounds = array<i64: 32, 4>}, {pipeline_mode = #tpu.pipeline_mode<synchronous>, transform_indices = @transform_12, window_bounds = array<i64: 1, 4>}, {pipeline_mode = #tpu.pipeline_mode<synchronous>, transform_indices = @transform_13, window_bounds = array<i64: 32, 32>}, {pipeline_mode = #tpu.pipeline_mode<synchronous>, transform_indices = @transform_14, window_bounds = array<i64: 1, 32>}, {pipeline_mode = #tpu.pipeline_mode<synchronous>, transform_indices = @transform_15, window_bounds = array<i64: 32, 1>}, {pipeline_mode = #tpu.pipeline_mode<synchronous>, transform_indices = @transform_16, window_bounds = array<i64: 1, 1>}, {transform_indices = @transform_17, window_bounds = array<i64: 8, 1>}]} {
    %c0 = arith.constant 0 : index
    %c0_0 = arith.constant 0 : index
    %0 = vector.load %arg1[%c0, %c0_0] : memref<128x4xf32, #tpu.memory_space<vmem>>, vector<128x4xf32>
    %c0_1 = arith.constant 0 : index
    %c0_2 = arith.constant 0 : index
    %1 = vector.load %arg4[%c0_1, %c0_2] : memref<4x32xf32, #tpu.memory_space<vmem>>, vector<4x32xf32>
    %cst = arith.constant dense<0.000000e+00> : vector<128x32xf32>
    %2 = tpu.matmul %0, %1, %cst {dimension_numbers = #tpu.dot_dimension_numbers<[1], [0], [0], [1], [0, 0, 1, 1], [], []>} : vector<128x4xf32>, vector<4x32xf32>, vector<128x32xf32> -> vector<128x32xf32>
    %c0_3 = arith.constant 0 : index
    %c0_4 = arith.constant 0 : index
    %3 = vector.load %arg5[%c0_3, %c0_4] : memref<1x32xf32, #tpu.memory_space<vmem>>, vector<1x32xf32>
    %4 = vector.broadcast %3 : vector<1x32xf32> to vector<128x32xf32>
    %5 = arith.addf %2, %4 : vector<128x32xf32>
    %6 = math.tanh %5 : vector<128x32xf32>
    %c0_5 = arith.constant 0 : index
    %c0_6 = arith.constant 0 : index
    %c0_7 = arith.constant 0 : index
    %7 = vector.load %arg2[%c0_5, %c0_6, %c0_7] : memref<1x128x128xf32, #tpu.memory_space<vmem>>, vector<1x128x128xf32>
    %8 = vector.shape_cast %7 : vector<1x128x128xf32> to vector<128x128xf32>
    %c0_8 = arith.constant 0 : index
    %c0_9 = arith.constant 0 : index
    %c0_10 = arith.constant 0 : index
    %c0_11 = arith.constant 0 : index
    %9 = vector.load %arg6[%c0_8, %c0_9, %c0_10, %c0_11] : memref<2x2x32x160xf32, #tpu.memory_space<vmem>>, vector<1x1x32x160xf32>
    %10 = vector.shape_cast %9 : vector<1x1x32x160xf32> to vector<32x160xf32>
    %cst_12 = arith.constant dense<0.000000e+00> : vector<128x160xf32>
    %11 = tpu.matmul %6, %10, %cst_12 {dimension_numbers = #tpu.dot_dimension_numbers<[1], [0], [0], [1], [0, 0, 1, 1], [], []>} : vector<128x32xf32>, vector<32x160xf32>, vector<128x160xf32> -> vector<128x160xf32>
    %c0_13 = arith.constant 0 : index
    %c0_14 = arith.constant 0 : index
    %c0_15 = arith.constant 0 : index
    %c0_16 = arith.constant 0 : index
    %12 = vector.load %arg7[%c0_13, %c0_14, %c0_15, %c0_16] : memref<2x2x1x160xf32, #tpu.memory_space<vmem>>, vector<1x1x1x160xf32>
    %13 = vector.shape_cast %12 : vector<1x1x1x160xf32> to vector<1x160xf32>
    %14 = vector.broadcast %13 : vector<1x160xf32> to vector<128x160xf32>
    %15 = arith.addf %11, %14 : vector<128x160xf32>
    %16 = vector.extract_strided_slice %15 {offsets = [0, 0], sizes = [128, 32], strides = [1, 1]} : vector<128x160xf32> to vector<128x32xf32>
    %17 = vector.extract_strided_slice %15 {offsets = [0, 32], sizes = [128, 96], strides = [1, 1]} : vector<128x160xf32> to vector<128x96xf32>
    %18 = vector.extract_strided_slice %15 {offsets = [0, 128], sizes = [128, 32], strides = [1, 1]} : vector<128x160xf32> to vector<128x32xf32>
    %cst_17 = arith.constant dense<0.000000e+00> : vector<128x128xf32>
    %19 = tpu.matmul %16, %16, %cst_17 {dimension_numbers = #tpu.dot_dimension_numbers<[1], [1], [0], [0], [0, 0, 1, 0], [], []>} : vector<128x32xf32>, vector<128x32xf32>, vector<128x128xf32> -> vector<128x128xf32>
    %cst_18 = arith.constant 0.000000e+00 : f32
    %20 = vector.broadcast %cst_18 : f32 to vector<128x128xf32>
    %21 = arith.cmpf oeq, %8, %20 : vector<128x128xf32>
    %cst_19 = arith.constant 0.176776692 : f32
    %22 = vector.broadcast %cst_19 : f32 to vector<128x128xf32>
    %23 = arith.mulf %19, %22 : vector<128x128xf32>
    %24 = arith.select %21, %23, %8 : vector<128x128xi1>, vector<128x128xf32>
    %cst_20 = arith.constant dense<0xFF800000> : vector<128xf32>
    %25 = vector.multi_reduction <maximumf>, %24, %cst_20 [1] : vector<128x128xf32> to vector<128xf32>
    %26 = vector.shape_cast %25 : vector<128xf32> to vector<128x1xf32>
    %27 = vector.broadcast %26 : vector<128x1xf32> to vector<128x128xf32>
    %28 = arith.subf %24, %27 : vector<128x128xf32>
    %29 = math.exp %28 : vector<128x128xf32>
    %cst_21 = arith.constant dense<0.000000e+00> : vector<128xf32>
    %30 = vector.multi_reduction <add>, %29, %cst_21 [1] : vector<128x128xf32> to vector<128xf32>
    %31 = vector.shape_cast %30 : vector<128xf32> to vector<128x1xf32>
    %32 = tpu.reciprocal %31 {approx = true} : vector<128x1xf32> -> vector<128x1xf32>
    %33 = vector.broadcast %32 : vector<128x1xf32> to vector<128x128xf32>
    %34 = arith.mulf %29, %33 : vector<128x128xf32>
    %cst_22 = arith.constant dense<0.000000e+00> : vector<128x32xf32>
    %35 = tpu.matmul %34, %18, %cst_22 {dimension_numbers = #tpu.dot_dimension_numbers<[1], [0], [0], [1], [0, 0, 1, 1], [], []>} : vector<128x128xf32>, vector<128x32xf32>, vector<128x32xf32> -> vector<128x32xf32>
    %36 = math.tanh %35 : vector<128x32xf32>
    %c0_23 = arith.constant 0 : index
    %c0_24 = arith.constant 0 : index
    %c0_25 = arith.constant 0 : index
    %c0_26 = arith.constant 0 : index
    %37 = vector.load %arg8[%c0_23, %c0_24, %c0_25, %c0_26] : memref<2x2x32x96xf32, #tpu.memory_space<vmem>>, vector<1x1x32x96xf32>
    %38 = vector.shape_cast %37 : vector<1x1x32x96xf32> to vector<32x96xf32>
    %cst_27 = arith.constant dense<0.000000e+00> : vector<128x96xf32>
    %39 = tpu.matmul %36, %38, %cst_27 {dimension_numbers = #tpu.dot_dimension_numbers<[1], [0], [0], [1], [0, 0, 1, 1], [], []>} : vector<128x32xf32>, vector<32x96xf32>, vector<128x96xf32> -> vector<128x96xf32>
    %c0_28 = arith.constant 0 : index
    %c0_29 = arith.constant 0 : index
    %c0_30 = arith.constant 0 : index
    %c0_31 = arith.constant 0 : index
    %40 = vector.load %arg9[%c0_28, %c0_29, %c0_30, %c0_31] : memref<2x2x1x96xf32, #tpu.memory_space<vmem>>, vector<1x1x1x96xf32>
    %41 = vector.shape_cast %40 : vector<1x1x1x96xf32> to vector<1x96xf32>
    %42 = vector.broadcast %41 : vector<1x96xf32> to vector<128x96xf32>
    %43 = arith.addf %39, %42 : vector<128x96xf32>
    %44 = vector.extract_strided_slice %43 {offsets = [0, 0], sizes = [128, 32], strides = [1, 1]} : vector<128x96xf32> to vector<128x32xf32>
    %45 = vector.extract_strided_slice %17 {offsets = [0, 0], sizes = [128, 32], strides = [1, 1]} : vector<128x96xf32> to vector<128x32xf32>
    %46 = arith.addf %44, %45 : vector<128x32xf32>
    %47 = arith.negf %46 : vector<128x32xf32>
    %48 = math.exp %47 : vector<128x32xf32>
    %cst_32 = arith.constant 1.000000e+00 : f32
    %49 = vector.broadcast %cst_32 : f32 to vector<128x32xf32>
    %50 = arith.addf %49, %48 : vector<128x32xf32>
    %51 = arith.divf %49, %50 : vector<128x32xf32>
    %52 = vector.extract_strided_slice %43 {offsets = [0, 32], sizes = [128, 32], strides = [1, 1]} : vector<128x96xf32> to vector<128x32xf32>
    %53 = vector.extract_strided_slice %17 {offsets = [0, 32], sizes = [128, 32], strides = [1, 1]} : vector<128x96xf32> to vector<128x32xf32>
    %54 = arith.addf %52, %53 : vector<128x32xf32>
    %55 = arith.negf %54 : vector<128x32xf32>
    %56 = math.exp %55 : vector<128x32xf32>
    %cst_33 = arith.constant 1.000000e+00 : f32
    %57 = vector.broadcast %cst_33 : f32 to vector<128x32xf32>
    %58 = arith.addf %57, %56 : vector<128x32xf32>
    %59 = arith.divf %57, %58 : vector<128x32xf32>
    %60 = vector.extract_strided_slice %43 {offsets = [0, 64], sizes = [128, 32], strides = [1, 1]} : vector<128x96xf32> to vector<128x32xf32>
    %61 = vector.extract_strided_slice %17 {offsets = [0, 64], sizes = [128, 32], strides = [1, 1]} : vector<128x96xf32> to vector<128x32xf32>
    %62 = arith.mulf %51, %61 : vector<128x32xf32>
    %63 = arith.addf %60, %62 : vector<128x32xf32>
    %64 = math.tanh %63 : vector<128x32xf32>
    %cst_34 = arith.constant 1.000000e+00 : f32
    %65 = vector.broadcast %cst_34 : f32 to vector<128x32xf32>
    %66 = arith.subf %65, %59 : vector<128x32xf32>
    %67 = arith.mulf %66, %64 : vector<128x32xf32>
    %68 = arith.mulf %59, %6 : vector<128x32xf32>
    %69 = arith.addf %67, %68 : vector<128x32xf32>
    %c0_35 = arith.constant 0 : index
    %c1 = arith.constant 1 : index
    %c0_36 = arith.constant 0 : index
    %c0_37 = arith.constant 0 : index
    %70 = vector.load %arg6[%c0_35, %c1, %c0_36, %c0_37] : memref<2x2x32x160xf32, #tpu.memory_space<vmem>>, vector<1x1x32x160xf32>
    %71 = vector.shape_cast %70 : vector<1x1x32x160xf32> to vector<32x160xf32>
    %cst_38 = arith.constant dense<0.000000e+00> : vector<128x160xf32>
    %72 = tpu.matmul %69, %71, %cst_38 {dimension_numbers = #tpu.dot_dimension_numbers<[1], [0], [0], [1], [0, 0, 1, 1], [], []>} : vector<128x32xf32>, vector<32x160xf32>, vector<128x160xf32> -> vector<128x160xf32>
    %c0_39 = arith.constant 0 : index
    %c1_40 = arith.constant 1 : index
    %c0_41 = arith.constant 0 : index
    %c0_42 = arith.constant 0 : index
    %73 = vector.load %arg7[%c0_39, %c1_40, %c0_41, %c0_42] : memref<2x2x1x160xf32, #tpu.memory_space<vmem>>, vector<1x1x1x160xf32>
    %74 = vector.shape_cast %73 : vector<1x1x1x160xf32> to vector<1x160xf32>
    %75 = vector.broadcast %74 : vector<1x160xf32> to vector<128x160xf32>
    %76 = arith.addf %72, %75 : vector<128x160xf32>
    %77 = vector.extract_strided_slice %76 {offsets = [0, 0], sizes = [128, 32], strides = [1, 1]} : vector<128x160xf32> to vector<128x32xf32>
    %78 = vector.extract_strided_slice %76 {offsets = [0, 32], sizes = [128, 96], strides = [1, 1]} : vector<128x160xf32> to vector<128x96xf32>
    %79 = vector.extract_strided_slice %76 {offsets = [0, 128], sizes = [128, 32], strides = [1, 1]} : vector<128x160xf32> to vector<128x32xf32>
    %cst_43 = arith.constant dense<0.000000e+00> : vector<128x128xf32>
    %80 = tpu.matmul %77, %77, %cst_43 {dimension_numbers = #tpu.dot_dimension_numbers<[1], [1], [0], [0], [0, 0, 1, 0], [], []>} : vector<128x32xf32>, vector<128x32xf32>, vector<128x128xf32> -> vector<128x128xf32>
    %cst_44 = arith.constant 0.000000e+00 : f32
    %81 = vector.broadcast %cst_44 : f32 to vector<128x128xf32>
    %82 = arith.cmpf oeq, %8, %81 : vector<128x128xf32>
    %cst_45 = arith.constant 0.176776692 : f32
    %83 = vector.broadcast %cst_45 : f32 to vector<128x128xf32>
    %84 = arith.mulf %80, %83 : vector<128x128xf32>
    %85 = arith.select %82, %84, %8 : vector<128x128xi1>, vector<128x128xf32>
    %cst_46 = arith.constant dense<0xFF800000> : vector<128xf32>
    %86 = vector.multi_reduction <maximumf>, %85, %cst_46 [1] : vector<128x128xf32> to vector<128xf32>
    %87 = vector.shape_cast %86 : vector<128xf32> to vector<128x1xf32>
    %88 = vector.broadcast %87 : vector<128x1xf32> to vector<128x128xf32>
    %89 = arith.subf %85, %88 : vector<128x128xf32>
    %90 = math.exp %89 : vector<128x128xf32>
    %cst_47 = arith.constant dense<0.000000e+00> : vector<128xf32>
    %91 = vector.multi_reduction <add>, %90, %cst_47 [1] : vector<128x128xf32> to vector<128xf32>
    %92 = vector.shape_cast %91 : vector<128xf32> to vector<128x1xf32>
    %93 = tpu.reciprocal %92 {approx = true} : vector<128x1xf32> -> vector<128x1xf32>
    %94 = vector.broadcast %93 : vector<128x1xf32> to vector<128x128xf32>
    %95 = arith.mulf %90, %94 : vector<128x128xf32>
    %cst_48 = arith.constant dense<0.000000e+00> : vector<128x32xf32>
    %96 = tpu.matmul %95, %79, %cst_48 {dimension_numbers = #tpu.dot_dimension_numbers<[1], [0], [0], [1], [0, 0, 1, 1], [], []>} : vector<128x128xf32>, vector<128x32xf32>, vector<128x32xf32> -> vector<128x32xf32>
    %97 = math.tanh %96 : vector<128x32xf32>
    %c0_49 = arith.constant 0 : index
    %c1_50 = arith.constant 1 : index
    %c0_51 = arith.constant 0 : index
    %c0_52 = arith.constant 0 : index
    %98 = vector.load %arg8[%c0_49, %c1_50, %c0_51, %c0_52] : memref<2x2x32x96xf32, #tpu.memory_space<vmem>>, vector<1x1x32x96xf32>
    %99 = vector.shape_cast %98 : vector<1x1x32x96xf32> to vector<32x96xf32>
    %cst_53 = arith.constant dense<0.000000e+00> : vector<128x96xf32>
    %100 = tpu.matmul %97, %99, %cst_53 {dimension_numbers = #tpu.dot_dimension_numbers<[1], [0], [0], [1], [0, 0, 1, 1], [], []>} : vector<128x32xf32>, vector<32x96xf32>, vector<128x96xf32> -> vector<128x96xf32>
    %c0_54 = arith.constant 0 : index
    %c1_55 = arith.constant 1 : index
    %c0_56 = arith.constant 0 : index
    %c0_57 = arith.constant 0 : index
    %101 = vector.load %arg9[%c0_54, %c1_55, %c0_56, %c0_57] : memref<2x2x1x96xf32, #tpu.memory_space<vmem>>, vector<1x1x1x96xf32>
    %102 = vector.shape_cast %101 : vector<1x1x1x96xf32> to vector<1x96xf32>
    %103 = vector.broadcast %102 : vector<1x96xf32> to vector<128x96xf32>
    %104 = arith.addf %100, %103 : vector<128x96xf32>
    %105 = vector.extract_strided_slice %104 {offsets = [0, 0], sizes = [128, 32], strides = [1, 1]} : vector<128x96xf32> to vector<128x32xf32>
    %106 = vector.extract_strided_slice %78 {offsets = [0, 0], sizes = [128, 32], strides = [1, 1]} : vector<128x96xf32> to vector<128x32xf32>
    %107 = arith.addf %105, %106 : vector<128x32xf32>
    %108 = arith.negf %107 : vector<128x32xf32>
    %109 = math.exp %108 : vector<128x32xf32>
    %cst_58 = arith.constant 1.000000e+00 : f32
    %110 = vector.broadcast %cst_58 : f32 to vector<128x32xf32>
    %111 = arith.addf %110, %109 : vector<128x32xf32>
    %112 = arith.divf %110, %111 : vector<128x32xf32>
    %113 = vector.extract_strided_slice %104 {offsets = [0, 32], sizes = [128, 32], strides = [1, 1]} : vector<128x96xf32> to vector<128x32xf32>
    %114 = vector.extract_strided_slice %78 {offsets = [0, 32], sizes = [128, 32], strides = [1, 1]} : vector<128x96xf32> to vector<128x32xf32>
    %115 = arith.addf %113, %114 : vector<128x32xf32>
    %116 = arith.negf %115 : vector<128x32xf32>
    %117 = math.exp %116 : vector<128x32xf32>
    %cst_59 = arith.constant 1.000000e+00 : f32
    %118 = vector.broadcast %cst_59 : f32 to vector<128x32xf32>
    %119 = arith.addf %118, %117 : vector<128x32xf32>
    %120 = arith.divf %118, %119 : vector<128x32xf32>
    %121 = vector.extract_strided_slice %104 {offsets = [0, 64], sizes = [128, 32], strides = [1, 1]} : vector<128x96xf32> to vector<128x32xf32>
    %122 = vector.extract_strided_slice %78 {offsets = [0, 64], sizes = [128, 32], strides = [1, 1]} : vector<128x96xf32> to vector<128x32xf32>
    %123 = arith.mulf %112, %122 : vector<128x32xf32>
    %124 = arith.addf %121, %123 : vector<128x32xf32>
    %125 = math.tanh %124 : vector<128x32xf32>
    %cst_60 = arith.constant 1.000000e+00 : f32
    %126 = vector.broadcast %cst_60 : f32 to vector<128x32xf32>
    %127 = arith.subf %126, %120 : vector<128x32xf32>
    %128 = arith.mulf %127, %125 : vector<128x32xf32>
    %129 = arith.mulf %120, %69 : vector<128x32xf32>
    %130 = arith.addf %128, %129 : vector<128x32xf32>
    %c0_61 = arith.constant 0 : index
    %c0_62 = arith.constant 0 : index
    %131 = vector.load %arg10[%c0_61, %c0_62] : memref<32x8xf32, #tpu.memory_space<vmem>>, vector<32x8xf32>
    %cst_63 = arith.constant dense<0.000000e+00> : vector<128x8xf32>
    %132 = tpu.matmul %130, %131, %cst_63 {dimension_numbers = #tpu.dot_dimension_numbers<[1], [0], [0], [1], [0, 0, 1, 1], [], []>} : vector<128x32xf32>, vector<32x8xf32>, vector<128x8xf32> -> vector<128x8xf32>
    %c0_64 = arith.constant 0 : index
    %c0_65 = arith.constant 0 : index
    %133 = vector.load %arg11[%c0_64, %c0_65] : memref<1x8xf32, #tpu.memory_space<vmem>>, vector<1x8xf32>
    %134 = vector.broadcast %133 : vector<1x8xf32> to vector<128x8xf32>
    %135 = arith.addf %132, %134 : vector<128x8xf32>
    %136 = vector.shape_cast %135 : vector<128x8xf32> to vector<8x16x8xf32>
    %137 = tpu.transpose %136, [0, 2, 1] : vector<8x16x8xf32> -> vector<8x8x16xf32>
    %cst_66 = arith.constant dense<0xFF800000> : vector<8x8xf32>
    %138 = vector.multi_reduction <maximumf>, %137, %cst_66 [2] : vector<8x8x16xf32> to vector<8x8xf32>
    %139 = vector.shape_cast %138 : vector<8x8xf32> to vector<8x8x1xf32>
    %140 = vector.broadcast %139 : vector<8x8x1xf32> to vector<8x8x16xf32>
    %141 = arith.subf %137, %140 : vector<8x8x16xf32>
    %142 = math.exp %141 : vector<8x8x16xf32>
    %cst_67 = arith.constant dense<0.000000e+00> : vector<8x8xf32>
    %143 = vector.multi_reduction <add>, %142, %cst_67 [2] : vector<8x8x16xf32> to vector<8x8xf32>
    %144 = vector.shape_cast %143 : vector<8x8xf32> to vector<8x8x1xf32>
    %145 = tpu.reciprocal %144 {approx = true} : vector<8x8x1xf32> -> vector<8x8x1xf32>
    %146 = vector.broadcast %145 : vector<8x8x1xf32> to vector<8x8x16xf32>
    %147 = arith.mulf %142, %146 : vector<8x8x16xf32>
    %148 = vector.shape_cast %130 : vector<128x32xf32> to vector<8x16x32xf32>
    "tpu.trace_start"() <{level = 10 : i32, message = "bon,bnh->boh"}> : () -> ()
    %cst_68 = arith.constant dense<0.000000e+00> : vector<8x8x32xf32>
    %149 = tpu.matmul %147, %148, %cst_68 {dimension_numbers = #tpu.dot_dimension_numbers<[2], [1], [1], [2], [0, 0, 0, 1, 1, 2], [0], [0]>} : vector<8x8x16xf32>, vector<8x16x32xf32>, vector<8x8x32xf32> -> vector<8x8x32xf32>
    "tpu.trace_stop"() : () -> ()
    %150 = vector.shape_cast %149 : vector<8x8x32xf32> to vector<64x32xf32>
    %c0_69 = arith.constant 0 : index
    %c0_70 = arith.constant 0 : index
    %151 = vector.load %arg3[%c0_69, %c0_70] : memref<64x64xf32, #tpu.memory_space<vmem>>, vector<64x64xf32>
    %c1_71 = arith.constant 1 : index
    %c0_72 = arith.constant 0 : index
    %c0_73 = arith.constant 0 : index
    %c0_74 = arith.constant 0 : index
    %152 = vector.load %arg6[%c1_71, %c0_72, %c0_73, %c0_74] : memref<2x2x32x160xf32, #tpu.memory_space<vmem>>, vector<1x1x32x160xf32>
    %153 = vector.shape_cast %152 : vector<1x1x32x160xf32> to vector<32x160xf32>
    %cst_75 = arith.constant dense<0.000000e+00> : vector<64x160xf32>
    %154 = tpu.matmul %150, %153, %cst_75 {dimension_numbers = #tpu.dot_dimension_numbers<[1], [0], [0], [1], [0, 0, 1, 1], [], []>} : vector<64x32xf32>, vector<32x160xf32>, vector<64x160xf32> -> vector<64x160xf32>
    %c1_76 = arith.constant 1 : index
    %c0_77 = arith.constant 0 : index
    %c0_78 = arith.constant 0 : index
    %c0_79 = arith.constant 0 : index
    %155 = vector.load %arg7[%c1_76, %c0_77, %c0_78, %c0_79] : memref<2x2x1x160xf32, #tpu.memory_space<vmem>>, vector<1x1x1x160xf32>
    %156 = vector.shape_cast %155 : vector<1x1x1x160xf32> to vector<1x160xf32>
    %157 = vector.broadcast %156 : vector<1x160xf32> to vector<64x160xf32>
    %158 = arith.addf %154, %157 : vector<64x160xf32>
    %159 = vector.extract_strided_slice %158 {offsets = [0, 0], sizes = [64, 32], strides = [1, 1]} : vector<64x160xf32> to vector<64x32xf32>
    %160 = vector.extract_strided_slice %158 {offsets = [0, 32], sizes = [64, 96], strides = [1, 1]} : vector<64x160xf32> to vector<64x96xf32>
    %161 = vector.extract_strided_slice %158 {offsets = [0, 128], sizes = [64, 32], strides = [1, 1]} : vector<64x160xf32> to vector<64x32xf32>
    %cst_80 = arith.constant dense<0.000000e+00> : vector<64x64xf32>
    %162 = tpu.matmul %159, %159, %cst_80 {dimension_numbers = #tpu.dot_dimension_numbers<[1], [1], [0], [0], [0, 0, 1, 0], [], []>} : vector<64x32xf32>, vector<64x32xf32>, vector<64x64xf32> -> vector<64x64xf32>
    %cst_81 = arith.constant 0.000000e+00 : f32
    %163 = vector.broadcast %cst_81 : f32 to vector<64x64xf32>
    %164 = arith.cmpf oeq, %151, %163 : vector<64x64xf32>
    %cst_82 = arith.constant 0.176776692 : f32
    %165 = vector.broadcast %cst_82 : f32 to vector<64x64xf32>
    %166 = arith.mulf %162, %165 : vector<64x64xf32>
    %167 = arith.select %164, %166, %151 : vector<64x64xi1>, vector<64x64xf32>
    %cst_83 = arith.constant dense<0xFF800000> : vector<64xf32>
    %168 = vector.multi_reduction <maximumf>, %167, %cst_83 [1] : vector<64x64xf32> to vector<64xf32>
    %169 = vector.shape_cast %168 : vector<64xf32> to vector<64x1xf32>
    %170 = vector.broadcast %169 : vector<64x1xf32> to vector<64x64xf32>
    %171 = arith.subf %167, %170 : vector<64x64xf32>
    %172 = math.exp %171 : vector<64x64xf32>
    %cst_84 = arith.constant dense<0.000000e+00> : vector<64xf32>
    %173 = vector.multi_reduction <add>, %172, %cst_84 [1] : vector<64x64xf32> to vector<64xf32>
    %174 = vector.shape_cast %173 : vector<64xf32> to vector<64x1xf32>
    %175 = tpu.reciprocal %174 {approx = true} : vector<64x1xf32> -> vector<64x1xf32>
    %176 = vector.broadcast %175 : vector<64x1xf32> to vector<64x64xf32>
    %177 = arith.mulf %172, %176 : vector<64x64xf32>
    %cst_85 = arith.constant dense<0.000000e+00> : vector<64x32xf32>
    %178 = tpu.matmul %177, %161, %cst_85 {dimension_numbers = #tpu.dot_dimension_numbers<[1], [0], [0], [1], [0, 0, 1, 1], [], []>} : vector<64x64xf32>, vector<64x32xf32>, vector<64x32xf32> -> vector<64x32xf32>
    %179 = math.tanh %178 : vector<64x32xf32>
    %c1_86 = arith.constant 1 : index
    %c0_87 = arith.constant 0 : index
    %c0_88 = arith.constant 0 : index
    %c0_89 = arith.constant 0 : index
    %180 = vector.load %arg8[%c1_86, %c0_87, %c0_88, %c0_89] : memref<2x2x32x96xf32, #tpu.memory_space<vmem>>, vector<1x1x32x96xf32>
    %181 = vector.shape_cast %180 : vector<1x1x32x96xf32> to vector<32x96xf32>
    %cst_90 = arith.constant dense<0.000000e+00> : vector<64x96xf32>
    %182 = tpu.matmul %179, %181, %cst_90 {dimension_numbers = #tpu.dot_dimension_numbers<[1], [0], [0], [1], [0, 0, 1, 1], [], []>} : vector<64x32xf32>, vector<32x96xf32>, vector<64x96xf32> -> vector<64x96xf32>
    %c1_91 = arith.constant 1 : index
    %c0_92 = arith.constant 0 : index
    %c0_93 = arith.constant 0 : index
    %c0_94 = arith.constant 0 : index
    %183 = vector.load %arg9[%c1_91, %c0_92, %c0_93, %c0_94] : memref<2x2x1x96xf32, #tpu.memory_space<vmem>>, vector<1x1x1x96xf32>
    %184 = vector.shape_cast %183 : vector<1x1x1x96xf32> to vector<1x96xf32>
    %185 = vector.broadcast %184 : vector<1x96xf32> to vector<64x96xf32>
    %186 = arith.addf %182, %185 : vector<64x96xf32>
    %187 = vector.extract_strided_slice %186 {offsets = [0, 0], sizes = [64, 32], strides = [1, 1]} : vector<64x96xf32> to vector<64x32xf32>
    %188 = vector.extract_strided_slice %160 {offsets = [0, 0], sizes = [64, 32], strides = [1, 1]} : vector<64x96xf32> to vector<64x32xf32>
    %189 = arith.addf %187, %188 : vector<64x32xf32>
    %190 = arith.negf %189 : vector<64x32xf32>
    %191 = math.exp %190 : vector<64x32xf32>
    %cst_95 = arith.constant 1.000000e+00 : f32
    %192 = vector.broadcast %cst_95 : f32 to vector<64x32xf32>
    %193 = arith.addf %192, %191 : vector<64x32xf32>
    %194 = arith.divf %192, %193 : vector<64x32xf32>
    %195 = vector.extract_strided_slice %186 {offsets = [0, 32], sizes = [64, 32], strides = [1, 1]} : vector<64x96xf32> to vector<64x32xf32>
    %196 = vector.extract_strided_slice %160 {offsets = [0, 32], sizes = [64, 32], strides = [1, 1]} : vector<64x96xf32> to vector<64x32xf32>
    %197 = arith.addf %195, %196 : vector<64x32xf32>
    %198 = arith.negf %197 : vector<64x32xf32>
    %199 = math.exp %198 : vector<64x32xf32>
    %cst_96 = arith.constant 1.000000e+00 : f32
    %200 = vector.broadcast %cst_96 : f32 to vector<64x32xf32>
    %201 = arith.addf %200, %199 : vector<64x32xf32>
    %202 = arith.divf %200, %201 : vector<64x32xf32>
    %203 = vector.extract_strided_slice %186 {offsets = [0, 64], sizes = [64, 32], strides = [1, 1]} : vector<64x96xf32> to vector<64x32xf32>
    %204 = vector.extract_strided_slice %160 {offsets = [0, 64], sizes = [64, 32], strides = [1, 1]} : vector<64x96xf32> to vector<64x32xf32>
    %205 = arith.mulf %194, %204 : vector<64x32xf32>
    %206 = arith.addf %203, %205 : vector<64x32xf32>
    %207 = math.tanh %206 : vector<64x32xf32>
    %cst_97 = arith.constant 1.000000e+00 : f32
    %208 = vector.broadcast %cst_97 : f32 to vector<64x32xf32>
    %209 = arith.subf %208, %202 : vector<64x32xf32>
    %210 = arith.mulf %209, %207 : vector<64x32xf32>
    %211 = arith.mulf %202, %150 : vector<64x32xf32>
    %212 = arith.addf %210, %211 : vector<64x32xf32>
    %c1_98 = arith.constant 1 : index
    %c1_99 = arith.constant 1 : index
    %c0_100 = arith.constant 0 : index
    %c0_101 = arith.constant 0 : index
    %213 = vector.load %arg6[%c1_98, %c1_99, %c0_100, %c0_101] : memref<2x2x32x160xf32, #tpu.memory_space<vmem>>, vector<1x1x32x160xf32>
    %214 = vector.shape_cast %213 : vector<1x1x32x160xf32> to vector<32x160xf32>
    %cst_102 = arith.constant dense<0.000000e+00> : vector<64x160xf32>
    %215 = tpu.matmul %212, %214, %cst_102 {dimension_numbers = #tpu.dot_dimension_numbers<[1], [0], [0], [1], [0, 0, 1, 1], [], []>} : vector<64x32xf32>, vector<32x160xf32>, vector<64x160xf32> -> vector<64x160xf32>
    %c1_103 = arith.constant 1 : index
    %c1_104 = arith.constant 1 : index
    %c0_105 = arith.constant 0 : index
    %c0_106 = arith.constant 0 : index
    %216 = vector.load %arg7[%c1_103, %c1_104, %c0_105, %c0_106] : memref<2x2x1x160xf32, #tpu.memory_space<vmem>>, vector<1x1x1x160xf32>
    %217 = vector.shape_cast %216 : vector<1x1x1x160xf32> to vector<1x160xf32>
    %218 = vector.broadcast %217 : vector<1x160xf32> to vector<64x160xf32>
    %219 = arith.addf %215, %218 : vector<64x160xf32>
    %220 = vector.extract_strided_slice %219 {offsets = [0, 0], sizes = [64, 32], strides = [1, 1]} : vector<64x160xf32> to vector<64x32xf32>
    %221 = vector.extract_strided_slice %219 {offsets = [0, 32], sizes = [64, 96], strides = [1, 1]} : vector<64x160xf32> to vector<64x96xf32>
    %222 = vector.extract_strided_slice %219 {offsets = [0, 128], sizes = [64, 32], strides = [1, 1]} : vector<64x160xf32> to vector<64x32xf32>
    %cst_107 = arith.constant dense<0.000000e+00> : vector<64x64xf32>
    %223 = tpu.matmul %220, %220, %cst_107 {dimension_numbers = #tpu.dot_dimension_numbers<[1], [1], [0], [0], [0, 0, 1, 0], [], []>} : vector<64x32xf32>, vector<64x32xf32>, vector<64x64xf32> -> vector<64x64xf32>
    %cst_108 = arith.constant 0.000000e+00 : f32
    %224 = vector.broadcast %cst_108 : f32 to vector<64x64xf32>
    %225 = arith.cmpf oeq, %151, %224 : vector<64x64xf32>
    %cst_109 = arith.constant 0.176776692 : f32
    %226 = vector.broadcast %cst_109 : f32 to vector<64x64xf32>
    %227 = arith.mulf %223, %226 : vector<64x64xf32>
    %228 = arith.select %225, %227, %151 : vector<64x64xi1>, vector<64x64xf32>
    %cst_110 = arith.constant dense<0xFF800000> : vector<64xf32>
    %229 = vector.multi_reduction <maximumf>, %228, %cst_110 [1] : vector<64x64xf32> to vector<64xf32>
    %230 = vector.shape_cast %229 : vector<64xf32> to vector<64x1xf32>
    %231 = vector.broadcast %230 : vector<64x1xf32> to vector<64x64xf32>
    %232 = arith.subf %228, %231 : vector<64x64xf32>
    %233 = math.exp %232 : vector<64x64xf32>
    %cst_111 = arith.constant dense<0.000000e+00> : vector<64xf32>
    %234 = vector.multi_reduction <add>, %233, %cst_111 [1] : vector<64x64xf32> to vector<64xf32>
    %235 = vector.shape_cast %234 : vector<64xf32> to vector<64x1xf32>
    %236 = tpu.reciprocal %235 {approx = true} : vector<64x1xf32> -> vector<64x1xf32>
    %237 = vector.broadcast %236 : vector<64x1xf32> to vector<64x64xf32>
    %238 = arith.mulf %233, %237 : vector<64x64xf32>
    %cst_112 = arith.constant dense<0.000000e+00> : vector<64x32xf32>
    %239 = tpu.matmul %238, %222, %cst_112 {dimension_numbers = #tpu.dot_dimension_numbers<[1], [0], [0], [1], [0, 0, 1, 1], [], []>} : vector<64x64xf32>, vector<64x32xf32>, vector<64x32xf32> -> vector<64x32xf32>
    %240 = math.tanh %239 : vector<64x32xf32>
    %c1_113 = arith.constant 1 : index
    %c1_114 = arith.constant 1 : index
    %c0_115 = arith.constant 0 : index
    %c0_116 = arith.constant 0 : index
    %241 = vector.load %arg8[%c1_113, %c1_114, %c0_115, %c0_116] : memref<2x2x32x96xf32, #tpu.memory_space<vmem>>, vector<1x1x32x96xf32>
    %242 = vector.shape_cast %241 : vector<1x1x32x96xf32> to vector<32x96xf32>
    %cst_117 = arith.constant dense<0.000000e+00> : vector<64x96xf32>
    %243 = tpu.matmul %240, %242, %cst_117 {dimension_numbers = #tpu.dot_dimension_numbers<[1], [0], [0], [1], [0, 0, 1, 1], [], []>} : vector<64x32xf32>, vector<32x96xf32>, vector<64x96xf32> -> vector<64x96xf32>
    %c1_118 = arith.constant 1 : index
    %c1_119 = arith.constant 1 : index
    %c0_120 = arith.constant 0 : index
    %c0_121 = arith.constant 0 : index
    %244 = vector.load %arg9[%c1_118, %c1_119, %c0_120, %c0_121] : memref<2x2x1x96xf32, #tpu.memory_space<vmem>>, vector<1x1x1x96xf32>
    %245 = vector.shape_cast %244 : vector<1x1x1x96xf32> to vector<1x96xf32>
    %246 = vector.broadcast %245 : vector<1x96xf32> to vector<64x96xf32>
    %247 = arith.addf %243, %246 : vector<64x96xf32>
    %248 = vector.extract_strided_slice %247 {offsets = [0, 0], sizes = [64, 32], strides = [1, 1]} : vector<64x96xf32> to vector<64x32xf32>
    %249 = vector.extract_strided_slice %221 {offsets = [0, 0], sizes = [64, 32], strides = [1, 1]} : vector<64x96xf32> to vector<64x32xf32>
    %250 = arith.addf %248, %249 : vector<64x32xf32>
    %251 = arith.negf %250 : vector<64x32xf32>
    %252 = math.exp %251 : vector<64x32xf32>
    %cst_122 = arith.constant 1.000000e+00 : f32
    %253 = vector.broadcast %cst_122 : f32 to vector<64x32xf32>
    %254 = arith.addf %253, %252 : vector<64x32xf32>
    %255 = arith.divf %253, %254 : vector<64x32xf32>
    %256 = vector.extract_strided_slice %247 {offsets = [0, 32], sizes = [64, 32], strides = [1, 1]} : vector<64x96xf32> to vector<64x32xf32>
    %257 = vector.extract_strided_slice %221 {offsets = [0, 32], sizes = [64, 32], strides = [1, 1]} : vector<64x96xf32> to vector<64x32xf32>
    %258 = arith.addf %256, %257 : vector<64x32xf32>
    %259 = arith.negf %258 : vector<64x32xf32>
    %260 = math.exp %259 : vector<64x32xf32>
    %cst_123 = arith.constant 1.000000e+00 : f32
    %261 = vector.broadcast %cst_123 : f32 to vector<64x32xf32>
    %262 = arith.addf %261, %260 : vector<64x32xf32>
    %263 = arith.divf %261, %262 : vector<64x32xf32>
    %264 = vector.extract_strided_slice %247 {offsets = [0, 64], sizes = [64, 32], strides = [1, 1]} : vector<64x96xf32> to vector<64x32xf32>
    %265 = vector.extract_strided_slice %221 {offsets = [0, 64], sizes = [64, 32], strides = [1, 1]} : vector<64x96xf32> to vector<64x32xf32>
    %266 = arith.mulf %255, %265 : vector<64x32xf32>
    %267 = arith.addf %264, %266 : vector<64x32xf32>
    %268 = math.tanh %267 : vector<64x32xf32>
    %cst_124 = arith.constant 1.000000e+00 : f32
    %269 = vector.broadcast %cst_124 : f32 to vector<64x32xf32>
    %270 = arith.subf %269, %263 : vector<64x32xf32>
    %271 = arith.mulf %270, %268 : vector<64x32xf32>
    %272 = arith.mulf %263, %212 : vector<64x32xf32>
    %273 = arith.addf %271, %272 : vector<64x32xf32>
    %c0_125 = arith.constant 0 : index
    %c0_126 = arith.constant 0 : index
    %274 = vector.load %arg12[%c0_125, %c0_126] : memref<32x4xf32, #tpu.memory_space<vmem>>, vector<32x4xf32>
    %cst_127 = arith.constant dense<0.000000e+00> : vector<64x4xf32>
    %275 = tpu.matmul %273, %274, %cst_127 {dimension_numbers = #tpu.dot_dimension_numbers<[1], [0], [0], [1], [0, 0, 1, 1], [], []>} : vector<64x32xf32>, vector<32x4xf32>, vector<64x4xf32> -> vector<64x4xf32>
    %c0_128 = arith.constant 0 : index
    %c0_129 = arith.constant 0 : index
    %276 = vector.load %arg13[%c0_128, %c0_129] : memref<1x4xf32, #tpu.memory_space<vmem>>, vector<1x4xf32>
    %277 = vector.broadcast %276 : vector<1x4xf32> to vector<64x4xf32>
    %278 = arith.addf %275, %277 : vector<64x4xf32>
    %279 = vector.shape_cast %278 : vector<64x4xf32> to vector<8x8x4xf32>
    %280 = tpu.transpose %279, [0, 2, 1] : vector<8x8x4xf32> -> vector<8x4x8xf32>
    %cst_130 = arith.constant dense<0xFF800000> : vector<8x4xf32>
    %281 = vector.multi_reduction <maximumf>, %280, %cst_130 [2] : vector<8x4x8xf32> to vector<8x4xf32>
    %282 = vector.shape_cast %281 : vector<8x4xf32> to vector<8x4x1xf32>
    %283 = vector.broadcast %282 : vector<8x4x1xf32> to vector<8x4x8xf32>
    %284 = arith.subf %280, %283 : vector<8x4x8xf32>
    %285 = math.exp %284 : vector<8x4x8xf32>
    %cst_131 = arith.constant dense<0.000000e+00> : vector<8x4xf32>
    %286 = vector.multi_reduction <add>, %285, %cst_131 [2] : vector<8x4x8xf32> to vector<8x4xf32>
    %287 = vector.shape_cast %286 : vector<8x4xf32> to vector<8x4x1xf32>
    %288 = tpu.reciprocal %287 {approx = true} : vector<8x4x1xf32> -> vector<8x4x1xf32>
    %289 = vector.broadcast %288 : vector<8x4x1xf32> to vector<8x4x8xf32>
    %290 = arith.mulf %285, %289 : vector<8x4x8xf32>
    %291 = vector.shape_cast %273 : vector<64x32xf32> to vector<8x8x32xf32>
    "tpu.trace_start"() <{level = 10 : i32, message = "bon,bnh->boh"}> : () -> ()
    %cst_132 = arith.constant dense<0.000000e+00> : vector<8x4x32xf32>
    %292 = tpu.matmul %290, %291, %cst_132 {dimension_numbers = #tpu.dot_dimension_numbers<[2], [1], [1], [2], [0, 0, 0, 1, 1, 2], [0], [0]>} : vector<8x4x8xf32>, vector<8x8x32xf32>, vector<8x4x32xf32> -> vector<8x4x32xf32>
    "tpu.trace_stop"() : () -> ()
    %293 = vector.shape_cast %292 : vector<8x4x32xf32> to vector<32x32xf32>
    %c0_133 = arith.constant 0 : index
    %c0_134 = arith.constant 0 : index
    %294 = vector.load %arg14[%c0_133, %c0_134] : memref<32x32xf32, #tpu.memory_space<vmem>>, vector<32x32xf32>
    %cst_135 = arith.constant dense<0.000000e+00> : vector<32x32xf32>
    %295 = tpu.matmul %293, %294, %cst_135 {dimension_numbers = #tpu.dot_dimension_numbers<[1], [0], [0], [1], [0, 0, 1, 1], [], []>} : vector<32x32xf32>, vector<32x32xf32>, vector<32x32xf32> -> vector<32x32xf32>
    %c0_136 = arith.constant 0 : index
    %c0_137 = arith.constant 0 : index
    %296 = vector.load %arg15[%c0_136, %c0_137] : memref<1x32xf32, #tpu.memory_space<vmem>>, vector<1x32xf32>
    %297 = vector.broadcast %296 : vector<1x32xf32> to vector<32x32xf32>
    %298 = arith.addf %295, %297 : vector<32x32xf32>
    %299 = math.tanh %298 : vector<32x32xf32>
    %c0_138 = arith.constant 0 : index
    %c0_139 = arith.constant 0 : index
    %300 = vector.load %arg16[%c0_138, %c0_139] : memref<32x1xf32, #tpu.memory_space<vmem>>, vector<32x1xf32>
    %cst_140 = arith.constant dense<0.000000e+00> : vector<32x1xf32>
    %301 = tpu.matmul %299, %300, %cst_140 {dimension_numbers = #tpu.dot_dimension_numbers<[1], [0], [0], [1], [0, 0, 1, 1], [], []>} : vector<32x32xf32>, vector<32x1xf32>, vector<32x1xf32> -> vector<32x1xf32>
    %c0_141 = arith.constant 0 : index
    %c0_142 = arith.constant 0 : index
    %302 = vector.load %arg17[%c0_141, %c0_142] : memref<1x1xf32, #tpu.memory_space<vmem>>, vector<1x1xf32>
    %303 = vector.broadcast %302 : vector<1x1xf32> to vector<32x1xf32>
    %304 = arith.addf %301, %303 : vector<32x1xf32>
    %305 = vector.shape_cast %304 : vector<32x1xf32> to vector<8x4x1xf32>
    %cst_143 = arith.constant dense<0.000000e+00> : vector<8x1xf32>
    %306 = vector.multi_reduction <add>, %305, %cst_143 [1] : vector<8x4x1xf32> to vector<8x1xf32>
    %c0_144 = arith.constant 0 : index
    %c0_145 = arith.constant 0 : index
    %307 = vector.load %arg18[%c0_144, %c0_145] : memref<8x1xf32, #tpu.memory_space<vmem>>, vector<8x1xf32>
    tpu.vector_store %arg18[%c0_144, %c0_145], %306 {strides = array<i32>} : memref<8x1xf32, #tpu.memory_space<vmem>>, vector<8x1xf32>,
    return
  }
  func.func @transform_0(%arg0: i32) -> (i32, i32) {
    %c0_i32 = arith.constant 0 : i32
    %c0_i32_0 = arith.constant 0 : i32
    return %arg0, %c0_i32 : i32, i32
  }
  func.func @transform_1(%arg0: i32) -> (i32, i32, i32) {
    %c0_i32 = arith.constant 0 : i32
    %c0_i32_0 = arith.constant 0 : i32
    %c0_i32_1 = arith.constant 0 : i32
    return %arg0, %c0_i32, %c0_i32_0 : i32, i32, i32
  }
  func.func @transform_2(%arg0: i32) -> (i32, i32) {
    %c0_i32 = arith.constant 0 : i32
    %c0_i32_0 = arith.constant 0 : i32
    %c0_i32_1 = arith.constant 0 : i32
    return %c0_i32, %c0_i32_0 : i32, i32
  }
  func.func @transform_3(%arg0: i32) -> (i32, i32) {
    %c0_i32 = arith.constant 0 : i32
    %c0_i32_0 = arith.constant 0 : i32
    %c0_i32_1 = arith.constant 0 : i32
    return %c0_i32, %c0_i32_0 : i32, i32
  }
  func.func @transform_4(%arg0: i32) -> (i32, i32) {
    %c0_i32 = arith.constant 0 : i32
    %c0_i32_0 = arith.constant 0 : i32
    %c0_i32_1 = arith.constant 0 : i32
    return %c0_i32, %c0_i32_0 : i32, i32
  }
  func.func @transform_5(%arg0: i32) -> (i32, i32, i32, i32) {
    %c0_i32 = arith.constant 0 : i32
    %c0_i32_0 = arith.constant 0 : i32
    %c0_i32_1 = arith.constant 0 : i32
    %c0_i32_2 = arith.constant 0 : i32
    %c0_i32_3 = arith.constant 0 : i32
    return %c0_i32, %c0_i32_0, %c0_i32_1, %c0_i32_2 : i32, i32, i32, i32
  }
  func.func @transform_6(%arg0: i32) -> (i32, i32, i32, i32) {
    %c0_i32 = arith.constant 0 : i32
    %c0_i32_0 = arith.constant 0 : i32
    %c0_i32_1 = arith.constant 0 : i32
    %c0_i32_2 = arith.constant 0 : i32
    %c0_i32_3 = arith.constant 0 : i32
    return %c0_i32, %c0_i32_0, %c0_i32_1, %c0_i32_2 : i32, i32, i32, i32
  }
  func.func @transform_7(%arg0: i32) -> (i32, i32, i32, i32) {
    %c0_i32 = arith.constant 0 : i32
    %c0_i32_0 = arith.constant 0 : i32
    %c0_i32_1 = arith.constant 0 : i32
    %c0_i32_2 = arith.constant 0 : i32
    %c0_i32_3 = arith.constant 0 : i32
    return %c0_i32, %c0_i32_0, %c0_i32_1, %c0_i32_2 : i32, i32, i32, i32
  }
  func.func @transform_8(%arg0: i32) -> (i32, i32, i32, i32) {
    %c0_i32 = arith.constant 0 : i32
    %c0_i32_0 = arith.constant 0 : i32
    %c0_i32_1 = arith.constant 0 : i32
    %c0_i32_2 = arith.constant 0 : i32
    %c0_i32_3 = arith.constant 0 : i32
    return %c0_i32, %c0_i32_0, %c0_i32_1, %c0_i32_2 : i32, i32, i32, i32
  }
  func.func @transform_9(%arg0: i32) -> (i32, i32) {
    %c0_i32 = arith.constant 0 : i32
    %c0_i32_0 = arith.constant 0 : i32
    %c0_i32_1 = arith.constant 0 : i32
    return %c0_i32, %c0_i32_0 : i32, i32
  }
  func.func @transform_10(%arg0: i32) -> (i32, i32) {
    %c0_i32 = arith.constant 0 : i32
    %c0_i32_0 = arith.constant 0 : i32
    %c0_i32_1 = arith.constant 0 : i32
    return %c0_i32, %c0_i32_0 : i32, i32
  }
  func.func @transform_11(%arg0: i32) -> (i32, i32) {
    %c0_i32 = arith.constant 0 : i32
    %c0_i32_0 = arith.constant 0 : i32
    %c0_i32_1 = arith.constant 0 : i32
    return %c0_i32, %c0_i32_0 : i32, i32
  }
  func.func @transform_12(%arg0: i32) -> (i32, i32) {
    %c0_i32 = arith.constant 0 : i32
    %c0_i32_0 = arith.constant 0 : i32
    %c0_i32_1 = arith.constant 0 : i32
    return %c0_i32, %c0_i32_0 : i32, i32
  }
  func.func @transform_13(%arg0: i32) -> (i32, i32) {
    %c0_i32 = arith.constant 0 : i32
    %c0_i32_0 = arith.constant 0 : i32
    %c0_i32_1 = arith.constant 0 : i32
    return %c0_i32, %c0_i32_0 : i32, i32
  }
  func.func @transform_14(%arg0: i32) -> (i32, i32) {
    %c0_i32 = arith.constant 0 : i32
    %c0_i32_0 = arith.constant 0 : i32
    %c0_i32_1 = arith.constant 0 : i32
    return %c0_i32, %c0_i32_0 : i32, i32
  }
  func.func @transform_15(%arg0: i32) -> (i32, i32) {
    %c0_i32 = arith.constant 0 : i32
    %c0_i32_0 = arith.constant 0 : i32
    %c0_i32_1 = arith.constant 0 : i32
    return %c0_i32, %c0_i32_0 : i32, i32
  }
  func.func @transform_16(%arg0: i32) -> (i32, i32) {
    %c0_i32 = arith.constant 0 : i32
    %c0_i32_0 = arith.constant 0 : i32
    %c0_i32_1 = arith.constant 0 : i32
    return %c0_i32, %c0_i32_0 : i32, i32
  }
  func.func @transform_17(%arg0: i32) -> (i32, i32) {
    %c0_i32 = arith.constant 0 : i32
    %c0_i32_0 = arith.constant 0 : i32
    return %arg0, %c0_i32 : i32, i32
  }
}

</mosaic_0001>

<bundles_post_ra>
// kernel: tpu_custom_call.1
= control target key start
LH: loop header
LB: loop body
LE: loop exit
PB: predicated region body
PF: predicated region fallthrough
CT: control target
= control target key end

     0   :  { %s14063_s0 = inlined_call_operand.vmem [shape: f32[256,4], index: 0, kind: input, shape index: {}]   ;;  %s14064_s1 = inlined_call_operand.vmem [shape: f32[2,128,128], index: 1, kind: input, shape index: {}]   ;;  %s14065_s2 = inlined_call_operand.hbm [shape: f32[64,64], index: 2, kind: input, shape index: {}]   ;;  %s14066_s3 = inlined_call_operand.hbm [shape: f32[4,32], index: 3, kind: input, shape index: {}]   ;;  %s14067_s4 = inlined_call_operand.vmem [shape: f32[1,32], index: 4, kind: input, shape index: {}]   ;;  %s14068_s5 = inlined_call_operand.hbm [shape: f32[2,2,32,160], index: 5, kind: input, shape index: {}]   ;;  %s14069_s6 = inlined_call_operand.hbm [shape: f32[2,2,1,160], index: 6, kind: input, shape index: {}]   ;;  %s14070_s7 = inlined_call_operand.vmem [shape: f32[2,2,32,96], index: 7, kind: input, shape index: {}]   ;;  %s14071_s8 = inlined_call_operand.hbm [shape: f32[2,2,1,96], index: 8, kind: input, shape index: {}]   ;;  %s14072_s9 = inlined_call_operand.vmem [shape: f32[32,8], index: 9, kind: input, shape index: {}]   ;;  %s14073_s10 = inlined_call_operand.hbm [shape: f32[1,8], index: 10, kind: input, shape index: {}]   ;;  %s14074_s11 = inlined_call_operand.vmem [shape: f32[32,4], index: 11, kind: input, shape index: {}]   ;;  %s14075_s12 = inlined_call_operand.hbm [shape: f32[1,4], index: 12, kind: input, shape index: {}]   ;;  %s14076_s13 = inlined_call_operand.vmem [shape: f32[32,32], index: 13, kind: input, shape index: {}]   ;;  %s14077_s14 = inlined_call_operand.vmem [shape: f32[1,32], index: 14, kind: input, shape index: {}]   ;;  %s14078_s15 = inlined_call_operand.vmem [shape: f32[32,1], index: 15, kind: input, shape index: {}]   ;;  %s14079_s16 = inlined_call_operand.<no memory space> [shape: f32[1,1], index: 16, kind: input, shape index: {}]   ;;  %s14080_s17 = inlined_call_operand.vmem [shape: f32[16,1], index: 17, kind: output, shape index: {}]  }
   0x1   :  { %14109 = sst [smem:[#allocation37_spill]] %s14063_s0  ;;  %v22_v0 = vstv %s14079_s16 }
   0x2   :  { %14110 = sst [smem:[#allocation38_spill]] %s14064_s1  ;;  %23 = vst [vmem:[#allocation2] sm:$0x1] %v22_v0 }
   0x3   :  { %14111 = sst [smem:[#allocation39_spill]] %s14065_s2 }
   0x4   :  { %14112 = sst [smem:[#allocation40_spill]] %s14066_s3 }
   0x5   :  { %14113 = sst [smem:[#allocation41_spill]] %s14069_s6 }
   0x6   :  { %14114 = sst [smem:[#allocation42_spill]] %s14080_s17 }
   0x7   :  { %24 = vsyncpa [#allocation4], 0 }
   0x8   :  { %25 = vsyncpa [#allocation6], 0 }
   0x9   :  { %26 = vsyncpa [#allocation9], 0 }
   0xa   :  { %27 = vsyncpa [#allocation12], 0  ;;  %s11283_s26 = smov 0  }
   0xb LB: > { %14115 = sst [smem:[#allocation18_spill]] %s11168_s26  ;;  %s11170_s27 = smov [#allocation5]   ;;  %s11168_s26 = sphi %s11283_s26, %s33_s26  }
   0xc   : > { %s457_s28 = sshll.u32 %s11170_s27, 4  ;;  %s11289_s29 = sadd.s32 4294967295, %s11168_s26   ;;  %s11294_s28 = int_to_ptr.vmem [resolvable:$true] %s457_s28 }
   0xd   : > { %p8424_p0 = scmp.ge.s32.totalorder %s11168_s26, 1  ;;  %p431_p1 = scmp.lt.s32.totalorder %s11168_s26, 3 }
   0xe   : > { %p14082_p2 = scmp.eq.s32.totalorder %s11289_s29, 0  ;;  %s11171_s0 = smov [#allocation8]  }
   0xf   : > { %p11296_p3 = pnand %p8424_p0, %p431_p1  ;;  %s483_s30 = sshll.u32 %s11171_s0, 4  ;;  %s11302_s30 = int_to_ptr.vmem [resolvable:$true] %s483_s30 }
  0x10   : > { %s11172_s19 = smov [#allocation11]   ;;  %s11173_s20 = smov [#allocation3]  }
  0x11   : > { %s14116_s16 = scalar_select %p11296_p3, 1, 0 }
  0x12   : > { %p10182_p4 = pneg %p11296_p3  ;;  %s516_s1 = sshll.u32 %s11172_s19, 4  ;;  %s11310_s1 = int_to_ptr.vmem [resolvable:$true] %s516_s1 }
  0x13   : > { %s11312_s21 = sshll.u32 %s11173_s20, 4  ;;  %s14118_s3 = sld [smem:[#allocation40_spill]]  ;;  %s444_s21 = int_to_ptr.vmem [resolvable:$true] %s11312_s21 }
  0x14   : > { %p11306_p5 = pnand %p14082_p2, %p10182_p4 }
  0x16   : > { %p11322_p7 = pneg %p11306_p5 }
  0x19   : > { %s10950_s24 = scalar_lea.hbm %s14118_s3, 64 }
  0x1a   : > { %p10951_p6 = scmp.ne.s32.totalorder %s14118_s3, %s10950_s24  ;;  %p10957_p10 = scmp.lt.u32.totalorder %s10950_s24, %s14118_s3 }
  0x1c   : > { %p10953_p8 = pnand %p11322_p7, %p10951_p6 }
  0x1e   : > { %p10954_p9 = pneg %p10953_p8 }
  0x20   : > { %p10959_p11 = pnand %p10957_p10, %p10954_p9 }
  0x22   : > { %10962 = shalt.err (!%p10959_p11)
}
  0x23   : > { %s10963_s22 = scalar_lea.vmem %s11294_s28, 64  ;;  %p10971_p1 = scmp.lt.s32.totalorder %s11294_s28, %s11294_s28 }
  0x24   : > { %p10964_p12 = scmp.ne.s32.totalorder %s11294_s28, %s10963_s22  ;;  %p10972_p4 = scmp.lt.s32.totalorder %s10963_s22, %s10963_s22 }
  0x26   : > { %p10966_p13 = pnand %p10964_p12, %p11322_p7  ;;  %p10973_p6 = por %p10972_p4, %p10971_p1 }
  0x28   : > { %p10967_p0 = pneg %p10966_p13 }
  0x2a   : > { %p10974_p8 = pnand %p10973_p6, %p10967_p0 }
  0x2c   : > { %10977 = shalt.err (!%p10974_p8)
}
  0x2d   : > { %10188 = dma.hbm_to_vmem [thread:$0]  (!%p11306_p5), %s14118_s3, 64, %s11294_s28, [#allocation6]  }
  0x2e   : > { %s14120_s6 = sld [smem:[#allocation41_spill]] }
  0x34   : > { %s10978_s19 = scalar_lea.hbm %s14120_s6, 128 }
  0x35   : > { %p10979_p9 = scmp.ne.s32.totalorder %s14120_s6, %s10978_s19  ;;  %p10985_p12 = scmp.lt.u32.totalorder %s10978_s19, %s14120_s6 }
  0x37   : > { %p10981_p10 = pnand %p10979_p9, %p11322_p7 }
  0x39   : > { %p10982_p11 = pneg %p10981_p10 }
  0x3b   : > { %p10987_p13 = pnand %p10985_p12, %p10982_p11 }
  0x3d   : > { %10990 = shalt.err (!%p10987_p13)
}
  0x3e   : > { %s10991_s28 = scalar_lea.vmem %s11302_s30, 128  ;;  %p10999_p6 = scmp.lt.s32.totalorder %s11302_s30, %s11302_s30 }
  0x3f   : > { %p10992_p0 = scmp.ne.s32.totalorder %s11302_s30, %s10991_s28  ;;  %p11000_p8 = scmp.lt.s32.totalorder %s10991_s28, %s10991_s28 }
  0x41   : > { %p10994_p1 = pnand %p10992_p0, %p11322_p7  ;;  %p11001_p9 = por %p11000_p8, %p10999_p6 }
  0x43   : > { %p10995_p4 = pneg %p10994_p1 }
  0x45   : > { %p11002_p10 = pnand %p11001_p9, %p10995_p4 }
  0x47   : > { %11005 = shalt.err (!%p11002_p10)
}
  0x48   : > { %s11174_s26 = smov 32   ;;  %s11175_s17 = smov 2  }
  0x49   : > { %10194 = dma.hbm_to_vmem [thread:$0]  (!%p11306_p5), %s14120_s6, 128, %s11302_s30, [#allocation9], %s11174_s26, %s11174_s26, %s11175_s17  }
  0x4a   : > { %s11006_s19 = scalar_lea.hbm %s14073_s10, 16 }
  0x4b   : > { %p11007_p11 = scmp.ne.s32.totalorder %s14073_s10, %s11006_s19  ;;  %p11013_p0 = scmp.lt.u32.totalorder %s11006_s19, %s14073_s10 }
  0x4d   : > { %p11009_p12 = pnand %p11007_p11, %p11322_p7 }
  0x4f   : > { %p11010_p13 = pneg %p11009_p12 }
  0x51   : > { %p11015_p1 = pnand %p11013_p0, %p11010_p13 }
  0x53   : > { %11018 = shalt.err (!%p11015_p1)
}
  0x54   : > { %s11019_s30 = scalar_lea.vmem %s11310_s1, 16  ;;  %s11026_s26 = scalar_lea.vmem %s11310_s1, 32 }
  0x55   : > { %p11020_p4 = scmp.ne.s32.totalorder %s11310_s1, %s11019_s30  ;;  %p11027_p9 = scmp.lt.s32.totalorder %s11310_s1, %s11310_s1 }
  0x56   : > { %p11028_p10 = scmp.lt.s32.totalorder %s11026_s26, %s11019_s30 }
  0x57   : > { %p11022_p6 = pnand %p11020_p4, %p11322_p7 }
  0x58   : > { %p11029_p11 = por %p11028_p10, %p11027_p9 }
  0x59   : > { %p11023_p8 = pneg %p11022_p6 }
  0x5b   : > { %p11030_p12 = pnand %p11029_p11, %p11023_p8 }
  0x5d   : > { %11033 = shalt.err (!%p11030_p12)
}
  0x5e   : > { %10200 = dma.hbm_to_vmem [thread:$0]  (!%p11306_p5), %s14073_s10, 16, %s11310_s1, [#allocation12]  }
  0x5f   : > { %s14121_s2 = sld [smem:[#allocation39_spill]] }
  0x65   : > { %s11034_s25 = scalar_lea.hbm %s14121_s2, 1024 }
  0x66   : > { %p11035_p13 = scmp.ne.s32.totalorder %s14121_s2, %s11034_s25  ;;  %p11041_p4 = scmp.lt.u32.totalorder %s11034_s25, %s14121_s2 }
  0x68   : > { %p11037_p0 = pnand %p11035_p13, %p11322_p7 }
  0x6a   : > { %p11038_p1 = pneg %p11037_p0 }
  0x6c   : > { %p11043_p6 = pnand %p11041_p4, %p11038_p1 }
  0x6e   : > { %11046 = shalt.err (!%p11043_p6)
}
  0x6f   : > { %s11047_s28 = scalar_lea.vmem %s444_s21, 1024  ;;  %p11055_p11 = scmp.lt.s32.totalorder %s444_s21, %s444_s21 }
  0x70   : > { %p11048_p8 = scmp.ne.s32.totalorder %s444_s21, %s11047_s28  ;;  %p11056_p12 = scmp.lt.s32.totalorder %s11047_s28, %s11047_s28 }
  0x72   : > { %p11050_p9 = pnand %p11048_p8, %p11322_p7  ;;  %p11057_p2 = por %p11056_p12, %p11055_p11 }
  0x74   : > { %p11051_p10 = pneg %p11050_p9 }
  0x76   : > { %p11058_p3 = pnand %p11057_p2, %p11051_p10 }
  0x78   : > { %11061 = shalt.err (!%p11058_p3)
}
  0x79   : > { %s11176_s1 = smov 128   ;;  %s11177_s30 = smov 8  }
  0x7a   : > { %10185 = dma.hbm_to_vmem [thread:$0]  (!%p11306_p5), %s14121_s2, 1024, %s444_s21, [#allocation4], %s11176_s1, %s11176_s1, %s11177_s30  }
  0x7b   : > { %s11178_s17 = smov [#allocation7]   ;;  %s11062_s27 = scalar_lea.hbm %s14068_s5, 4096 }
  0x7c   : > { %s470_s23 = sshll.u32 %s11178_s17, 4  ;;  %p11063_p2 = scmp.ne.s32.totalorder %s14068_s5, %s11062_s27  ;;  %s471_s23 = int_to_ptr.vmem [resolvable:$true] %s470_s23 }
  0x7d   : > { %p11069_p0 = scmp.lt.u32.totalorder %s11062_s27, %s14068_s5 }
  0x7e   : > { %p11065_p3 = pnand %p11063_p2, %p11322_p7 }
  0x80   : > { %p11066_p13 = pneg %p11065_p3 }
  0x82   : > { %p11071_p1 = pnand %p11069_p0, %p11066_p13 }
  0x84   : > { %11074 = shalt.err (!%p11071_p1)
}
  0x85   : > { %s11075_s21 = scalar_lea.vmem %s471_s23, 4096  ;;  %p11083_p9 = scmp.lt.s32.totalorder %s471_s23, %s471_s23 }
  0x86   : > { %p11076_p4 = scmp.ne.s32.totalorder %s471_s23, %s11075_s21  ;;  %p11084_p10 = scmp.lt.s32.totalorder %s11075_s21, %s11075_s21 }
  0x88   : > { %p11078_p6 = pnand %p11076_p4, %p11322_p7  ;;  %p11085_p11 = por %p11084_p10, %p11083_p9 }
  0x8a   : > { %p11079_p8 = pneg %p11078_p6 }
  0x8c   : > { %p11086_p12 = pnand %p11085_p11, %p11079_p8 }
  0x8e   : > { %11089 = shalt.err (!%p11086_p12)
}
  0x8f   : > { %s11179_s1 = smov 256   ;;  %s11180_s30 = smov 16  }
  0x90   : > { %10191 = dma.hbm_to_vmem [thread:$0]  (!%p11306_p5), %s14068_s5, 4096, %s471_s23, [#allocation6], %s11179_s1, %s11179_s1, %s11180_s30  }
  0x91   : > { %s11181_s17 = smov [#allocation10]   ;;  %s11182_s25 = smov [#allocation13]  }
  0x92   : > { %s499_s24 = sshll.u32 %s11181_s17, 4  ;;  %s530_s27 = sshll.u32 %s11182_s25, 4  ;;  %s500_s24 = int_to_ptr.vmem [resolvable:$true] %s499_s24  ;;  %s531_s27 = int_to_ptr.vmem [resolvable:$true] %s530_s27 }
  0x93   : > { %s11090_s22 = scalar_lea.hbm %s14071_s8, 64 }
  0x94   : > { %p11091_p2 = scmp.ne.s32.totalorder %s14071_s8, %s11090_s22  ;;  %p11097_p0 = scmp.lt.u32.totalorder %s11090_s22, %s14071_s8 }
  0x96   : > { %p11093_p3 = pnand %p11091_p2, %p11322_p7 }
  0x98   : > { %p11094_p13 = pneg %p11093_p3 }
  0x9a   : > { %p11099_p1 = pnand %p11097_p0, %p11094_p13 }
  0x9c   : > { %11102 = shalt.err (!%p11099_p1)
}
  0x9d   : > { %s11103_s23 = scalar_lea.vmem %s500_s24, 64  ;;  %p11111_p9 = scmp.lt.s32.totalorder %s500_s24, %s500_s24 }
  0x9e   : > { %p11104_p4 = scmp.ne.s32.totalorder %s500_s24, %s11103_s23  ;;  %p11112_p10 = scmp.lt.s32.totalorder %s11103_s23, %s11103_s23 }
  0xa0   : > { %p11106_p6 = pnand %p11104_p4, %p11322_p7  ;;  %p11113_p11 = por %p11112_p10, %p11111_p9 }
  0xa2   : > { %p11107_p8 = pneg %p11106_p6 }
  0xa4   : > { %p11114_p12 = pnand %p11113_p11, %p11107_p8 }
  0xa6   : > { %11117 = shalt.err (!%p11114_p12)
}
  0xa7   : > { %s11183_s1 = smov 1   ;;  %s11118_s17 = scalar_lea.hbm %s14075_s12, 16 }
  0xa8   : > { %10197 = dma.hbm_to_vmem [thread:$0]  (!%p11306_p5), %s14071_s8, 64, %s500_s24, [#allocation9], %s11180_s30, %s11180_s30, %s11183_s1  }
  0xa9   : > { %p11119_p2 = scmp.ne.s32.totalorder %s14075_s12, %s11118_s17  ;;  %p11125_p0 = scmp.lt.u32.totalorder %s11118_s17, %s14075_s12 }
  0xab   : > { %p11121_p3 = pnand %p11119_p2, %p11322_p7 }
  0xad   : > { %p11122_p13 = pneg %p11121_p3 }
  0xaf   : > { %p11127_p1 = pnand %p11125_p0, %p11122_p13 }
  0xb1   : > { %11130 = shalt.err (!%p11127_p1)
}
  0xb2   : > { %s11131_s28 = scalar_lea.vmem %s531_s27, 16  ;;  %s11138_s30 = scalar_lea.vmem %s531_s27, 32 }
  0xb3   : > { %p11132_p4 = scmp.ne.s32.totalorder %s531_s27, %s11131_s28  ;;  %p11139_p9 = scmp.lt.s32.totalorder %s531_s27, %s531_s27 }
  0xb4   : > { %p11140_p10 = scmp.lt.s32.totalorder %s11138_s30, %s11131_s28 }
  0xb5   : > { %p11134_p6 = pnand %p11132_p4, %p11322_p7 }
  0xb6   : > { %p11141_p11 = por %p11140_p10, %p11139_p9 }
  0xb7   : > { %p11135_p8 = pneg %p11134_p6 }
  0xb9   : > { %p11142_p12 = pnand %p11141_p11, %p11135_p8 }
  0xbb   : > { %11145 = shalt.err (!%p11142_p12)
}
  0xbc   : > { %10203 = dma.hbm_to_vmem [thread:$0]  (!%p11306_p5), %s14075_s12, 16, %s531_s27, [#allocation12]  }
  0xbd   : > { %p14122_p2 = scmp.ne.s32.totalorder %s14116_s16, 0 }
  0xbf   : > { %572 = sbr.rel (%p14122_p2) target bundleno = 9209 (0x23f9), region = 88 }
  0xc6   : > { %p14123_p3 = scmp.eq.s32.totalorder %s11289_s29, 0 }
  0xc8   : > { %11151 = dma.done.wait (%p14123_p3), [#allocation4], 1024   ;;  %p14124_p7 = pmov %p14123_p3 }
  0xc9   : > { %p14125_p13 = pmov %p14123_p3 }
  0xca   : > { %11153 = vsyncadd (%p14124_p7), [#allocation4], 4294966272 }
  0xcb   : > { %11155 = dma.done.wait (%p14125_p13), [#allocation6], 4160   ;;  %p14126_p0 = pmov %p14123_p3 }
  0xcd   : > { %11157 = vsyncadd (%p14126_p0), [#allocation6], 4294963136  ;;  %p14127_p1 = pmov %p14126_p0 }
  0xce   : > { %p14128_p5 = pmov %p14126_p0 }
  0xcf   : > { %11159 = dma.done.wait (%p14127_p1), [#allocation9], 192  }
  0xd0   : > { %11161 = vsyncadd (%p14128_p5), [#allocation9], 4294967104  ;;  %p14129_p4 = pmov %p14126_p0 }
  0xd1   : > { %p14130_p6 = pmov %p14126_p0 }
  0xd2   : > { %11163 = dma.done.wait (%p14129_p4), [#allocation12], 32  }
  0xd3   : > { %11165 = vsyncadd (%p14130_p6), [#allocation12], 4294967264  ;;  %s8441_s16 = sshll.u32 %s11289_s29, 4  ;;  %vm740_vm0 = vcmask 1043456   ;;  %vm691_vm1 = vcmask 31744   ;;  %s14131_s23 = sld [smem:[#allocation37_spill]] }
  0xd4   : > { %p653_p8 = scmp.lt.s32.totalorder %s8441_s16, 31  ;;  %v683_v1 = vld [vmem:[#allocation5] sm:$0xf]  ;;  %v922_v18 = vld [vmem:[#allocation7 + $0x8] sm:$0xff]  ;;  %v921_v21 = vld [vmem:[#allocation7] sm:$0xff]  ;;  %v14084_v29 = vmov 0.0  }
  0xd5   : > { %9152 = vmatprep.subr.msk.mxu0 %vm740_vm0, %v683_v1  ;;  %v924_v19 = vld [vmem:[#allocation7 + $0x18] sm:$0xff]  ;;  %v923_v22 = vld [vmem:[#allocation7 + $0x10] sm:$0xff]  ;;  %v926_v24 = vld [vmem:[#allocation7 + $0x28] sm:$0xff]  ;;  %1054 = vmatprep.mubr.f32.mxu1 %v14084_v29  ;;  %vm941_vm2 = vcmask 261120   ;;  %p658_p9 = scmp.lt.s32.totalorder %s11289_s29, 1  ;;  %s14136_s25 = sld [smem:[#allocation38_spill]] }
  0xd6   : > { %s14178_s16 = smov (!%p653_p8, %s8441_s16), 31  ;;  %9153 = vmatpush3.msk.msra.mxu0 %vm740_vm0, %v683_v1  ;;  %v9794_v20 = vpack.c.bf16 %v924_v19, %v922_v18  ;;  %v9796_v23 = vpack.c.bf16 %v923_v22, %v921_v21  ;;  %v928_v25 = vld [vmem:[#allocation7 + $0x38] sm:$0xff]  ;;  %v925_v26 = vld [vmem:[#allocation7 + $0x20] sm:$0xff]  ;;  %v927_v28 = vld [vmem:[#allocation7 + $0x30] sm:$0xff]  ;;  %s11185_s20 = smov 96  }
  0xd7   : > { %s8442_s18 = sshll.u32 %s14178_s16, 3  ;;  %v9798_v27 = vpack.c.bf16 %v928_v25, %v926_v24  ;;  %v9800_v30 = vpack.c.bf16 %v927_v28, %v925_v26  ;;  %v11523_v31 = vld [vmem:[%s14067_s4] ss:$0 sm:$0xff]  ;;  %v929_v19 = vld [vmem:[#allocation8] sm:$0x3]  ;;  %vm11642_vm3 = vmpackc.low %vm941_vm2, %vm941_vm2  ;;  %s14180_s29 = smov (!%p658_p9, %s11289_s29), 1 }
  0xd8   : > { %9795 = vmatprep.subr.bf16.mxu1 %v9794_v20  ;;  %s8790_s2 = sshll.u32 %s14180_s29, 7  ;;  %s11186_s22 = smov 32  }
  0xd9   : > { %s11485_s1 = scalar_lea.vmem %s14131_s23, %s8442_s18  ;;  %9797 = vmatpush1.bf16.msra.mxu1 %v9796_v23  ;;  %s11187_s23 = smov 64  }
  0xda   : > { %v667_v2 = vld [vmem:[%s11485_s1] sm:$0xff]  ;;  %v668_v3 = vld [vmem:[%s11485_s1 + $0x8] sm:$0xff]  ;;  %v669_v4 = vld [vmem:[%s11485_s1 + $0x10] sm:$0xff]  ;;  %9799 = vmatprep.subr.bf16.mxu1 %v9798_v27  ;;  %s8445_s17 = sshll.u32 %s14180_s29, 3 }
  0xdb   : > { %9154 = vmatprep.mubr.msk.f32.mxu0 %vm691_vm1, %v667_v2  ;;  %v670_v5 = vld [vmem:[%s11485_s1 + $0x18] sm:$0xff]  ;;  %v671_v6 = vld [vmem:[%s11485_s1 + $0x20] sm:$0xff]  ;;  %v672_v7 = vld [vmem:[%s11485_s1 + $0x28] sm:$0xff]  ;;  %s11788_s19 = scalar_lea.vmem %s14136_s25, %s8790_s2 }
  0xdc   : > { %9155 = vmatmul.mubr.msk.f32.vlgmr.msra.gmra.mrb[0].mxu0 %vm691_vm1, %v668_v3  ;;  %v673_v8 = vld [vmem:[%s11485_s1 + $0x30] sm:$0xff]  ;;  %v674_v9 = vld [vmem:[%s11485_s1 + $0x38] sm:$0xff]  ;;  %v675_v10 = vld [vmem:[%s11485_s1 + $0x40] sm:$0xff] }
  0xdd   : > { %9157 = vmatprep.mubr.msk.f32.mxu0 %vm691_vm1, %v669_v4  ;;  %v676_v11 = vld [vmem:[%s11485_s1 + $0x48] sm:$0xff]  ;;  %v677_v12 = vld [vmem:[%s11485_s1 + $0x50] sm:$0xff]  ;;  %v678_v13 = vld [vmem:[%s11485_s1 + $0x58] sm:$0xff]  ;;  %9801 = vmatpush1.bf16.msra.mxu1 %v9800_v30 }
  0xde   : > { %v679_v14 = vld [vmem:[%s11485_s1 + $0x60] sm:$0xff]  ;;  %v680_v15 = vld [vmem:[%s11485_s1 + $0x68] sm:$0xff]  ;;  %v681_v16 = vld [vmem:[%s11485_s1 + $0x70] sm:$0xff] }
  0xdf   : > { %v682_v17 = vld [vmem:[%s11485_s1 + $0x78] sm:$0xff] }
  0xe0   : > { %9158 = vmatmul.mubr.msk.f32.gmra.mrb[2].mxu0 %vm691_vm1, %v670_v5 }
  0xe1   : > { %9160 = vmatprep.mubr.msk.f32.mxu0 %vm691_vm1, %v671_v6 }
  0xe4   : > { %9161 = vmatmul.mubr.msk.f32.gmra.mrb[4].mxu0 %vm691_vm1, %v672_v7 }
  0xe5   : > { %9163 = vmatprep.mubr.msk.f32.mxu0 %vm691_vm1, %v673_v8 }
  0xe8   : > { %9164 = vmatmul.mubr.msk.f32.gmra.mrb[6].mxu0 %vm691_vm1, %v674_v9 }
  0xe9   : > { %9166 = vmatprep.mubr.msk.f32.mxu0 %vm691_vm1, %v675_v10 }
  0xec   : > { %9167 = vmatmul.mubr.msk.f32.gmra.mrb[8].mxu0 %vm691_vm1, %v676_v11 }
  0xed   : > { %9169 = vmatprep.mubr.msk.f32.mxu0 %vm691_vm1, %v677_v12 }
  0xf0   : > { %9170 = vmatmul.mubr.msk.f32.gmra.mrb[10].mxu0 %vm691_vm1, %v678_v13 }
  0xf1   : > { %9172 = vmatprep.mubr.msk.f32.mxu0 %vm691_vm1, %v679_v14 }
  0xf4   : > { %9173 = vmatmul.mubr.msk.f32.gmra.mrb[12].mxu0 %vm691_vm1, %v680_v15 }
  0xf5   : > { %9175 = vmatprep.mubr.msk.f32.mxu0 %vm691_vm1, %v681_v16  ;;  %v931_v16 = vlaneseq }
  0xf8   : > { %9176 = vmatmul.mubr.msk.f32.gmra.mrb[14].mxu0 %vm691_vm1, %v682_v17  ;;  %v932_v17 = vshrl.u32 %v931_v16, 7 }
  0xfa   : > { %v11620_v18 = vsub.s32 0, %v932_v17  ;;  %v11625_v21 = vsub.s32 1, %v932_v17 }
  0xfc   : > { %v11623_v20 = vrot.slane %v929_v19, %v11620_v18  ;;  %14132 = vst [vmem:[#allocation19_spill] sm:$0xff] %v11625_v21  ;;  %v11631_v25 = vrot.slane %v929_v19, %v11625_v21 }
 0x1af   : > { %v9156_v32 = vpop.f32.mrb[0].mxu0 }
 0x1b0   : > { %v810_v33 = vpop.f32.mrb[1].mxu0  ;;  %v816_v35 = vadd.f32 %v9156_v32, %v11523_v31  ;;  %v14133_v32 = vmov 0 }
 0x1b1   : > { %v811_v34 = vadd.f32 %v11523_v31, %v810_v33  ;;  %v14134_v32 = vsel %vm11642_vm3, 4294967295, %v14133_v32 }
 0x1b2   : > { %14135 = vst [vmem:[#allocation20_spill] sm:$0xff] %v14134_v32 }
 0x1b3   : > { %10246 = vtanh.f32 %v811_v34  ;;  %v9159_v36 = vpop.f32.mrb[2].mxu0 }
 0x1b4   : > { %v820_v37 = vpop.f32.mrb[3].mxu0  ;;  %10248 = vtanh.f32 %v816_v35  ;;  %v826_v41 = vadd.f32 %v9159_v36, %v11523_v31 }
 0x1b5   : > { %v821_v38 = vadd.f32 %v11523_v31, %v820_v37 }
 0x1b7   : > { %v9162_v39 = vpop.f32.mrb[4].mxu0  ;;  %10250 = vtanh.f32 %v821_v38 }
 0x1b8   : > { %v830_v40 = vpop.f32.mrb[5].mxu0  ;;  %10252 = vtanh.f32 %v826_v41  ;;  %v836_v50 = vadd.f32 %v9162_v39, %v11523_v31 }
 0x1b9   : > { %v831_v45 = vadd.f32 %v11523_v31, %v830_v40 }
 0x1bb   : > { %v9165_v42 = vpop.f32.mrb[6].mxu0  ;;  %10254 = vtanh.f32 %v831_v45 }
 0x1bc   : > { %v840_v43 = vpop.f32.mrb[7].mxu0  ;;  %10256 = vtanh.f32 %v836_v50  ;;  %v846_v58 = vadd.f32 %v9165_v42, %v11523_v31 }
 0x1bd   : > { %v11529_v44 = vpop.eup %10246  ;;  %v841_v53 = vadd.f32 %v11523_v31, %v840_v43 }
 0x1be   : > { %8464 = vmatmul.mubr.msk.f32.vlgmr.msra.gmra.mrb[0].mxu1 %vm941_vm2, %v11529_v44  ;;  %v11535_v48 = vpop.eup %10248 }
 0x1bf   : > { %1060 = vmatprep.mubr.f32.mxu1 %v14084_v29  ;;  %v9168_v46 = vpop.f32.mrb[8].mxu0  ;;  %10258 = vtanh.f32 %v841_v53 }
 0x1c0   : > { %v850_v47 = vpop.f32.mrb[9].mxu0  ;;  %10260 = vtanh.f32 %v846_v58  ;;  %v856_v0 = vadd.f32 %v9168_v46, %v11523_v31 }
 0x1c1   : > { %v11539_v49 = vpop.eup %10250  ;;  %v851_v61 = vadd.f32 %v11523_v31, %v850_v47 }
 0x1c2   : > { %8465 = vmatmul.mubr.msk.f32.gmra.mrb[2].mxu1 %vm941_vm2, %v11535_v48  ;;  %v11547_v56 = vpop.eup %10252 }
 0x1c3   : > { %1066 = vmatprep.mubr.f32.mxu1 %v14084_v29  ;;  %v9171_v51 = vpop.f32.mrb[10].mxu0  ;;  %10262 = vtanh.f32 %v851_v61 }
 0x1c4   : > { %v860_v52 = vpop.f32.mrb[11].mxu0  ;;  %10264 = vtanh.f32 %v856_v0  ;;  %v866_v4 = vadd.f32 %v9171_v51, %v11523_v31 }
 0x1c5   : > { %v11551_v57 = vpop.eup %10254  ;;  %v861_v1 = vadd.f32 %v11523_v31, %v860_v52 }
 0x1c6   : > { %8466 = vmatmul.mubr.msk.f32.gmra.mrb[4].mxu1 %vm941_vm2, %v11539_v49  ;;  %v11559_v62 = vpop.eup %10256 }
 0x1c7   : > { %1072 = vmatprep.mubr.f32.mxu1 %v14084_v29  ;;  %v9174_v54 = vpop.f32.mrb[12].mxu0  ;;  %10266 = vtanh.f32 %v861_v1 }
 0x1c8   : > { %v870_v55 = vpop.f32.mrb[13].mxu0  ;;  %10268 = vtanh.f32 %v866_v4  ;;  %v876_v8 = vadd.f32 %v9174_v54, %v11523_v31 }
 0x1c9   : > { %v11563_v63 = vpop.eup %10258  ;;  %v871_v5 = vadd.f32 %v11523_v31, %v870_v55 }
 0x1ca   : > { %8467 = vmatmul.mubr.msk.f32.gmra.mrb[6].mxu1 %vm941_vm2, %v11547_v56  ;;  %v11571_v2 = vpop.eup %10260 }
 0x1cb   : > { %1078 = vmatprep.mubr.f32.mxu1 %v14084_v29  ;;  %v9177_v59 = vpop.f32.mrb[14].mxu0  ;;  %10270 = vtanh.f32 %v871_v5 }
 0x1cc   : > { %v880_v60 = vpop.f32.mrb[15].mxu0  ;;  %10272 = vtanh.f32 %v876_v8  ;;  %v886_v12 = vadd.f32 %v9177_v59, %v11523_v31 }
 0x1cd   : > { %v11575_v3 = vpop.eup %10262  ;;  %v881_v9 = vadd.f32 %v11523_v31, %v880_v60 }
 0x1ce   : > { %8468 = vmatmul.mubr.msk.f32.gmra.mrb[8].mxu1 %vm941_vm2, %v11551_v57  ;;  %v11583_v6 = vpop.eup %10264 }
 0x1cf   : > { %1084 = vmatprep.mubr.f32.mxu1 %v14084_v29  ;;  %10274 = vtanh.f32 %v881_v9 }
 0x1d0   : > { %10276 = vtanh.f32 %v886_v12 }
 0x1d1   : > { %v11587_v7 = vpop.eup %10266 }
 0x1d2   : > { %8469 = vmatmul.mubr.msk.f32.gmra.mrb[10].mxu1 %vm941_vm2, %v11559_v62  ;;  %v11595_v10 = vpop.eup %10268 }
 0x1d3   : > { %1090 = vmatprep.mubr.f32.mxu1 %v14084_v29 }
 0x1d5   : > { %v11599_v11 = vpop.eup %10270 }
 0x1d6   : > { %8470 = vmatmul.mubr.msk.f32.gmra.mrb[12].mxu1 %vm941_vm2, %v11563_v63  ;;  %v11606_v13 = vpop.eup %10272 }
 0x1d7   : > { %1096 = vmatprep.mubr.f32.mxu1 %v14084_v29 }
 0x1d9   : > { %v11610_v14 = vpop.eup %10274 }
 0x1da   : > { %8471 = vmatmul.mubr.msk.f32.gmra.mrb[14].mxu1 %vm941_vm2, %v11571_v2  ;;  %v11616_v15 = vpop.eup %10276 }
 0x1db   : > { %1102 = vmatprep.mubr.f32.mxu1 %v14084_v29 }
 0x1de   : > { %8472 = vmatmul.mubr.msk.f32.gmra.mrb[16].mxu1 %vm941_vm2, %v11575_v3 }
 0x1df   : > { %1108 = vmatprep.mubr.f32.mxu1 %v14084_v29 }
 0x1e2   : > { %8473 = vmatmul.mubr.msk.f32.gmra.mrb[18].mxu1 %vm941_vm2, %v11583_v6 }
 0x1e3   : > { %1114 = vmatprep.mubr.f32.mxu1 %v14084_v29 }
 0x1e6   : > { %8474 = vmatmul.mubr.msk.f32.gmra.mrb[20].mxu1 %vm941_vm2, %v11587_v7 }
 0x1e7   : > { %1120 = vmatprep.mubr.f32.mxu1 %v14084_v29 }
 0x1ea   : > { %8475 = vmatmul.mubr.msk.f32.gmra.mrb[22].mxu1 %vm941_vm2, %v11595_v10 }
 0x1eb   : > { %1126 = vmatprep.mubr.f32.mxu1 %v14084_v29 }
 0x1ee   : > { %8476 = vmatmul.mubr.msk.f32.gmra.mrb[24].mxu1 %vm941_vm2, %v11599_v11 }
 0x1ef   : > { %1132 = vmatprep.mubr.f32.mxu1 %v14084_v29 }
 0x1f2   : > { %8477 = vmatmul.mubr.msk.f32.gmra.mrb[26].mxu1 %vm941_vm2, %v11606_v13 }
 0x1f3   : > { %1138 = vmatprep.mubr.f32.mxu1 %v14084_v29 }
 0x1f6   : > { %8478 = vmatmul.mubr.msk.f32.gmra.mrb[28].mxu1 %vm941_vm2, %v11610_v14 }
 0x1f7   : > { %1144 = vmatprep.mubr.f32.mxu1 %v14084_v29 }
 0x1fa   : > { %8479 = vmatmul.mubr.msk.f32.gmra.mrb[30].mxu1 %vm941_vm2, %v11616_v15 }
 0x291   : > { %v1056_v22 = vpop.f32.mrb[0].mxu1 }
 0x292   : > { %v11628_v23 = vadd.f32 %v1056_v22, %v11623_v20  ;;  %v1058_v24 = vpop.f32.mrb[1].mxu1 }
 0x293   : > { %v1059_v30 = vadd.f32 %v1058_v24, %v11631_v25 }
 0x294   : > { %9210 = vmatprep.mubr.msk.f32.mxu0 %vm941_vm2, %v11628_v23 }
 0x295   : > { %v1062_v26 = vpop.f32.mrb[2].mxu1 }
 0x296   : > { %v11636_v27 = vadd.f32 %v1062_v26, %v11623_v20  ;;  %v1064_v28 = vpop.f32.mrb[3].mxu1 }
 0x297   : > { %v1065_v31 = vadd.f32 %v1064_v28, %v11631_v25 }
 0x298   : > { %v9802_v33 = vpack.c.bf16 %v11636_v27, %v11628_v23 }
 0x299   : > { %v9850_v34 = vpack.c.bf16 %v1065_v31, %v1059_v30  ;;  %v1068_v35 = vpop.f32.mrb[4].mxu1 }
 0x29a   : > { %v1070_v36 = vpop.f32.mrb[5].mxu1  ;;  %9804 = vmatprep.subr.msk.bf16.mxu0 %vm11642_vm3, %v9802_v33  ;;  %v11653_v38 = vadd.f32 %v1068_v35, %v11623_v20 }
 0x29b   : > { %9807 = vmatpush3.bf16.xpose.msk.msra.mxu0 %vm11642_vm3, %v9802_v33  ;;  %9851 = vmatprep.subr.bf16.mxu1 %v9850_v34  ;;  %v1071_v41 = vadd.f32 %v1070_v36, %v11631_v25 }
 0x29c   : > { %9853 = vmatpush3.bf16.msra.mxu1 %v9850_v34 }
 0x29d   : > { %v1074_v37 = vpop.f32.mrb[6].mxu1 }
 0x29e   : > { %v11656_v39 = vadd.f32 %v1074_v37, %v11623_v20  ;;  %v1076_v40 = vpop.f32.mrb[7].mxu1 }
 0x29f   : > { %v1077_v42 = vadd.f32 %v1076_v40, %v11631_v25 }
 0x2a0   : > { %v9808_v43 = vpack.c.bf16 %v11656_v39, %v11653_v38 }
 0x2a1   : > { %v9854_v45 = vpack.c.bf16 %v1077_v42, %v1071_v41  ;;  %v1080_v46 = vpop.f32.mrb[8].mxu1 }
 0x2a2   : > { %v1082_v47 = vpop.f32.mrb[9].mxu1  ;;  %9810 = vmatprep.subr.msk.bf16.mxu0 %vm11642_vm3, %v9808_v43  ;;  %v11667_v51 = vadd.f32 %v1080_v46, %v11623_v20 }
 0x2a3   : > { %9813 = vmatpush3.bf16.xpose.msk.msra.mxu0 %vm11642_vm3, %v9808_v43  ;;  %9855 = vmatprep.subr.bf16.mxu1 %v9854_v45  ;;  %v1083_v54 = vadd.f32 %v1082_v47, %v11631_v25 }
 0x2a4   : > { %9857 = vmatpush3.bf16.msra.mxu1 %v9854_v45 }
 0x2a5   : > { %v1086_v50 = vpop.f32.mrb[10].mxu1 }
 0x2a6   : > { %v11670_v52 = vadd.f32 %v1086_v50, %v11623_v20  ;;  %v1088_v53 = vpop.f32.mrb[11].mxu1 }
 0x2a7   : > { %v1089_v55 = vadd.f32 %v1088_v53, %v11631_v25 }
 0x2a8   : > { %v9814_v58 = vpack.c.bf16 %v11670_v52, %v11667_v51 }
 0x2a9   : > { %v9858_v59 = vpack.c.bf16 %v1089_v55, %v1083_v54  ;;  %v1092_v60 = vpop.f32.mrb[12].mxu1 }
 0x2aa   : > { %v1094_v61 = vpop.f32.mrb[13].mxu1  ;;  %9816 = vmatprep.subr.msk.bf16.mxu0 %vm11642_vm3, %v9814_v58  ;;  %v11681_v1 = vadd.f32 %v1092_v60, %v11623_v20 }
 0x2ab   : > { %9819 = vmatpush3.bf16.xpose.msk.msra.mxu0 %vm11642_vm3, %v9814_v58  ;;  %9859 = vmatprep.subr.bf16.mxu1 %v9858_v59  ;;  %v1095_v8 = vadd.f32 %v1094_v61, %v11631_v25 }
 0x2ac   : > { %9861 = vmatpush3.bf16.msra.mxu1 %v9858_v59 }
 0x2ad   : > { %v1098_v0 = vpop.f32.mrb[14].mxu1 }
 0x2ae   : > { %v11684_v4 = vadd.f32 %v1098_v0, %v11623_v20  ;;  %v1100_v5 = vpop.f32.mrb[15].mxu1 }
 0x2af   : > { %v1101_v9 = vadd.f32 %v1100_v5, %v11631_v25 }
 0x2b0   : > { %v9820_v12 = vpack.c.bf16 %v11684_v4, %v11681_v1 }
 0x2b1   : > { %v9862_v16 = vpack.c.bf16 %v1101_v9, %v1095_v8  ;;  %v1104_v17 = vpop.f32.mrb[16].mxu1 }
 0x2b2   : > { %v1106_v19 = vpop.f32.mrb[17].mxu1  ;;  %9822 = vmatprep.subr.msk.bf16.mxu0 %vm11642_vm3, %v9820_v12  ;;  %v11695_v24 = vadd.f32 %v1104_v17, %v11623_v20 }
 0x2b3   : > { %9825 = vmatpush3.bf16.xpose.msk.msra.mxu0 %vm11642_vm3, %v9820_v12  ;;  %9863 = vmatprep.subr.bf16.mxu1 %v9862_v16  ;;  %v1107_v30 = vadd.f32 %v1106_v19, %v11631_v25 }
 0x2b4   : > { %9865 = vmatpush3.bf16.msra.mxu1 %v9862_v16 }
 0x2b5   : > { %v1110_v22 = vpop.f32.mrb[18].mxu1 }
 0x2b6   : > { %v11698_v26 = vadd.f32 %v1110_v22, %v11623_v20  ;;  %v1112_v28 = vpop.f32.mrb[19].mxu1 }
 0x2b7   : > { %v1113_v31 = vadd.f32 %v1112_v28, %v11631_v25 }
 0x2b8   : > { %v9826_v33 = vpack.c.bf16 %v11698_v26, %v11695_v24 }
 0x2b9   : > { %v9866_v34 = vpack.c.bf16 %v1113_v31, %v1107_v30  ;;  %v1116_v35 = vpop.f32.mrb[20].mxu1 }
 0x2ba   : > { %v1118_v36 = vpop.f32.mrb[21].mxu1  ;;  %9828 = vmatprep.subr.msk.bf16.mxu0 %vm11642_vm3, %v9826_v33  ;;  %v11709_v40 = vadd.f32 %v1116_v35, %v11623_v20  ;;  %v11795_v35 = vld [vmem:[%s11788_s19 + $0x8] sm:$0xff] }
 0x2bb   : > { %9831 = vmatpush3.bf16.xpose.msk.msra.mxu0 %vm11642_vm3, %v9826_v33  ;;  %9867 = vmatprep.subr.bf16.mxu1 %v9866_v34  ;;  %v1119_v43 = vadd.f32 %v1118_v36, %v11631_v25  ;;  %14138 = vst [vmem:[#allocation22_spill] sm:$0xff] %v11795_v35  ;;  %v11798_v36 = vld [vmem:[%s11788_s19 + $0x10] sm:$0xff]  ;;  %vm1345_vm5 = vcmp.eq.f32.partialorder %v11795_v35, 0.0 }
 0x2bc   : > { %9869 = vmatpush3.bf16.msra.mxu1 %v9866_v34  ;;  %14139 = vst [vmem:[#allocation23_spill] sm:$0xff] %v11798_v36  ;;  %vm1346_vm6 = vcmp.eq.f32.partialorder %v11798_v36, 0.0 }
 0x2bd   : > { %v1122_v37 = vpop.f32.mrb[22].mxu1 }
 0x2be   : > { %v11712_v41 = vadd.f32 %v1122_v37, %v11623_v20  ;;  %v1124_v42 = vpop.f32.mrb[23].mxu1 }
 0x2bf   : > { %v1125_v45 = vadd.f32 %v1124_v42, %v11631_v25 }
 0x2c0   : > { %v9832_v46 = vpack.c.bf16 %v11712_v41, %v11709_v40 }
 0x2c1   : > { %v9870_v47 = vpack.c.bf16 %v1125_v45, %v1119_v43  ;;  %v1128_v50 = vpop.f32.mrb[24].mxu1 }
 0x2c2   : > { %v1130_v53 = vpop.f32.mrb[25].mxu1  ;;  %9834 = vmatprep.subr.msk.bf16.mxu0 %vm11642_vm3, %v9832_v46  ;;  %v11723_v55 = vadd.f32 %v1128_v50, %v11623_v20  ;;  %v11812_v50 = vld [vmem:[%s11788_s19 + $0x20] sm:$0xff] }
 0x2c3   : > { %9837 = vmatpush3.bf16.xpose.msk.msra.mxu0 %vm11642_vm3, %v9832_v46  ;;  %9871 = vmatprep.subr.bf16.mxu1 %v9870_v47  ;;  %v1131_v60 = vadd.f32 %v1130_v53, %v11631_v25  ;;  %14141 = vst [vmem:[#allocation25_spill] sm:$0xff] %v11812_v50  ;;  %vm1348_vm8 = vcmp.eq.f32.partialorder %v11812_v50, 0.0 }
 0x2c4   : > { %9873 = vmatpush3.bf16.msra.mxu1 %v9870_v47  ;;  %v11809_v47 = vld [vmem:[%s11788_s19 + $0x18] sm:$0xff] }
 0x2c5   : > { %v1134_v54 = vpop.f32.mrb[26].mxu1  ;;  %14140 = vst [vmem:[#allocation24_spill] sm:$0xff] %v11809_v47  ;;  %vm1347_vm7 = vcmp.eq.f32.partialorder %v11809_v47, 0.0 }
 0x2c6   : > { %v11726_v58 = vadd.f32 %v1134_v54, %v11623_v20  ;;  %v1136_v59 = vpop.f32.mrb[27].mxu1 }
 0x2c7   : > { %v1137_v61 = vadd.f32 %v1136_v59, %v11631_v25 }
 0x2c8   : > { %v9838_v0 = vpack.c.bf16 %v11726_v58, %v11723_v55 }
 0x2c9   : > { %v9874_v5 = vpack.c.bf16 %v1137_v61, %v1131_v60  ;;  %v1140_v8 = vpop.f32.mrb[28].mxu1 }
 0x2ca   : > { %v1142_v9 = vpop.f32.mrb[29].mxu1  ;;  %9840 = vmatprep.subr.msk.bf16.mxu0 %vm11642_vm3, %v9838_v0  ;;  %v11737_v16 = vadd.f32 %v1140_v8, %v11623_v20  ;;  %v11832_v8 = vld [vmem:[%s11788_s19 + $0x30] sm:$0xff] }
 0x2cb   : > { %9843 = vmatpush3.bf16.xpose.msk.msra.mxu0 %vm11642_vm3, %v9838_v0  ;;  %9875 = vmatprep.subr.bf16.mxu1 %v9874_v5  ;;  %v1143_v22 = vadd.f32 %v1142_v9, %v11631_v25  ;;  %14143 = vst [vmem:[#allocation27_spill] sm:$0xff] %v11832_v8  ;;  %vm1350_vm10 = vcmp.eq.f32.partialorder %v11832_v8, 0.0 }
 0x2cc   : > { %9877 = vmatpush3.bf16.msra.mxu1 %v9874_v5  ;;  %v11829_v5 = vld [vmem:[%s11788_s19 + $0x28] sm:$0xff] }
 0x2cd   : > { %v1146_v12 = vpop.f32.mrb[30].mxu1  ;;  %14142 = vst [vmem:[#allocation26_spill] sm:$0xff] %v11829_v5  ;;  %vm1349_vm9 = vcmp.eq.f32.partialorder %v11829_v5, 0.0 }
 0x2ce   : > { %v11740_v17 = vadd.f32 %v1146_v12, %v11623_v20  ;;  %v1148_v19 = vpop.f32.mrb[31].mxu1  ;;  %v11791_v20 = vld [vmem:[%s11788_s19] sm:$0xff] }
 0x2cf   : > { %v1149_v28 = vadd.f32 %v1148_v19, %v11631_v25  ;;  %14137 = vst [vmem:[#allocation21_spill] sm:$0xff] %v11791_v20  ;;  %vm1344_vm4 = vcmp.eq.f32.partialorder %v11791_v20, 0.0 }
 0x2d0   : > { %v9844_v30 = vpack.c.bf16 %v11740_v17, %v11737_v16 }
 0x2d1   : > { %v9878_v31 = vpack.c.bf16 %v1149_v28, %v1143_v22 }
 0x2d2   : > { %9846 = vmatprep.subr.msk.bf16.mxu0 %vm11642_vm3, %v9844_v30 }
 0x2d3   : > { %9849 = vmatpush3.bf16.xpose.msk.msra.mxu0 %vm11642_vm3, %v9844_v30  ;;  %9879 = vmatprep.subr.bf16.mxu1 %v9878_v31 }
 0x2d4   : > { %9881 = vmatpush3.bf16.msra.mxu1 %v9878_v31  ;;  %v11849_v31 = vld [vmem:[%s11788_s19 + $0x38] sm:$0xff] }
 0x2d5   : > { %14144 = vst [vmem:[#allocation28_spill] sm:$0xff] %v11849_v31  ;;  %vm1351_vm11 = vcmp.eq.f32.partialorder %v11849_v31, 0.0 }
 0x2da   : > { %9211 = vmatmul.mubr.msk.f32.vlgmr.msra.gmra.mrb[16].mxu0 %vm941_vm2, %v11636_v27 }
 0x2db   : > { %9213 = vmatprep.mubr.msk.f32.mxu0 %vm941_vm2, %v11653_v38 }
 0x2de   : > { %9214 = vmatmul.mubr.msk.f32.gmra.mrb[18].mxu0 %vm941_vm2, %v11656_v39 }
 0x2df   : > { %9216 = vmatprep.mubr.msk.f32.mxu0 %vm941_vm2, %v11667_v51 }
 0x2e2   : > { %9217 = vmatmul.mubr.msk.f32.gmra.mrb[20].mxu0 %vm941_vm2, %v11670_v52 }
 0x2e3   : > { %9219 = vmatprep.mubr.msk.f32.mxu0 %vm941_vm2, %v11681_v1 }
 0x2e6   : > { %9220 = vmatmul.mubr.msk.f32.gmra.mrb[22].mxu0 %vm941_vm2, %v11684_v4 }
 0x2e7   : > { %9222 = vmatprep.mubr.msk.f32.mxu0 %vm941_vm2, %v11695_v24 }
 0x2ea   : > { %9223 = vmatmul.mubr.msk.f32.gmra.mrb[24].mxu0 %vm941_vm2, %v11698_v26 }
 0x2eb   : > { %9225 = vmatprep.mubr.msk.f32.mxu0 %vm941_vm2, %v11709_v40 }
 0x2ee   : > { %9226 = vmatmul.mubr.msk.f32.gmra.mrb[26].mxu0 %vm941_vm2, %v11712_v41 }
 0x2ef   : > { %9228 = vmatprep.mubr.msk.f32.mxu0 %vm941_vm2, %v11723_v55 }
 0x2f2   : > { %9229 = vmatmul.mubr.msk.f32.gmra.mrb[28].mxu0 %vm941_vm2, %v11726_v58 }
 0x2f3   : > { %9231 = vmatprep.mubr.msk.f32.mxu0 %vm941_vm2, %v11737_v16 }
 0x2f6   : > { %9232 = vmatmul.mubr.msk.f32.gmra.mrb[30].mxu0 %vm941_vm2, %v11740_v17 }
 0x3ad   : > { %v9212_v25 = vpop.f32.mrb[16].mxu0 }
 0x3ae   : > { %v1265_v33 = vpop.f32.mrb[17].mxu0  ;;  %v1361_v37 = vmul.f32 0.17677669, %v9212_v25  ;;  %v11852_v25 = vld [vmem:[%s11788_s19 + $0x40] sm:$0xff] }
 0x3af   : > { %v1360_v34 = vmul.f32 0.17677669, %v1265_v33  ;;  %14145 = vst [vmem:[#allocation29_spill] sm:$0xff] %v11852_v25  ;;  %vm1352_vm12 = vcmp.eq.f32.partialorder %v11852_v25, 0.0 }
 0x3b0   : > { %v11817_v59 = vsel %vm1345_vm5, %v1361_v37, %v11795_v35 }
 0x3b1   : > { %v9215_v42 = vpop.f32.mrb[18].mxu0  ;;  %v11803_v43 = vsel %vm1344_vm4, %v1360_v34, %v11791_v20 }
 0x3b2   : > { %1392 = vmax.xlane.f32.xlu0 %v11803_v43  ;;  %v1275_v45 = vpop.f32.mrb[19].mxu0  ;;  %v1363_v53 = vmul.f32 0.17677669, %v9215_v42 }
 0x3b3   : > { %v1362_v46 = vmul.f32 0.17677669, %v1275_v45 }
 0x3b4   : > { %v11837_v19 = vsel %vm1347_vm7, %v1363_v53, %v11809_v47  ;;  %v11869_v53 = vld [vmem:[%s11788_s19 + $0x48] sm:$0xff] }
 0x3b5   : > { %v9218_v54 = vpop.f32.mrb[20].mxu0  ;;  %v11822_v60 = vsel %vm1346_vm6, %v1362_v46, %v11798_v36  ;;  %14146 = vst [vmem:[#allocation30_spill] sm:$0xff] %v11869_v53  ;;  %vm1353_vm13 = vcmp.eq.f32.partialorder %v11869_v53, 0.0 }
 0x3b6   : > { %1394 = vmax.xlane.f32.xlu0 %v11817_v59  ;;  %1396 = vmax.xlane.f32.xlu1 %v11822_v60  ;;  %v1285_v61 = vpop.f32.mrb[21].mxu0  ;;  %v1365_v9 = vmul.f32 0.17677669, %v9218_v54  ;;  %v11872_v54 = vld [vmem:[%s11788_s19 + $0x50] sm:$0xff] }
 0x3b7   : > { %v1364_v0 = vmul.f32 0.17677669, %v1285_v61  ;;  %14147 = vst [vmem:[#allocation31_spill] sm:$0xff] %v11872_v54  ;;  %vm14091_vm14 = vcmp.eq.f32.partialorder %v11872_v54, 0.0 }
 0x3b8   : > { %v11857_v37 = vsel %vm1349_vm9, %v1365_v9, %v11829_v5 }
 0x3b9   : > { %v9221_v12 = vpop.f32.mrb[22].mxu0  ;;  %v11842_v22 = vsel %vm1348_vm8, %v1364_v0, %v11812_v50 }
 0x3ba   : > { %1398 = vmax.xlane.f32.xlu1 %v11837_v19  ;;  %1400 = vmax.xlane.f32.xlu0 %v11842_v22  ;;  %v1295_v28 = vpop.f32.mrb[23].mxu0  ;;  %v1367_v33 = vmul.f32 0.17677669, %v9221_v12 }
 0x3bb   : > { %v1366_v30 = vmul.f32 0.17677669, %v1295_v28 }
 0x3bc   : > { %v11877_v9 = vsel %vm1351_vm11, %v1367_v33, %v11849_v31  ;;  %v11892_v33 = vld [vmem:[%s11788_s19 + $0x60] sm:$0xff]  ;;  %v11929_v31 = vld [vmem:[%s11788_s19 + $0x78] sm:$0xff] }
 0x3bd   : > { %v9224_v34 = vpop.f32.mrb[24].mxu0  ;;  %v11862_v42 = vsel %vm1350_vm10, %v1366_v30, %v11832_v8  ;;  %14149 = vst [vmem:[#allocation33_spill] sm:$0xff] %v11892_v33  ;;  %vm14094_vm0 = vcmp.eq.f32.partialorder %v11892_v33, 0.0  ;;  %v11909_v8 = vld [vmem:[%s11788_s19 + $0x68] sm:$0xff]  ;;  %14152 = vst [vmem:[#allocation36_spill] sm:$0xff] %v11929_v31 }
 0x3be   : > { %1402 = vmax.xlane.f32.xlu1 %v11857_v37  ;;  %1404 = vmax.xlane.f32.xlu0 %v11862_v42  ;;  %v1305_v45 = vpop.f32.mrb[25].mxu0  ;;  %v1369_v61 = vmul.f32 0.17677669, %v9224_v34  ;;  %v11889_v34 = vld [vmem:[%s11788_s19 + $0x58] sm:$0xff]  ;;  %14150 = vst [vmem:[#allocation34_spill] sm:$0xff] %v11909_v8  ;;  %vm1357_vm1 = vcmp.eq.f32.partialorder %v11909_v8, 0.0 }
 0x3bf   : > { %v1368_v46 = vmul.f32 0.17677669, %v1305_v45  ;;  %14148 = vst [vmem:[#allocation32_spill] sm:$0xff] %v11889_v34  ;;  %vm1355_vm15 = vcmp.eq.f32.partialorder %v11889_v34, 0.0 }
 0x3c1   : > { %v9227_v0 = vpop.f32.mrb[26].mxu0  ;;  %v11882_v12 = vsel %vm1352_vm12, %v1368_v46, %v11852_v25  ;;  %v11897_v46 = vsel %vm1353_vm13, %v1369_v61, %v11869_v53  ;;  %v11912_v61 = vld [vmem:[%s11788_s19 + $0x70] sm:$0xff] }
 0x3c2   : > { %1406 = vmax.xlane.f32.xlu1 %v11877_v9  ;;  %1408 = vmax.xlane.f32.xlu0 %v11882_v12  ;;  %v1315_v28 = vpop.f32.mrb[27].mxu0  ;;  %v1371_v45 = vmul.f32 0.17677669, %v9227_v0  ;;  %14151 = vst [vmem:[#allocation35_spill] sm:$0xff] %v11912_v61 }
 0x3c3   : > { %v1370_v30 = vmul.f32 0.17677669, %v1315_v28 }
 0x3c5   : > { %v9230_v29 = vpop.f32.mrb[28].mxu0  ;;  %v11902_v25 = vsel %vm14091_vm14, %v1370_v30, %v11872_v54  ;;  %v11917_v30 = vsel %vm1355_vm15, %v1371_v45, %v11889_v34  ;;  %vm1358_vm14 = vcmp.eq.f32.partialorder %v11912_v61, 0.0 }
 0x3c6   : > { %1410 = vmax.xlane.f32.xlu1 %v11897_v46  ;;  %1412 = vmax.xlane.f32.xlu0 %v11902_v25  ;;  %v1325_v28 = vpop.f32.mrb[29].mxu0  ;;  %v1373_v53 = vmul.f32 0.17677669, %v9230_v29 }
 0x3c7   : > { %v1372_v0 = vmul.f32 0.17677669, %v1325_v28 }
 0x3c8   : > { %v11934_v45 = vsel %vm1357_vm1, %v1373_v53, %v11909_v8 }
 0x3c9   : > { %v9233_v50 = vpop.f32.mrb[30].mxu0  ;;  %v11922_v54 = vsel %vm14094_vm0, %v1372_v0, %v11892_v33  ;;  %vm1359_vm0 = vcmp.eq.f32.partialorder %v11929_v31, 0.0 }
 0x3ca   : > { %1414 = vmax.xlane.f32.xlu1 %v11917_v30  ;;  %1416 = vmax.xlane.f32.xlu0 %v11922_v54  ;;  %v1335_v28 = vpop.f32.mrb[31].mxu0  ;;  %v1375_v36 = vmul.f32 0.17677669, %v9233_v50 }
 0x3cb   : > { %v1374_v29 = vmul.f32 0.17677669, %v1335_v28 }
 0x3cc   : > { %v11947_v50 = vsel %vm1359_vm0, %v1375_v36, %v11929_v31 }
 0x3cd   : > { %v11939_v0 = vsel %vm1358_vm14, %v1374_v29, %v11912_v61 }
 0x3ce   : > { %1418 = vmax.xlane.f32.xlu1 %v11934_v45  ;;  %1420 = vmax.xlane.f32.xlu0 %v11939_v0 }
 0x3d2   : > { %1422 = vmax.xlane.f32.xlu1 %v11947_v50 }
 0x43f   : > { %v1393_v53 = vpop.xlane.xlu0 %1392 }
 0x440   : > { %v1424_v28 = vsub.f32 %v11803_v43, %v1393_v53 }
 0x442   : > { %v1440_v33 = vmul.f32 1.442695, %v1424_v28 }
 0x443   : > { %v1395_v8 = vpop.xlane.xlu0 %1394  ;;  %v1397_v29 = vpop.xlane.xlu1 %1396 }
 0x444   : > { %10278 = vpow2.f32 %v1440_v33  ;;  %v1425_v61 = vsub.f32 %v11817_v59, %v1395_v8  ;;  %v1426_v34 = vsub.f32 %v11822_v60, %v1397_v29 }
 0x446   : > { %v1442_v5 = vmul.f32 1.442695, %v1425_v61  ;;  %v1444_v47 = vmul.f32 1.442695, %v1426_v34 }
 0x447   : > { %v1399_v20 = vpop.xlane.xlu1 %1398  ;;  %v1401_v35 = vpop.xlane.xlu0 %1400 }
 0x448   : > { %10280 = vpow2.f32 %v1442_v5  ;;  %v1427_v36 = vsub.f32 %v11837_v19, %v1399_v20  ;;  %v1428_v31 = vsub.f32 %v11842_v22, %v1401_v35 }
 0x449   : > { %10282 = vpow2.f32 %v1444_v47 }
 0x44a   : > { %v1446_v32 = vmul.f32 1.442695, %v1427_v36  ;;  %v1448_v43 = vmul.f32 1.442695, %v1428_v31 }
 0x44b   : > { %v1403_v53 = vpop.xlane.xlu1 %1402  ;;  %v1405_v28 = vpop.xlane.xlu0 %1404 }
 0x44c   : > { %10284 = vpow2.f32 %v1446_v32  ;;  %v1429_v33 = vsub.f32 %v11857_v37, %v1403_v53  ;;  %v1430_v59 = vsub.f32 %v11862_v42, %v1405_v28 }
 0x44d   : > { %10286 = vpow2.f32 %v1448_v43 }
 0x44e   : > { %v11957_v60 = vpop.eup %10278  ;;  %v1450_v8 = vmul.f32 1.442695, %v1429_v33  ;;  %v1452_v34 = vmul.f32 1.442695, %v1430_v59 }
 0x44f   : > { %v1407_v5 = vpop.xlane.xlu1 %1406  ;;  %v1409_v61 = vpop.xlane.xlu0 %1408  ;;  %1472 = vadd.xlane.f32.xlu0 %v11957_v60 }
 0x450   : > { %10288 = vpow2.f32 %v1450_v8  ;;  %v1431_v20 = vsub.f32 %v11877_v9, %v1407_v5  ;;  %v1432_v35 = vsub.f32 %v11882_v12, %v1409_v61 }
 0x451   : > { %10290 = vpow2.f32 %v1452_v34 }
 0x452   : > { %v11962_v32 = vpop.eup %10280  ;;  %v1454_v47 = vmul.f32 1.442695, %v1431_v20  ;;  %v1456_v19 = vmul.f32 1.442695, %v1432_v35 }
 0x453   : > { %v11964_v22 = vpop.eup %10282  ;;  %v1411_v31 = vpop.xlane.xlu1 %1410  ;;  %1474 = vadd.xlane.f32.xlu1 %v11962_v32 }
 0x454   : > { %v1413_v37 = vpop.xlane.xlu0 %1412  ;;  %10292 = vpow2.f32 %v1454_v47  ;;  %v1433_v42 = vsub.f32 %v11897_v46, %v1411_v31  ;;  %1476 = vadd.xlane.f32.xlu0 %v11964_v22 }
 0x455   : > { %v1434_v29 = vsub.f32 %v11902_v25, %v1413_v37  ;;  %10294 = vpow2.f32 %v1456_v19 }
 0x456   : > { %v11970_v9 = vpop.eup %10284  ;;  %v1458_v12 = vmul.f32 1.442695, %v1433_v42 }
 0x457   : > { %v1460_v36 = vmul.f32 1.442695, %v1434_v29  ;;  %v11972_v43 = vpop.eup %10286  ;;  %v1415_v53 = vpop.xlane.xlu1 %1414  ;;  %1478 = vadd.xlane.f32.xlu1 %v11970_v9 }
 0x458   : > { %v1417_v28 = vpop.xlane.xlu0 %1416  ;;  %10296 = vpow2.f32 %v1458_v12  ;;  %v1435_v33 = vsub.f32 %v11917_v30, %v1415_v53  ;;  %1480 = vadd.xlane.f32.xlu0 %v11972_v43 }
 0x459   : > { %v1436_v46 = vsub.f32 %v11922_v54, %v1417_v28  ;;  %10298 = vpow2.f32 %v1460_v36 }
 0x45a   : > { %v11978_v25 = vpop.eup %10288  ;;  %v1462_v59 = vmul.f32 1.442695, %v1435_v33 }
 0x45b   : > { %v1464_v8 = vmul.f32 1.442695, %v1436_v46  ;;  %v11980_v34 = vpop.eup %10290  ;;  %v1419_v5 = vpop.xlane.xlu1 %1418  ;;  %1482 = vadd.xlane.f32.xlu1 %v11978_v25 }
 0x45c   : > { %v1421_v61 = vpop.xlane.xlu0 %1420  ;;  %10300 = vpow2.f32 %v1462_v59  ;;  %v1437_v20 = vsub.f32 %v11934_v45, %v1419_v5  ;;  %1484 = vadd.xlane.f32.xlu0 %v11980_v34 }
 0x45d   : > { %v1438_v54 = vsub.f32 %v11939_v0, %v1421_v61  ;;  %10302 = vpow2.f32 %v1464_v8 }
 0x45e   : > { %v11986_v30 = vpop.eup %10292  ;;  %v1466_v35 = vmul.f32 1.442695, %v1437_v20 }
 0x45f   : > { %v1468_v47 = vmul.f32 1.442695, %v1438_v54  ;;  %v11988_v19 = vpop.eup %10294  ;;  %1486 = vadd.xlane.f32.xlu1 %v11986_v30  ;;  %v1423_v31 = vpop.xlane.xlu1 %1422 }
 0x460   : > { %10304 = vpow2.f32 %v1466_v35  ;;  %v1439_v37 = vsub.f32 %v11947_v50, %v1423_v31  ;;  %1488 = vadd.xlane.f32.xlu0 %v11988_v19 }
 0x461   : > { %10306 = vpow2.f32 %v1468_v47 }
 0x462   : > { %v11993_v45 = vpop.eup %10296  ;;  %v1470_v42 = vmul.f32 1.442695, %v1439_v37 }
 0x463   : > { %v11995_v0 = vpop.eup %10298  ;;  %1490 = vadd.xlane.f32.xlu1 %v11993_v45 }
 0x464   : > { %10308 = vpow2.f32 %v1470_v42  ;;  %1492 = vadd.xlane.f32.xlu0 %v11995_v0 }
 0x466   : > { %v11999_v29 = vpop.eup %10300 }
 0x467   : > { %v12001_v12 = vpop.eup %10302  ;;  %1494 = vadd.xlane.f32.xlu1 %v11999_v29 }
 0x468   : > { %1496 = vadd.xlane.f32.xlu0 %v12001_v12 }
 0x46a   : > { %v12005_v50 = vpop.eup %10304 }
 0x46b   : > { %v12007_v36 = vpop.eup %10306  ;;  %1498 = vadd.xlane.f32.xlu1 %v12005_v50 }
 0x46c   : > { %1500 = vadd.xlane.f32.xlu0 %v12007_v36 }
 0x46e   : > { %v12011_v53 = vpop.eup %10308 }
 0x46f   : > { %1502 = vadd.xlane.f32.xlu1 %v12011_v53 }
 0x480   : > { %1903 = vrot.lane.b32.xlu1 %v11636_v27, %s11185_s20 }
 0x482   : > { %1901 = vrot.lane.b32.xlu0 %v11628_v23, %s11185_s20 }
 0x484   : > { %1905 = vrot.lane.b32.xlu1 %v11653_v38, %s11185_s20 }
 0x486   : > { %1909 = vrot.lane.b32.xlu0 %v11667_v51, %s11185_s20 }
 0x488   : > { %1907 = vrot.lane.b32.xlu1 %v11656_v39, %s11185_s20 }
 0x48a   : > { %1913 = vrot.lane.b32.xlu0 %v11681_v1, %s11185_s20 }
 0x48c   : > { %1911 = vrot.lane.b32.xlu1 %v11670_v52, %s11185_s20 }
 0x48e   : > { %2061 = vrot.lane.b32.xlu0 %v11628_v23, %s11186_s22  ;;  %v1697_v23 = vld [vmem:[%s14070_s7] sm:$0xff] }
 0x490   : > { %1915 = vrot.lane.b32.xlu1 %v11684_v4, %s11185_s20 }
 0x492   : > { %2063 = vrot.lane.b32.xlu0 %v11636_v27, %s11186_s22  ;;  %v1698_v27 = vld [vmem:[%s14070_s7 + $0x8] sm:$0xff] }
 0x494   : > { %1917 = vrot.lane.b32.xlu1 %v11695_v24, %s11185_s20 }
 0x496   : > { %2065 = vrot.lane.b32.xlu0 %v11653_v38, %s11186_s22  ;;  %v1699_v38 = vld [vmem:[%s14070_s7 + $0x10] sm:$0xff] }
 0x498   : > { %1919 = vrot.lane.b32.xlu1 %v11698_v26, %s11185_s20 }
 0x49a   : > { %2067 = vrot.lane.b32.xlu0 %v11656_v39, %s11186_s22  ;;  %v9882_v39 = vpack.c.bf16 %v1698_v27, %v1697_v23 }
 0x49c   : > { %1921 = vrot.lane.b32.xlu1 %v11709_v40, %s11185_s20  ;;  %9883 = vmatprep.subr.bf16.mxu0 %v9882_v39 }
 0x49d   : > { %9885 = vmatpush3.bf16.msra.mxu0 %v9882_v39 }
 0x49e   : > { %2069 = vrot.lane.b32.xlu0 %v11667_v51, %s11186_s22  ;;  %v1700_v51 = vld [vmem:[%s14070_s7 + $0x18] sm:$0xff] }
 0x4a0   : > { %1923 = vrot.lane.b32.xlu1 %v11712_v41, %s11185_s20 }
 0x4a2   : > { %2071 = vrot.lane.b32.xlu0 %v11670_v52, %s11186_s22  ;;  %v9886_v52 = vpack.c.bf16 %v1700_v51, %v1699_v38 }
 0x4a4   : > { %1925 = vrot.lane.b32.xlu1 %v11723_v55, %s11185_s20  ;;  %9887 = vmatprep.subr.bf16.mxu0 %v9886_v52 }
 0x4a5   : > { %9889 = vmatpush3.bf16.msra.mxu0 %v9886_v52 }
 0x4a6   : > { %2073 = vrot.lane.b32.xlu0 %v11681_v1, %s11186_s22 }
 0x4a8   : > { %1927 = vrot.lane.b32.xlu1 %v11726_v58, %s11185_s20 }
 0x4aa   : > { %2075 = vrot.lane.b32.xlu0 %v11684_v4, %s11186_s22 }
 0x4ac   : > { %1929 = vrot.lane.b32.xlu1 %v11737_v16, %s11185_s20 }
 0x4ae   : > { %2077 = vrot.lane.b32.xlu0 %v11695_v24, %s11186_s22 }
 0x4b0   : > { %1931 = vrot.lane.b32.xlu1 %v11740_v17, %s11185_s20 }
 0x4b2   : > { %2081 = vrot.lane.b32.xlu0 %v11709_v40, %s11186_s22 }
 0x4b4   : > { %2079 = vrot.lane.b32.xlu1 %v11698_v26, %s11186_s22 }
 0x4b6   : > { %2085 = vrot.lane.b32.xlu0 %v11723_v55, %s11186_s22 }
 0x4b8   : > { %2083 = vrot.lane.b32.xlu1 %v11712_v41, %s11186_s22 }
 0x4ba   : > { %2089 = vrot.lane.b32.xlu0 %v11737_v16, %s11186_s22 }
 0x4bc   : > { %2087 = vrot.lane.b32.xlu1 %v11726_v58, %s11186_s22 }
 0x4c0   : > { %2091 = vrot.lane.b32.xlu1 %v11740_v17, %s11186_s22 }
 0x4dc   : > { %v1473_v1 = vpop.xlane.xlu0 %1472 }
 0x4dd   : > { %10310 = vrcp.f32 %v1473_v1 }
 0x4e0   : > { %v1475_v4 = vpop.xlane.xlu1 %1474 }
 0x4e1   : > { %10312 = vrcp.f32 %v1475_v4  ;;  %v1477_v24 = vpop.xlane.xlu0 %1476 }
 0x4e2   : > { %10314 = vrcp.f32 %v1477_v24 }
 0x4e4   : > { %v1479_v26 = vpop.xlane.xlu1 %1478 }
 0x4e5   : > { %10316 = vrcp.f32 %v1479_v26  ;;  %v1481_v40 = vpop.xlane.xlu0 %1480 }
 0x4e6   : > { %10318 = vrcp.f32 %v1481_v40 }
 0x4e7   : > { %v10311_v41 = vpop.eup %10310 }
 0x4e8   : > { %v1483_v55 = vpop.xlane.xlu1 %1482  ;;  %v1520_v58 = vmul.f32 %v10311_v41, %v11957_v60 }
 0x4e9   : > { %10320 = vrcp.f32 %v1483_v55  ;;  %v1485_v16 = vpop.xlane.xlu0 %1484 }
 0x4ea   : > { %10322 = vrcp.f32 %v1485_v16  ;;  %9266 = vmatprep.mubr.f32.mxu1 %v1520_v58  ;;  %v14153_v58 = vmov 0.0  }
 0x4eb   : > { %v10313_v17 = vpop.eup %10312 }
 0x4ec   : > { %v10315_v28 = vpop.eup %10314  ;;  %v1487_v33 = vpop.xlane.xlu1 %1486  ;;  %v1521_v46 = vmul.f32 %v10313_v17, %v11962_v32 }
 0x4ed   : > { %10324 = vrcp.f32 %v1487_v33  ;;  %v1489_v59 = vpop.xlane.xlu0 %1488  ;;  %v1522_v8 = vmul.f32 %v10315_v28, %v11964_v22 }
 0x4ee   : > { %10326 = vrcp.f32 %v1489_v59  ;;  %9267 = vmatmul.mubr.f32.vlgmr.msra.gmra.mrb[32].mxu1 %v1521_v46 }
 0x4ef   : > { %v10317_v5 = vpop.eup %10316  ;;  %9269 = vmatprep.mubr.f32.mxu1 %v1522_v8 }
 0x4f0   : > { %v10319_v61 = vpop.eup %10318  ;;  %v1491_v20 = vpop.xlane.xlu1 %1490  ;;  %v1523_v60 = vmul.f32 %v10317_v5, %v11970_v9 }
 0x4f1   : > { %10328 = vrcp.f32 %v1491_v20  ;;  %v1493_v54 = vpop.xlane.xlu0 %1492  ;;  %v1524_v35 = vmul.f32 %v10319_v61, %v11972_v43 }
 0x4f2   : > { %10330 = vrcp.f32 %v1493_v54  ;;  %9270 = vmatmul.mubr.f32.gmra.mrb[34].mxu1 %v1523_v60 }
 0x4f3   : > { %v10321_v47 = vpop.eup %10320  ;;  %9272 = vmatprep.mubr.f32.mxu1 %v1524_v35 }
 0x4f4   : > { %v10323_v32 = vpop.eup %10322  ;;  %v1495_v31 = vpop.xlane.xlu1 %1494  ;;  %v1525_v22 = vmul.f32 %v10321_v47, %v11978_v25 }
 0x4f5   : > { %10332 = vrcp.f32 %v1495_v31  ;;  %v1497_v37 = vpop.xlane.xlu0 %1496  ;;  %v1526_v42 = vmul.f32 %v10323_v32, %v11980_v34 }
 0x4f6   : > { %10334 = vrcp.f32 %v1497_v37  ;;  %9273 = vmatmul.mubr.f32.gmra.mrb[36].mxu1 %v1525_v22 }
 0x4f7   : > { %v10325_v23 = vpop.eup %10324  ;;  %9275 = vmatprep.mubr.f32.mxu1 %v1526_v42 }
 0x4f8   : > { %v10327_v9 = vpop.eup %10326  ;;  %v1499_v27 = vpop.xlane.xlu1 %1498  ;;  %v1527_v43 = vmul.f32 %v10325_v23, %v11986_v30 }
 0x4f9   : > { %10336 = vrcp.f32 %v1499_v27  ;;  %v1501_v38 = vpop.xlane.xlu0 %1500  ;;  %v1528_v39 = vmul.f32 %v10327_v9, %v11988_v19 }
 0x4fa   : > { %10338 = vrcp.f32 %v1501_v38  ;;  %9276 = vmatmul.mubr.f32.gmra.mrb[38].mxu1 %v1527_v43 }
 0x4fb   : > { %v10329_v51 = vpop.eup %10328  ;;  %9278 = vmatprep.mubr.f32.mxu1 %v1528_v39 }
 0x4fc   : > { %v10331_v25 = vpop.eup %10330  ;;  %v1503_v52 = vpop.xlane.xlu1 %1502  ;;  %v1529_v34 = vmul.f32 %v10329_v51, %v11993_v45 }
 0x4fd   : > { %10340 = vrcp.f32 %v1503_v52  ;;  %v1530_v1 = vmul.f32 %v10331_v25, %v11995_v0 }
 0x4fe   : > { %9279 = vmatmul.mubr.f32.gmra.mrb[40].mxu1 %v1529_v34 }
 0x4ff   : > { %v10333_v4 = vpop.eup %10332  ;;  %9281 = vmatprep.mubr.f32.mxu1 %v1530_v1 }
 0x500   : > { %v10335_v24 = vpop.eup %10334  ;;  %v1531_v30 = vmul.f32 %v10333_v4, %v11999_v29  ;;  %v1904_v52 = vpop.permute.xlu1 %1903 }
 0x501   : > { %v1532_v26 = vmul.f32 %v10335_v24, %v12001_v12  ;;  %v1902_v24 = vpop.permute.xlu0 %1901 }
 0x502   : > { %9282 = vmatmul.mubr.f32.gmra.mrb[42].mxu1 %v1531_v30 }
 0x503   : > { %v10337_v19 = vpop.eup %10336  ;;  %9284 = vmatprep.mubr.f32.mxu1 %v1532_v26 }
 0x504   : > { %v10339_v40 = vpop.eup %10338  ;;  %v1533_v41 = vmul.f32 %v10337_v19, %v12005_v50  ;;  %v1906_v34 = vpop.permute.xlu1 %1905 }
 0x505   : > { %v1534_v55 = vmul.f32 %v10339_v40, %v12007_v36  ;;  %v1910_v26 = vpop.permute.xlu0 %1909 }
 0x506   : > { %9285 = vmatmul.mubr.f32.gmra.mrb[44].mxu1 %v1533_v41 }
 0x507   : > { %v10341_v45 = vpop.eup %10340  ;;  %9287 = vmatprep.mubr.f32.mxu1 %v1534_v55 }
 0x508   : > { %v1535_v0 = vmul.f32 %v10341_v45, %v12011_v53  ;;  %v1908_v1 = vpop.permute.xlu1 %1907  ;;  %v12125_v45 = vld [vmem:[#allocation10] ss:$0 sm:$0xff] }
 0x509   : > { %v1914_v40 = vpop.permute.xlu0 %1913 }
 0x50a   : > { %9288 = vmatmul.mubr.f32.gmra.mrb[46].mxu1 %v1535_v0 }
 0x50b   : > { %2563 = vmatprep.mubr.f32.mxu1 %v14153_v58 }
 0x50c   : > { %v1912_v4 = vpop.permute.xlu1 %1911 }
 0x50d   : > { %v12123_v55 = vpop.permute.xlu0 %2061 }
 0x510   : > { %v1916_v30 = vpop.permute.xlu1 %1915 }
 0x514   : > { %v1918_v19 = vpop.permute.xlu1 %1917 }
 0x518   : > { %v1920_v41 = vpop.permute.xlu1 %1919 }
 0x51c   : > { %v12127_v0 = vpop.permute.xlu1 %1921 }
 0x5c1   : > { %v9268_v16 = vpop.f32.mrb[32].mxu1 }
 0x5c2   : > { %v1602_v29 = vpop.f32.mrb[33].mxu1 }
 0x5c3   : > { %10342 = vtanh.f32 %v1602_v29  ;;  %v12129_v29 = vpop.permute.xlu0 %2063 }
 0x5c4   : > { %10344 = vtanh.f32 %v9268_v16 }
 0x5c5   : > { %v9271_v12 = vpop.f32.mrb[34].mxu1 }
 0x5c6   : > { %v1612_v17 = vpop.f32.mrb[35].mxu1 }
 0x5c7   : > { %10346 = vtanh.f32 %v1612_v17 }
 0x5c8   : > { %10348 = vtanh.f32 %v9271_v12 }
 0x5c9   : > { %v9274_v28 = vpop.f32.mrb[36].mxu1 }
 0x5ca   : > { %v1622_v50 = vpop.f32.mrb[37].mxu1 }
 0x5cb   : > { %10350 = vtanh.f32 %v1622_v50 }
 0x5cc   : > { %10352 = vtanh.f32 %v9274_v28 }
 0x5cd   : > { %v10343_v36 = vpop.eup %10342  ;;  %v9277_v33 = vpop.f32.mrb[38].mxu1 }
 0x5ce   : > { %v10345_v46 = vpop.eup %10344  ;;  %v1632_v59 = vpop.f32.mrb[39].mxu1  ;;  %9298 = vmatprep.mubr.msk.f32.mxu0 %vm941_vm2, %v10343_v36 }
 0x5cf   : > { %10354 = vtanh.f32 %v1632_v59  ;;  %9299 = vmatmul.mubr.msk.f32.vlgmr.msra.gmra.mrb[32].mxu0 %vm941_vm2, %v10345_v46 }
 0x5d0   : > { %10356 = vtanh.f32 %v9277_v33 }
 0x5d1   : > { %v10347_v53 = vpop.eup %10346  ;;  %v9280_v8 = vpop.f32.mrb[40].mxu1 }
 0x5d2   : > { %v10349_v5 = vpop.eup %10348  ;;  %v1642_v61 = vpop.f32.mrb[41].mxu1  ;;  %9301 = vmatprep.mubr.msk.f32.mxu0 %vm941_vm2, %v10347_v53 }
 0x5d3   : > { %10358 = vtanh.f32 %v1642_v61  ;;  %9302 = vmatmul.mubr.msk.f32.gmra.mrb[34].mxu0 %vm941_vm2, %v10349_v5 }
 0x5d4   : > { %10360 = vtanh.f32 %v9280_v8  ;;  %v1924_v8 = vpop.permute.xlu1 %1923 }
 0x5d5   : > { %v10351_v20 = vpop.eup %10350  ;;  %v9283_v60 = vpop.f32.mrb[42].mxu1 }
 0x5d6   : > { %v10353_v54 = vpop.eup %10352  ;;  %v1652_v35 = vpop.f32.mrb[43].mxu1  ;;  %9304 = vmatprep.mubr.msk.f32.mxu0 %vm941_vm2, %v10351_v20 }
 0x5d7   : > { %10362 = vtanh.f32 %v1652_v35  ;;  %9305 = vmatmul.mubr.msk.f32.gmra.mrb[36].mxu0 %vm941_vm2, %v10353_v54  ;;  %v12145_v20 = vpop.permute.xlu0 %2065 }
 0x5d8   : > { %10364 = vtanh.f32 %v9283_v60 }
 0x5d9   : > { %v10355_v47 = vpop.eup %10354  ;;  %v9286_v32 = vpop.f32.mrb[44].mxu1 }
 0x5da   : > { %v10357_v31 = vpop.eup %10356  ;;  %v1662_v22 = vpop.f32.mrb[45].mxu1  ;;  %9307 = vmatprep.mubr.msk.f32.mxu0 %vm941_vm2, %v10355_v47 }
 0x5db   : > { %10366 = vtanh.f32 %v1662_v22  ;;  %9308 = vmatmul.mubr.msk.f32.gmra.mrb[38].mxu0 %vm941_vm2, %v10357_v31 }
 0x5dc   : > { %10368 = vtanh.f32 %v9286_v32 }
 0x5dd   : > { %v10359_v37 = vpop.eup %10358  ;;  %v9289_v42 = vpop.f32.mrb[46].mxu1 }
 0x5de   : > { %v10361_v23 = vpop.eup %10360  ;;  %v1672_v9 = vpop.f32.mrb[47].mxu1  ;;  %9310 = vmatprep.mubr.msk.f32.mxu0 %vm941_vm2, %v10359_v37 }
 0x5df   : > { %10370 = vtanh.f32 %v1672_v9  ;;  %9311 = vmatmul.mubr.msk.f32.gmra.mrb[40].mxu0 %vm941_vm2, %v10361_v23  ;;  %v12156_v23 = vpop.permute.xlu1 %1925 }
 0x5e0   : > { %10372 = vtanh.f32 %v9289_v42 }
 0x5e1   : > { %v10363_v27 = vpop.eup %10362 }
 0x5e2   : > { %v10365_v43 = vpop.eup %10364  ;;  %9313 = vmatprep.mubr.msk.f32.mxu0 %vm941_vm2, %v10363_v27 }
 0x5e3   : > { %9314 = vmatmul.mubr.msk.f32.gmra.mrb[42].mxu0 %vm941_vm2, %v10365_v43  ;;  %v12159_v43 = vpop.permute.xlu0 %2067 }
 0x5e5   : > { %v10367_v38 = vpop.eup %10366 }
 0x5e6   : > { %v10369_v39 = vpop.eup %10368  ;;  %9316 = vmatprep.mubr.msk.f32.mxu0 %vm941_vm2, %v10367_v38 }
 0x5e7   : > { %9317 = vmatmul.mubr.msk.f32.gmra.mrb[44].mxu0 %vm941_vm2, %v10369_v39 }
 0x5e9   : > { %v10371_v51 = vpop.eup %10370 }
 0x5ea   : > { %v10373_v25 = vpop.eup %10372  ;;  %9319 = vmatprep.mubr.msk.f32.mxu0 %vm941_vm2, %v10371_v51 }
 0x5eb   : > { %9320 = vmatmul.mubr.msk.f32.gmra.mrb[46].mxu0 %vm941_vm2, %v10373_v25 }
 0x6a2   : > { %v9300_v16 = vpop.f32.mrb[32].mxu0 }
 0x6a3   : > { %v12132_v12 = vadd.f32 %v9300_v16, %v12125_v45  ;;  %v1822_v17 = vpop.f32.mrb[33].mxu0 }
 0x6a4   : > { %v12135_v28 = vadd.f32 %v12125_v45, %v1822_v17 }
 0x6a5   : > { %v1950_v50 = vadd.f32 %v1904_v52, %v12132_v12 }
 0x6a6   : > { %v1949_v36 = vadd.f32 %v1902_v24, %v12135_v28  ;;  %v9303_v33 = vpop.f32.mrb[34].mxu0 }
 0x6a7   : > { %v8530_v46 = vmul.f32 -1.442695, %v1950_v50  ;;  %v12140_v59 = vadd.f32 %v9303_v33, %v12125_v45  ;;  %v1832_v53 = vpop.f32.mrb[35].mxu0 }
 0x6a8   : > { %v8529_v5 = vmul.f32 -1.442695, %v1949_v36  ;;  %v12143_v61 = vadd.f32 %v12125_v45, %v1832_v53  ;;  %v1928_v36 = vpop.permute.xlu1 %1927 }
 0x6a9   : > { %10374 = vpow2.f32 %v8530_v46  ;;  %v1952_v60 = vadd.f32 %v1908_v1, %v12140_v59 }
 0x6aa   : > { %10376 = vpow2.f32 %v8529_v5  ;;  %v1951_v54 = vadd.f32 %v1906_v34, %v12143_v61  ;;  %v9306_v35 = vpop.f32.mrb[36].mxu0  ;;  %v12175_v5 = vpop.permute.xlu0 %2069 }
 0x6ab   : > { %v8532_v47 = vmul.f32 -1.442695, %v1952_v60  ;;  %v12150_v32 = vadd.f32 %v9306_v35, %v12125_v45  ;;  %v1842_v31 = vpop.f32.mrb[37].mxu0 }
 0x6ac   : > { %v8531_v22 = vmul.f32 -1.442695, %v1951_v54  ;;  %v12153_v37 = vadd.f32 %v12125_v45, %v1842_v31 }
 0x6ad   : > { %10378 = vpow2.f32 %v8532_v47  ;;  %v1954_v42 = vadd.f32 %v1912_v4, %v12150_v32 }
 0x6ae   : > { %10380 = vpow2.f32 %v8531_v22  ;;  %v1953_v9 = vadd.f32 %v1910_v26, %v12153_v37  ;;  %v9309_v27 = vpop.f32.mrb[38].mxu0 }
 0x6af   : > { %v8534_v38 = vmul.f32 -1.442695, %v1954_v42  ;;  %v12162_v39 = vadd.f32 %v9309_v27, %v12125_v45  ;;  %v1852_v51 = vpop.f32.mrb[39].mxu0 }
 0x6b0   : > { %v8533_v25 = vmul.f32 -1.442695, %v1953_v9  ;;  %v12165_v52 = vadd.f32 %v12125_v45, %v1852_v51 }
 0x6b1   : > { %10382 = vpow2.f32 %v8534_v38  ;;  %v1956_v34 = vadd.f32 %v1916_v30, %v12162_v39 }
 0x6b2   : > { %10384 = vpow2.f32 %v8533_v25  ;;  %v1955_v1 = vadd.f32 %v1914_v40, %v12165_v52  ;;  %v9312_v4 = vpop.f32.mrb[40].mxu0 }
 0x6b3   : > { %v10375_v24 = vpop.eup %10374  ;;  %v8536_v26 = vmul.f32 -1.442695, %v1956_v34  ;;  %v12170_v16 = vadd.f32 %v9312_v4, %v12125_v45  ;;  %v1862_v17 = vpop.f32.mrb[41].mxu0 }
 0x6b4   : > { %v10377_v50 = vpop.eup %10376  ;;  %v2014_v33 = vadd.f32 1.0, %v10375_v24  ;;  %v8535_v46 = vmul.f32 -1.442695, %v1955_v1  ;;  %v12173_v53 = vadd.f32 %v12125_v45, %v1862_v17  ;;  %v12188_v4 = vpop.permute.xlu0 %2071 }
 0x6b5   : > { %v2013_v30 = vadd.f32 1.0, %v10377_v50  ;;  %10386 = vpow2.f32 %v8536_v26  ;;  %v1958_v40 = vadd.f32 %v1920_v41, %v12170_v16 }
 0x6b6   : > { %10388 = vrcp.f32 %v2014_v33  ;;  %v1957_v60 = vadd.f32 %v1918_v19, %v12173_v53  ;;  %v9315_v54 = vpop.f32.mrb[42].mxu0  ;;  %v1930_v19 = vpop.permute.xlu1 %1929 }
 0x6b7   : > { %v10379_v35 = vpop.eup %10378  ;;  %10390 = vrcp.f32 %v2013_v30  ;;  %v8538_v47 = vmul.f32 -1.442695, %v1958_v40  ;;  %v12180_v31 = vadd.f32 %v9315_v54, %v12125_v45  ;;  %v1872_v22 = vpop.f32.mrb[43].mxu0 }
 0x6b8   : > { %v10381_v42 = vpop.eup %10380  ;;  %v2016_v9 = vadd.f32 1.0, %v10379_v35  ;;  %10392 = vpow2.f32 %v8535_v46  ;;  %v8537_v27 = vmul.f32 -1.442695, %v1957_v60  ;;  %v12183_v38 = vadd.f32 %v12125_v45, %v1872_v22 }
 0x6b9   : > { %v2015_v51 = vadd.f32 1.0, %v10381_v42  ;;  %10394 = vpow2.f32 %v8538_v47  ;;  %v1960_v41 = vadd.f32 %v1924_v8, %v12180_v31 }
 0x6ba   : > { %10396 = vrcp.f32 %v2016_v9  ;;  %v1959_v25 = vadd.f32 %v12127_v0, %v12183_v38  ;;  %v9318_v34 = vpop.f32.mrb[44].mxu0  ;;  %v1932_v9 = vpop.permute.xlu1 %1931 }
 0x6bb   : > { %v10383_v1 = vpop.eup %10382  ;;  %10398 = vrcp.f32 %v2015_v51  ;;  %v8540_v24 = vmul.f32 -1.442695, %v1960_v41  ;;  %v12191_v26 = vadd.f32 %v9318_v34, %v12125_v45  ;;  %v1882_v17 = vpop.f32.mrb[45].mxu0 }
 0x6bc   : > { %v10385_v50 = vpop.eup %10384  ;;  %v2018_v33 = vadd.f32 1.0, %v10383_v1  ;;  %10400 = vpow2.f32 %v8537_v27  ;;  %v8539_v46 = vmul.f32 -1.442695, %v1959_v25  ;;  %v12194_v8 = vadd.f32 %v12125_v45, %v1882_v17 }
 0x6bd   : > { %v2017_v30 = vadd.f32 1.0, %v10385_v50  ;;  %10402 = vpow2.f32 %v8540_v24  ;;  %v1962_v0 = vadd.f32 %v1928_v36, %v12191_v26 }
 0x6be   : > { %10404 = vrcp.f32 %v2018_v33  ;;  %v1961_v40 = vadd.f32 %v12156_v23, %v12194_v8  ;;  %v9321_v60 = vpop.f32.mrb[46].mxu0  ;;  %v2074_v23 = vpop.permute.xlu0 %2073 }
 0x6bf   : > { %v10387_v54 = vpop.eup %10386  ;;  %10406 = vrcp.f32 %v2017_v30  ;;  %v8542_v35 = vmul.f32 -1.442695, %v1962_v0  ;;  %v12200_v47 = vadd.f32 %v9321_v60, %v12125_v45  ;;  %v1892_v22 = vpop.f32.mrb[47].mxu0 }
 0x6c0   : > { %v12202_v42 = vpop.eup %10388  ;;  %v2020_v27 = vadd.f32 1.0, %v10387_v54  ;;  %10408 = vpow2.f32 %v8539_v46  ;;  %v8541_v51 = vmul.f32 -1.442695, %v1961_v40  ;;  %v12205_v36 = vadd.f32 %v12125_v45, %v1892_v22 }
 0x6c1   : > { %v12207_v41 = vpop.eup %10390  ;;  %10410 = vpow2.f32 %v8542_v35  ;;  %v1964_v25 = vadd.f32 %v1932_v9, %v12200_v47  ;;  %v2110_v34 = vmul.f32 %v12202_v42, %v12129_v29 }
 0x6c2   : > { %v10393_v1 = vpop.eup %10392  ;;  %10412 = vrcp.f32 %v2020_v27  ;;  %v1963_v24 = vadd.f32 %v1930_v19, %v12205_v36  ;;  %v2109_v17 = vmul.f32 %v12207_v41, %v12123_v55  ;;  %v2076_v54 = vpop.permute.xlu0 %2075 }
 0x6c3   : > { %v10395_v50 = vpop.eup %10394  ;;  %v2019_v33 = vadd.f32 1.0, %v10393_v1  ;;  %10414 = vpow2.f32 %v8541_v51  ;;  %v8544_v45 = vmul.f32 -1.442695, %v1964_v25  ;;  %2143 = vrot.lane.b32.xlu1 %v2110_v34, %s11187_s23 }
 0x6c4   : > { %v12216_v46 = vpop.eup %10396  ;;  %v2022_v30 = vadd.f32 1.0, %v10395_v50  ;;  %v8543_v0 = vmul.f32 -1.442695, %v1963_v24  ;;  %2141 = vrot.lane.b32.xlu0 %v2109_v17, %s11187_s23  ;;  %v2080_v24 = vpop.permute.xlu1 %2079 }
 0x6c5   : > { %v12219_v29 = vpop.eup %10398  ;;  %10416 = vrcp.f32 %v2019_v33  ;;  %v2112_v19 = vmul.f32 %v12216_v46, %v12159_v43 }
 0x6c6   : > { %v10401_v55 = vpop.eup %10400  ;;  %10418 = vrcp.f32 %v2022_v30  ;;  %v2111_v40 = vmul.f32 %v12219_v29, %v12145_v20  ;;  %v2078_v33 = vpop.permute.xlu0 %2077 }
 0x6c7   : > { %v10403_v60 = vpop.eup %10402  ;;  %v2021_v35 = vadd.f32 1.0, %v10401_v55  ;;  %10420 = vpow2.f32 %v8544_v45  ;;  %2147 = vrot.lane.b32.xlu1 %v2112_v19, %s11187_s23 }
 0x6c8   : > { %v12226_v22 = vpop.eup %10404  ;;  %v2024_v9 = vadd.f32 1.0, %v10403_v60  ;;  %10422 = vpow2.f32 %v8543_v0  ;;  %2145 = vrot.lane.b32.xlu0 %v2111_v40, %s11187_s23  ;;  %v2084_v60 = vpop.permute.xlu1 %2083 }
 0x6c9   : > { %v12229_v27 = vpop.eup %10406  ;;  %10424 = vrcp.f32 %v2021_v35  ;;  %v2114_v43 = vmul.f32 %v12226_v22, %v12188_v4 }
 0x6ca   : > { %v10409_v51 = vpop.eup %10408  ;;  %10426 = vrcp.f32 %v2024_v9  ;;  %v2113_v20 = vmul.f32 %v12229_v27, %v12175_v5  ;;  %v2082_v9 = vpop.permute.xlu0 %2081 }
 0x6cb   : > { %v10411_v25 = vpop.eup %10410  ;;  %v2023_v34 = vadd.f32 1.0, %v10409_v51  ;;  %2151 = vrot.lane.b32.xlu1 %v2114_v43, %s11187_s23 }
 0x6cc   : > { %v12236_v1 = vpop.eup %10412  ;;  %v2026_v17 = vadd.f32 1.0, %v10411_v25  ;;  %2149 = vrot.lane.b32.xlu0 %v2113_v20, %s11187_s23 }
 0x6cd   : > { %v10415_v50 = vpop.eup %10414  ;;  %10428 = vrcp.f32 %v2023_v34  ;;  %v2116_v4 = vmul.f32 %v12236_v1, %v2076_v54 }
 0x6ce   : > { %10430 = vrcp.f32 %v2026_v17  ;;  %v2025_v45 = vadd.f32 1.0, %v10415_v50  ;;  %v2086_v50 = vpop.permute.xlu0 %2085 }
 0x6cf   : > { %v12240_v30 = vpop.eup %10416  ;;  %2155 = vrot.lane.b32.xlu1 %v2116_v4, %s11187_s23 }
 0x6d0   : > { %v12243_v5 = vpop.eup %10418  ;;  %10432 = vrcp.f32 %v2025_v45  ;;  %v2115_v0 = vmul.f32 %v12240_v30, %v2074_v23 }
 0x6d1   : > { %v10421_v19 = vpop.eup %10420  ;;  %v2118_v55 = vmul.f32 %v12243_v5, %v2080_v24  ;;  %v2088_v24 = vpop.permute.xlu1 %2087 }
 0x6d2   : > { %v10423_v40 = vpop.eup %10422  ;;  %v2028_v35 = vadd.f32 1.0, %v10421_v19  ;;  %2153 = vrot.lane.b32.xlu0 %v2115_v0, %s11187_s23 }
 0x6d3   : > { %v12248_v54 = vpop.eup %10424  ;;  %v2027_v43 = vadd.f32 1.0, %v10423_v40  ;;  %2159 = vrot.lane.b32.xlu1 %v2118_v55, %s11187_s23  ;;  %v2090_v40 = vpop.permute.xlu0 %2089 }
 0x6d4   : > { %v12251_v51 = vpop.eup %10426  ;;  %10434 = vrcp.f32 %v2028_v35  ;;  %v2117_v20 = vmul.f32 %v12248_v54, %v2078_v33 }
 0x6d5   : > { %10436 = vrcp.f32 %v2027_v43  ;;  %v2120_v23 = vmul.f32 %v12251_v51, %v2084_v60  ;;  %v2092_v19 = vpop.permute.xlu1 %2091 }
 0x6d6   : > { %2157 = vrot.lane.b32.xlu0 %v2117_v20, %s11187_s23 }
 0x6d7   : > { %v12256_v25 = vpop.eup %10428  ;;  %2163 = vrot.lane.b32.xlu1 %v2120_v23, %s11187_s23 }
 0x6d8   : > { %v12259_v34 = vpop.eup %10430  ;;  %v2119_v17 = vmul.f32 %v12256_v25, %v2082_v9 }
 0x6d9   : > { %v2122_v4 = vmul.f32 %v12259_v34, %v2088_v24 }
 0x6da   : > { %v12263_v45 = vpop.eup %10432  ;;  %2161 = vrot.lane.b32.xlu0 %v2119_v17, %s11187_s23 }
 0x6db   : > { %2167 = vrot.lane.b32.xlu1 %v2122_v4, %s11187_s23  ;;  %v2121_v33 = vmul.f32 %v12263_v45, %v2086_v50 }
 0x6de   : > { %v12268_v0 = vpop.eup %10434  ;;  %2165 = vrot.lane.b32.xlu0 %v2121_v33, %s11187_s23 }
 0x6df   : > { %v12271_v55 = vpop.eup %10436  ;;  %v2124_v60 = vmul.f32 %v12268_v0, %v2092_v19 }
 0x6e0   : > { %v2123_v35 = vmul.f32 %v12271_v55, %v2090_v40 }
 0x6e1   : > { %2171 = vrot.lane.b32.xlu1 %v2124_v60, %s11187_s23 }
 0x6e2   : > { %2169 = vrot.lane.b32.xlu0 %v2123_v35, %s11187_s23 }
 0x6e5   : > { %2317 = vrot.lane.b32.xlu1 %v11529_v44, %s11186_s22 }
 0x6e9   : > { %2319 = vrot.lane.b32.xlu1 %v11535_v48, %s11186_s22 }
 0x6ed   : > { %2321 = vrot.lane.b32.xlu1 %v11539_v49, %s11186_s22 }
 0x6f1   : > { %2323 = vrot.lane.b32.xlu1 %v11547_v56, %s11186_s22 }
 0x6f5   : > { %2325 = vrot.lane.b32.xlu1 %v11551_v57, %s11186_s22 }
 0x6f9   : > { %2327 = vrot.lane.b32.xlu1 %v11559_v62, %s11186_s22 }
 0x6fd   : > { %2329 = vrot.lane.b32.xlu1 %v11563_v63, %s11186_s22 }
 0x701   : > { %2331 = vrot.lane.b32.xlu1 %v11571_v2, %s11186_s22 }
 0x705   : > { %2333 = vrot.lane.b32.xlu1 %v11575_v3, %s11186_s22 }
 0x709   : > { %2335 = vrot.lane.b32.xlu1 %v11583_v6, %s11186_s22 }
 0x70d   : > { %2337 = vrot.lane.b32.xlu1 %v11587_v7, %s11186_s22 }
 0x711   : > { %2339 = vrot.lane.b32.xlu1 %v11595_v10, %s11186_s22 }
 0x715   : > { %2341 = vrot.lane.b32.xlu1 %v11599_v11, %s11186_s22 }
 0x719   : > { %2343 = vrot.lane.b32.xlu1 %v11606_v13, %s11186_s22 }
 0x71d   : > { %2345 = vrot.lane.b32.xlu1 %v11610_v14, %s11186_s22 }
 0x721   : > { %2347 = vrot.lane.b32.xlu1 %v11616_v15, %s11186_s22 }
 0x735   : > { %v2144_v44 = vpop.permute.xlu1 %2143 }
 0x736   : > { %v2142_v48 = vpop.permute.xlu0 %2141  ;;  %v2190_v56 = vadd.f32 %v2144_v44, %v12132_v12 }
 0x737   : > { %v2189_v49 = vadd.f32 %v2142_v48, %v12135_v28 }
 0x739   : > { %10438 = vtanh.f32 %v2189_v49  ;;  %v2148_v63 = vpop.permute.xlu1 %2147 }
 0x73a   : > { %v2146_v57 = vpop.permute.xlu0 %2145  ;;  %10440 = vtanh.f32 %v2190_v56  ;;  %v2192_v2 = vadd.f32 %v2148_v63, %v12140_v59  ;;  %v2399_v56 = vld [vmem:[#allocation7 + $0x48] sm:$0xff] }
 0x73b   : > { %v2191_v62 = vadd.f32 %v2146_v57, %v12143_v61  ;;  %v2401_v57 = vld [vmem:[#allocation7 + $0x58] sm:$0xff] }
 0x73c   : > { %v9890_v63 = vpack.c.bf16 %v2401_v57, %v2399_v56 }
 0x73d   : > { %10442 = vtanh.f32 %v2191_v62  ;;  %v2152_v10 = vpop.permute.xlu1 %2151  ;;  %v2398_v62 = vld [vmem:[#allocation7 + $0x40] sm:$0xff] }
 0x73e   : > { %v2150_v3 = vpop.permute.xlu0 %2149  ;;  %10444 = vtanh.f32 %v2192_v2  ;;  %v2194_v13 = vadd.f32 %v2152_v10, %v12150_v32  ;;  %v2400_v2 = vld [vmem:[#allocation7 + $0x50] sm:$0xff]  ;;  %v2402_v10 = vld [vmem:[#allocation7 + $0x60] sm:$0xff]  ;;  %9891 = vmatprep.subr.bf16.mxu1 %v9890_v63 }
 0x73f   : > { %v2193_v7 = vadd.f32 %v2150_v3, %v12153_v37  ;;  %v2405_v3 = vld [vmem:[#allocation7 + $0x78] sm:$0xff] }
 0x741   : > { %10446 = vtanh.f32 %v2193_v7  ;;  %v2156_v28 = vpop.permute.xlu1 %2155 }
 0x742   : > { %10448 = vtanh.f32 %v2194_v13  ;;  %v2196_v61 = vadd.f32 %v2156_v28, %v12162_v39 }
 0x743   : > { %v10439_v6 = vpop.eup %10438 }
 0x744   : > { %2253 = vrot.lane.b32.xlu0 %v10439_v6, %s11185_s20  ;;  %v10441_v11 = vpop.eup %10440  ;;  %v2154_v14 = vpop.permute.xlu0 %2153  ;;  %v9892_v6 = vpack.c.bf16 %v2400_v2, %v2398_v62 }
 0x745   : > { %v2195_v12 = vadd.f32 %v2154_v14, %v12165_v52  ;;  %v2160_v43 = vpop.permute.xlu1 %2159 }
 0x746   : > { %v2198_v52 = vadd.f32 %v2160_v43, %v12170_v16  ;;  %9893 = vmatpush1.bf16.msra.mxu1 %v9892_v6 }
 0x747   : > { %v10443_v15 = vpop.eup %10442  ;;  %10450 = vtanh.f32 %v2195_v12 }
 0x748   : > { %2255 = vrot.lane.b32.xlu0 %v10441_v11, %s11185_s20  ;;  %v10445_v59 = vpop.eup %10444  ;;  %v2158_v37 = vpop.permute.xlu0 %2157  ;;  %10452 = vtanh.f32 %v2196_v61  ;;  %v2404_v11 = vld [vmem:[#allocation7 + $0x70] sm:$0xff] }
 0x749   : > { %v2197_v32 = vadd.f32 %v2158_v37, %v12173_v53  ;;  %v2164_v17 = vpop.permute.xlu1 %2163  ;;  %v9896_v13 = vpack.c.bf16 %v2404_v11, %v2402_v10 }
 0x74a   : > { %v2200_v53 = vadd.f32 %v2164_v17, %v12180_v31 }
 0x74b   : > { %v10447_v9 = vpop.eup %10446  ;;  %10454 = vtanh.f32 %v2197_v32 }
 0x74c   : > { %2257 = vrot.lane.b32.xlu0 %v10443_v15, %s11185_s20  ;;  %v10449_v20 = vpop.eup %10448  ;;  %v2162_v23 = vpop.permute.xlu0 %2161  ;;  %10456 = vtanh.f32 %v2198_v52 }
 0x74d   : > { %v2199_v39 = vadd.f32 %v2162_v23, %v12183_v38  ;;  %v2168_v19 = vpop.permute.xlu1 %2167  ;;  %v2222_v23 = vsub.f32 1.0, %v12202_v42 }
 0x74e   : > { %v2202_v38 = vadd.f32 %v2168_v19, %v12191_v26 }
 0x74f   : > { %10458 = vtanh.f32 %v2199_v39 }
 0x750   : > { %2259 = vrot.lane.b32.xlu0 %v10445_v59, %s11185_s20  ;;  %v2166_v4 = vpop.permute.xlu0 %2165  ;;  %10460 = vtanh.f32 %v2200_v53 }
 0x751   : > { %v10451_v24 = vpop.eup %10450  ;;  %v2201_v16 = vadd.f32 %v2166_v4, %v12194_v8  ;;  %v2223_v4 = vsub.f32 1.0, %v12219_v29 }
 0x752   : > { %v10453_v50 = vpop.eup %10452 }
 0x753   : > { %10462 = vtanh.f32 %v2201_v16  ;;  %v2172_v44 = vpop.permute.xlu1 %2171 }
 0x754   : > { %2261 = vrot.lane.b32.xlu0 %v10447_v9, %s11185_s20  ;;  %v2170_v60 = vpop.permute.xlu0 %2169  ;;  %10464 = vtanh.f32 %v2202_v38  ;;  %v2204_v8 = vadd.f32 %v2172_v44, %v12200_v47  ;;  %v2221_v9 = vsub.f32 1.0, %v12207_v41 }
 0x755   : > { %v10455_v33 = vpop.eup %10454  ;;  %v2203_v31 = vadd.f32 %v2170_v60, %v12205_v36  ;;  %v2403_v36 = vld [vmem:[#allocation7 + $0x68] sm:$0xff] }
 0x756   : > { %v10457_v40 = vpop.eup %10456  ;;  %v9894_v7 = vpack.c.bf16 %v2405_v3, %v2403_v36 }
 0x757   : > { %10466 = vtanh.f32 %v2203_v31  ;;  %v2318_v15 = vpop.permute.xlu1 %2317 }
 0x758   : > { %2263 = vrot.lane.b32.xlu0 %v10449_v20, %s11185_s20  ;;  %10468 = vtanh.f32 %v2204_v8  ;;  %9895 = vmatprep.subr.bf16.mxu1 %v9894_v7  ;;  %v2365_v43 = vmul.f32 %v12207_v41, %v2318_v15 }
 0x759   : > { %v10459_v35 = vpop.eup %10458  ;;  %9897 = vmatpush1.bf16.msra.mxu1 %v9896_v13 }
 0x75a   : > { %v10461_v48 = vpop.eup %10460 }
 0x75b   : > { %v2320_v12 = vpop.permute.xlu1 %2319 }
 0x75c   : > { %2265 = vrot.lane.b32.xlu0 %v10451_v24, %s11185_s20  ;;  %v2366_v17 = vmul.f32 %v12202_v42, %v2320_v12  ;;  %v2224_v42 = vsub.f32 1.0, %v12216_v46 }
 0x75d   : > { %v10463_v49 = vpop.eup %10462 }
 0x75e   : > { %v10465_v26 = vpop.eup %10464 }
 0x75f   : > { %v2322_v28 = vpop.permute.xlu1 %2321 }
 0x760   : > { %2267 = vrot.lane.b32.xlu0 %v10453_v50, %s11185_s20  ;;  %v2367_v41 = vmul.f32 %v12219_v29, %v2322_v28  ;;  %v2225_v29 = vsub.f32 1.0, %v12229_v27 }
 0x761   : > { %v10467_v47 = vpop.eup %10466 }
 0x762   : > { %v10469_v14 = vpop.eup %10468 }
 0x763   : > { %v2324_v59 = vpop.permute.xlu1 %2323 }
 0x764   : > { %2269 = vrot.lane.b32.xlu0 %v10455_v33, %s11185_s20  ;;  %v2368_v60 = vmul.f32 %v12216_v46, %v2324_v59  ;;  %v2226_v46 = vsub.f32 1.0, %v12226_v22 }
 0x767   : > { %v2326_v61 = vpop.permute.xlu1 %2325 }
 0x768   : > { %2271 = vrot.lane.b32.xlu0 %v10457_v40, %s11185_s20  ;;  %v2369_v8 = vmul.f32 %v12229_v27, %v2326_v61  ;;  %v2227_v27 = vsub.f32 1.0, %v12240_v30 }
 0x76b   : > { %v2328_v37 = vpop.permute.xlu1 %2327 }
 0x76c   : > { %2273 = vrot.lane.b32.xlu0 %v10459_v35, %s11185_s20  ;;  %v2370_v57 = vmul.f32 %v12226_v22, %v2328_v37  ;;  %v2228_v22 = vsub.f32 1.0, %v12236_v1 }
 0x76f   : > { %v2330_v24 = vpop.permute.xlu1 %2329 }
 0x770   : > { %2275 = vrot.lane.b32.xlu0 %v10461_v48, %s11185_s20  ;;  %v2371_v3 = vmul.f32 %v12240_v30, %v2330_v24  ;;  %v2229_v30 = vsub.f32 1.0, %v12248_v54 }
 0x773   : > { %v2332_v19 = vpop.permute.xlu1 %2331 }
 0x774   : > { %2277 = vrot.lane.b32.xlu0 %v10463_v49, %s11185_s20 }
 0x777   : > { %v2334_v44 = vpop.permute.xlu1 %2333 }
 0x778   : > { %2279 = vrot.lane.b32.xlu0 %v10465_v26, %s11185_s20  ;;  %v2373_v12 = vmul.f32 %v12248_v54, %v2334_v44  ;;  %v2231_v54 = vsub.f32 1.0, %v12256_v25 }
 0x77b   : > { %v2336_v63 = vpop.permute.xlu1 %2335 }
 0x77c   : > { %2281 = vrot.lane.b32.xlu0 %v10467_v47, %s11185_s20  ;;  %v2372_v47 = vmul.f32 %v12236_v1, %v2332_v19  ;;  %v2230_v1 = vsub.f32 1.0, %v12243_v5 }
 0x77f   : > { %v2338_v10 = vpop.permute.xlu1 %2337 }
 0x780   : > { %2283 = vrot.lane.b32.xlu0 %v10469_v14, %s11185_s20  ;;  %v2375_v24 = vmul.f32 %v12256_v25, %v2338_v10  ;;  %v2233_v25 = vsub.f32 1.0, %v12263_v45 }
 0x783   : > { %v2340_v59 = vpop.permute.xlu1 %2339 }
 0x7b6   : > { %v2254_v32 = vpop.permute.xlu0 %2253 }
 0x7b7   : > { %v2301_v20 = vmul.f32 %v2254_v32, %v2221_v9  ;;  %v2374_v9 = vmul.f32 %v12243_v5, %v2336_v63  ;;  %v2232_v5 = vsub.f32 1.0, %v12251_v51 }
 0x7b9   : > { %v12343_v52 = vadd.f32 %v2365_v43, %v2301_v20  ;;  %v2342_v20 = vpop.permute.xlu1 %2341 }
 0x7ba   : > { %v2256_v39 = vpop.permute.xlu0 %2255 }
 0x7bb   : > { %v2302_v50 = vmul.f32 %v2256_v39, %v2222_v23  ;;  %2435 = vrot.lane.b32.xlu0 %v12343_v52, %s11185_s20 }
 0x7bd   : > { %v12349_v53 = vadd.f32 %v2366_v17, %v2302_v50 }
 0x7be   : > { %v2258_v33 = vpop.permute.xlu0 %2257 }
 0x7bf   : > { %v2303_v16 = vmul.f32 %v2258_v33, %v2223_v4  ;;  %2437 = vrot.lane.b32.xlu1 %v12349_v53, %s11185_s20  ;;  %v2376_v4 = vmul.f32 %v12251_v51, %v2340_v59  ;;  %v2234_v51 = vsub.f32 1.0, %v12259_v34 }
 0x7c1   : > { %v12355_v40 = vadd.f32 %v2367_v41, %v2303_v16  ;;  %v2344_v41 = vpop.permute.xlu1 %2343 }
 0x7c2   : > { %v2260_v38 = vpop.permute.xlu0 %2259  ;;  %v2378_v44 = vmul.f32 %v12259_v34, %v2344_v41  ;;  %v2236_v34 = vsub.f32 1.0, %v12268_v0 }
 0x7c3   : > { %v2304_v35 = vmul.f32 %v2260_v38, %v2224_v42  ;;  %2439 = vrot.lane.b32.xlu0 %v12355_v40, %s11185_s20  ;;  %v2377_v42 = vmul.f32 %v12263_v45, %v2342_v20  ;;  %v2235_v45 = vsub.f32 1.0, %v12271_v55 }
 0x7c5   : > { %v12361_v31 = vadd.f32 %v2368_v60, %v2304_v35  ;;  %v2346_v35 = vpop.permute.xlu1 %2345 }
 0x7c6   : > { %v2262_v48 = vpop.permute.xlu0 %2261 }
 0x7c7   : > { %v2305_v49 = vmul.f32 %v2262_v48, %v2225_v29  ;;  %2441 = vrot.lane.b32.xlu1 %v12361_v31, %s11185_s20 }
 0x7c9   : > { %v12367_v26 = vadd.f32 %v2369_v8, %v2305_v49 }
 0x7ca   : > { %v2264_v56 = vpop.permute.xlu0 %2263 }
 0x7cb   : > { %v2306_v62 = vmul.f32 %v2264_v56, %v2226_v46  ;;  %2443 = vrot.lane.b32.xlu0 %v12367_v26, %s11185_s20  ;;  %v2379_v46 = vmul.f32 %v12271_v55, %v2346_v35 }
 0x7cd   : > { %v12373_v2 = vadd.f32 %v2370_v57, %v2306_v62  ;;  %v2348_v57 = vpop.permute.xlu1 %2347 }
 0x7ce   : > { %v2266_v36 = vpop.permute.xlu0 %2265 }
 0x7cf   : > { %v2307_v6 = vmul.f32 %v2266_v36, %v2227_v27  ;;  %2445 = vrot.lane.b32.xlu1 %v12373_v2, %s11185_s20  ;;  %v2380_v27 = vmul.f32 %v12268_v0, %v2348_v57 }
 0x7d1   : > { %v12379_v7 = vadd.f32 %v2371_v3, %v2307_v6 }
 0x7d2   : > { %v2268_v11 = vpop.permute.xlu0 %2267 }
 0x7d3   : > { %v2308_v13 = vmul.f32 %v2268_v11, %v2228_v22  ;;  %2447 = vrot.lane.b32.xlu0 %v12379_v7, %s11185_s20 }
 0x7d5   : > { %v12385_v14 = vadd.f32 %v2372_v47, %v2308_v13 }
 0x7d6   : > { %v2270_v15 = vpop.permute.xlu0 %2269 }
 0x7d7   : > { %v2309_v28 = vmul.f32 %v2270_v15, %v2229_v30  ;;  %2449 = vrot.lane.b32.xlu1 %v12385_v14, %s11185_s20 }
 0x7d9   : > { %v12391_v61 = vadd.f32 %v2373_v12, %v2309_v28 }
 0x7da   : > { %v2272_v37 = vpop.permute.xlu0 %2271 }
 0x7db   : > { %v2310_v32 = vmul.f32 %v2272_v37, %v2230_v1  ;;  %2451 = vrot.lane.b32.xlu0 %v12391_v61, %s11185_s20 }
 0x7dd   : > { %v12397_v43 = vadd.f32 %v2374_v9, %v2310_v32  ;;  %v2407_v32 = vld [vmem:[#allocation8 + $0x2] sm:$0x3] }
 0x7de   : > { %v2274_v23 = vpop.permute.xlu0 %2273 }
 0x7df   : > { %v2311_v39 = vmul.f32 %v2274_v23, %v2231_v54  ;;  %2453 = vrot.lane.b32.xlu1 %v12397_v43, %s11185_s20  ;;  %v12469_v54 = vrot.slane %v2407_v32, %v11620_v18 }
 0x7e1   : > { %v12403_v17 = vadd.f32 %v2375_v24, %v2311_v39  ;;  %v12475_v39 = vrot.slane %v2407_v32, %v11625_v21 }
 0x7e2   : > { %v2276_v50 = vpop.permute.xlu0 %2275 }
 0x7e3   : > { %v2312_v33 = vmul.f32 %v2276_v50, %v2232_v5  ;;  %2455 = vrot.lane.b32.xlu0 %v12403_v17, %s11185_s20 }
 0x7e5   : > { %v12409_v16 = vadd.f32 %v2376_v4, %v2312_v33 }
 0x7e6   : > { %v2278_v19 = vpop.permute.xlu0 %2277 }
 0x7e7   : > { %v2313_v38 = vmul.f32 %v2278_v19, %v2233_v25  ;;  %2457 = vrot.lane.b32.xlu1 %v12409_v16, %s11185_s20 }
 0x7e9   : > { %v12415_v60 = vadd.f32 %v2377_v42, %v2313_v38 }
 0x7ea   : > { %v2280_v29 = vpop.permute.xlu0 %2279 }
 0x7eb   : > { %v2314_v48 = vmul.f32 %v2280_v29, %v2234_v51  ;;  %2459 = vrot.lane.b32.xlu0 %v12415_v60, %s11185_s20 }
 0x7ed   : > { %v12421_v8 = vadd.f32 %v2378_v44, %v2314_v48 }
 0x7ee   : > { %v2282_v49 = vpop.permute.xlu0 %2281 }
 0x7ef   : > { %v2315_v56 = vmul.f32 %v2282_v49, %v2235_v45  ;;  %2461 = vrot.lane.b32.xlu1 %v12421_v8, %s11185_s20 }
 0x7f1   : > { %v12427_v62 = vadd.f32 %v2379_v46, %v2315_v56 }
 0x7f2   : > { %v2284_v63 = vpop.permute.xlu0 %2283 }
 0x7f3   : > { %v2316_v36 = vmul.f32 %v2284_v63, %v2236_v34  ;;  %2463 = vrot.lane.b32.xlu0 %v12427_v62, %s11185_s20 }
 0x7f5   : > { %v12433_v3 = vadd.f32 %v2380_v27, %v2316_v36 }
 0x7f7   : > { %2465 = vrot.lane.b32.xlu1 %v12433_v3, %s11185_s20 }
 0x82d   : > { %v2436_v55 = vpop.permute.xlu0 %2435 }
 0x82e   : > { %8545 = vmatmul.mubr.msk.f32.vlgmr.msra.gmra.mrb[48].mxu1 %vm941_vm2, %v2436_v55 }
 0x82f   : > { %2569 = vmatprep.mubr.f32.mxu1 %v14153_v58 }
 0x831   : > { %v2438_v6 = vpop.permute.xlu1 %2437 }
 0x832   : > { %8546 = vmatmul.mubr.msk.f32.gmra.mrb[50].mxu1 %vm941_vm2, %v2438_v6 }
 0x833   : > { %2575 = vmatprep.mubr.f32.mxu1 %v14153_v58 }
 0x835   : > { %v2440_v0 = vpop.permute.xlu0 %2439 }
 0x836   : > { %8547 = vmatmul.mubr.msk.f32.gmra.mrb[52].mxu1 %vm941_vm2, %v2440_v0 }
 0x837   : > { %2581 = vmatprep.mubr.f32.mxu1 %v14153_v58 }
 0x839   : > { %v2442_v22 = vpop.permute.xlu1 %2441 }
 0x83a   : > { %8548 = vmatmul.mubr.msk.f32.gmra.mrb[54].mxu1 %vm941_vm2, %v2442_v22 }
 0x83b   : > { %2587 = vmatprep.mubr.f32.mxu1 %v14153_v58 }
 0x83d   : > { %v2444_v10 = vpop.permute.xlu0 %2443 }
 0x83e   : > { %8549 = vmatmul.mubr.msk.f32.gmra.mrb[56].mxu1 %vm941_vm2, %v2444_v10 }
 0x83f   : > { %2593 = vmatprep.mubr.f32.mxu1 %v14153_v58 }
 0x841   : > { %v2446_v11 = vpop.permute.xlu1 %2445 }
 0x842   : > { %8550 = vmatmul.mubr.msk.f32.gmra.mrb[58].mxu1 %vm941_vm2, %v2446_v11 }
 0x843   : > { %2599 = vmatprep.mubr.f32.mxu1 %v14153_v58 }
 0x845   : > { %v2448_v47 = vpop.permute.xlu0 %2447 }
 0x846   : > { %8551 = vmatmul.mubr.msk.f32.gmra.mrb[60].mxu1 %vm941_vm2, %v2448_v47 }
 0x847   : > { %2605 = vmatprep.mubr.f32.mxu1 %v14153_v58 }
 0x849   : > { %v2450_v13 = vpop.permute.xlu1 %2449 }
 0x84a   : > { %8552 = vmatmul.mubr.msk.f32.gmra.mrb[62].mxu1 %vm941_vm2, %v2450_v13 }
 0x84b   : > { %2611 = vmatprep.mubr.f32.mxu1 %v14153_v58 }
 0x84d   : > { %v2452_v30 = vpop.permute.xlu0 %2451 }
 0x84e   : > { %8553 = vmatmul.mubr.msk.f32.gmra.mrb[64].mxu1 %vm941_vm2, %v2452_v30 }
 0x84f   : > { %2617 = vmatprep.mubr.f32.mxu1 %v14153_v58 }
 0x851   : > { %v2454_v15 = vpop.permute.xlu1 %2453 }
 0x852   : > { %8554 = vmatmul.mubr.msk.f32.gmra.mrb[66].mxu1 %vm941_vm2, %v2454_v15 }
 0x853   : > { %2623 = vmatprep.mubr.f32.mxu1 %v14153_v58 }
 0x855   : > { %v2456_v12 = vpop.permute.xlu0 %2455 }
 0x856   : > { %8555 = vmatmul.mubr.msk.f32.gmra.mrb[68].mxu1 %vm941_vm2, %v2456_v12 }
 0x857   : > { %2629 = vmatprep.mubr.f32.mxu1 %v14153_v58 }
 0x859   : > { %v2458_v28 = vpop.permute.xlu1 %2457 }
 0x85a   : > { %8556 = vmatmul.mubr.msk.f32.gmra.mrb[70].mxu1 %vm941_vm2, %v2458_v28 }
 0x85b   : > { %2635 = vmatprep.mubr.f32.mxu1 %v14153_v58 }
 0x85d   : > { %v2460_v59 = vpop.permute.xlu0 %2459 }
 0x85e   : > { %8557 = vmatmul.mubr.msk.f32.gmra.mrb[72].mxu1 %vm941_vm2, %v2460_v59 }
 0x85f   : > { %2641 = vmatprep.mubr.f32.mxu1 %v14153_v58 }
 0x861   : > { %v2462_v1 = vpop.permute.xlu1 %2461 }
 0x862   : > { %8558 = vmatmul.mubr.msk.f32.gmra.mrb[74].mxu1 %vm941_vm2, %v2462_v1 }
 0x863   : > { %2647 = vmatprep.mubr.f32.mxu1 %v14153_v58 }
 0x865   : > { %v2464_v37 = vpop.permute.xlu0 %2463 }
 0x866   : > { %8559 = vmatmul.mubr.msk.f32.gmra.mrb[76].mxu1 %vm941_vm2, %v2464_v37 }
 0x867   : > { %2653 = vmatprep.mubr.f32.mxu1 %v14153_v58 }
 0x869   : > { %v2466_v9 = vpop.permute.xlu1 %2465 }
 0x86a   : > { %8560 = vmatmul.mubr.msk.f32.gmra.mrb[78].mxu1 %vm941_vm2, %v2466_v9 }
 0x901   : > { %v2565_v20 = vpop.f32.mrb[48].mxu1 }
 0x902   : > { %v12472_v23 = vadd.f32 %v2565_v20, %v12469_v54  ;;  %v2567_v24 = vpop.f32.mrb[49].mxu1 }
 0x903   : > { %v2568_v33 = vadd.f32 %v2567_v24, %v12475_v39 }
 0x904   : > { %9354 = vmatprep.mubr.msk.f32.mxu0 %vm941_vm2, %v12472_v23 }
 0x905   : > { %v2571_v5 = vpop.f32.mrb[50].mxu1 }
 0x906   : > { %v12480_v50 = vadd.f32 %v2571_v5, %v12469_v54  ;;  %v2573_v4 = vpop.f32.mrb[51].mxu1 }
 0x907   : > { %v2574_v41 = vadd.f32 %v2573_v4, %v12475_v39 }
 0x908   : > { %v9898_v25 = vpack.c.bf16 %v12480_v50, %v12472_v23 }
 0x909   : > { %v9946_v19 = vpack.c.bf16 %v2574_v41, %v2568_v33  ;;  %v2577_v42 = vpop.f32.mrb[52].mxu1 }
 0x90a   : > { %v2579_v38 = vpop.f32.mrb[53].mxu1  ;;  %9900 = vmatprep.subr.msk.bf16.mxu0 %vm11642_vm3, %v9898_v25  ;;  %v12491_v29 = vadd.f32 %v2577_v42, %v12469_v54 }
 0x90b   : > { %9903 = vmatpush3.bf16.xpose.msk.msra.mxu0 %vm11642_vm3, %v9898_v25  ;;  %9947 = vmatprep.subr.bf16.mxu1 %v9946_v19  ;;  %v2580_v45 = vadd.f32 %v2579_v38, %v12475_v39 }
 0x90c   : > { %9949 = vmatpush3.bf16.msra.mxu1 %v9946_v19 }
 0x90d   : > { %v2583_v35 = vpop.f32.mrb[54].mxu1 }
 0x90e   : > { %v12494_v44 = vadd.f32 %v2583_v35, %v12469_v54  ;;  %v2585_v48 = vpop.f32.mrb[55].mxu1 }
 0x90f   : > { %v2586_v49 = vadd.f32 %v2585_v48, %v12475_v39 }
 0x910   : > { %v9904_v46 = vpack.c.bf16 %v12494_v44, %v12491_v29 }
 0x911   : > { %v9950_v56 = vpack.c.bf16 %v2586_v49, %v2580_v45  ;;  %v2589_v57 = vpop.f32.mrb[56].mxu1 }
 0x912   : > { %v2591_v34 = vpop.f32.mrb[57].mxu1  ;;  %9906 = vmatprep.subr.msk.bf16.mxu0 %vm11642_vm3, %v9904_v46  ;;  %v12505_v27 = vadd.f32 %v2589_v57, %v12469_v54 }
 0x913   : > { %9909 = vmatpush3.bf16.xpose.msk.msra.mxu0 %vm11642_vm3, %v9904_v46  ;;  %9951 = vmatprep.subr.bf16.mxu1 %v9950_v56  ;;  %v2592_v6 = vadd.f32 %v2591_v34, %v12475_v39 }
 0x914   : > { %9953 = vmatpush3.bf16.msra.mxu1 %v9950_v56 }
 0x915   : > { %v2595_v63 = vpop.f32.mrb[58].mxu1 }
 0x916   : > { %v12508_v36 = vadd.f32 %v2595_v63, %v12469_v54  ;;  %v2597_v55 = vpop.f32.mrb[59].mxu1 }
 0x917   : > { %v2598_v0 = vadd.f32 %v2597_v55, %v12475_v39 }
 0x918   : > { %v9910_v22 = vpack.c.bf16 %v12508_v36, %v12505_v27 }
 0x919   : > { %v9954_v10 = vpack.c.bf16 %v2598_v0, %v2592_v6  ;;  %v2601_v11 = vpop.f32.mrb[60].mxu1 }
 0x91a   : > { %v2603_v47 = vpop.f32.mrb[61].mxu1  ;;  %9912 = vmatprep.subr.msk.bf16.mxu0 %vm11642_vm3, %v9910_v22  ;;  %v12519_v30 = vadd.f32 %v2601_v11, %v12469_v54 }
 0x91b   : > { %9915 = vmatpush3.bf16.xpose.msk.msra.mxu0 %vm11642_vm3, %v9910_v22  ;;  %9955 = vmatprep.subr.bf16.mxu1 %v9954_v10  ;;  %v2604_v28 = vadd.f32 %v2603_v47, %v12475_v39 }
 0x91c   : > { %9957 = vmatpush3.bf16.msra.mxu1 %v9954_v10 }
 0x91d   : > { %v2607_v13 = vpop.f32.mrb[62].mxu1 }
 0x91e   : > { %v12522_v15 = vadd.f32 %v2607_v13, %v12469_v54  ;;  %v2609_v12 = vpop.f32.mrb[63].mxu1 }
 0x91f   : > { %v2610_v59 = vadd.f32 %v2609_v12, %v12475_v39 }
 0x920   : > { %v9916_v1 = vpack.c.bf16 %v12522_v15, %v12519_v30 }
 0x921   : > { %v9958_v37 = vpack.c.bf16 %v2610_v59, %v2604_v28  ;;  %v2613_v9 = vpop.f32.mrb[64].mxu1 }
 0x922   : > { %v2615_v32 = vpop.f32.mrb[65].mxu1  ;;  %9918 = vmatprep.subr.msk.bf16.mxu0 %vm11642_vm3, %v9916_v1  ;;  %v12533_v24 = vadd.f32 %v2613_v9, %v12469_v54 }
 0x923   : > { %9921 = vmatpush3.bf16.xpose.msk.msra.mxu0 %vm11642_vm3, %v9916_v1  ;;  %9959 = vmatprep.subr.bf16.mxu1 %v9958_v37  ;;  %v2616_v33 = vadd.f32 %v2615_v32, %v12475_v39 }
 0x924   : > { %9961 = vmatpush3.bf16.msra.mxu1 %v9958_v37 }
 0x925   : > { %v2619_v20 = vpop.f32.mrb[66].mxu1 }
 0x926   : > { %v12536_v5 = vadd.f32 %v2619_v20, %v12469_v54  ;;  %v2621_v4 = vpop.f32.mrb[67].mxu1 }
 0x927   : > { %v2622_v41 = vadd.f32 %v2621_v4, %v12475_v39 }
 0x928   : > { %v9922_v25 = vpack.c.bf16 %v12536_v5, %v12533_v24 }
 0x929   : > { %v9962_v19 = vpack.c.bf16 %v2622_v41, %v2616_v33  ;;  %v2625_v42 = vpop.f32.mrb[68].mxu1 }
 0x92a   : > { %v2627_v38 = vpop.f32.mrb[69].mxu1  ;;  %9924 = vmatprep.subr.msk.bf16.mxu0 %vm11642_vm3, %v9922_v25  ;;  %v12547_v48 = vadd.f32 %v2625_v42, %v12469_v54  ;;  %v10926_v42 = vld [vmem:[%s11788_s19 + $0x8] sm:$0xff] }
 0x92b   : > { %9927 = vmatpush3.bf16.xpose.msk.msra.mxu0 %vm11642_vm3, %v9922_v25  ;;  %9963 = vmatprep.subr.bf16.mxu1 %v9962_v19  ;;  %v2628_v46 = vadd.f32 %v2627_v38, %v12475_v39 }
 0x92c   : > { %9965 = vmatpush3.bf16.msra.mxu1 %v9962_v19 }
 0x92d   : > { %v2631_v35 = vpop.f32.mrb[70].mxu1 }
 0x92e   : > { %v12550_v45 = vadd.f32 %v2631_v35, %v12469_v54  ;;  %v2633_v49 = vpop.f32.mrb[71].mxu1 }
 0x92f   : > { %v2634_v56 = vadd.f32 %v2633_v49, %v12475_v39 }
 0x930   : > { %v9928_v57 = vpack.c.bf16 %v12550_v45, %v12547_v48 }
 0x931   : > { %v9966_v34 = vpack.c.bf16 %v2634_v56, %v2628_v46  ;;  %v2637_v63 = vpop.f32.mrb[72].mxu1  ;;  %v10927_v46 = vld [vmem:[%s11788_s19] sm:$0xff] }
 0x932   : > { %v2639_v55 = vpop.f32.mrb[73].mxu1  ;;  %9930 = vmatprep.subr.msk.bf16.mxu0 %vm11642_vm3, %v9928_v57  ;;  %v12561_v0 = vadd.f32 %v2637_v63, %v12469_v54 }
 0x933   : > { %9933 = vmatpush3.bf16.xpose.msk.msra.mxu0 %vm11642_vm3, %v9928_v57  ;;  %9967 = vmatprep.subr.bf16.mxu1 %v9966_v34  ;;  %v2640_v11 = vadd.f32 %v2639_v55, %v12475_v39  ;;  %v10928_v55 = vld [vmem:[%s11788_s19 + $0x18] sm:$0xff] }
 0x934   : > { %9969 = vmatpush3.bf16.msra.mxu1 %v9966_v34 }
 0x935   : > { %v2643_v6 = vpop.f32.mrb[74].mxu1 }
 0x936   : > { %v12564_v22 = vadd.f32 %v2643_v6, %v12469_v54  ;;  %v2645_v10 = vpop.f32.mrb[75].mxu1  ;;  %v10933_v6 = vld [vmem:[%s11788_s19 + $0x48] sm:$0xff] }
 0x937   : > { %v2646_v47 = vadd.f32 %v2645_v10, %v12475_v39 }
 0x938   : > { %v9934_v13 = vpack.c.bf16 %v12564_v22, %v12561_v0 }
 0x939   : > { %v9970_v12 = vpack.c.bf16 %v2646_v47, %v2640_v11  ;;  %v2649_v28 = vpop.f32.mrb[76].mxu1 }
 0x93a   : > { %v2651_v59 = vpop.f32.mrb[77].mxu1  ;;  %9936 = vmatprep.subr.msk.bf16.mxu0 %vm11642_vm3, %v9934_v13  ;;  %v12575_v37 = vadd.f32 %v2649_v28, %v12469_v54  ;;  %v10929_v28 = vld [vmem:[%s11788_s19 + $0x28] sm:$0xff] }
 0x93b   : > { %9939 = vmatpush3.bf16.xpose.msk.msra.mxu0 %vm11642_vm3, %v9934_v13  ;;  %9971 = vmatprep.subr.bf16.mxu1 %v9970_v12  ;;  %v2652_v20 = vadd.f32 %v2651_v59, %v12475_v39  ;;  %v10938_v59 = vld [vmem:[%s11788_s19 + $0x50] sm:$0xff] }
 0x93c   : > { %9973 = vmatpush3.bf16.msra.mxu1 %v9970_v12 }
 0x93d   : > { %v2655_v1 = vpop.f32.mrb[78].mxu1 }
 0x93e   : > { %v12578_v9 = vadd.f32 %v2655_v1, %v12469_v54  ;;  %v2657_v32 = vpop.f32.mrb[79].mxu1 }
 0x93f   : > { %v2658_v4 = vadd.f32 %v2657_v32, %v12475_v39 }
 0x940   : > { %v9940_v33 = vpack.c.bf16 %v12578_v9, %v12575_v37 }
 0x941   : > { %v9974_v41 = vpack.c.bf16 %v2658_v4, %v2652_v20  ;;  %v10930_v4 = vld [vmem:[%s11788_s19 + $0x10] sm:$0xff] }
 0x942   : > { %9942 = vmatprep.subr.msk.bf16.mxu0 %vm11642_vm3, %v9940_v33 }
 0x943   : > { %9945 = vmatpush3.bf16.xpose.msk.msra.mxu0 %vm11642_vm3, %v9940_v33  ;;  %9975 = vmatprep.subr.bf16.mxu1 %v9974_v41  ;;  %v10935_v33 = vld [vmem:[%s11788_s19 + $0x58] sm:$0xff] }
 0x944   : > { %9977 = vmatpush3.bf16.msra.mxu1 %v9974_v41 }
 0x94a   : > { %9355 = vmatmul.mubr.msk.f32.vlgmr.msra.gmra.mrb[48].mxu0 %vm941_vm2, %v12480_v50 }
 0x94b   : > { %9357 = vmatprep.mubr.msk.f32.mxu0 %vm941_vm2, %v12491_v29 }
 0x94e   : > { %9358 = vmatmul.mubr.msk.f32.gmra.mrb[50].mxu0 %vm941_vm2, %v12494_v44 }
 0x94f   : > { %9360 = vmatprep.mubr.msk.f32.mxu0 %vm941_vm2, %v12505_v27 }
 0x952   : > { %9361 = vmatmul.mubr.msk.f32.gmra.mrb[52].mxu0 %vm941_vm2, %v12508_v36 }
 0x953   : > { %9363 = vmatprep.mubr.msk.f32.mxu0 %vm941_vm2, %v12519_v30 }
 0x956   : > { %9364 = vmatmul.mubr.msk.f32.gmra.mrb[54].mxu0 %vm941_vm2, %v12522_v15 }
 0x957   : > { %9366 = vmatprep.mubr.msk.f32.mxu0 %vm941_vm2, %v12533_v24 }
 0x95a   : > { %9367 = vmatmul.mubr.msk.f32.gmra.mrb[56].mxu0 %vm941_vm2, %v12536_v5 }
 0x95b   : > { %9369 = vmatprep.mubr.msk.f32.mxu0 %vm941_vm2, %v12547_v48 }
 0x95e   : > { %9370 = vmatmul.mubr.msk.f32.gmra.mrb[58].mxu0 %vm941_vm2, %v12550_v45 }
 0x95f   : > { %9372 = vmatprep.mubr.msk.f32.mxu0 %vm941_vm2, %v12561_v0 }
 0x962   : > { %9373 = vmatmul.mubr.msk.f32.gmra.mrb[60].mxu0 %vm941_vm2, %v12564_v22 }
 0x963   : > { %9375 = vmatprep.mubr.msk.f32.mxu0 %vm941_vm2, %v12575_v37 }
 0x966   : > { %9376 = vmatmul.mubr.msk.f32.gmra.mrb[62].mxu0 %vm941_vm2, %v12578_v9 }
 0xa1d   : > { %v9356_v54 = vpop.f32.mrb[48].mxu0 }
 0xa1e   : > { %v2854_v39 = vmul.f32 0.17677669, %v9356_v54  ;;  %v2774_v25 = vpop.f32.mrb[49].mxu0 }
 0xa1f   : > { %v2853_v19 = vmul.f32 0.17677669, %v2774_v25  ;;  %v10931_v25 = vld [vmem:[%s11788_s19 + $0x38] sm:$0xff] }
 0xa20   : > { %v12621_v35 = vsel %vm1345_vm5, %v2854_v39, %v10926_v42 }
 0xa21   : > { %2887 = vmax.xlane.f32.xlu1 %v12621_v35  ;;  %v9359_v49 = vpop.f32.mrb[50].mxu0  ;;  %v12627_v57 = vsel %vm1344_vm4, %v2853_v19, %v10927_v46  ;;  %v10932_v46 = vld [vmem:[%s11788_s19 + $0x20] sm:$0xff] }
 0xa22   : > { %v2856_v34 = vmul.f32 0.17677669, %v9359_v49  ;;  %2885 = vmax.xlane.f32.xlu0 %v12627_v57  ;;  %v2784_v63 = vpop.f32.mrb[51].mxu0 }
 0xa23   : > { %v2855_v11 = vmul.f32 0.17677669, %v2784_v63 }
 0xa24   : > { %v12633_v10 = vsel %vm1347_vm7, %v2856_v34, %v10928_v55  ;;  %vm11189_vm7 = vmmov 0  }
 0xa25   : > { %v9362_v47 = vpop.f32.mrb[52].mxu0  ;;  %v12645_v41 = vsel %vm1346_vm6, %v2855_v11, %v10930_v4  ;;  %vm4336_vm6 = vcmask 130048  }
 0xa26   : > { %v2858_v13 = vmul.f32 0.17677669, %v9362_v47  ;;  %2891 = vmax.xlane.f32.xlu0 %v12633_v10  ;;  %v2794_v12 = vpop.f32.mrb[53].mxu0 }
 0xa27   : > { %v2857_v32 = vmul.f32 0.17677669, %v2794_v12 }
 0xa28   : > { %v12639_v1 = vsel %vm1349_vm9, %v2858_v13, %v10929_v28  ;;  %v10934_v28 = vld [vmem:[%s11788_s19 + $0x30] sm:$0xff]  ;;  %vm5345_vm9 = vcmask 523264  }
 0xa29   : > { %2895 = vmax.xlane.f32.xlu1 %v12639_v1  ;;  %v9365_v20 = vpop.f32.mrb[54].mxu0  ;;  %v12657_v34 = vsel %vm1348_vm8, %v2857_v32, %v10932_v46 }
 0xa2a   : > { %v2860_v54 = vmul.f32 0.17677669, %v9365_v20  ;;  %2889 = vmax.xlane.f32.xlu0 %v12645_v41  ;;  %v2804_v39 = vpop.f32.mrb[55].mxu0 }
 0xa2b   : > { %v2859_v38 = vmul.f32 0.17677669, %v2804_v39 }
 0xa2c   : > { %v12651_v42 = vsel %vm1351_vm11, %v2860_v54, %v10931_v25  ;;  %v10939_v54 = vld [vmem:[%s11788_s19 + $0x78] sm:$0xff] }
 0xa2d   : > { %2899 = vmax.xlane.f32.xlu1 %v12651_v42  ;;  %v9368_v49 = vpop.f32.mrb[56].mxu0  ;;  %v12669_v32 = vsel %vm1350_vm10, %v2859_v38, %v10934_v28 }
 0xa2e   : > { %v2862_v63 = vmul.f32 0.17677669, %v9368_v49  ;;  %2893 = vmax.xlane.f32.xlu0 %v12657_v34  ;;  %v2814_v55 = vpop.f32.mrb[57].mxu0  ;;  %v10936_v49 = vld [vmem:[%s11788_s19 + $0x40] sm:$0xff] }
 0xa2f   : > { %v2861_v13 = vmul.f32 0.17677669, %v2814_v55  ;;  %v10937_v55 = vld [vmem:[%s11788_s19 + $0x68] sm:$0xff] }
 0xa30   : > { %v12663_v47 = vsel %vm1353_vm13, %v2862_v63, %v10933_v6 }
 0xa31   : > { %2903 = vmax.xlane.f32.xlu1 %v12663_v47  ;;  %v9371_v12 = vpop.f32.mrb[58].mxu0  ;;  %v12681_v38 = vsel %vm1352_vm12, %v2861_v13, %v10936_v49 }
 0xa32   : > { %v2864_v20 = vmul.f32 0.17677669, %v9371_v12  ;;  %2897 = vmax.xlane.f32.xlu0 %v12669_v32  ;;  %v2824_v4 = vpop.f32.mrb[59].mxu0 }
 0xa33   : > { %v2863_v25 = vmul.f32 0.17677669, %v2824_v4 }
 0xa34   : > { %v12675_v39 = vsel %vm1355_vm15, %v2864_v20, %v10935_v33  ;;  %v14167_v20 = vld [vmem:[#allocation31_spill] sm:$0xff] }
 0xa35   : > { %2907 = vmax.xlane.f32.xlu1 %v12675_v39  ;;  %v9374_v19 = vpop.f32.mrb[60].mxu0  ;;  %vm14168_vm4 = vcmp.eq.f32.partialorder %v14167_v20, 0.0 }
 0xa36   : > { %v2866_v56 = vmul.f32 0.17677669, %v9374_v19  ;;  %2901 = vmax.xlane.f32.xlu0 %v12681_v38  ;;  %v2834_v63 = vpop.f32.mrb[61].mxu0  ;;  %v12693_v13 = vsel %vm14168_vm4, %v2863_v25, %v10938_v59  ;;  %v10941_v25 = vld [vmem:[%s11788_s19 + $0x70] sm:$0xff]  ;;  %vm8206_vm4 = vcmask 3072  }
 0xa37   : > { %v2865_v12 = vmul.f32 0.17677669, %v2834_v63  ;;  %v14170_v63 = vld [vmem:[#allocation33_spill] sm:$0xff] }
 0xa38   : > { %v12687_v11 = vsel %vm1357_vm1, %v2866_v56, %v10937_v55  ;;  %v10940_v56 = vld [vmem:[%s11788_s19 + $0x60] sm:$0xff]  ;;  %vm14171_vm5 = vcmp.eq.f32.partialorder %v14170_v63, 0.0  ;;  %vm7374_vm1 = vcmask 64512   ;;  %s14175_s19 = sld [smem:[#allocation42_spill]] }
 0xa39   : > { %2911 = vmax.xlane.f32.xlu1 %v12687_v11  ;;  %v9377_v28 = vpop.f32.mrb[62].mxu0  ;;  %v12705_v55 = vsel %vm14171_vm5, %v2865_v12, %v10940_v56  ;;  %vm8273_vm5 = vcmask 1042434  }
 0xa3a   : > { %v2868_v4 = vmul.f32 0.17677669, %v9377_v28  ;;  %2905 = vmax.xlane.f32.xlu0 %v12693_v13  ;;  %v2844_v33 = vpop.f32.mrb[63].mxu0 }
 0xa3b   : > { %v2867_v46 = vmul.f32 0.17677669, %v2844_v33 }
 0xa3c   : > { %v12699_v49 = vsel %vm1359_vm0, %v2868_v4, %v10939_v54 }
 0xa3d   : > { %2915 = vmax.xlane.f32.xlu1 %v12699_v49  ;;  %v12711_v28 = vsel %vm1358_vm14, %v2867_v46, %v10941_v25 }
 0xa3e   : > { %2909 = vmax.xlane.f32.xlu0 %v12705_v55 }
 0xa42   : > { %2913 = vmax.xlane.f32.xlu0 %v12711_v28 }
 0xaae   : > { %v2888_v59 = vpop.xlane.xlu1 %2887 }
 0xaaf   : > { %v2918_v20 = vsub.f32 %v12621_v35, %v2888_v59  ;;  %v2886_v4 = vpop.xlane.xlu0 %2885 }
 0xab0   : > { %v2917_v33 = vsub.f32 %v12627_v57, %v2886_v4 }
 0xab1   : > { %v2935_v54 = vmul.f32 1.442695, %v2918_v20 }
 0xab2   : > { %v2933_v19 = vmul.f32 1.442695, %v2917_v33 }
 0xab3   : > { %10470 = vpow2.f32 %v2935_v54  ;;  %v2892_v12 = vpop.xlane.xlu0 %2891 }
 0xab4   : > { %10472 = vpow2.f32 %v2933_v19  ;;  %v2920_v56 = vsub.f32 %v12633_v10, %v2892_v12 }
 0xab6   : > { %v2939_v63 = vmul.f32 1.442695, %v2920_v56  ;;  %v2896_v51 = vpop.xlane.xlu1 %2895 }
 0xab7   : > { %v2922_v46 = vsub.f32 %v12639_v1, %v2896_v51  ;;  %v2890_v25 = vpop.xlane.xlu0 %2889 }
 0xab8   : > { %10474 = vpow2.f32 %v2939_v63  ;;  %v2919_v6 = vsub.f32 %v12645_v41, %v2890_v25 }
 0xab9   : > { %v2943_v21 = vmul.f32 1.442695, %v2922_v46 }
 0xaba   : > { %v2937_v35 = vmul.f32 1.442695, %v2919_v6  ;;  %v2900_v59 = vpop.xlane.xlu1 %2899 }
 0xabb   : > { %10476 = vpow2.f32 %v2943_v21  ;;  %v2924_v57 = vsub.f32 %v12651_v42, %v2900_v59  ;;  %v2894_v20 = vpop.xlane.xlu0 %2893 }
 0xabc   : > { %10478 = vpow2.f32 %v2937_v35  ;;  %v2921_v4 = vsub.f32 %v12657_v34, %v2894_v20 }
 0xabd   : > { %v12721_v33 = vpop.eup %10470  ;;  %v2947_v10 = vmul.f32 1.442695, %v2924_v57 }
 0xabe   : > { %v12723_v54 = vpop.eup %10472  ;;  %v2941_v51 = vmul.f32 1.442695, %v2921_v4  ;;  %v2904_v1 = vpop.xlane.xlu1 %2903  ;;  %2967 = vadd.xlane.f32.xlu1 %v12721_v33 }
 0xabf   : > { %10480 = vpow2.f32 %v2947_v10  ;;  %v2926_v41 = vsub.f32 %v12663_v47, %v2904_v1  ;;  %v2898_v19 = vpop.xlane.xlu0 %2897  ;;  %2965 = vadd.xlane.f32.xlu0 %v12723_v54 }
 0xac0   : > { %10482 = vpow2.f32 %v2941_v51  ;;  %v2923_v21 = vsub.f32 %v12669_v32, %v2898_v19 }
 0xac1   : > { %v2951_v42 = vmul.f32 1.442695, %v2926_v41 }
 0xac2   : > { %v12729_v34 = vpop.eup %10474  ;;  %v2945_v12 = vmul.f32 1.442695, %v2923_v21  ;;  %v2908_v56 = vpop.xlane.xlu1 %2907 }
 0xac3   : > { %10484 = vpow2.f32 %v2951_v42  ;;  %v2928_v63 = vsub.f32 %v12675_v39, %v2908_v56  ;;  %v2902_v46 = vpop.xlane.xlu0 %2901  ;;  %2971 = vadd.xlane.f32.xlu1 %v12729_v34 }
 0xac4   : > { %10486 = vpow2.f32 %v2945_v12  ;;  %v2925_v47 = vsub.f32 %v12681_v38, %v2902_v46 }
 0xac5   : > { %v12734_v25 = vpop.eup %10476  ;;  %v2955_v6 = vmul.f32 1.442695, %v2928_v63 }
 0xac6   : > { %v12736_v35 = vpop.eup %10478  ;;  %v2949_v32 = vmul.f32 1.442695, %v2925_v47  ;;  %v2912_v59 = vpop.xlane.xlu1 %2911 }
 0xac7   : > { %10488 = vpow2.f32 %v2955_v6  ;;  %v2930_v57 = vsub.f32 %v12687_v11, %v2912_v59  ;;  %v2906_v20 = vpop.xlane.xlu0 %2905  ;;  %2975 = vadd.xlane.f32.xlu1 %v12734_v25  ;;  %2969 = vadd.xlane.f32.xlu0 %v12736_v35 }
 0xac8   : > { %10490 = vpow2.f32 %v2949_v32  ;;  %v2927_v39 = vsub.f32 %v12693_v13, %v2906_v20 }
 0xac9   : > { %v12742_v4 = vpop.eup %10480  ;;  %v2959_v38 = vmul.f32 1.442695, %v2930_v57 }
 0xaca   : > { %v12744_v10 = vpop.eup %10482  ;;  %v2953_v51 = vmul.f32 1.442695, %v2927_v39  ;;  %v2916_v1 = vpop.xlane.xlu1 %2915 }
 0xacb   : > { %10492 = vpow2.f32 %v2959_v38  ;;  %v2932_v41 = vsub.f32 %v12699_v49, %v2916_v1  ;;  %v2910_v19 = vpop.xlane.xlu0 %2909  ;;  %2979 = vadd.xlane.f32.xlu1 %v12742_v4  ;;  %2973 = vadd.xlane.f32.xlu0 %v12744_v10 }
 0xacc   : > { %10494 = vpow2.f32 %v2953_v51  ;;  %v2929_v11 = vsub.f32 %v12705_v55, %v2910_v19 }
 0xacd   : > { %v12750_v21 = vpop.eup %10484  ;;  %v2963_v13 = vmul.f32 1.442695, %v2932_v41 }
 0xace   : > { %v12752_v42 = vpop.eup %10486  ;;  %v2957_v12 = vmul.f32 1.442695, %v2929_v11 }
 0xacf   : > { %10496 = vpow2.f32 %v2963_v13  ;;  %2983 = vadd.xlane.f32.xlu1 %v12750_v21  ;;  %2977 = vadd.xlane.f32.xlu0 %v12752_v42  ;;  %v2914_v49 = vpop.xlane.xlu0 %2913 }
 0xad0   : > { %10498 = vpow2.f32 %v2957_v12  ;;  %v2931_v56 = vsub.f32 %v12711_v28, %v2914_v49 }
 0xad1   : > { %v12757_v63 = vpop.eup %10488 }
 0xad2   : > { %v12759_v46 = vpop.eup %10490  ;;  %v2961_v55 = vmul.f32 1.442695, %v2931_v56 }
 0xad3   : > { %2987 = vadd.xlane.f32.xlu1 %v12757_v63  ;;  %2981 = vadd.xlane.f32.xlu0 %v12759_v46 }
 0xad4   : > { %10500 = vpow2.f32 %v2961_v55 }
 0xad5   : > { %v12763_v47 = vpop.eup %10492 }
 0xad6   : > { %v12765_v6 = vpop.eup %10494 }
 0xad7   : > { %2991 = vadd.xlane.f32.xlu1 %v12763_v47  ;;  %2985 = vadd.xlane.f32.xlu0 %v12765_v6 }
 0xad9   : > { %v12769_v32 = vpop.eup %10496 }
 0xada   : > { %v12771_v28 = vpop.eup %10498 }
 0xadb   : > { %2995 = vadd.xlane.f32.xlu1 %v12769_v32  ;;  %2989 = vadd.xlane.f32.xlu0 %v12771_v28 }
 0xade   : > { %v12775_v59 = vpop.eup %10500 }
 0xadf   : > { %2993 = vadd.xlane.f32.xlu0 %v12775_v59 }
 0xaec   : > { %3398 = vrot.lane.b32.xlu1 %v12480_v50, %s11185_s20 }
 0xaf0   : > { %3400 = vrot.lane.b32.xlu1 %v12491_v29, %s11185_s20 }
 0xaf4   : > { %3402 = vrot.lane.b32.xlu1 %v12494_v44, %s11185_s20 }
 0xaf5   : > { %3396 = vrot.lane.b32.xlu0 %v12472_v23, %s11185_s20 }
 0xaf8   : > { %3406 = vrot.lane.b32.xlu1 %v12508_v36, %s11185_s20 }
 0xaf9   : > { %3404 = vrot.lane.b32.xlu0 %v12505_v27, %s11185_s20 }
 0xafc   : > { %3410 = vrot.lane.b32.xlu1 %v12522_v15, %s11185_s20 }
 0xafd   : > { %3408 = vrot.lane.b32.xlu0 %v12519_v30, %s11185_s20 }
 0xb00   : > { %3414 = vrot.lane.b32.xlu1 %v12536_v5, %s11185_s20 }
 0xb01   : > { %3412 = vrot.lane.b32.xlu0 %v12533_v24, %s11185_s20 }
 0xb04   : > { %3418 = vrot.lane.b32.xlu1 %v12550_v45, %s11185_s20 }
 0xb05   : > { %3416 = vrot.lane.b32.xlu0 %v12547_v48, %s11185_s20 }
 0xb08   : > { %3422 = vrot.lane.b32.xlu1 %v12564_v22, %s11185_s20 }
 0xb09   : > { %3420 = vrot.lane.b32.xlu0 %v12561_v0, %s11185_s20 }
 0xb0c   : > { %3556 = vrot.lane.b32.xlu1 %v12472_v23, %s11186_s22  ;;  %v8593_v23 = vld [vmem:[%s14070_s7 + $0x20] sm:$0xff] }
 0xb0d   : > { %3424 = vrot.lane.b32.xlu0 %v12575_v37, %s11185_s20 }
 0xb10   : > { %3558 = vrot.lane.b32.xlu1 %v12480_v50, %s11186_s22  ;;  %v8594_v50 = vld [vmem:[%s14070_s7 + $0x28] sm:$0xff] }
 0xb11   : > { %3426 = vrot.lane.b32.xlu0 %v12578_v9, %s11185_s20 }
 0xb14   : > { %3562 = vrot.lane.b32.xlu1 %v12494_v44, %s11186_s22 }
 0xb15   : > { %3560 = vrot.lane.b32.xlu0 %v12491_v29, %s11186_s22  ;;  %v9978_v29 = vpack.c.bf16 %v8594_v50, %v8593_v23 }
 0xb17   : > { %9979 = vmatprep.subr.bf16.mxu0 %v9978_v29 }
 0xb18   : > { %3566 = vrot.lane.b32.xlu1 %v12508_v36, %s11186_s22  ;;  %9981 = vmatpush3.bf16.msra.mxu0 %v9978_v29 }
 0xb19   : > { %3564 = vrot.lane.b32.xlu0 %v12505_v27, %s11186_s22 }
 0xb1c   : > { %3570 = vrot.lane.b32.xlu1 %v12522_v15, %s11186_s22 }
 0xb1d   : > { %3568 = vrot.lane.b32.xlu0 %v12519_v30, %s11186_s22 }
 0xb20   : > { %3574 = vrot.lane.b32.xlu1 %v12536_v5, %s11186_s22 }
 0xb21   : > { %3572 = vrot.lane.b32.xlu0 %v12533_v24, %s11186_s22 }
 0xb24   : > { %3578 = vrot.lane.b32.xlu1 %v12550_v45, %s11186_s22 }
 0xb25   : > { %3576 = vrot.lane.b32.xlu0 %v12547_v48, %s11186_s22 }
 0xb28   : > { %3582 = vrot.lane.b32.xlu1 %v12564_v22, %s11186_s22 }
 0xb29   : > { %3580 = vrot.lane.b32.xlu0 %v12561_v0, %s11186_s22 }
 0xb2c   : > { %3586 = vrot.lane.b32.xlu1 %v12578_v9, %s11186_s22 }
 0xb2d   : > { %3584 = vrot.lane.b32.xlu0 %v12575_v37, %s11186_s22 }
 0xb4b   : > { %v2968_v44 = vpop.xlane.xlu1 %2967 }
 0xb4c   : > { %10502 = vrcp.f32 %v2968_v44  ;;  %v2966_v27 = vpop.xlane.xlu0 %2965 }
 0xb4d   : > { %10504 = vrcp.f32 %v2966_v27 }
 0xb50   : > { %v2972_v36 = vpop.xlane.xlu1 %2971 }
 0xb51   : > { %10506 = vrcp.f32 %v2972_v36 }
 0xb54   : > { %v2976_v30 = vpop.xlane.xlu1 %2975  ;;  %v2970_v15 = vpop.xlane.xlu0 %2969 }
 0xb55   : > { %10508 = vrcp.f32 %v2970_v15 }
 0xb56   : > { %v10503_v24 = vpop.eup %10502  ;;  %10510 = vrcp.f32 %v2976_v30 }
 0xb57   : > { %v10505_v5 = vpop.eup %10504  ;;  %v3014_v22 = vmul.f32 %v10503_v24, %v12721_v33 }
 0xb58   : > { %v2980_v48 = vpop.xlane.xlu1 %2979  ;;  %v2974_v45 = vpop.xlane.xlu0 %2973  ;;  %v3013_v0 = vmul.f32 %v10505_v5, %v12723_v54 }
 0xb59   : > { %10512 = vrcp.f32 %v2974_v45 }
 0xb5a   : > { %9410 = vmatprep.mubr.f32.mxu1 %v3013_v0  ;;  %10514 = vrcp.f32 %v2980_v48 }
 0xb5b   : > { %9411 = vmatmul.mubr.f32.vlgmr.msra.gmra.mrb[80].mxu1 %v3014_v22  ;;  %v10507_v57 = vpop.eup %10506 }
 0xb5c   : > { %v2984_v37 = vpop.xlane.xlu1 %2983  ;;  %v2978_v9 = vpop.xlane.xlu0 %2977  ;;  %v3016_v54 = vmul.f32 %v10507_v57, %v12729_v34 }
 0xb5d   : > { %10516 = vrcp.f32 %v2978_v9 }
 0xb5e   : > { %10518 = vrcp.f32 %v2984_v37 }
 0xb5f   : > { %v10509_v20 = vpop.eup %10508 }
 0xb60   : > { %v2988_v39 = vpop.xlane.xlu1 %2987  ;;  %v2982_v38 = vpop.xlane.xlu0 %2981  ;;  %v3015_v51 = vmul.f32 %v10509_v20, %v12736_v35 }
 0xb61   : > { %10520 = vrcp.f32 %v2982_v38  ;;  %v10511_v1 = vpop.eup %10510 }
 0xb62   : > { %9413 = vmatprep.mubr.f32.mxu1 %v3015_v51  ;;  %10522 = vrcp.f32 %v2988_v39  ;;  %v3018_v13 = vmul.f32 %v10511_v1, %v12734_v25 }
 0xb63   : > { %v10513_v33 = vpop.eup %10512  ;;  %9414 = vmatmul.mubr.f32.gmra.mrb[82].mxu1 %v3016_v54 }
 0xb64   : > { %v2992_v41 = vpop.xlane.xlu1 %2991  ;;  %v2986_v19 = vpop.xlane.xlu0 %2985  ;;  %v3017_v11 = vmul.f32 %v10513_v33, %v12744_v10 }
 0xb65   : > { %10524 = vrcp.f32 %v2986_v19  ;;  %v10515_v12 = vpop.eup %10514 }
 0xb66   : > { %9416 = vmatprep.mubr.f32.mxu1 %v3017_v11  ;;  %10526 = vrcp.f32 %v2992_v41  ;;  %v3020_v55 = vmul.f32 %v10515_v12, %v12742_v4 }
 0xb67   : > { %v10517_v49 = vpop.eup %10516  ;;  %9417 = vmatmul.mubr.f32.gmra.mrb[84].mxu1 %v3018_v13 }
 0xb68   : > { %v2990_v35 = vpop.xlane.xlu0 %2989  ;;  %v2996_v56 = vpop.xlane.xlu1 %2995  ;;  %v3019_v34 = vmul.f32 %v10517_v49, %v12752_v42 }
 0xb69   : > { %10528 = vrcp.f32 %v2990_v35  ;;  %v10519_v23 = vpop.eup %10518 }
 0xb6a   : > { %9419 = vmatprep.mubr.f32.mxu1 %v3019_v34  ;;  %10530 = vrcp.f32 %v2996_v56  ;;  %v3022_v29 = vmul.f32 %v10519_v23, %v12750_v21 }
 0xb6b   : > { %v10521_v50 = vpop.eup %10520  ;;  %9420 = vmatmul.mubr.f32.gmra.mrb[86].mxu1 %v3020_v55 }
 0xb6c   : > { %v2994_v10 = vpop.xlane.xlu0 %2993  ;;  %v3021_v25 = vmul.f32 %v10521_v50, %v12759_v46  ;;  %v10523_v44 = vpop.eup %10522 }
 0xb6d   : > { %10532 = vrcp.f32 %v2994_v10  ;;  %v3024_v36 = vmul.f32 %v10523_v44, %v12757_v63  ;;  %v8595_v63 = vld [vmem:[%s14070_s7 + $0x30] sm:$0xff] }
 0xb6e   : > { %9422 = vmatprep.mubr.f32.mxu1 %v3021_v25 }
 0xb6f   : > { %v10525_v27 = vpop.eup %10524  ;;  %9423 = vmatmul.mubr.f32.gmra.mrb[88].mxu1 %v3022_v29 }
 0xb70   : > { %v3023_v42 = vmul.f32 %v10525_v27, %v12765_v6  ;;  %v10527_v4 = vpop.eup %10526  ;;  %v8596_v6 = vld [vmem:[%s14070_s7 + $0x38] sm:$0xff]  ;;  %v3399_v27 = vpop.permute.xlu1 %3398 }
 0xb71   : > { %v3026_v5 = vmul.f32 %v10527_v4, %v12763_v47  ;;  %v3397_v4 = vpop.permute.xlu0 %3396 }
 0xb72   : > { %9425 = vmatprep.mubr.f32.mxu1 %v3023_v42 }
 0xb73   : > { %v10529_v30 = vpop.eup %10528  ;;  %9426 = vmatmul.mubr.f32.gmra.mrb[90].mxu1 %v3024_v36 }
 0xb74   : > { %v3025_v15 = vmul.f32 %v10529_v30, %v12771_v28  ;;  %v10531_v24 = vpop.eup %10530  ;;  %v9982_v28 = vpack.c.bf16 %v8596_v6, %v8595_v63  ;;  %v3401_v42 = vpop.permute.xlu1 %3400 }
 0xb75   : > { %v3028_v48 = vmul.f32 %v10531_v24, %v12769_v32 }
 0xb76   : > { %9428 = vmatprep.mubr.f32.mxu1 %v3025_v15  ;;  %9983 = vmatprep.subr.bf16.mxu0 %v9982_v28  ;;  %v3405_v15 = vpop.permute.xlu0 %3404 }
 0xb77   : > { %v10533_v46 = vpop.eup %10532  ;;  %9429 = vmatmul.mubr.f32.gmra.mrb[92].mxu1 %v3026_v5  ;;  %9985 = vmatpush3.bf16.msra.mxu0 %v9982_v28 }
 0xb78   : > { %v3027_v21 = vmul.f32 %v10533_v46, %v12775_v59  ;;  %v3403_v36 = vpop.permute.xlu1 %3402  ;;  %v12886_v46 = vld [vmem:[#allocation10 + $0x1] ss:$0 sm:$0xff] }
 0xb7a   : > { %9431 = vmatprep.mubr.f32.mxu1 %v3027_v21  ;;  %v3409_v5 = vpop.permute.xlu0 %3408 }
 0xb7b   : > { %9432 = vmatmul.mubr.f32.gmra.mrb[94].mxu1 %v3028_v48 }
 0xb7c   : > { %v3407_v30 = vpop.permute.xlu1 %3406 }
 0xb7e   : > { %v3413_v48 = vpop.permute.xlu0 %3412 }
 0xb80   : > { %v3411_v24 = vpop.permute.xlu1 %3410 }
 0xb84   : > { %v3415_v21 = vpop.permute.xlu1 %3414 }
 0xc2e   : > { %v9412_v47 = vpop.f32.mrb[80].mxu1 }
 0xc2f   : > { %v3095_v45 = vpop.f32.mrb[81].mxu1 }
 0xc30   : > { %10534 = vtanh.f32 %v3095_v45 }
 0xc31   : > { %10536 = vtanh.f32 %v9412_v47 }
 0xc36   : > { %v9415_v59 = vpop.f32.mrb[82].mxu1 }
 0xc37   : > { %v3105_v0 = vpop.f32.mrb[83].mxu1 }
 0xc38   : > { %10538 = vtanh.f32 %v3105_v0  ;;  %v12896_v0 = vpop.permute.xlu1 %3418 }
 0xc39   : > { %10540 = vtanh.f32 %v9415_v59 }
 0xc3a   : > { %v10535_v32 = vpop.eup %10534  ;;  %v9418_v37 = vpop.f32.mrb[84].mxu1 }
 0xc3b   : > { %v10537_v22 = vpop.eup %10536  ;;  %9442 = vmatprep.mubr.msk.f32.mxu0 %vm941_vm2, %v10535_v32  ;;  %v3115_v9 = vpop.f32.mrb[85].mxu1 }
 0xc3c   : > { %9443 = vmatmul.mubr.msk.f32.vlgmr.msra.gmra.mrb[64].mxu0 %vm941_vm2, %v10537_v22  ;;  %10542 = vtanh.f32 %v3115_v9  ;;  %v12898_v22 = vpop.permute.xlu0 %3416 }
 0xc3d   : > { %10544 = vtanh.f32 %v9418_v37 }
 0xc3e   : > { %v9421_v57 = vpop.f32.mrb[86].mxu1 }
 0xc3f   : > { %v3125_v20 = vpop.f32.mrb[87].mxu1 }
 0xc40   : > { %10546 = vtanh.f32 %v3125_v20 }
 0xc41   : > { %10548 = vtanh.f32 %v9421_v57 }
 0xc42   : > { %v10539_v39 = vpop.eup %10538  ;;  %v9424_v38 = vpop.f32.mrb[88].mxu1 }
 0xc43   : > { %v10541_v51 = vpop.eup %10540  ;;  %v3135_v54 = vpop.f32.mrb[89].mxu1  ;;  %9445 = vmatprep.mubr.msk.f32.mxu0 %vm941_vm2, %v10539_v39 }
 0xc44   : > { %10550 = vtanh.f32 %v3135_v54  ;;  %9446 = vmatmul.mubr.msk.f32.gmra.mrb[66].mxu0 %vm941_vm2, %v10541_v51  ;;  %v12903_v39 = vpop.permute.xlu1 %3422  ;;  %v12908_v51 = vpop.permute.xlu0 %3420 }
 0xc45   : > { %10552 = vtanh.f32 %v9424_v38 }
 0xc46   : > { %v10543_v1 = vpop.eup %10542  ;;  %v9427_v33 = vpop.f32.mrb[90].mxu1 }
 0xc47   : > { %v10545_v41 = vpop.eup %10544  ;;  %v3145_v19 = vpop.f32.mrb[91].mxu1  ;;  %9448 = vmatprep.mubr.msk.f32.mxu0 %vm941_vm2, %v10543_v1 }
 0xc48   : > { %10554 = vtanh.f32 %v3145_v19  ;;  %9449 = vmatmul.mubr.msk.f32.gmra.mrb[68].mxu0 %vm941_vm2, %v10545_v41 }
 0xc49   : > { %10556 = vtanh.f32 %v9427_v33 }
 0xc4a   : > { %v10547_v11 = vpop.eup %10546  ;;  %v9430_v13 = vpop.f32.mrb[92].mxu1 }
 0xc4b   : > { %v10549_v12 = vpop.eup %10548  ;;  %v3155_v49 = vpop.f32.mrb[93].mxu1  ;;  %9451 = vmatprep.mubr.msk.f32.mxu0 %vm941_vm2, %v10547_v11 }
 0xc4c   : > { %10558 = vtanh.f32 %v3155_v49  ;;  %9452 = vmatmul.mubr.msk.f32.gmra.mrb[70].mxu0 %vm941_vm2, %v10549_v12 }
 0xc4d   : > { %10560 = vtanh.f32 %v9430_v13 }
 0xc4e   : > { %v10551_v35 = vpop.eup %10550  ;;  %v9433_v56 = vpop.f32.mrb[94].mxu1 }
 0xc4f   : > { %v10553_v34 = vpop.eup %10552  ;;  %v3165_v55 = vpop.f32.mrb[95].mxu1  ;;  %9454 = vmatprep.mubr.msk.f32.mxu0 %vm941_vm2, %v10551_v35 }
 0xc50   : > { %10562 = vtanh.f32 %v3165_v55  ;;  %9455 = vmatmul.mubr.msk.f32.gmra.mrb[72].mxu0 %vm941_vm2, %v10553_v34 }
 0xc51   : > { %10564 = vtanh.f32 %v9433_v56  ;;  %v3557_v56 = vpop.permute.xlu1 %3556 }
 0xc52   : > { %v10555_v23 = vpop.eup %10554 }
 0xc53   : > { %v10557_v50 = vpop.eup %10556  ;;  %9457 = vmatprep.mubr.msk.f32.mxu0 %vm941_vm2, %v10555_v23 }
 0xc54   : > { %9458 = vmatmul.mubr.msk.f32.gmra.mrb[74].mxu0 %vm941_vm2, %v10557_v50  ;;  %v12920_v50 = vpop.permute.xlu0 %3424 }
 0xc56   : > { %v10559_v10 = vpop.eup %10558 }
 0xc57   : > { %v10561_v25 = vpop.eup %10560  ;;  %9460 = vmatprep.mubr.msk.f32.mxu0 %vm941_vm2, %v10559_v10 }
 0xc58   : > { %9461 = vmatmul.mubr.msk.f32.gmra.mrb[76].mxu0 %vm941_vm2, %v10561_v25 }
 0xc5a   : > { %v10563_v29 = vpop.eup %10562 }
 0xc5b   : > { %v10565_v44 = vpop.eup %10564  ;;  %9463 = vmatprep.mubr.msk.f32.mxu0 %vm941_vm2, %v10563_v29 }
 0xc5c   : > { %9464 = vmatmul.mubr.msk.f32.gmra.mrb[78].mxu0 %vm941_vm2, %v10565_v44 }
 0xc5d   : > { %9502 = vmatprep.mubr.msk.f32.mxu0 %vm11189_vm7, %v14153_v58 }
 0xd0f   : > { %v9444_v63 = vpop.f32.mrb[64].mxu0 }
 0xd10   : > { %v12889_v6 = vadd.f32 %v9444_v63, %v12886_v46  ;;  %v3317_v28 = vpop.f32.mrb[65].mxu0 }
 0xd11   : > { %v12892_v47 = vadd.f32 %v12886_v46, %v3317_v28 }
 0xd12   : > { %v3445_v45 = vadd.f32 %v3399_v27, %v12889_v6 }
 0xd13   : > { %v3444_v59 = vadd.f32 %v3397_v4, %v12892_v47 }
 0xd14   : > { %v8615_v32 = vmul.f32 -1.442695, %v3445_v45 }
 0xd15   : > { %v8614_v37 = vmul.f32 -1.442695, %v3444_v59  ;;  %v3559_v59 = vpop.permute.xlu1 %3558 }
 0xd16   : > { %10566 = vpow2.f32 %v8615_v32 }
 0xd17   : > { %10568 = vpow2.f32 %v8614_v37  ;;  %v9447_v9 = vpop.f32.mrb[66].mxu0 }
 0xd18   : > { %v12901_v57 = vadd.f32 %v9447_v9, %v12886_v46  ;;  %v3327_v20 = vpop.f32.mrb[67].mxu0  ;;  %v3427_v9 = vpop.permute.xlu0 %3426 }
 0xd19   : > { %v12906_v38 = vadd.f32 %v12886_v46, %v3327_v20 }
 0xd1a   : > { %v3447_v54 = vadd.f32 %v3403_v36, %v12901_v57 }
 0xd1b   : > { %v3446_v1 = vadd.f32 %v3401_v42, %v12906_v38  ;;  %v9450_v33 = vpop.f32.mrb[68].mxu0 }
 0xd1c   : > { %v8617_v41 = vmul.f32 -1.442695, %v3447_v54  ;;  %v12913_v19 = vadd.f32 %v9450_v33, %v12886_v46  ;;  %v3337_v11 = vpop.f32.mrb[69].mxu0 }
 0xd1d   : > { %v8616_v13 = vmul.f32 -1.442695, %v3446_v1  ;;  %v12916_v12 = vadd.f32 %v12886_v46, %v3337_v11 }
 0xd1e   : > { %10570 = vpow2.f32 %v8617_v41  ;;  %v3449_v49 = vadd.f32 %v3407_v30, %v12913_v19 }
 0xd1f   : > { %10572 = vpow2.f32 %v8616_v13  ;;  %v3448_v34 = vadd.f32 %v3405_v15, %v12916_v12  ;;  %v9453_v55 = vpop.f32.mrb[70].mxu0 }
 0xd20   : > { %v10567_v35 = vpop.eup %10566  ;;  %v8619_v25 = vmul.f32 -1.442695, %v3449_v49  ;;  %v12923_v29 = vadd.f32 %v9453_v55, %v12886_v46  ;;  %v3347_v44 = vpop.f32.mrb[71].mxu0 }
 0xd21   : > { %v10569_v23 = vpop.eup %10568  ;;  %v3509_v10 = vadd.f32 1.0, %v10567_v35  ;;  %v8618_v42 = vmul.f32 -1.442695, %v3448_v34  ;;  %v12926_v36 = vadd.f32 %v12886_v46, %v3347_v44  ;;  %v3563_v55 = vpop.permute.xlu1 %3562 }
 0xd22   : > { %v3508_v27 = vadd.f32 1.0, %v10569_v23  ;;  %v3451_v4 = vadd.f32 %v3411_v24, %v12923_v29 }
 0xd23   : > { %10574 = vrcp.f32 %v3509_v10  ;;  %v3450_v30 = vadd.f32 %v3409_v5, %v12926_v36  ;;  %v9456_v15 = vpop.f32.mrb[72].mxu0 }
 0xd24   : > { %10576 = vrcp.f32 %v3508_v27  ;;  %v8621_v63 = vmul.f32 -1.442695, %v3451_v4  ;;  %v12931_v28 = vadd.f32 %v9456_v15, %v12886_v46  ;;  %v3357_v45 = vpop.f32.mrb[73].mxu0 }
 0xd25   : > { %10578 = vpow2.f32 %v8619_v25  ;;  %v8620_v32 = vmul.f32 -1.442695, %v3450_v30  ;;  %v12934_v37 = vadd.f32 %v12886_v46, %v3357_v45  ;;  %v3561_v25 = vpop.permute.xlu0 %3560 }
 0xd26   : > { %10580 = vpow2.f32 %v8618_v42  ;;  %v3453_v24 = vadd.f32 %v3415_v21, %v12931_v28 }
 0xd27   : > { %10582 = vpow2.f32 %v8621_v63  ;;  %v3452_v5 = vadd.f32 %v3413_v48, %v12934_v37  ;;  %v9459_v20 = vpop.f32.mrb[74].mxu0 }
 0xd28   : > { %10584 = vpow2.f32 %v8620_v32  ;;  %v10571_v54 = vpop.eup %10570  ;;  %v8623_v1 = vmul.f32 -1.442695, %v3453_v24  ;;  %v12939_v33 = vadd.f32 %v9459_v20, %v12886_v46  ;;  %v3367_v41 = vpop.f32.mrb[75].mxu0 }
 0xd29   : > { %v10573_v11 = vpop.eup %10572  ;;  %v3511_v13 = vadd.f32 1.0, %v10571_v54  ;;  %v8622_v49 = vmul.f32 -1.442695, %v3452_v5  ;;  %v12942_v35 = vadd.f32 %v12886_v46, %v3367_v41 }
 0xd2a   : > { %v3510_v34 = vadd.f32 1.0, %v10573_v11  ;;  %10586 = vpow2.f32 %v8623_v1  ;;  %v3455_v21 = vadd.f32 %v12896_v0, %v12939_v33  ;;  %v3567_v11 = vpop.permute.xlu1 %3566 }
 0xd2b   : > { %10588 = vrcp.f32 %v3511_v13  ;;  %v3454_v48 = vadd.f32 %v12898_v22, %v12942_v35  ;;  %v9462_v23 = vpop.f32.mrb[76].mxu0 }
 0xd2c   : > { %10590 = vrcp.f32 %v3510_v34  ;;  %v8625_v44 = vmul.f32 -1.442695, %v3455_v21  ;;  %v12951_v27 = vadd.f32 %v9462_v23, %v12886_v46  ;;  %v3377_v42 = vpop.f32.mrb[77].mxu0 }
 0xd2d   : > { %v12948_v10 = vpop.eup %10574  ;;  %10592 = vpow2.f32 %v8622_v49  ;;  %v8624_v30 = vmul.f32 -1.442695, %v3454_v48  ;;  %v12956_v0 = vadd.f32 %v12886_v46, %v3377_v42 }
 0xd2e   : > { %v12953_v4 = vpop.eup %10576  ;;  %v3605_v15 = vmul.f32 %v12948_v10, %v3559_v59  ;;  %10594 = vpow2.f32 %v8625_v44  ;;  %v3457_v63 = vadd.f32 %v12903_v39, %v12951_v27 }
 0xd2f   : > { %v10579_v22 = vpop.eup %10578  ;;  %v3604_v45 = vmul.f32 %v12953_v4, %v3557_v56  ;;  %10596 = vpow2.f32 %v8624_v30  ;;  %v3456_v5 = vadd.f32 %v12908_v51, %v12956_v0  ;;  %v9465_v20 = vpop.f32.mrb[78].mxu0 }
 0xd30   : > { %v10581_v32 = vpop.eup %10580  ;;  %v3513_v24 = vadd.f32 1.0, %v10579_v22  ;;  %3638 = vrot.lane.b32.xlu1 %v3605_v15, %s11187_s23  ;;  %v12966_v59 = vadd.f32 %v9465_v20, %v12886_v46  ;;  %v3387_v41 = vpop.f32.mrb[79].mxu0  ;;  %v8627_v13 = vmul.f32 -1.442695, %v3457_v63 }
 0xd31   : > { %v10583_v54 = vpop.eup %10582  ;;  %v3512_v1 = vadd.f32 1.0, %v10581_v32  ;;  %3636 = vrot.lane.b32.xlu0 %v3604_v45, %s11187_s23  ;;  %v12970_v49 = vadd.f32 %v12886_v46, %v3387_v41  ;;  %v3565_v51 = vpop.permute.xlu0 %3564  ;;  %v8626_v21 = vmul.f32 -1.442695, %v3456_v5 }
 0xd32   : > { %v10585_v39 = vpop.eup %10584  ;;  %10598 = vrcp.f32 %v3513_v24  ;;  %v3515_v56 = vadd.f32 1.0, %v10583_v54  ;;  %v3459_v48 = vadd.f32 %v3427_v9, %v12966_v59  ;;  %v3571_v32 = vpop.permute.xlu1 %3570 }
 0xd33   : > { %10600 = vrcp.f32 %v3512_v1  ;;  %v3514_v34 = vadd.f32 1.0, %v10585_v39  ;;  %v3458_v23 = vadd.f32 %v12920_v50, %v12970_v49 }
 0xd34   : > { %10602 = vrcp.f32 %v3515_v56  ;;  %v10587_v44 = vpop.eup %10586  ;;  %v8629_v42 = vmul.f32 -1.442695, %v3459_v48 }
 0xd35   : > { %10604 = vrcp.f32 %v3514_v34  ;;  %v12975_v30 = vpop.eup %10588  ;;  %v3517_v15 = vadd.f32 1.0, %v10587_v44  ;;  %v8628_v22 = vmul.f32 -1.442695, %v3458_v23  ;;  %v3569_v50 = vpop.permute.xlu0 %3568 }
 0xd36   : > { %10606 = vpow2.f32 %v8627_v13  ;;  %v12977_v46 = vpop.eup %10590  ;;  %v3607_v63 = vmul.f32 %v12975_v30, %v3563_v55  ;;  %v3575_v56 = vpop.permute.xlu1 %3574 }
 0xd37   : > { %10608 = vpow2.f32 %v8626_v21  ;;  %v10593_v45 = vpop.eup %10592  ;;  %v3606_v9 = vmul.f32 %v12977_v46, %v3561_v25 }
 0xd38   : > { %10610 = vrcp.f32 %v3517_v15  ;;  %v10595_v24 = vpop.eup %10594  ;;  %v3516_v5 = vadd.f32 1.0, %v10593_v45  ;;  %3642 = vrot.lane.b32.xlu1 %v3607_v63, %s11187_s23 }
 0xd39   : > { %10612 = vpow2.f32 %v8629_v42  ;;  %v10597_v20 = vpop.eup %10596  ;;  %v3519_v54 = vadd.f32 1.0, %v10595_v24  ;;  %3640 = vrot.lane.b32.xlu0 %v3606_v9, %s11187_s23  ;;  %v3573_v21 = vpop.permute.xlu0 %3572 }
 0xd3a   : > { %10614 = vpow2.f32 %v8628_v22  ;;  %v3518_v1 = vadd.f32 1.0, %v10597_v20  ;;  %v3579_v9 = vpop.permute.xlu1 %3578 }
 0xd3b   : > { %10616 = vrcp.f32 %v3516_v5 }
 0xd3c   : > { %v12983_v41 = vpop.eup %10598  ;;  %10618 = vrcp.f32 %v3519_v54 }
 0xd3d   : > { %v12985_v55 = vpop.eup %10600  ;;  %10620 = vrcp.f32 %v3518_v1  ;;  %v3609_v25 = vmul.f32 %v12983_v41, %v3567_v11 }
 0xd3e   : > { %v12988_v39 = vpop.eup %10602  ;;  %v3608_v13 = vmul.f32 %v12985_v55, %v3565_v51 }
 0xd3f   : > { %v12991_v34 = vpop.eup %10604  ;;  %3646 = vrot.lane.b32.xlu1 %v3609_v25, %s11187_s23  ;;  %v3611_v48 = vmul.f32 %v12988_v39, %v3571_v32 }
 0xd40   : > { %v10607_v23 = vpop.eup %10606  ;;  %3644 = vrot.lane.b32.xlu0 %v3608_v13, %s11187_s23  ;;  %v3610_v44 = vmul.f32 %v12991_v34, %v3569_v50  ;;  %v3577_v50 = vpop.permute.xlu0 %3576 }
 0xd41   : > { %v10609_v42 = vpop.eup %10608  ;;  %v3521_v15 = vadd.f32 1.0, %v10607_v23  ;;  %v3583_v13 = vpop.permute.xlu1 %3582 }
 0xd42   : > { %v12997_v11 = vpop.eup %10610  ;;  %v3520_v22 = vadd.f32 1.0, %v10609_v42 }
 0xd43   : > { %v10613_v63 = vpop.eup %10612  ;;  %10622 = vrcp.f32 %v3521_v15  ;;  %3650 = vrot.lane.b32.xlu1 %v3611_v48, %s11187_s23  ;;  %v3613_v51 = vmul.f32 %v12997_v11, %v3575_v56 }
 0xd44   : > { %v10615_v45 = vpop.eup %10614  ;;  %10624 = vrcp.f32 %v3520_v22  ;;  %v3523_v32 = vadd.f32 1.0, %v10613_v63  ;;  %3648 = vrot.lane.b32.xlu0 %v3610_v44, %s11187_s23  ;;  %v3581_v48 = vpop.permute.xlu0 %3580 }
 0xd45   : > { %v13002_v24 = vpop.eup %10616  ;;  %v3522_v5 = vadd.f32 1.0, %v10615_v45  ;;  %v3587_v22 = vpop.permute.xlu1 %3586 }
 0xd46   : > { %v13004_v20 = vpop.eup %10618  ;;  %10626 = vrcp.f32 %v3523_v32  ;;  %v3612_v54 = vmul.f32 %v13002_v24, %v3573_v21 }
 0xd47   : > { %v13007_v1 = vpop.eup %10620  ;;  %10628 = vrcp.f32 %v3522_v5  ;;  %3654 = vrot.lane.b32.xlu1 %v3613_v51, %s11187_s23  ;;  %v3615_v25 = vmul.f32 %v13004_v20, %v3579_v9 }
 0xd48   : > { %3652 = vrot.lane.b32.xlu0 %v3612_v54, %s11187_s23  ;;  %v3614_v56 = vmul.f32 %v13007_v1, %v3577_v50  ;;  %v3585_v51 = vpop.permute.xlu0 %3584 }
 0xd4b   : > { %3658 = vrot.lane.b32.xlu1 %v3615_v25, %s11187_s23 }
 0xd4c   : > { %3656 = vrot.lane.b32.xlu0 %v3614_v56, %s11187_s23 }
 0xd4d   : > { %v13015_v23 = vpop.eup %10622 }
 0xd4e   : > { %v13017_v21 = vpop.eup %10624  ;;  %v3617_v44 = vmul.f32 %v13015_v23, %v3583_v13 }
 0xd4f   : > { %v3616_v42 = vmul.f32 %v13017_v21, %v3581_v48 }
 0xd50   : > { %v13021_v15 = vpop.eup %10626  ;;  %3662 = vrot.lane.b32.xlu1 %v3617_v44, %s11187_s23 }
 0xd51   : > { %v13024_v63 = vpop.eup %10628  ;;  %3660 = vrot.lane.b32.xlu0 %v3616_v42, %s11187_s23  ;;  %v3619_v45 = vmul.f32 %v13021_v15, %v3587_v22 }
 0xd52   : > { %v3618_v9 = vmul.f32 %v13024_v63, %v3585_v51 }
 0xd54   : > { %3666 = vrot.lane.b32.xlu1 %v3619_v45, %s11187_s23 }
 0xd55   : > { %3664 = vrot.lane.b32.xlu0 %v3618_v9, %s11187_s23 }
 0xda2   : > { %v3639_v32 = vpop.permute.xlu1 %3638 }
 0xda3   : > { %v3685_v50 = vadd.f32 %v3639_v32, %v12889_v6  ;;  %v3637_v5 = vpop.permute.xlu0 %3636 }
 0xda4   : > { %v3684_v54 = vadd.f32 %v3637_v5, %v12892_v47 }
 0xda5   : > { %10630 = vtanh.f32 %v3685_v50 }
 0xda6   : > { %10632 = vtanh.f32 %v3684_v54 }
 0xdaa   : > { %v3643_v25 = vpop.permute.xlu1 %3642 }
 0xdab   : > { %v3687_v56 = vadd.f32 %v3643_v25, %v12901_v57  ;;  %v3641_v13 = vpop.permute.xlu0 %3640 }
 0xdac   : > { %v3686_v48 = vadd.f32 %v3641_v13, %v12906_v38 }
 0xdad   : > { %10634 = vtanh.f32 %v3687_v56 }
 0xdae   : > { %10636 = vtanh.f32 %v3686_v48 }
 0xdaf   : > { %v10631_v44 = vpop.eup %10630 }
 0xdb0   : > { %v10633_v42 = vpop.eup %10632  ;;  %3750 = vrot.lane.b32.xlu1 %v10631_v44, %s11185_s20 }
 0xdb1   : > { %v3647_v22 = vpop.permute.xlu1 %3646  ;;  %3748 = vrot.lane.b32.xlu0 %v10633_v42, %s11185_s20 }
 0xdb2   : > { %v3689_v6 = vadd.f32 %v3647_v22, %v12913_v19  ;;  %v3645_v47 = vpop.permute.xlu0 %3644 }
 0xdb3   : > { %v3688_v51 = vadd.f32 %v3645_v47, %v12916_v12 }
 0xdb4   : > { %10638 = vtanh.f32 %v3689_v6 }
 0xdb5   : > { %10640 = vtanh.f32 %v3688_v51  ;;  %v3651_v57 = vpop.permute.xlu1 %3650 }
 0xdb6   : > { %v3691_v45 = vadd.f32 %v3651_v57, %v12923_v29  ;;  %v3649_v38 = vpop.permute.xlu0 %3648 }
 0xdb7   : > { %v3690_v9 = vadd.f32 %v3649_v38, %v12926_v36  ;;  %v10635_v32 = vpop.eup %10634  ;;  %v3844_v38 = vld [vmem:[%s14072_s9] sm:$0xff] }
 0xdb8   : > { %10642 = vtanh.f32 %v3691_v45  ;;  %v10637_v50 = vpop.eup %10636  ;;  %3754 = vrot.lane.b32.xlu1 %v10635_v32, %s11185_s20  ;;  %v3847_v32 = vld [vmem:[%s14072_s9 + $0x18] sm:$0xff] }
 0xdb9   : > { %10644 = vtanh.f32 %v3690_v9  ;;  %v3655_v5 = vpop.permute.xlu1 %3654  ;;  %3752 = vrot.lane.b32.xlu0 %v10637_v50, %s11185_s20 }
 0xdba   : > { %v3693_v19 = vadd.f32 %v3655_v5, %v12931_v28  ;;  %v3653_v54 = vpop.permute.xlu0 %3652 }
 0xdbb   : > { %v3692_v12 = vadd.f32 %v3653_v54, %v12934_v37 }
 0xdbc   : > { %10646 = vtanh.f32 %v3693_v19 }
 0xdbd   : > { %10648 = vtanh.f32 %v3692_v12  ;;  %v3659_v29 = vpop.permute.xlu1 %3658 }
 0xdbe   : > { %v10639_v25 = vpop.eup %10638  ;;  %v3695_v36 = vadd.f32 %v3659_v29, %v12939_v33  ;;  %v3657_v56 = vpop.permute.xlu0 %3656  ;;  %v11188_v29 = vmov 0.0|0.0  }
 0xdbf   : > { %v10641_v13 = vpop.eup %10640  ;;  %v3694_v48 = vadd.f32 %v3657_v56, %v12942_v35  ;;  %3758 = vrot.lane.b32.xlu1 %v10639_v25, %s11185_s20  ;;  %9994 = vmatprep.subr.bf16.mxu0 %v11188_v29  ;;  %v3717_v25 = vsub.f32 1.0, %v12948_v10  ;;  %v3716_v56 = vsub.f32 1.0, %v12953_v4 }
 0xdc0   : > { %10650 = vtanh.f32 %v3695_v36  ;;  %3756 = vrot.lane.b32.xlu0 %v10641_v13, %s11185_s20  ;;  %v3813_v13 = vmul.f32 %v12948_v10, %v12349_v53  ;;  %v3815_v53 = vmul.f32 %v12975_v30, %v12361_v31  ;;  %v3817_v31 = vmul.f32 %v12983_v41, %v12373_v2 }
 0xdc1   : > { %10652 = vtanh.f32 %v3694_v48 }
 0xdc2   : > { %v10643_v28 = vpop.eup %10642  ;;  %v3663_v44 = vpop.permute.xlu1 %3662 }
 0xdc3   : > { %v10645_v42 = vpop.eup %10644  ;;  %v3697_v37 = vadd.f32 %v3663_v44, %v12951_v27  ;;  %v3661_v22 = vpop.permute.xlu0 %3660  ;;  %3762 = vrot.lane.b32.xlu1 %v10643_v28, %s11185_s20  ;;  %v3812_v44 = vmul.f32 %v12953_v4, %v12343_v52  ;;  %v3814_v52 = vmul.f32 %v12977_v46, %v12355_v40  ;;  %v3816_v40 = vmul.f32 %v12985_v55, %v12367_v26 }
 0xdc4   : > { %v3696_v33 = vadd.f32 %v3661_v22, %v12956_v0  ;;  %3760 = vrot.lane.b32.xlu0 %v10645_v42, %s11185_s20 }
 0xdc5   : > { %10654 = vtanh.f32 %v3697_v37 }
 0xdc6   : > { %v10647_v35 = vpop.eup %10646  ;;  %10656 = vtanh.f32 %v3696_v33  ;;  %v3667_v6 = vpop.permute.xlu1 %3666  ;;  %v3719_v33 = vsub.f32 1.0, %v12975_v30 }
 0xdc7   : > { %v10649_v47 = vpop.eup %10648  ;;  %v3699_v51 = vadd.f32 %v3667_v6, %v12966_v59  ;;  %v3665_v57 = vpop.permute.xlu0 %3664  ;;  %3766 = vrot.lane.b32.xlu1 %v10647_v35, %s11185_s20  ;;  %v3845_v59 = vld [vmem:[%s14072_s9 + $0x8] sm:$0xff]  ;;  %v3718_v6 = vsub.f32 1.0, %v12977_v46 }
 0xdc8   : > { %v3698_v45 = vadd.f32 %v3665_v57, %v12970_v49  ;;  %3764 = vrot.lane.b32.xlu0 %v10649_v47, %s11185_s20  ;;  %v3846_v49 = vld [vmem:[%s14072_s9 + $0x10] sm:$0xff]  ;;  %v9986_v9 = vpack.c.bf16 %v3845_v59, %v3844_v38 }
 0xdc9   : > { %10658 = vtanh.f32 %v3699_v51  ;;  %v9990_v50 = vpack.c.bf16 %v3847_v32, %v3846_v49  ;;  %v3723_v49 = vsub.f32 1.0, %v12988_v39 }
 0xdca   : > { %v10651_v27 = vpop.eup %10650  ;;  %10660 = vtanh.f32 %v3698_v45  ;;  %9987 = vmatprep.subr.bf16.mxu1 %v9986_v9  ;;  %v3721_v45 = vsub.f32 1.0, %v12983_v41  ;;  %v3818_v41 = vmul.f32 %v12991_v34, %v12379_v7  ;;  %v3820_v7 = vmul.f32 %v13002_v24, %v12391_v61 }
 0xdcb   : > { %v10653_v0 = vpop.eup %10652  ;;  %3770 = vrot.lane.b32.xlu1 %v10651_v27, %s11185_s20  ;;  %9989 = vmatpush3.bf16.msra.mxu1 %v9986_v9  ;;  %v3822_v61 = vmul.f32 %v13007_v1, %v12403_v17  ;;  %v3824_v17 = vmul.f32 %v13017_v21, %v12415_v60 }
 0xdcc   : > { %3768 = vrot.lane.b32.xlu0 %v10653_v0, %s11185_s20  ;;  %9991 = vmatprep.subr.bf16.mxu1 %v9990_v50  ;;  %v3720_v0 = vsub.f32 1.0, %v12985_v55  ;;  %v3725_v55 = vsub.f32 1.0, %v12997_v11 }
 0xdcf   : > { %v10655_v5 = vpop.eup %10654  ;;  %9993 = vmatpush3.bf16.msra.mxu1 %v9990_v50  ;;  %v3722_v50 = vsub.f32 1.0, %v12991_v34 }
 0xdd0   : > { %v10657_v19 = vpop.eup %10656  ;;  %3774 = vrot.lane.b32.xlu1 %v10655_v5, %s11185_s20  ;;  %10000 = vmatprep.subr.bf16.mxu1 %v11188_v29  ;;  %v3819_v5 = vmul.f32 %v12988_v39, %v12385_v14  ;;  %v3821_v14 = vmul.f32 %v12997_v11, %v12397_v43  ;;  %v3823_v43 = vmul.f32 %v13004_v20, %v12409_v16 }
 0xdd1   : > { %3772 = vrot.lane.b32.xlu0 %v10657_v19, %s11185_s20  ;;  %v3825_v16 = vmul.f32 %v13015_v23, %v12421_v8 }
 0xdd3   : > { %v10659_v54 = vpop.eup %10658 }
 0xdd4   : > { %v10661_v12 = vpop.eup %10660  ;;  %3778 = vrot.lane.b32.xlu1 %v10659_v54, %s11185_s20 }
 0xdd5   : > { %3776 = vrot.lane.b32.xlu0 %v10661_v12, %s11185_s20 }
 0xe22   : > { %v3751_v36 = vpop.permute.xlu1 %3750 }
 0xe23   : > { %v3797_v48 = vmul.f32 %v3751_v36, %v3717_v25  ;;  %v3749_v28 = vpop.permute.xlu0 %3748  ;;  %v3724_v36 = vsub.f32 1.0, %v13002_v24 }
 0xe24   : > { %v3796_v42 = vmul.f32 %v3749_v28, %v3716_v56 }
 0xe25   : > { %v3829_v37 = vadd.f32 %v3813_v13, %v3797_v48  ;;  %v3727_v48 = vsub.f32 1.0, %v13004_v20 }
 0xe26   : > { %v3828_v22 = vadd.f32 %v3812_v44, %v3796_v42  ;;  %v3726_v42 = vsub.f32 1.0, %v13007_v1 }
 0xe27   : > { %3873 = vrot.lane.b32.xlu1 %v3829_v37, %s11185_s20 }
 0xe28   : > { %3871 = vrot.lane.b32.xlu0 %v3828_v22, %s11185_s20 }
 0xe2a   : > { %v3755_v35 = vpop.permute.xlu1 %3754 }
 0xe2b   : > { %v3799_v10 = vmul.f32 %v3755_v35, %v3719_v33  ;;  %v3753_v47 = vpop.permute.xlu0 %3752  ;;  %v3729_v35 = vsub.f32 1.0, %v13015_v23  ;;  %v3826_v23 = vmul.f32 %v13024_v63, %v12427_v62 }
 0xe2c   : > { %v3798_v4 = vmul.f32 %v3753_v47, %v3718_v6 }
 0xe2d   : > { %v3831_v51 = vadd.f32 %v3815_v53, %v3799_v10  ;;  %v3728_v53 = vsub.f32 1.0, %v13017_v21 }
 0xe2e   : > { %v3830_v57 = vadd.f32 %v3814_v52, %v3798_v4  ;;  %v3731_v52 = vsub.f32 1.0, %v13021_v15 }
 0xe2f   : > { %3877 = vrot.lane.b32.xlu1 %v3831_v51, %s11185_s20 }
 0xe30   : > { %3875 = vrot.lane.b32.xlu0 %v3830_v57, %s11185_s20  ;;  %v3730_v57 = vsub.f32 1.0, %v13024_v63 }
 0xe31   : > { %v3759_v27 = vpop.permute.xlu1 %3758 }
 0xe32   : > { %v3801_v30 = vmul.f32 %v3759_v27, %v3721_v45  ;;  %v3757_v38 = vpop.permute.xlu0 %3756  ;;  %v3827_v45 = vmul.f32 %v13021_v15, %v12433_v3 }
 0xe33   : > { %v3800_v46 = vmul.f32 %v3757_v38, %v3720_v0 }
 0xe34   : > { %v3833_v59 = vadd.f32 %v3817_v31, %v3801_v30 }
 0xe35   : > { %v3832_v9 = vadd.f32 %v3816_v40, %v3800_v46  ;;  %v3763_v32 = vpop.permute.xlu1 %3762 }
 0xe36   : > { %v3803_v19 = vmul.f32 %v3763_v32, %v3723_v49  ;;  %3881 = vrot.lane.b32.xlu1 %v3833_v59, %s11185_s20  ;;  %v3761_v2 = vpop.permute.xlu0 %3760 }
 0xe37   : > { %v3802_v54 = vmul.f32 %v3761_v2, %v3722_v50  ;;  %3879 = vrot.lane.b32.xlu0 %v3832_v9, %s11185_s20 }
 0xe38   : > { %v3835_v26 = vadd.f32 %v3819_v5, %v3803_v19 }
 0xe39   : > { %v3834_v12 = vadd.f32 %v3818_v41, %v3802_v54  ;;  %v3767_v25 = vpop.permute.xlu1 %3766  ;;  %v8630_v54 = vld [vmem:[#allocation11] ss:$0 sm:$0xff] }
 0xe3a   : > { %v3805_v39 = vmul.f32 %v3767_v25, %v3725_v55  ;;  %3885 = vrot.lane.b32.xlu1 %v3835_v26, %s11185_s20  ;;  %v3765_v56 = vpop.permute.xlu0 %3764 }
 0xe3b   : > { %v3804_v34 = vmul.f32 %v3765_v56, %v3724_v36  ;;  %3883 = vrot.lane.b32.xlu0 %v3834_v12, %s11185_s20 }
 0xe3c   : > { %v3837_v13 = vadd.f32 %v3821_v14, %v3805_v39 }
 0xe3d   : > { %v3836_v28 = vadd.f32 %v3820_v7, %v3804_v34  ;;  %v3771_v44 = vpop.permute.xlu1 %3770 }
 0xe3e   : > { %v3807_v11 = vmul.f32 %v3771_v44, %v3727_v48  ;;  %3889 = vrot.lane.b32.xlu1 %v3837_v13, %s11185_s20  ;;  %v3769_v37 = vpop.permute.xlu0 %3768 }
 0xe3f   : > { %v3806_v24 = vmul.f32 %v3769_v37, %v3726_v42  ;;  %3887 = vrot.lane.b32.xlu0 %v3836_v28, %s11185_s20 }
 0xe40   : > { %v3839_v22 = vadd.f32 %v3823_v43, %v3807_v11 }
 0xe41   : > { %v3838_v33 = vadd.f32 %v3822_v61, %v3806_v24 }
 0xe42   : > { %v3775_v6 = vpop.permute.xlu1 %3774  ;;  %3893 = vrot.lane.b32.xlu1 %v3839_v22, %s11185_s20 }
 0xe43   : > { %v3809_v20 = vmul.f32 %v3775_v6, %v3729_v35  ;;  %v3773_v10 = vpop.permute.xlu0 %3772  ;;  %3891 = vrot.lane.b32.xlu0 %v3838_v33, %s11185_s20 }
 0xe44   : > { %v3808_v1 = vmul.f32 %v3773_v10, %v3728_v53 }
 0xe45   : > { %v3841_v47 = vadd.f32 %v3825_v16, %v3809_v20 }
 0xe46   : > { %v3840_v4 = vadd.f32 %v3824_v17, %v3808_v1  ;;  %v3779_v51 = vpop.permute.xlu1 %3778 }
 0xe47   : > { %v3811_v27 = vmul.f32 %v3779_v51, %v3731_v52  ;;  %3897 = vrot.lane.b32.xlu1 %v3841_v47, %s11185_s20  ;;  %v3777_v8 = vpop.permute.xlu0 %3776 }
 0xe48   : > { %v3810_v0 = vmul.f32 %v3777_v8, %v3730_v57  ;;  %3895 = vrot.lane.b32.xlu0 %v3840_v4, %s11185_s20 }
 0xe49   : > { %v3843_v60 = vadd.f32 %v3827_v45, %v3811_v27 }
 0xe4a   : > { %v3842_v21 = vadd.f32 %v3826_v23, %v3810_v0 }
 0xe4b   : > { %3901 = vrot.lane.b32.xlu1 %v3843_v60, %s11185_s20 }
 0xe4c   : > { %3899 = vrot.lane.b32.xlu0 %v3842_v21, %s11185_s20 }
 0xe99   : > { %v3874_v31 = vpop.permute.xlu1 %3873 }
 0xe9a   : > { %v3872_v30 = vpop.permute.xlu0 %3871 }
 0xe9b   : > { %v9995_v38 = vpack.c.bf16 %v3874_v31, %v3872_v30  ;;  %9474 = vmatprep.mubr.msk.f32.mxu1 %vm941_vm2, %v3872_v30 }
 0xe9c   : > { %9475 = vmatmul.mubr.msk.f32.vlgmr.msra.gmra.mrb[96].mxu1 %vm941_vm2, %v3874_v31 }
 0xe9d   : > { %9996 = vmatpush3.bf16.msra.mxu0 %v9995_v38 }
 0xe9e   : > { %9997 = vmatprep.subr.bf16.mxu0 %v11188_v29 }
 0xea1   : > { %v13144_v62 = vpop.permute.xlu1 %3877 }
 0xea2   : > { %v13146_v3 = vpop.permute.xlu0 %3875 }
 0xea3   : > { %9477 = vmatprep.mubr.msk.f32.mxu1 %vm941_vm2, %v13146_v3 }
 0xea4   : > { %9478 = vmatmul.mubr.msk.f32.gmra.mrb[98].mxu1 %vm941_vm2, %v13144_v62 }
 0xea8   : > { %v3882_v15 = vpop.permute.xlu1 %3881 }
 0xea9   : > { %v3880_v63 = vpop.permute.xlu0 %3879 }
 0xeaa   : > { %v10001_v40 = vpack.c.bf16 %v3882_v15, %v3880_v63  ;;  %9480 = vmatprep.mubr.msk.f32.mxu1 %vm941_vm2, %v3880_v63 }
 0xeab   : > { %9481 = vmatmul.mubr.msk.f32.gmra.mrb[100].mxu1 %vm941_vm2, %v3882_v15 }
 0xeac   : > { %v13154_v46 = vpop.permute.xlu1 %3885  ;;  %10002 = vmatpush3.bf16.msra.mxu1 %v10001_v40 }
 0xead   : > { %v13156_v59 = vpop.permute.xlu0 %3883  ;;  %10006 = vmatprep.subr.bf16.mxu1 %v11188_v29 }
 0xeae   : > { %9483 = vmatprep.mubr.msk.f32.mxu1 %vm941_vm2, %v13156_v59 }
 0xeaf   : > { %9484 = vmatmul.mubr.msk.f32.gmra.mrb[102].mxu1 %vm941_vm2, %v13154_v46 }
 0xeb0   : > { %v13163_v49 = vpop.permute.xlu1 %3889 }
 0xeb1   : > { %v13165_v9 = vpop.permute.xlu0 %3887 }
 0xeb2   : > { %9486 = vmatprep.mubr.msk.f32.mxu1 %vm941_vm2, %v13165_v9 }
 0xeb3   : > { %9487 = vmatmul.mubr.msk.f32.gmra.mrb[104].mxu1 %vm941_vm2, %v13163_v49 }
 0xeb4   : > { %v13171_v32 = vpop.permute.xlu1 %3893 }
 0xeb5   : > { %v13173_v50 = vpop.permute.xlu0 %3891 }
 0xeb6   : > { %9489 = vmatprep.mubr.msk.f32.mxu1 %vm941_vm2, %v13173_v50 }
 0xeb7   : > { %9490 = vmatmul.mubr.msk.f32.gmra.mrb[106].mxu1 %vm941_vm2, %v13171_v32 }
 0xeb9   : > { %v13179_v5 = vpop.permute.xlu1 %3897 }
 0xeba   : > { %v13181_v19 = vpop.permute.xlu0 %3895 }
 0xebb   : > { %9492 = vmatprep.mubr.msk.f32.mxu1 %vm941_vm2, %v13181_v19 }
 0xebc   : > { %9493 = vmatmul.mubr.msk.f32.gmra.mrb[108].mxu1 %vm941_vm2, %v13179_v5 }
 0xebd   : > { %v13189_v41 = vpop.permute.xlu1 %3901 }
 0xebe   : > { %v13187_v2 = vpop.permute.xlu0 %3899 }
 0xebf   : > { %9495 = vmatprep.mubr.msk.f32.mxu1 %vm941_vm2, %v13187_v2 }
 0xec0   : > { %9496 = vmatmul.mubr.msk.f32.gmra.mrb[110].mxu1 %vm941_vm2, %v13189_v41 }
 0xec1   : > { %9516 = vmatprep.mubr.msk.f32.mxu1 %vm11189_vm7, %v14153_v58 }
 0xf6f   : > { %v9476_v26 = vpop.f32.mrb[96].mxu1 }
 0xf70   : > { %v4001_v55 = vpop.f32.mrb[97].mxu1  ;;  %v4007_v25 = vadd.f32 %v9476_v26, %v8630_v54 }
 0xf71   : > { %v4002_v12 = vadd.f32 %v8630_v54, %v4001_v55 }
 0xf73   : > { %4080 = vxpose.xlu0.b32.start [1/2] (short) (narrow) %v4002_v12, 8 }
 0xf77   : > { %4081 = vxpose.xlu0.b32.end [2/2] (short) (narrow) %v4007_v25, 8  ;;  %v9479_v36 = vpop.f32.mrb[98].mxu1 }
 0xf78   : > { %v4011_v14 = vpop.f32.mrb[99].mxu1  ;;  %v4017_v56 = vadd.f32 %v9479_v36, %v8630_v54 }
 0xf79   : > { %v4012_v39 = vadd.f32 %v8630_v54, %v4011_v14 }
 0xf7b   : > { %4112 = vxpose.xlu1.b32.start [1/2] (short) (narrow) %v4012_v39, 8 }
 0xf7e   : > { %v9482_v7 = vpop.f32.mrb[100].mxu1 }
 0xf7f   : > { %v4021_v34 = vpop.f32.mrb[101].mxu1  ;;  %4113 = vxpose.xlu1.b32.end [2/2] (short) (narrow) %v4017_v56, 8  ;;  %v4027_v44 = vadd.f32 %v9482_v7, %v8630_v54 }
 0xf80   : > { %v4022_v13 = vadd.f32 %v8630_v54, %v4021_v34 }
 0xf82   : > { %4144 = vxpose.xlu0.b32.start [1/2] (short) (narrow) %v4022_v13, 8  ;;  %v9485_v48 = vpop.f32.mrb[102].mxu1 }
 0xf83   : > { %v4031_v28 = vpop.f32.mrb[103].mxu1  ;;  %v4037_v22 = vadd.f32 %v9485_v48, %v8630_v54 }
 0xf84   : > { %v4032_v11 = vadd.f32 %v8630_v54, %v4031_v28 }
 0xf86   : > { %4145 = vxpose.xlu0.b32.end [2/2] (short) (narrow) %v4027_v44, 8  ;;  %v9488_v42 = vpop.f32.mrb[104].mxu1 }
 0xf87   : > { %v4041_v43 = vpop.f32.mrb[105].mxu1  ;;  %v4047_v33 = vadd.f32 %v9488_v42, %v8630_v54 }
 0xf88   : > { %v4042_v37 = vadd.f32 %v8630_v54, %v4041_v43 }
 0xf8a   : > { %4176 = vxpose.xlu0.b32.start [1/2] (short) (narrow) %v4032_v11, 8  ;;  %4208 = vxpose.xlu1.b32.start [1/2] (short) (narrow) %v4042_v37, 8  ;;  %v9491_v61 = vpop.f32.mrb[106].mxu1 }
 0xf8b   : > { %v4051_v24 = vpop.f32.mrb[107].mxu1  ;;  %v4057_v10 = vadd.f32 %v9491_v61, %v8630_v54 }
 0xf8c   : > { %v4052_v6 = vadd.f32 %v8630_v54, %v4051_v24 }
 0xf8e   : > { %4177 = vxpose.xlu0.b32.end [2/2] (short) (narrow) %v4037_v22, 8  ;;  %4209 = vxpose.xlu1.b32.end [2/2] (short) (narrow) %v4047_v33, 8 }
 0xf8f   : > { %v9494_v35 = vpop.f32.mrb[108].mxu1 }
 0xf90   : > { %v4061_v53 = vpop.f32.mrb[109].mxu1  ;;  %v4067_v1 = vadd.f32 %v9494_v35, %v8630_v54 }
 0xf91   : > { %v4062_v16 = vadd.f32 %v8630_v54, %v4061_v53 }
 0xf92   : > { %4240 = vxpose.xlu0.b32.start [1/2] (short) (narrow) %v4052_v6, 8 }
 0xf93   : > { %4272 = vxpose.xlu1.b32.start [1/2] (short) (narrow) %v4062_v16, 8  ;;  %v9497_v20 = vpop.f32.mrb[110].mxu1 }
 0xf94   : > { %v4071_v17 = vpop.f32.mrb[111].mxu1  ;;  %v4077_v52 = vadd.f32 %v9497_v20, %v8630_v54 }
 0xf95   : > { %v4072_v47 = vadd.f32 %v8630_v54, %v4071_v17 }
 0xf96   : > { %4241 = vxpose.xlu0.b32.end [2/2] (short) (narrow) %v4057_v10, 8 }
 0xf97   : > { %4273 = vxpose.xlu1.b32.end [2/2] (short) (narrow) %v4067_v1, 8 }
 0xf9a   : > { %4304 = vxpose.xlu0.b32.start [1/2] (short) (narrow) %v4072_v47, 8 }
 0xf9e   : > { %4305 = vxpose.xlu0.b32.end [2/2] (short) (narrow) %v4077_v52, 8 }
 0xff3   : > { %v4096_v4 = vpop.trf.xlu0 }
 0xff4   : > { %v4337_v51 = vsel %vm4336_vm6, %v4096_v4, -inf }
 0xff5   : > { %4338 = vmax.xlane.f32.xlu1 %v4337_v51 }
 0xffb   : > { %v4128_v57 = vpop.trf.xlu1 }
 0xffc   : > { %v4340_v45 = vsel %vm4336_vm6, %v4128_v57, -inf }
 0xffd   : > { %4341 = vmax.xlane.f32.xlu0 %v4340_v45 }
0x1002   : > { %v4160_v27 = vpop.trf.xlu0 }
0x1003   : > { %v4343_v8 = vsel %vm4336_vm6, %v4160_v27, -inf }
0x1004   : > { %4344 = vmax.xlane.f32.xlu1 %v4343_v8 }
0x100a   : > { %v4224_v23 = vpop.trf.xlu1  ;;  %v4192_v0 = vpop.trf.xlu0 }
0x100b   : > { %v4349_v60 = vsel %vm4336_vm6, %v4224_v23, -inf  ;;  %v4346_v21 = vsel %vm4336_vm6, %v4192_v0, -inf }
0x100c   : > { %4350 = vmax.xlane.f32.xlu0 %v4349_v60  ;;  %4347 = vmax.xlane.f32.xlu1 %v4346_v21 }
0x1012   : > { %v4256_v31 = vpop.trf.xlu0 }
0x1013   : > { %v4288_v30 = vpop.trf.xlu1  ;;  %v4352_v38 = vsel %vm4336_vm6, %v4256_v31, -inf }
0x1014   : > { %v4355_v15 = vsel %vm4336_vm6, %v4288_v30, -inf  ;;  %4353 = vmax.xlane.f32.xlu1 %v4352_v38 }
0x1015   : > { %4356 = vmax.xlane.f32.xlu0 %v4355_v15 }
0x101a   : > { %v4320_v63 = vpop.trf.xlu0 }
0x101b   : > { %v4358_v40 = vsel %vm4336_vm6, %v4320_v63, -inf }
0x101c   : > { %4359 = vmax.xlane.f32.xlu1 %v4358_v40  ;;  %v10004_v40 = vpack.c.bf16 %v13154_v46, %v13156_v59 }
0x1082   : > { %v4339_v54 = vpop.xlane.xlu1 %4338 }
0x1083   : > { %v4361_v26 = vsub.f32 %v4096_v4, %v4339_v54 }
0x1085   : > { %v4369_v55 = vmul.f32 1.442695, %v4361_v26 }
0x1087   : > { %10662 = vpow2.f32 %v4369_v55  ;;  %v10007_v55 = vpack.c.bf16 %v13163_v49, %v13165_v9  ;;  %v10010_v49 = vpack.c.bf16 %v13171_v32, %v13173_v50  ;;  %v5034_v32 = vld [vmem:[#allocation7 + $0x80] sm:$0xff]  ;;  %v5036_v50 = vld [vmem:[#allocation7 + $0x90] sm:$0xff] }
0x108a   : > { %v4342_v12 = vpop.xlane.xlu0 %4341 }
0x108b   : > { %v4362_v25 = vsub.f32 %v4128_v57, %v4342_v12 }
0x108d   : > { %v4371_v36 = vmul.f32 1.442695, %v4362_v25  ;;  %v5035_v25 = vld [vmem:[#allocation7 + $0x88] sm:$0xff] }
0x108f   : > { %10664 = vpow2.f32 %v4371_v36  ;;  %v5037_v36 = vld [vmem:[#allocation7 + $0x98] sm:$0xff] }
0x1091   : > { %v10663_v14 = vpop.eup %10662  ;;  %v4345_v39 = vpop.xlane.xlu1 %4344 }
0x1092   : > { %v4363_v56 = vsub.f32 %v4160_v27, %v4345_v39  ;;  %v4385_v7 = vsel %vm4336_vm6, %v10663_v14, 0.0 }
0x1093   : > { %4386 = vadd.xlane.f32.xlu0 %v4385_v7  ;;  %v10018_v7 = vpack.c.bf16 %v5037_v36, %v5035_v25 }
0x1094   : > { %v4373_v34 = vmul.f32 1.442695, %v4363_v56  ;;  %v10013_v56 = vpack.c.bf16 %v13179_v5, %v13181_v19  ;;  %v5039_v5 = vld [vmem:[#allocation7 + $0xa8] sm:$0xff]  ;;  %v5041_v19 = vld [vmem:[#allocation7 + $0xb8] sm:$0xff] }
0x1096   : > { %10666 = vpow2.f32 %v4373_v34 }
0x1099   : > { %v4348_v13 = vpop.xlane.xlu1 %4347  ;;  %v4351_v48 = vpop.xlane.xlu0 %4350 }
0x109a   : > { %v10665_v28 = vpop.eup %10664  ;;  %v4364_v44 = vsub.f32 %v4192_v0, %v4348_v13  ;;  %v4365_v42 = vsub.f32 %v4224_v23, %v4351_v48 }
0x109b   : > { %v4388_v43 = vsel %vm4336_vm6, %v10665_v28, 0.0 }
0x109c   : > { %v4375_v11 = vmul.f32 1.442695, %v4364_v44  ;;  %v4377_v37 = vmul.f32 1.442695, %v4365_v42  ;;  %4389 = vadd.xlane.f32.xlu1 %v4388_v43  ;;  %v10020_v44 = vpack.c.bf16 %v5036_v50, %v5034_v32  ;;  %v10016_v42 = vpack.c.bf16 %v13189_v41, %v13187_v2 }
0x109e   : > { %10668 = vpow2.f32 %v4375_v11  ;;  %v10022_v11 = vpack.c.bf16 %v5041_v19, %v5039_v5 }
0x109f   : > { %10670 = vpow2.f32 %v4377_v37  ;;  %v5038_v37 = vld [vmem:[#allocation7 + $0xa0] sm:$0xff] }
0x10a0   : > { %v10667_v61 = vpop.eup %10666 }
0x10a1   : > { %v4354_v24 = vpop.xlane.xlu1 %4353  ;;  %v4391_v22 = vsel %vm4336_vm6, %v10667_v61, 0.0 }
0x10a2   : > { %v4366_v33 = vsub.f32 %v4256_v31, %v4354_v24  ;;  %v4357_v35 = vpop.xlane.xlu0 %4356  ;;  %4392 = vadd.xlane.f32.xlu0 %v4391_v22 }
0x10a3   : > { %v4367_v6 = vsub.f32 %v4288_v30, %v4357_v35  ;;  %v9998_v30 = vpack.c.bf16 %v13144_v62, %v13146_v3 }
0x10a4   : > { %v4379_v53 = vmul.f32 1.442695, %v4366_v33 }
0x10a5   : > { %v4381_v16 = vmul.f32 1.442695, %v4367_v6 }
0x10a6   : > { %10672 = vpow2.f32 %v4379_v53 }
0x10a7   : > { %10674 = vpow2.f32 %v4381_v16 }
0x10a8   : > { %v10669_v20 = vpop.eup %10668 }
0x10a9   : > { %v10671_v10 = vpop.eup %10670  ;;  %v4360_v17 = vpop.xlane.xlu1 %4359  ;;  %v4394_v1 = vsel %vm4336_vm6, %v10669_v20, 0.0 }
0x10aa   : > { %v4368_v47 = vsub.f32 %v4320_v63, %v4360_v17  ;;  %4395 = vadd.xlane.f32.xlu1 %v4394_v1  ;;  %v4397_v52 = vsel %vm4336_vm6, %v10671_v10, 0.0 }
0x10ab   : > { %4398 = vadd.xlane.f32.xlu0 %v4397_v52 }
0x10ac   : > { %v4383_v4 = vmul.f32 1.442695, %v4368_v47 }
0x10ae   : > { %10676 = vpow2.f32 %v4383_v4 }
0x10b0   : > { %v13208_v51 = vpop.eup %10672 }
0x10b1   : > { %v13210_v57 = vpop.eup %10674  ;;  %v4400_v45 = vsel %vm4336_vm6, %v13208_v51, 0.0 }
0x10b2   : > { %4401 = vadd.xlane.f32.xlu1 %v4400_v45  ;;  %v4403_v27 = vsel %vm4336_vm6, %v13210_v57, 0.0  ;;  %v5043_v45 = vld [vmem:[#allocation8 + $0x4] sm:$0x3] }
0x10b3   : > { %4404 = vadd.xlane.f32.xlu0 %v4403_v27  ;;  %v5048_v27 = vrot.slane %v5043_v45, %v11620_v18 }
0x10b8   : > { %v13220_v8 = vpop.eup %10676 }
0x10b9   : > { %v4406_v23 = vsel %vm4336_vm6, %v13220_v8, 0.0 }
0x10ba   : > { %4407 = vadd.xlane.f32.xlu1 %v4406_v23 }
0x1120   : > { %v4387_v0 = vpop.xlane.xlu0 %4386 }
0x1121   : > { %10678 = vrcp.f32 %v4387_v0 }
0x1129   : > { %v4390_v60 = vpop.xlane.xlu1 %4389 }
0x112a   : > { %10680 = vrcp.f32 %v4390_v60  ;;  %v14173_v60 = vld [vmem:[#allocation19_spill] sm:$0xff] }
0x112b   : > { %v10679_v21 = vpop.eup %10678 }
0x112c   : > { %v4417_v31 = vmul.f32 %v10679_v21, %v10663_v14  ;;  %v5052_v21 = vrot.slane %v5043_v45, %v14173_v60 }
0x112e   : > { %9503 = vmatmul.mubr.msk.f32.vlgmr.msra.gmra.mrb[80].mxu0 %vm4336_vm6, %v4417_v31 }
0x112f   : > { %v4393_v38 = vpop.xlane.xlu0 %4392  ;;  %9999 = vmatpush3.bf16.msra.mxu0 %v9998_v30  ;;  %9509 = vmatprep.mubr.msk.f32.mxu0 %vm11189_vm7, %v14153_v58 }
0x1130   : > { %10682 = vrcp.f32 %v4393_v38  ;;  %10003 = vmatprep.subr.bf16.mxu0 %v11188_v29 }
0x1134   : > { %v10681_v15 = vpop.eup %10680 }
0x1135   : > { %v4418_v63 = vmul.f32 %v10681_v15, %v10665_v28 }
0x1137   : > { %v4396_v54 = vpop.xlane.xlu1 %4395  ;;  %9510 = vmatmul.mubr.msk.f32.vlgmr.msra.gmra.mrb[82].mxu0 %vm4336_vm6, %v4418_v63 }
0x1138   : > { %10684 = vrcp.f32 %v4396_v54  ;;  %v4399_v62 = vpop.xlane.xlu0 %4398  ;;  %10005 = vmatpush3.bf16.msra.mxu0 %v10004_v40  ;;  %9523 = vmatprep.mubr.msk.f32.mxu0 %vm11189_vm7, %v14153_v58 }
0x1139   : > { %10686 = vrcp.f32 %v4399_v62  ;;  %10009 = vmatprep.subr.bf16.mxu0 %v11188_v29 }
0x113a   : > { %v10683_v3 = vpop.eup %10682 }
0x113b   : > { %v4419_v26 = vmul.f32 %v10683_v3, %v10667_v61  ;;  %v5040_v61 = vld [vmem:[#allocation7 + $0xb0] sm:$0xff] }
0x113d   : > { %9517 = vmatmul.mubr.msk.f32.vlgmr.msra.gmra.mrb[112].mxu1 %vm4336_vm6, %v4419_v26 }
0x113e   : > { %10008 = vmatpush3.bf16.msra.mxu1 %v10007_v55  ;;  %9530 = vmatprep.mubr.msk.f32.mxu1 %vm11189_vm7, %v14153_v58 }
0x113f   : > { %v4402_v46 = vpop.xlane.xlu1 %4401  ;;  %10012 = vmatprep.subr.bf16.mxu1 %v11188_v29 }
0x1140   : > { %10688 = vrcp.f32 %v4402_v46  ;;  %v4405_v59 = vpop.xlane.xlu0 %4404 }
0x1141   : > { %10690 = vrcp.f32 %v4405_v59 }
0x1142   : > { %v10685_v12 = vpop.eup %10684 }
0x1143   : > { %v10687_v14 = vpop.eup %10686  ;;  %v4420_v39 = vmul.f32 %v10685_v12, %v10669_v20 }
0x1144   : > { %v4421_v9 = vmul.f32 %v10687_v14, %v10671_v10 }
0x1145   : > { %9524 = vmatmul.mubr.msk.f32.vlgmr.msra.gmra.mrb[84].mxu0 %vm4336_vm6, %v4420_v39 }
0x1146   : > { %9531 = vmatmul.mubr.msk.f32.vlgmr.msra.gmra.mrb[114].mxu1 %vm4336_vm6, %v4421_v9  ;;  %10011 = vmatpush3.bf16.msra.mxu0 %v10010_v49 }
0x1147   : > { %10014 = vmatpush3.bf16.msra.mxu1 %v10013_v56  ;;  %v4408_v34 = vpop.xlane.xlu1 %4407  ;;  %9537 = vmatprep.mubr.msk.f32.mxu0 %vm11189_vm7, %v14153_v58 }
0x1148   : > { %10692 = vrcp.f32 %v4408_v34  ;;  %9544 = vmatprep.mubr.msk.f32.mxu1 %vm11189_vm7, %v14153_v58  ;;  %10015 = vmatprep.subr.bf16.mxu0 %v11188_v29  ;;  %v10024_v29 = vpack.c.bf16 %v5040_v61, %v5038_v37 }
0x1149   : > { %10019 = vmatprep.subr.bf16.mxu1 %v10018_v7 }
0x114a   : > { %v10689_v13 = vpop.eup %10688 }
0x114b   : > { %v10691_v48 = vpop.eup %10690  ;;  %v4422_v28 = vmul.f32 %v10689_v13, %v13208_v51 }
0x114c   : > { %v4423_v43 = vmul.f32 %v10691_v48, %v13210_v57 }
0x114d   : > { %9538 = vmatmul.mubr.msk.f32.vlgmr.msra.gmra.mrb[86].mxu0 %vm4336_vm6, %v4422_v28 }
0x114e   : > { %9545 = vmatmul.mubr.msk.f32.vlgmr.msra.gmra.mrb[116].mxu1 %vm4336_vm6, %v4423_v43  ;;  %10017 = vmatpush3.bf16.msra.mxu0 %v10016_v42 }
0x114f   : > { %9551 = vmatprep.mubr.msk.f32.mxu0 %vm11189_vm7, %v14153_v58  ;;  %10021 = vmatpush1.bf16.msra.mxu1 %v10020_v44 }
0x1150   : > { %10023 = vmatprep.subr.bf16.mxu1 %v10022_v11  ;;  %5143 = vmatprep.mubr.f32.mxu1 %v14153_v58 }
0x1152   : > { %v10693_v24 = vpop.eup %10692 }
0x1153   : > { %v4424_v2 = vmul.f32 %v10693_v24, %v13220_v8  ;;  %10025 = vmatpush1.bf16.msra.mxu1 %v10024_v29 }
0x1155   : > { %9552 = vmatmul.mubr.msk.f32.vlgmr.msra.gmra.mrb[88].mxu0 %vm4336_vm6, %v4424_v2  ;;  %v13361_v2 = vld [vmem:[#allocation3 + $0x8] sm:$0xff]  ;;  %vm8275_vm6 = vcmask 1043459  }
0x1156   : > { %vm5322_vm8 = vcmp.eq.f32.partialorder %v13361_v2, 0.0 }
0x1201   : > { %v13264_v41 = vpop.f32.mrb[80].mxu0 }
0x1202   : > { %v9504_v22 = vpop.f32.mrb[81].mxu0  ;;  %8655 = vmatmul.mubr.msk.f32.vlgmr.msra.gmra.mrb[118].mxu1 %vm941_vm2, %v13264_v41 }
0x1203   : > { %5149 = vmatprep.mubr.f32.mxu1 %v14153_v58  ;;  %v13363_v22 = vld [vmem:[#allocation3] sm:$0xff] }
0x1204   : > { %vm5321_vm10 = vcmp.eq.f32.partialorder %v13363_v22, 0.0 }
0x120a   : > { %v13269_v33 = vpop.f32.mrb[82].mxu0 }
0x120b   : > { %v9511_v35 = vpop.f32.mrb[83].mxu0  ;;  %8656 = vmatmul.mubr.msk.f32.gmra.mrb[120].mxu1 %vm941_vm2, %v13269_v33 }
0x120c   : > { %5155 = vmatprep.mubr.f32.mxu1 %v14153_v58 }
0x1210   : > { %v13274_v6 = vpop.f32.mrb[112].mxu1 }
0x1211   : > { %v9518_v53 = vpop.f32.mrb[113].mxu1  ;;  %8657 = vmatmul.mubr.msk.f32.gmra.mrb[122].mxu1 %vm941_vm2, %v13274_v6 }
0x1212   : > { %5161 = vmatprep.mubr.f32.mxu1 %v14153_v58 }
0x1218   : > { %v13279_v16 = vpop.f32.mrb[84].mxu0 }
0x1219   : > { %v13281_v20 = vpop.f32.mrb[114].mxu1  ;;  %v9525_v10 = vpop.f32.mrb[85].mxu0  ;;  %8658 = vmatmul.mubr.msk.f32.gmra.mrb[124].mxu1 %vm941_vm2, %v13279_v16 }
0x121a   : > { %v9532_v17 = vpop.f32.mrb[115].mxu1  ;;  %5167 = vmatprep.mubr.f32.mxu1 %v14153_v58 }
0x121b   : > { %v13367_v17 = vld [vmem:[#allocation3 + $0x18] sm:$0xff] }
0x121c   : > { %vm5324_vm11 = vcmp.eq.f32.partialorder %v13367_v17, 0.0 }
0x121d   : > { %8659 = vmatmul.mubr.msk.f32.gmra.mrb[126].mxu1 %vm941_vm2, %v13281_v20 }
0x121e   : > { %5173 = vmatprep.mubr.f32.mxu1 %v14153_v58 }
0x1220   : > { %v13289_v1 = vpop.f32.mrb[86].mxu0 }
0x1221   : > { %v13291_v47 = vpop.f32.mrb[116].mxu1  ;;  %v9539_v52 = vpop.f32.mrb[87].mxu0  ;;  %8660 = vmatmul.mubr.msk.f32.gmra.mrb[128].mxu1 %vm941_vm2, %v13289_v1 }
0x1222   : > { %v9546_v4 = vpop.f32.mrb[117].mxu1  ;;  %5179 = vmatprep.mubr.f32.mxu1 %v14153_v58 }
0x1223   : > { %v13369_v4 = vld [vmem:[#allocation3 + $0x10] sm:$0xff] }
0x1224   : > { %vm5323_vm12 = vcmp.eq.f32.partialorder %v13369_v4, 0.0 }
0x1225   : > { %8661 = vmatmul.mubr.msk.f32.gmra.mrb[130].mxu1 %vm941_vm2, %v13291_v47 }
0x1226   : > { %5185 = vmatprep.mubr.f32.mxu1 %v14153_v58 }
0x1228   : > { %v13299_v51 = vpop.f32.mrb[88].mxu0 }
0x1229   : > { %v9553_v57 = vpop.f32.mrb[89].mxu0  ;;  %8662 = vmatmul.mubr.msk.f32.gmra.mrb[132].mxu1 %vm941_vm2, %v13299_v51 }
0x12d5   : > { %v5145_v8 = vpop.f32.mrb[118].mxu1 }
0x12d6   : > { %v13304_v23 = vadd.f32 %v5145_v8, %v5048_v27  ;;  %v5147_v0 = vpop.f32.mrb[119].mxu1 }
0x12d7   : > { %v5148_v15 = vadd.f32 %v5147_v0, %v5052_v21 }
0x12d8   : > { %9570 = vmatprep.mubr.msk.f32.mxu0 %vm941_vm2, %v13304_v23 }
0x12de   : > { %v5151_v31 = vpop.f32.mrb[120].mxu1 }
0x12df   : > { %v13309_v30 = vadd.f32 %v5151_v31, %v5048_v27  ;;  %v5153_v38 = vpop.f32.mrb[121].mxu1 }
0x12e0   : > { %v5154_v63 = vadd.f32 %v5153_v38, %v5052_v21  ;;  %v13381_v38 = vld [vmem:[#allocation3 + $0x28] sm:$0xff] }
0x12e1   : > { %v10026_v40 = vpack.c.bf16 %v13309_v30, %v13304_v23  ;;  %vm5326_vm13 = vcmp.eq.f32.partialorder %v13381_v38, 0.0 }
0x12e2   : > { %v10050_v54 = vpack.c.bf16 %v5154_v63, %v5148_v15  ;;  %v13383_v63 = vld [vmem:[#allocation3 + $0x20] sm:$0xff] }
0x12e3   : > { %10028 = vmatprep.subr.msk.bf16.mxu0 %vm11642_vm3, %v10026_v40  ;;  %vm5325_vm14 = vcmp.eq.f32.partialorder %v13383_v63, 0.0 }
0x12e4   : > { %v5157_v3 = vpop.f32.mrb[122].mxu1  ;;  %10031 = vmatpush3.bf16.xpose.msk.msra.mxu0 %vm11642_vm3, %v10026_v40  ;;  %10051 = vmatprep.subr.bf16.mxu1 %v10050_v54 }
0x12e5   : > { %v5159_v26 = vpop.f32.mrb[123].mxu1  ;;  %10053 = vmatpush3.bf16.msra.mxu1 %v10050_v54  ;;  %v13317_v46 = vadd.f32 %v5157_v3, %v5048_v27 }
0x12e6   : > { %v5160_v25 = vadd.f32 %v5159_v26, %v5052_v21 }
0x12ec   : > { %v5163_v55 = vpop.f32.mrb[124].mxu1 }
0x12ed   : > { %v13319_v59 = vadd.f32 %v5163_v55, %v5048_v27  ;;  %v5165_v12 = vpop.f32.mrb[125].mxu1 }
0x12ee   : > { %v5166_v36 = vadd.f32 %v5165_v12, %v5052_v21 }
0x12ef   : > { %v10032_v14 = vpack.c.bf16 %v13319_v59, %v13317_v46 }
0x12f0   : > { %v10054_v39 = vpack.c.bf16 %v5166_v36, %v5160_v25  ;;  %v5169_v49 = vpop.f32.mrb[126].mxu1  ;;  %v13395_v36 = vld [vmem:[#allocation3 + $0x38] sm:$0xff] }
0x12f1   : > { %v5171_v9 = vpop.f32.mrb[127].mxu1  ;;  %10034 = vmatprep.subr.msk.bf16.mxu0 %vm11642_vm3, %v10032_v14  ;;  %v13327_v7 = vadd.f32 %v5169_v49, %v5048_v27  ;;  %vm5328_vm15 = vcmp.eq.f32.partialorder %v13395_v36, 0.0 }
0x12f2   : > { %10037 = vmatpush3.bf16.xpose.msk.msra.mxu0 %vm11642_vm3, %v10032_v14  ;;  %10055 = vmatprep.subr.bf16.mxu1 %v10054_v39  ;;  %v5172_v50 = vadd.f32 %v5171_v9, %v5052_v21 }
0x12f3   : > { %10057 = vmatpush3.bf16.msra.mxu1 %v10054_v39  ;;  %v13397_v39 = vld [vmem:[#allocation3 + $0x30] sm:$0xff] }
0x12f4   : > { %v5175_v56 = vpop.f32.mrb[128].mxu1  ;;  %vm5327_vm0 = vcmp.eq.f32.partialorder %v13397_v39, 0.0 }
0x12f5   : > { %v13329_v34 = vadd.f32 %v5175_v56, %v5048_v27  ;;  %v5177_v32 = vpop.f32.mrb[129].mxu1 }
0x12f6   : > { %v5178_v5 = vadd.f32 %v5177_v32, %v5052_v21 }
0x12f7   : > { %v10038_v19 = vpack.c.bf16 %v13329_v34, %v13327_v7 }
0x12f8   : > { %v10058_v13 = vpack.c.bf16 %v5178_v5, %v5172_v50  ;;  %v5181_v48 = vpop.f32.mrb[130].mxu1 }
0x12f9   : > { %v5183_v28 = vpop.f32.mrb[131].mxu1  ;;  %10040 = vmatprep.subr.msk.bf16.mxu0 %vm11642_vm3, %v10038_v19  ;;  %v13337_v42 = vadd.f32 %v5181_v48, %v5048_v27 }
0x12fa   : > { %10043 = vmatpush3.bf16.xpose.msk.msra.mxu0 %vm11642_vm3, %v10038_v19  ;;  %10059 = vmatprep.subr.bf16.mxu1 %v10058_v13  ;;  %v5184_v37 = vadd.f32 %v5183_v28, %v5052_v21 }
0x12fb   : > { %10061 = vmatpush3.bf16.msra.mxu1 %v10058_v13 }
0x12fc   : > { %v5187_v44 = vpop.f32.mrb[132].mxu1 }
0x12fd   : > { %v13339_v43 = vadd.f32 %v5187_v44, %v5048_v27  ;;  %v5189_v11 = vpop.f32.mrb[133].mxu1 }
0x12fe   : > { %v5190_v61 = vadd.f32 %v5189_v11, %v5052_v21 }
0x12ff   : > { %v10044_v29 = vpack.c.bf16 %v13339_v43, %v13337_v42 }
0x1300   : > { %v10062_v24 = vpack.c.bf16 %v5190_v61, %v5184_v37 }
0x1301   : > { %10046 = vmatprep.subr.msk.bf16.mxu0 %vm11642_vm3, %v10044_v29 }
0x1302   : > { %10049 = vmatpush3.bf16.xpose.msk.msra.mxu0 %vm11642_vm3, %v10044_v29  ;;  %10063 = vmatprep.subr.bf16.mxu1 %v10062_v24 }
0x1303   : > { %10065 = vmatpush3.bf16.msra.mxu1 %v10062_v24 }
0x1309   : > { %9571 = vmatmul.mubr.msk.f32.vlgmr.msra.gmra.mrb[90].mxu0 %vm941_vm2, %v13309_v30 }
0x130a   : > { %9573 = vmatprep.mubr.msk.f32.mxu0 %vm941_vm2, %v13317_v46 }
0x130d   : > { %9574 = vmatmul.mubr.msk.f32.gmra.mrb[92].mxu0 %vm941_vm2, %v13319_v59 }
0x130e   : > { %9576 = vmatprep.mubr.msk.f32.mxu0 %vm941_vm2, %v13327_v7 }
0x1311   : > { %9577 = vmatmul.mubr.msk.f32.gmra.mrb[94].mxu0 %vm941_vm2, %v13329_v34 }
0x1312   : > { %9579 = vmatprep.mubr.msk.f32.mxu0 %vm941_vm2, %v13337_v42 }
0x1315   : > { %9580 = vmatmul.mubr.msk.f32.gmra.mrb[96].mxu0 %vm941_vm2, %v13339_v43 }
0x13dc   : > { %v9572_v35 = vpop.f32.mrb[90].mxu0 }
0x13dd   : > { %v5330_v53 = vmul.f32 0.17677669, %v9572_v35  ;;  %v5282_v10 = vpop.f32.mrb[91].mxu0 }
0x13de   : > { %v5329_v52 = vmul.f32 0.17677669, %v5282_v10 }
0x13df   : > { %v5338_v57 = vsel %vm5322_vm8, %v5330_v53, %v13361_v2 }
0x13e0   : > { %v9575_v45 = vpop.f32.mrb[92].mxu0  ;;  %v5349_v27 = vsel %vm5345_vm9, %v5338_v57, -inf  ;;  %v5337_v8 = vsel %vm5321_vm10, %v5329_v52, %v13363_v22  ;;  %v10945_v22 = vld [vmem:[#allocation3 + $0x10] sm:$0xff] }
0x13e1   : > { %v5332_v0 = vmul.f32 0.17677669, %v9575_v45  ;;  %5350 = vmax.xlane.f32.xlu1 %v5349_v27  ;;  %v5292_v21 = vpop.f32.mrb[93].mxu0  ;;  %v5346_v31 = vsel %vm5345_vm9, %v5337_v8, -inf }
0x13e2   : > { %v5331_v15 = vmul.f32 0.17677669, %v5292_v21  ;;  %5347 = vmax.xlane.f32.xlu0 %v5346_v31 }
0x13e3   : > { %v5340_v40 = vsel %vm5324_vm11, %v5332_v0, %v13367_v17 }
0x13e4   : > { %v9578_v54 = vpop.f32.mrb[94].mxu0  ;;  %v5355_v3 = vsel %vm5345_vm9, %v5340_v40, -inf  ;;  %v5339_v26 = vsel %vm5323_vm12, %v5331_v15, %v13369_v4  ;;  %v10948_v4 = vld [vmem:[#allocation3 + $0x38] sm:$0xff] }
0x13e5   : > { %v5334_v55 = vmul.f32 0.17677669, %v9578_v54  ;;  %5356 = vmax.xlane.f32.xlu1 %v5355_v3  ;;  %v5302_v12 = vpop.f32.mrb[95].mxu0  ;;  %v5352_v25 = vsel %vm5345_vm9, %v5339_v26, -inf }
0x13e6   : > { %v5333_v14 = vmul.f32 0.17677669, %v5302_v12  ;;  %5353 = vmax.xlane.f32.xlu0 %v5352_v25 }
0x13e7   : > { %v5342_v49 = vsel %vm5326_vm13, %v5334_v55, %v13381_v38 }
0x13e8   : > { %v9581_v9 = vpop.f32.mrb[96].mxu0  ;;  %v5361_v56 = vsel %vm5345_vm9, %v5342_v49, -inf  ;;  %v5341_v32 = vsel %vm5325_vm14, %v5333_v14, %v13383_v63 }
0x13e9   : > { %v5336_v50 = vmul.f32 0.17677669, %v9581_v9  ;;  %5362 = vmax.xlane.f32.xlu1 %v5361_v56  ;;  %v5312_v5 = vpop.f32.mrb[97].mxu0  ;;  %v5358_v19 = vsel %vm5345_vm9, %v5341_v32, -inf }
0x13ea   : > { %v5335_v13 = vmul.f32 0.17677669, %v5312_v5  ;;  %5359 = vmax.xlane.f32.xlu0 %v5358_v19 }
0x13eb   : > { %v5344_v48 = vsel %vm5328_vm15, %v5336_v50, %v13395_v36 }
0x13ec   : > { %v5367_v28 = vsel %vm5345_vm9, %v5344_v48, -inf  ;;  %v5343_v44 = vsel %vm5327_vm0, %v5335_v13, %v13397_v39 }
0x13ed   : > { %5368 = vmax.xlane.f32.xlu1 %v5367_v28  ;;  %v5364_v11 = vsel %vm5345_vm9, %v5343_v44, -inf }
0x13ee   : > { %5365 = vmax.xlane.f32.xlu0 %v5364_v11 }
0x146e   : > { %v5351_v37 = vpop.xlane.xlu1 %5350 }
0x146f   : > { %v5371_v61 = vsub.f32 %v5338_v57, %v5351_v37  ;;  %v5348_v29 = vpop.xlane.xlu0 %5347 }
0x1470   : > { %v5370_v24 = vsub.f32 %v5337_v8, %v5348_v29 }
0x1471   : > { %v5380_v35 = vmul.f32 1.442695, %v5371_v61 }
0x1472   : > { %v5378_v53 = vmul.f32 1.442695, %v5370_v24  ;;  %v5357_v10 = vpop.xlane.xlu1 %5356 }
0x1473   : > { %10694 = vpow2.f32 %v5380_v35  ;;  %v5373_v52 = vsub.f32 %v5340_v40, %v5357_v10  ;;  %v5354_v45 = vpop.xlane.xlu0 %5353 }
0x1474   : > { %10696 = vpow2.f32 %v5378_v53  ;;  %v5372_v27 = vsub.f32 %v5339_v26, %v5354_v45 }
0x1475   : > { %v5384_v0 = vmul.f32 1.442695, %v5373_v52 }
0x1476   : > { %v5382_v21 = vmul.f32 1.442695, %v5372_v27  ;;  %v5363_v31 = vpop.xlane.xlu1 %5362 }
0x1477   : > { %10698 = vpow2.f32 %v5384_v0  ;;  %v5375_v15 = vsub.f32 %v5342_v49, %v5363_v31  ;;  %v5360_v54 = vpop.xlane.xlu0 %5359 }
0x1478   : > { %10700 = vpow2.f32 %v5382_v21  ;;  %v5374_v3 = vsub.f32 %v5341_v32, %v5360_v54 }
0x1479   : > { %v5388_v55 = vmul.f32 1.442695, %v5375_v15 }
0x147a   : > { %v5386_v57 = vmul.f32 1.442695, %v5374_v3  ;;  %v5369_v12 = vpop.xlane.xlu1 %5368 }
0x147b   : > { %10702 = vpow2.f32 %v5388_v55  ;;  %v5377_v8 = vsub.f32 %v5344_v48, %v5369_v12  ;;  %v5366_v25 = vpop.xlane.xlu0 %5365 }
0x147c   : > { %10704 = vpow2.f32 %v5386_v57  ;;  %v5376_v14 = vsub.f32 %v5343_v44, %v5366_v25 }
0x147d   : > { %v13417_v40 = vpop.eup %10694  ;;  %v5392_v9 = vmul.f32 1.442695, %v5377_v8 }
0x147e   : > { %v13419_v26 = vpop.eup %10696  ;;  %v5390_v56 = vmul.f32 1.442695, %v5376_v14  ;;  %v5397_v49 = vsel %vm5345_vm9, %v13417_v40, 0.0 }
0x147f   : > { %10706 = vpow2.f32 %v5392_v9  ;;  %5398 = vadd.xlane.f32.xlu1 %v5397_v49  ;;  %v5394_v32 = vsel %vm5345_vm9, %v13419_v26, 0.0  ;;  %v8689_v9 = vld [vmem:[%s14070_s7 + $0x50] sm:$0xff] }
0x1480   : > { %10708 = vpow2.f32 %v5390_v56  ;;  %5395 = vadd.xlane.f32.xlu0 %v5394_v32 }
0x1481   : > { %v13425_v50 = vpop.eup %10698 }
0x1482   : > { %v10701_v5 = vpop.eup %10700  ;;  %v5403_v19 = vsel %vm5345_vm9, %v13425_v50, 0.0 }
0x1483   : > { %5404 = vadd.xlane.f32.xlu1 %v5403_v19  ;;  %v5400_v13 = vsel %vm5345_vm9, %v10701_v5, 0.0 }
0x1484   : > { %5401 = vadd.xlane.f32.xlu0 %v5400_v13 }
0x1485   : > { %v13430_v48 = vpop.eup %10702 }
0x1486   : > { %v10705_v28 = vpop.eup %10704  ;;  %v5409_v44 = vsel %vm5345_vm9, %v13430_v48, 0.0 }
0x1487   : > { %5410 = vadd.xlane.f32.xlu1 %v5409_v44  ;;  %v5406_v11 = vsel %vm5345_vm9, %v10705_v28, 0.0 }
0x1488   : > { %5407 = vadd.xlane.f32.xlu0 %v5406_v11 }
0x1489   : > { %v13435_v37 = vpop.eup %10706 }
0x148a   : > { %v10709_v61 = vpop.eup %10708  ;;  %v5415_v29 = vsel %vm5345_vm9, %v13435_v37, 0.0 }
0x148b   : > { %5416 = vadd.xlane.f32.xlu1 %v5415_v29  ;;  %v5412_v24 = vsel %vm5345_vm9, %v10709_v61, 0.0 }
0x148c   : > { %5413 = vadd.xlane.f32.xlu0 %v5412_v24 }
0x149c   : > { %5715 = vrot.lane.b32.xlu1 %v13309_v30, %s11185_s20 }
0x14a0   : > { %5717 = vrot.lane.b32.xlu1 %v13317_v46, %s11185_s20 }
0x14a2   : > { %5713 = vrot.lane.b32.xlu0 %v13304_v23, %s11185_s20 }
0x14a4   : > { %5719 = vrot.lane.b32.xlu1 %v13319_v59, %s11185_s20 }
0x14a6   : > { %5721 = vrot.lane.b32.xlu0 %v13327_v7, %s11185_s20 }
0x14a8   : > { %5723 = vrot.lane.b32.xlu1 %v13329_v34, %s11185_s20 }
0x14aa   : > { %5725 = vrot.lane.b32.xlu0 %v13337_v42, %s11185_s20 }
0x14ac   : > { %5727 = vrot.lane.b32.xlu1 %v13339_v43, %s11185_s20 }
0x14ae   : > { %5793 = vrot.lane.b32.xlu0 %v13304_v23, %s11186_s22  ;;  %v8687_v23 = vld [vmem:[%s14070_s7 + $0x40] sm:$0xff] }
0x14b0   : > { %5795 = vrot.lane.b32.xlu1 %v13309_v30, %s11186_s22  ;;  %v8688_v30 = vld [vmem:[%s14070_s7 + $0x48] sm:$0xff] }
0x14b2   : > { %5797 = vrot.lane.b32.xlu0 %v13317_v46, %s11186_s22  ;;  %v10066_v46 = vpack.c.bf16 %v8688_v30, %v8687_v23 }
0x14b4   : > { %5799 = vrot.lane.b32.xlu1 %v13319_v59, %s11186_s22  ;;  %10067 = vmatprep.subr.bf16.mxu0 %v10066_v46 }
0x14b5   : > { %10069 = vmatpush3.bf16.msra.mxu0 %v10066_v46 }
0x14b6   : > { %5801 = vrot.lane.b32.xlu0 %v13327_v7, %s11186_s22 }
0x14b8   : > { %5803 = vrot.lane.b32.xlu1 %v13329_v34, %s11186_s22 }
0x14ba   : > { %5805 = vrot.lane.b32.xlu0 %v13337_v42, %s11186_s22 }
0x14bc   : > { %5807 = vrot.lane.b32.xlu1 %v13339_v43, %s11186_s22 }
0x150c   : > { %v5399_v59 = vpop.xlane.xlu1 %5398 }
0x150d   : > { %10710 = vrcp.f32 %v5399_v59  ;;  %v5396_v7 = vpop.xlane.xlu0 %5395 }
0x150e   : > { %10712 = vrcp.f32 %v5396_v7  ;;  %v8691_v7 = vld [vmem:[#allocation10 + $0x2] ss:$0 sm:$0xff] }
0x1510   : > { %v5405_v34 = vpop.xlane.xlu1 %5404 }
0x1511   : > { %10714 = vrcp.f32 %v5405_v34  ;;  %v5402_v42 = vpop.xlane.xlu0 %5401 }
0x1512   : > { %10716 = vrcp.f32 %v5402_v42 }
0x1514   : > { %v5411_v43 = vpop.xlane.xlu1 %5410 }
0x1515   : > { %10718 = vrcp.f32 %v5411_v43  ;;  %v5408_v35 = vpop.xlane.xlu0 %5407 }
0x1516   : > { %10720 = vrcp.f32 %v5408_v35 }
0x1517   : > { %v10711_v53 = vpop.eup %10710 }
0x1518   : > { %v10713_v10 = vpop.eup %10712  ;;  %v5417_v52 = vpop.xlane.xlu1 %5416  ;;  %v5427_v0 = vmul.f32 %v10711_v53, %v13417_v40 }
0x1519   : > { %10722 = vrcp.f32 %v5417_v52  ;;  %v5414_v45 = vpop.xlane.xlu0 %5413  ;;  %v5426_v27 = vmul.f32 %v10713_v10, %v13419_v26  ;;  %v8690_v26 = vld [vmem:[%s14070_s7 + $0x58] sm:$0xff] }
0x151a   : > { %10724 = vrcp.f32 %v5414_v45  ;;  %v10070_v56 = vpack.c.bf16 %v8690_v26, %v8689_v9 }
0x151b   : > { %v10715_v21 = vpop.eup %10714  ;;  %9598 = vmatprep.mubr.msk.f32.mxu1 %vm5345_vm9, %v5426_v27 }
0x151c   : > { %v10717_v31 = vpop.eup %10716  ;;  %9599 = vmatmul.mubr.msk.f32.vlgmr.msra.gmra.mrb[134].mxu1 %vm5345_vm9, %v5427_v0  ;;  %v5429_v54 = vmul.f32 %v10715_v21, %v13425_v50  ;;  %10071 = vmatprep.subr.bf16.mxu0 %v10070_v56  ;;  %v5716_v46 = vpop.permute.xlu1 %5715 }
0x151d   : > { %v5428_v15 = vmul.f32 %v10717_v31, %v10701_v5  ;;  %10073 = vmatpush3.bf16.msra.mxu0 %v10070_v56  ;;  %v5714_v10 = vpop.permute.xlu0 %5713 }
0x151f   : > { %v10719_v3 = vpop.eup %10718  ;;  %9601 = vmatprep.mubr.msk.f32.mxu1 %vm5345_vm9, %v5428_v15 }
0x1520   : > { %v10721_v55 = vpop.eup %10720  ;;  %9602 = vmatmul.mubr.msk.f32.gmra.mrb[136].mxu1 %vm5345_vm9, %v5429_v54  ;;  %v5431_v12 = vmul.f32 %v10719_v3, %v13430_v48  ;;  %v5718_v59 = vpop.permute.xlu1 %5717 }
0x1521   : > { %v5430_v57 = vmul.f32 %v10721_v55, %v10705_v28 }
0x1523   : > { %v10723_v8 = vpop.eup %10722  ;;  %9604 = vmatprep.mubr.msk.f32.mxu1 %vm5345_vm9, %v5430_v57 }
0x1524   : > { %v10725_v25 = vpop.eup %10724  ;;  %9605 = vmatmul.mubr.msk.f32.gmra.mrb[138].mxu1 %vm5345_vm9, %v5431_v12  ;;  %v5433_v40 = vmul.f32 %v10723_v8, %v13435_v37  ;;  %v5720_v35 = vpop.permute.xlu1 %5719 }
0x1525   : > { %v5432_v14 = vmul.f32 %v10725_v25, %v10709_v61  ;;  %v5722_v8 = vpop.permute.xlu0 %5721 }
0x1527   : > { %9607 = vmatprep.mubr.msk.f32.mxu1 %vm5345_vm9, %v5432_v14 }
0x1528   : > { %9608 = vmatmul.mubr.msk.f32.gmra.mrb[140].mxu1 %vm5345_vm9, %v5433_v40  ;;  %v5724_v55 = vpop.permute.xlu1 %5723 }
0x1529   : > { %6087 = vmatprep.mubr.f32.mxu1 %v14153_v58 }
0x15ef   : > { %v9600_v49 = vpop.f32.mrb[134].mxu1 }
0x15f0   : > { %v5524_v32 = vpop.f32.mrb[135].mxu1 }
0x15f1   : > { %10726 = vtanh.f32 %v5524_v32 }
0x15f2   : > { %10728 = vtanh.f32 %v9600_v49 }
0x15f3   : > { %v9603_v50 = vpop.f32.mrb[136].mxu1 }
0x15f4   : > { %v5534_v5 = vpop.f32.mrb[137].mxu1 }
0x15f5   : > { %10730 = vtanh.f32 %v5534_v5 }
0x15f6   : > { %10732 = vtanh.f32 %v9603_v50 }
0x15f7   : > { %v9606_v19 = vpop.f32.mrb[138].mxu1 }
0x15f8   : > { %v5544_v13 = vpop.f32.mrb[139].mxu1 }
0x15f9   : > { %10734 = vtanh.f32 %v5544_v13  ;;  %v5728_v13 = vpop.permute.xlu1 %5727 }
0x15fa   : > { %10736 = vtanh.f32 %v9606_v19 }
0x15fb   : > { %v10727_v48 = vpop.eup %10726  ;;  %v9609_v28 = vpop.f32.mrb[140].mxu1 }
0x15fc   : > { %v10729_v44 = vpop.eup %10728  ;;  %v5554_v11 = vpop.f32.mrb[141].mxu1  ;;  %9618 = vmatprep.mubr.msk.f32.mxu0 %vm941_vm2, %v10727_v48 }
0x15fd   : > { %10738 = vtanh.f32 %v5554_v11  ;;  %9619 = vmatmul.mubr.msk.f32.vlgmr.msra.gmra.mrb[98].mxu0 %vm941_vm2, %v10729_v44  ;;  %v5726_v44 = vpop.permute.xlu0 %5725 }
0x15fe   : > { %10740 = vtanh.f32 %v9609_v28 }
0x15ff   : > { %v10731_v37 = vpop.eup %10730 }
0x1600   : > { %v10733_v61 = vpop.eup %10732  ;;  %9621 = vmatprep.mubr.msk.f32.mxu0 %vm941_vm2, %v10731_v37 }
0x1601   : > { %9622 = vmatmul.mubr.msk.f32.gmra.mrb[100].mxu0 %vm941_vm2, %v10733_v61 }
0x1603   : > { %v10735_v29 = vpop.eup %10734 }
0x1604   : > { %v10737_v24 = vpop.eup %10736  ;;  %9624 = vmatprep.mubr.msk.f32.mxu0 %vm941_vm2, %v10735_v29 }
0x1605   : > { %9625 = vmatmul.mubr.msk.f32.gmra.mrb[102].mxu0 %vm941_vm2, %v10737_v24 }
0x1607   : > { %v10739_v23 = vpop.eup %10738 }
0x1608   : > { %v10741_v30 = vpop.eup %10740  ;;  %9627 = vmatprep.mubr.msk.f32.mxu0 %vm941_vm2, %v10739_v23 }
0x1609   : > { %9628 = vmatmul.mubr.msk.f32.gmra.mrb[104].mxu0 %vm941_vm2, %v10741_v30 }
0x16d0   : > { %v9620_v34 = vpop.f32.mrb[98].mxu0 }
0x16d1   : > { %v13506_v42 = vadd.f32 %v9620_v34, %v8691_v7  ;;  %v5674_v43 = vpop.f32.mrb[99].mxu0 }
0x16d2   : > { %v13508_v53 = vadd.f32 %v8691_v7, %v5674_v43 }
0x16d3   : > { %v5738_v52 = vadd.f32 %v5716_v46, %v13506_v42 }
0x16d4   : > { %v5737_v45 = vadd.f32 %v5714_v10, %v13508_v53  ;;  %v9623_v27 = vpop.f32.mrb[100].mxu0 }
0x16d5   : > { %v8701_v0 = vmul.f32 -1.442695, %v5738_v52  ;;  %v13512_v21 = vadd.f32 %v9623_v27, %v8691_v7  ;;  %v5684_v31 = vpop.f32.mrb[101].mxu0  ;;  %v5794_v27 = vpop.permute.xlu0 %5793 }
0x16d6   : > { %v8700_v15 = vmul.f32 -1.442695, %v5737_v45  ;;  %v13514_v54 = vadd.f32 %v8691_v7, %v5684_v31 }
0x16d7   : > { %10742 = vpow2.f32 %v8701_v0  ;;  %v5740_v3 = vadd.f32 %v5720_v35, %v13512_v21  ;;  %v5796_v35 = vpop.permute.xlu1 %5795 }
0x16d8   : > { %10744 = vpow2.f32 %v8700_v15  ;;  %v5739_v57 = vadd.f32 %v5718_v59, %v13514_v54  ;;  %v9626_v12 = vpop.f32.mrb[102].mxu0 }
0x16d9   : > { %v8703_v25 = vmul.f32 -1.442695, %v5740_v3  ;;  %v13518_v14 = vadd.f32 %v9626_v12, %v8691_v7  ;;  %v5694_v40 = vpop.f32.mrb[103].mxu0 }
0x16da   : > { %v8702_v9 = vmul.f32 -1.442695, %v5739_v57  ;;  %v13520_v26 = vadd.f32 %v8691_v7, %v5694_v40  ;;  %v5798_v40 = vpop.permute.xlu0 %5797 }
0x16db   : > { %10746 = vpow2.f32 %v8703_v25  ;;  %v5742_v56 = vadd.f32 %v5724_v55, %v13518_v14  ;;  %v5800_v3 = vpop.permute.xlu1 %5799 }
0x16dc   : > { %10748 = vpow2.f32 %v8702_v9  ;;  %v5741_v49 = vadd.f32 %v5722_v8, %v13520_v26  ;;  %v9629_v32 = vpop.f32.mrb[104].mxu0 }
0x16dd   : > { %v8705_v50 = vmul.f32 -1.442695, %v5742_v56  ;;  %v13524_v5 = vadd.f32 %v9629_v32, %v8691_v7  ;;  %v5704_v19 = vpop.f32.mrb[105].mxu0 }
0x16de   : > { %v8704_v48 = vmul.f32 -1.442695, %v5741_v49  ;;  %v13526_v28 = vadd.f32 %v8691_v7, %v5704_v19 }
0x16df   : > { %10750 = vpow2.f32 %v8705_v50  ;;  %v5744_v11 = vadd.f32 %v5728_v13, %v13524_v5  ;;  %v5804_v50 = vpop.permute.xlu1 %5803 }
0x16e0   : > { %10752 = vpow2.f32 %v8704_v48  ;;  %v5743_v37 = vadd.f32 %v5726_v44, %v13526_v28  ;;  %v5802_v44 = vpop.permute.xlu0 %5801 }
0x16e1   : > { %v10743_v61 = vpop.eup %10742  ;;  %v8707_v29 = vmul.f32 -1.442695, %v5744_v11 }
0x16e2   : > { %v10745_v24 = vpop.eup %10744  ;;  %v5770_v23 = vadd.f32 1.0, %v10743_v61  ;;  %v8706_v30 = vmul.f32 -1.442695, %v5743_v37 }
0x16e3   : > { %v5769_v46 = vadd.f32 1.0, %v10745_v24  ;;  %10754 = vpow2.f32 %v8707_v29  ;;  %v5808_v29 = vpop.permute.xlu1 %5807 }
0x16e4   : > { %10756 = vrcp.f32 %v5770_v23 }
0x16e5   : > { %v10747_v59 = vpop.eup %10746  ;;  %10758 = vrcp.f32 %v5769_v46 }
0x16e6   : > { %v10749_v34 = vpop.eup %10748  ;;  %v5772_v7 = vadd.f32 1.0, %v10747_v59  ;;  %10760 = vpow2.f32 %v8706_v30  ;;  %v5806_v30 = vpop.permute.xlu0 %5805 }
0x16e7   : > { %v5771_v43 = vadd.f32 1.0, %v10749_v34 }
0x16e8   : > { %10762 = vrcp.f32 %v5772_v7 }
0x16e9   : > { %v10751_v10 = vpop.eup %10750  ;;  %10764 = vrcp.f32 %v5771_v43 }
0x16ea   : > { %v10753_v52 = vpop.eup %10752  ;;  %v5774_v45 = vadd.f32 1.0, %v10751_v10 }
0x16eb   : > { %v5773_v0 = vadd.f32 1.0, %v10753_v52 }
0x16ec   : > { %10766 = vrcp.f32 %v5774_v45 }
0x16ed   : > { %v10755_v31 = vpop.eup %10754  ;;  %10768 = vrcp.f32 %v5773_v0  ;;  %v5965_v0 = vld [vmem:[#allocation7 + $0xd8] sm:$0xff] }
0x16ee   : > { %v13530_v15 = vpop.eup %10756  ;;  %v5776_v55 = vadd.f32 1.0, %v10755_v31  ;;  %v5962_v31 = vld [vmem:[#allocation7 + $0xc0] sm:$0xff] }
0x16ef   : > { %v13532_v57 = vpop.eup %10758  ;;  %v5818_v12 = vmul.f32 %v13530_v15, %v5796_v35 }
0x16f0   : > { %v10761_v8 = vpop.eup %10760  ;;  %10770 = vrcp.f32 %v5776_v55  ;;  %v5817_v25 = vmul.f32 %v13532_v57, %v5794_v27  ;;  %v5963_v27 = vld [vmem:[#allocation7 + $0xc8] sm:$0xff]  ;;  %v5964_v55 = vld [vmem:[#allocation7 + $0xd0] sm:$0xff] }
0x16f1   : > { %v5775_v9 = vadd.f32 1.0, %v10761_v8  ;;  %5835 = vrot.lane.b32.xlu1 %v5818_v12, %s11187_s23  ;;  %v5969_v12 = vld [vmem:[#allocation7 + $0xf8] sm:$0xff]  ;;  %v10076_v8 = vpack.c.bf16 %v5964_v55, %v5962_v31 }
0x16f2   : > { %v13537_v56 = vpop.eup %10762  ;;  %5833 = vrot.lane.b32.xlu0 %v5817_v25, %s11187_s23 }
0x16f3   : > { %v13540_v49 = vpop.eup %10764  ;;  %10772 = vrcp.f32 %v5775_v9  ;;  %v5820_v32 = vmul.f32 %v13537_v56, %v5800_v3  ;;  %v10074_v3 = vpack.c.bf16 %v5965_v0, %v5963_v27  ;;  %v5968_v9 = vld [vmem:[#allocation7 + $0xf0] sm:$0xff] }
0x16f4   : > { %v5819_v19 = vmul.f32 %v13540_v49, %v5798_v40  ;;  %v5966_v40 = vld [vmem:[#allocation7 + $0xe0] sm:$0xff] }
0x16f5   : > { %5839 = vrot.lane.b32.xlu1 %v5820_v32, %s11187_s23  ;;  %10075 = vmatprep.subr.bf16.mxu1 %v10074_v3  ;;  %v10080_v32 = vpack.c.bf16 %v5968_v9, %v5966_v40 }
0x16f6   : > { %v13545_v13 = vpop.eup %10766  ;;  %5837 = vrot.lane.b32.xlu0 %v5819_v19, %s11187_s23  ;;  %10077 = vmatpush1.bf16.msra.mxu1 %v10076_v8 }
0x16f7   : > { %v13548_v48 = vpop.eup %10768  ;;  %v5822_v11 = vmul.f32 %v13545_v13, %v5804_v50 }
0x16f8   : > { %v5821_v37 = vmul.f32 %v13548_v48, %v5802_v44 }
0x16f9   : > { %5843 = vrot.lane.b32.xlu1 %v5822_v11, %s11187_s23 }
0x16fa   : > { %v13553_v61 = vpop.eup %10770  ;;  %5841 = vrot.lane.b32.xlu0 %v5821_v37, %s11187_s23  ;;  %v5873_v37 = vsub.f32 1.0, %v13532_v57 }
0x16fb   : > { %v5824_v24 = vmul.f32 %v13553_v61, %v5808_v29 }
0x16fd   : > { %v13557_v23 = vpop.eup %10772  ;;  %5847 = vrot.lane.b32.xlu1 %v5824_v24, %s11187_s23 }
0x16fe   : > { %v5823_v46 = vmul.f32 %v13557_v23, %v5806_v30 }
0x1700   : > { %5845 = vrot.lane.b32.xlu0 %v5823_v46, %s11187_s23 }
0x1701   : > { %5921 = vrot.lane.b32.xlu1 %v13264_v41, %s11186_s22 }
0x1705   : > { %5923 = vrot.lane.b32.xlu1 %v13269_v33, %s11186_s22 }
0x1709   : > { %5925 = vrot.lane.b32.xlu1 %v13274_v6, %s11186_s22 }
0x170d   : > { %5927 = vrot.lane.b32.xlu1 %v13279_v16, %s11186_s22 }
0x1711   : > { %5929 = vrot.lane.b32.xlu1 %v13281_v20, %s11186_s22 }
0x1715   : > { %5931 = vrot.lane.b32.xlu1 %v13289_v1, %s11186_s22 }
0x1719   : > { %5933 = vrot.lane.b32.xlu1 %v13291_v47, %s11186_s22 }
0x171d   : > { %5935 = vrot.lane.b32.xlu1 %v13299_v51, %s11186_s22 }
0x1763   : > { %v5836_v41 = vpop.permute.xlu1 %5835 }
0x1764   : > { %v5834_v33 = vpop.permute.xlu0 %5833  ;;  %v5858_v6 = vadd.f32 %v5836_v41, %v13506_v42 }
0x1765   : > { %v5857_v59 = vadd.f32 %v5834_v33, %v13508_v53  ;;  %v5874_v33 = vsub.f32 1.0, %v13530_v15 }
0x1767   : > { %10774 = vtanh.f32 %v5857_v59  ;;  %v5840_v34 = vpop.permute.xlu1 %5839 }
0x1768   : > { %v5838_v16 = vpop.permute.xlu0 %5837  ;;  %10776 = vtanh.f32 %v5858_v6  ;;  %v5860_v1 = vadd.f32 %v5840_v34, %v13512_v21  ;;  %v5875_v34 = vsub.f32 1.0, %v13540_v49 }
0x1769   : > { %v5859_v20 = vadd.f32 %v5838_v16, %v13514_v54 }
0x176b   : > { %10778 = vtanh.f32 %v5859_v20  ;;  %v5844_v43 = vpop.permute.xlu1 %5843 }
0x176c   : > { %v5842_v7 = vpop.permute.xlu0 %5841  ;;  %10780 = vtanh.f32 %v5860_v1  ;;  %v5862_v42 = vadd.f32 %v5844_v43, %v13518_v14 }
0x176d   : > { %v5861_v51 = vadd.f32 %v5842_v7, %v13520_v26 }
0x176f   : > { %10782 = vtanh.f32 %v5861_v51  ;;  %v5848_v10 = vpop.permute.xlu1 %5847 }
0x1770   : > { %10784 = vtanh.f32 %v5862_v42  ;;  %v5864_v26 = vadd.f32 %v5848_v10, %v13524_v5 }
0x1771   : > { %v10775_v47 = vpop.eup %10774 }
0x1772   : > { %5889 = vrot.lane.b32.xlu0 %v10775_v47, %s11185_s20  ;;  %v10777_v53 = vpop.eup %10776  ;;  %v5846_v35 = vpop.permute.xlu0 %5845 }
0x1773   : > { %v5863_v21 = vadd.f32 %v5846_v35, %v13526_v28  ;;  %v5967_v28 = vld [vmem:[#allocation7 + $0xe8] sm:$0xff]  ;;  %v5922_v19 = vpop.permute.xlu1 %5921 }
0x1774   : > { %v10078_v25 = vpack.c.bf16 %v5969_v12, %v5967_v28  ;;  %v5945_v24 = vmul.f32 %v13532_v57, %v5922_v19 }
0x1775   : > { %v10779_v54 = vpop.eup %10778  ;;  %10786 = vtanh.f32 %v5863_v21 }
0x1776   : > { %5891 = vrot.lane.b32.xlu0 %v10777_v53, %s11185_s20  ;;  %v10781_v52 = vpop.eup %10780  ;;  %10788 = vtanh.f32 %v5864_v26  ;;  %10079 = vmatprep.subr.bf16.mxu1 %v10078_v25 }
0x1777   : > { %10081 = vmatpush1.bf16.msra.mxu1 %v10080_v32  ;;  %v5924_v44 = vpop.permute.xlu1 %5923 }
0x1778   : > { %v5946_v6 = vmul.f32 %v13530_v15, %v5924_v44  ;;  %v5876_v15 = vsub.f32 1.0, %v13537_v56 }
0x1779   : > { %v10783_v45 = vpop.eup %10782 }
0x177a   : > { %5893 = vrot.lane.b32.xlu0 %v10779_v54, %s11185_s20  ;;  %v10785_v14 = vpop.eup %10784 }
0x177b   : > { %v5926_v11 = vpop.permute.xlu1 %5925 }
0x177c   : > { %v5947_v57 = vmul.f32 %v13540_v49, %v5926_v11  ;;  %v5877_v49 = vsub.f32 1.0, %v13548_v48 }
0x177e   : > { %5895 = vrot.lane.b32.xlu0 %v10781_v52, %s11185_s20 }
0x177f   : > { %v10787_v5 = vpop.eup %10786  ;;  %v5928_v46 = vpop.permute.xlu1 %5927 }
0x1780   : > { %v10789_v50 = vpop.eup %10788  ;;  %v5948_v53 = vmul.f32 %v13537_v56, %v5928_v46  ;;  %v5878_v56 = vsub.f32 1.0, %v13545_v13 }
0x1782   : > { %5897 = vrot.lane.b32.xlu0 %v10783_v45, %s11185_s20 }
0x1783   : > { %v5930_v1 = vpop.permute.xlu1 %5929 }
0x1784   : > { %v5949_v10 = vmul.f32 %v13548_v48, %v5930_v1  ;;  %v5879_v48 = vsub.f32 1.0, %v13557_v23 }
0x1786   : > { %5899 = vrot.lane.b32.xlu0 %v10785_v14, %s11185_s20 }
0x1787   : > { %v5932_v35 = vpop.permute.xlu1 %5931 }
0x1788   : > { %v5950_v27 = vmul.f32 %v13545_v13, %v5932_v35  ;;  %v5880_v13 = vsub.f32 1.0, %v13553_v61 }
0x178a   : > { %5901 = vrot.lane.b32.xlu0 %v10787_v5, %s11185_s20 }
0x178b   : > { %v5934_v45 = vpop.permute.xlu1 %5933 }
0x178c   : > { %v5951_v55 = vmul.f32 %v13557_v23, %v5934_v45 }
0x178e   : > { %5903 = vrot.lane.b32.xlu0 %v10789_v50, %s11185_s20 }
0x178f   : > { %v5936_v12 = vpop.permute.xlu1 %5935 }
0x1790   : > { %v5952_v40 = vmul.f32 %v13553_v61, %v5936_v12 }
0x17e4   : > { %v5890_v29 = vpop.permute.xlu0 %5889 }
0x17e5   : > { %v5913_v30 = vmul.f32 %v5890_v29, %v5873_v37  ;;  %v5971_v29 = vld [vmem:[#allocation8 + $0x6] sm:$0x3] }
0x17e7   : > { %v13596_v41 = vadd.f32 %v5945_v24, %v5913_v30  ;;  %v5976_v24 = vrot.slane %v5971_v29, %v11620_v18 }
0x17e8   : > { %v5892_v59 = vpop.permute.xlu0 %5891 }
0x17e9   : > { %v5914_v16 = vmul.f32 %v5892_v59, %v5874_v33  ;;  %5991 = vrot.lane.b32.xlu0 %v13596_v41, %s11185_s20  ;;  %v5980_v59 = vrot.slane %v5971_v29, %v14173_v60  ;;  %v10942_v29 = vld [vmem:[#allocation3 + $0x8] sm:$0xff] }
0x17eb   : > { %v13602_v20 = vadd.f32 %v5946_v6, %v5914_v16 }
0x17ec   : > { %v5894_v7 = vpop.permute.xlu0 %5893 }
0x17ed   : > { %v5915_v47 = vmul.f32 %v5894_v7, %v5875_v34  ;;  %5993 = vrot.lane.b32.xlu1 %v13602_v20, %s11185_s20 }
0x17ef   : > { %v13608_v51 = vadd.f32 %v5947_v57, %v5915_v47 }
0x17f0   : > { %v5896_v43 = vpop.permute.xlu0 %5895 }
0x17f1   : > { %v5916_v42 = vmul.f32 %v5896_v43, %v5876_v15  ;;  %5995 = vrot.lane.b32.xlu0 %v13608_v51, %s11185_s20 }
0x17f3   : > { %v13614_v54 = vadd.f32 %v5948_v53, %v5916_v42 }
0x17f4   : > { %v5898_v21 = vpop.permute.xlu0 %5897 }
0x17f5   : > { %v5917_v52 = vmul.f32 %v5898_v21, %v5877_v49  ;;  %5997 = vrot.lane.b32.xlu1 %v13614_v54, %s11185_s20 }
0x17f7   : > { %v13620_v26 = vadd.f32 %v5949_v10, %v5917_v52 }
0x17f8   : > { %v5900_v14 = vpop.permute.xlu0 %5899 }
0x17f9   : > { %v5918_v0 = vmul.f32 %v5900_v14, %v5878_v56  ;;  %5999 = vrot.lane.b32.xlu0 %v13620_v26, %s11185_s20 }
0x17fb   : > { %v13626_v31 = vadd.f32 %v5950_v27, %v5918_v0 }
0x17fc   : > { %v5902_v3 = vpop.permute.xlu0 %5901 }
0x17fd   : > { %v5919_v28 = vmul.f32 %v5902_v3, %v5879_v48  ;;  %6001 = vrot.lane.b32.xlu1 %v13626_v31, %s11185_s20 }
0x17ff   : > { %v13632_v8 = vadd.f32 %v5951_v55, %v5919_v28 }
0x1800   : > { %v5904_v25 = vpop.permute.xlu0 %5903 }
0x1801   : > { %v5920_v9 = vmul.f32 %v5904_v25, %v5880_v13  ;;  %6003 = vrot.lane.b32.xlu0 %v13632_v8, %s11185_s20 }
0x1803   : > { %v13638_v5 = vadd.f32 %v5952_v40, %v5920_v9 }
0x1805   : > { %6005 = vrot.lane.b32.xlu1 %v13638_v5, %s11185_s20 }
0x185b   : > { %v5992_v23 = vpop.permute.xlu0 %5991 }
0x185c   : > { %8708 = vmatmul.mubr.msk.f32.vlgmr.msra.gmra.mrb[142].mxu1 %vm941_vm2, %v5992_v23 }
0x185d   : > { %6093 = vmatprep.mubr.f32.mxu1 %v14153_v58 }
0x185f   : > { %v5994_v32 = vpop.permute.xlu1 %5993 }
0x1860   : > { %8709 = vmatmul.mubr.msk.f32.gmra.mrb[144].mxu1 %vm941_vm2, %v5994_v32 }
0x1861   : > { %6099 = vmatprep.mubr.f32.mxu1 %v14153_v58 }
0x1863   : > { %v5996_v61 = vpop.permute.xlu0 %5995 }
0x1864   : > { %8710 = vmatmul.mubr.msk.f32.gmra.mrb[146].mxu1 %vm941_vm2, %v5996_v61 }
0x1865   : > { %6105 = vmatprep.mubr.f32.mxu1 %v14153_v58 }
0x1867   : > { %v5998_v50 = vpop.permute.xlu1 %5997 }
0x1868   : > { %8711 = vmatmul.mubr.msk.f32.gmra.mrb[148].mxu1 %vm941_vm2, %v5998_v50 }
0x1869   : > { %6111 = vmatprep.mubr.f32.mxu1 %v14153_v58 }
0x186b   : > { %v6000_v19 = vpop.permute.xlu0 %5999 }
0x186c   : > { %8712 = vmatmul.mubr.msk.f32.gmra.mrb[150].mxu1 %vm941_vm2, %v6000_v19 }
0x186d   : > { %6117 = vmatprep.mubr.f32.mxu1 %v14153_v58 }
0x186f   : > { %v6002_v44 = vpop.permute.xlu1 %6001 }
0x1870   : > { %8713 = vmatmul.mubr.msk.f32.gmra.mrb[152].mxu1 %vm941_vm2, %v6002_v44 }
0x1871   : > { %6123 = vmatprep.mubr.f32.mxu1 %v14153_v58 }
0x1873   : > { %v6004_v11 = vpop.permute.xlu0 %6003 }
0x1874   : > { %8714 = vmatmul.mubr.msk.f32.gmra.mrb[154].mxu1 %vm941_vm2, %v6004_v11 }
0x1875   : > { %6129 = vmatprep.mubr.f32.mxu1 %v14153_v58 }
0x1877   : > { %v6006_v37 = vpop.permute.xlu1 %6005 }
0x1878   : > { %8715 = vmatmul.mubr.msk.f32.gmra.mrb[156].mxu1 %vm941_vm2, %v6006_v37 }
0x192f   : > { %v6089_v30 = vpop.f32.mrb[142].mxu1 }
0x1930   : > { %v13658_v46 = vadd.f32 %v6089_v30, %v5976_v24  ;;  %v6091_v33 = vpop.f32.mrb[143].mxu1 }
0x1931   : > { %v6092_v1 = vadd.f32 %v6091_v33, %v5980_v59 }
0x1932   : > { %9646 = vmatprep.mubr.msk.f32.mxu0 %vm941_vm2, %v13658_v46 }
0x1933   : > { %v6095_v6 = vpop.f32.mrb[144].mxu1 }
0x1934   : > { %v13663_v16 = vadd.f32 %v6095_v6, %v5976_v24  ;;  %v6097_v34 = vpop.f32.mrb[145].mxu1 }
0x1935   : > { %v6098_v7 = vadd.f32 %v6097_v34, %v5980_v59 }
0x1936   : > { %v10082_v57 = vpack.c.bf16 %v13663_v16, %v13658_v46 }
0x1937   : > { %v10106_v47 = vpack.c.bf16 %v6098_v7, %v6092_v1  ;;  %v6101_v18 = vpop.f32.mrb[146].mxu1 }
0x1938   : > { %v6103_v15 = vpop.f32.mrb[147].mxu1  ;;  %10084 = vmatprep.subr.msk.bf16.mxu0 %vm11642_vm3, %v10082_v57  ;;  %v13671_v43 = vadd.f32 %v6101_v18, %v5976_v24 }
0x1939   : > { %10087 = vmatpush3.bf16.xpose.msk.msra.mxu0 %vm11642_vm3, %v10082_v57  ;;  %10107 = vmatprep.subr.bf16.mxu1 %v10106_v47  ;;  %v6104_v35 = vadd.f32 %v6103_v15, %v5980_v59 }
0x193a   : > { %10109 = vmatpush3.bf16.msra.mxu1 %v10106_v47  ;;  %v10944_v47 = vld [vmem:[#allocation3 + $0x18] sm:$0xff] }
0x193b   : > { %v6107_v60 = vpop.f32.mrb[148].mxu1 }
0x193c   : > { %v13673_v53 = vadd.f32 %v6107_v60, %v5976_v24  ;;  %v6109_v42 = vpop.f32.mrb[149].mxu1 }
0x193d   : > { %v6110_v49 = vadd.f32 %v6109_v42, %v5980_v59 }
0x193e   : > { %v10088_v21 = vpack.c.bf16 %v13673_v53, %v13671_v43 }
0x193f   : > { %v10110_v10 = vpack.c.bf16 %v6110_v49, %v6104_v35  ;;  %v6113_v52 = vpop.f32.mrb[150].mxu1 }
0x1940   : > { %v6115_v56 = vpop.f32.mrb[151].mxu1  ;;  %10090 = vmatprep.subr.msk.bf16.mxu0 %vm11642_vm3, %v10088_v21  ;;  %v13681_v14 = vadd.f32 %v6113_v52, %v5976_v24 }
0x1941   : > { %10093 = vmatpush3.bf16.xpose.msk.msra.mxu0 %vm11642_vm3, %v10088_v21  ;;  %10111 = vmatprep.subr.bf16.mxu1 %v10110_v10  ;;  %v6116_v48 = vadd.f32 %v6115_v56, %v5980_v59  ;;  %v10946_v21 = vld [vmem:[#allocation3 + $0x28] sm:$0xff] }
0x1942   : > { %10113 = vmatpush3.bf16.msra.mxu1 %v10110_v10 }
0x1943   : > { %v6119_v45 = vpop.f32.mrb[152].mxu1 }
0x1944   : > { %v13683_v27 = vadd.f32 %v6119_v45, %v5976_v24  ;;  %v6121_v0 = vpop.f32.mrb[153].mxu1 }
0x1945   : > { %v6122_v3 = vadd.f32 %v6121_v0, %v5980_v59 }
0x1946   : > { %v10094_v55 = vpack.c.bf16 %v13683_v27, %v13681_v14 }
0x1947   : > { %v10114_v28 = vpack.c.bf16 %v6122_v3, %v6116_v48  ;;  %v6125_v12 = vpop.f32.mrb[154].mxu1  ;;  %v10947_v3 = vld [vmem:[#allocation3 + $0x20] sm:$0xff] }
0x1948   : > { %v6127_v13 = vpop.f32.mrb[155].mxu1  ;;  %10096 = vmatprep.subr.msk.bf16.mxu0 %vm11642_vm3, %v10094_v55  ;;  %v13691_v40 = vadd.f32 %v6125_v12, %v5976_v24 }
0x1949   : > { %10099 = vmatpush3.bf16.xpose.msk.msra.mxu0 %vm11642_vm3, %v10094_v55  ;;  %10115 = vmatprep.subr.bf16.mxu1 %v10114_v28  ;;  %v6128_v32 = vadd.f32 %v6127_v13, %v5980_v59  ;;  %v10949_v13 = vld [vmem:[#allocation3 + $0x30] sm:$0xff] }
0x194a   : > { %10117 = vmatpush3.bf16.msra.mxu1 %v10114_v28 }
0x194b   : > { %v6131_v25 = vpop.f32.mrb[156].mxu1 }
0x194c   : > { %v13693_v9 = vadd.f32 %v6131_v25, %v5976_v24  ;;  %v6133_v23 = vpop.f32.mrb[157].mxu1 }
0x194d   : > { %v6134_v61 = vadd.f32 %v6133_v23, %v5980_v59  ;;  %v10943_v59 = vld [vmem:[#allocation3] sm:$0xff] }
0x194e   : > { %v10100_v50 = vpack.c.bf16 %v13693_v9, %v13691_v40 }
0x194f   : > { %v10118_v19 = vpack.c.bf16 %v6134_v61, %v6128_v32 }
0x1950   : > { %10102 = vmatprep.subr.msk.bf16.mxu0 %vm11642_vm3, %v10100_v50 }
0x1951   : > { %10105 = vmatpush3.bf16.xpose.msk.msra.mxu0 %vm11642_vm3, %v10100_v50  ;;  %10119 = vmatprep.subr.bf16.mxu1 %v10118_v19  ;;  %vm7284_vm3 = vcmask 60416  }
0x1952   : > { %10121 = vmatpush3.bf16.msra.mxu1 %v10118_v19 }
0x1958   : > { %9647 = vmatmul.mubr.msk.f32.vlgmr.msra.gmra.mrb[106].mxu0 %vm941_vm2, %v13663_v16 }
0x1959   : > { %9649 = vmatprep.mubr.msk.f32.mxu0 %vm941_vm2, %v13671_v43 }
0x195c   : > { %9650 = vmatmul.mubr.msk.f32.gmra.mrb[108].mxu0 %vm941_vm2, %v13673_v53 }
0x195d   : > { %9652 = vmatprep.mubr.msk.f32.mxu0 %vm941_vm2, %v13681_v14 }
0x1960   : > { %9653 = vmatmul.mubr.msk.f32.gmra.mrb[110].mxu0 %vm941_vm2, %v13683_v27 }
0x1961   : > { %9655 = vmatprep.mubr.msk.f32.mxu0 %vm941_vm2, %v13691_v40 }
0x1964   : > { %9656 = vmatmul.mubr.msk.f32.gmra.mrb[112].mxu0 %vm941_vm2, %v13693_v9 }
0x1a2b   : > { %v9648_v62 = vpop.f32.mrb[106].mxu0 }
0x1a2c   : > { %v6266_v44 = vmul.f32 0.17677669, %v9648_v62  ;;  %v6226_v11 = vpop.f32.mrb[107].mxu0 }
0x1a2d   : > { %v6265_v37 = vmul.f32 0.17677669, %v6226_v11 }
0x1a2e   : > { %v6274_v24 = vsel %vm5322_vm8, %v6266_v44, %v10942_v29  ;;  %vm8279_vm8 = vcmask 1045509  }
0x1a2f   : > { %v9651_v30 = vpop.f32.mrb[108].mxu0  ;;  %v6284_v33 = vsel %vm5345_vm9, %v6274_v24, -inf  ;;  %v6273_v6 = vsel %vm5321_vm10, %v6265_v37, %v10943_v59  ;;  %vm8283_vm10 = vcmask 1047559  }
0x1a30   : > { %v6268_v34 = vmul.f32 0.17677669, %v9651_v30  ;;  %6285 = vmax.xlane.f32.xlu1 %v6284_v33  ;;  %v6236_v1 = vpop.f32.mrb[109].mxu0  ;;  %v6281_v7 = vsel %vm5345_vm9, %v6273_v6, -inf }
0x1a31   : > { %v6267_v57 = vmul.f32 0.17677669, %v6236_v1  ;;  %6282 = vmax.xlane.f32.xlu0 %v6281_v7 }
0x1a32   : > { %v6276_v18 = vsel %vm5324_vm11, %v6268_v34, %v10944_v47  ;;  %vm8286_vm11 = vcmask 7168  }
0x1a33   : > { %v9654_v2 = vpop.f32.mrb[110].mxu0  ;;  %v6290_v15 = vsel %vm5345_vm9, %v6276_v18, -inf  ;;  %v6275_v49 = vsel %vm5323_vm12, %v6267_v57, %v10945_v22 }
0x1a34   : > { %v6270_v60 = vmul.f32 0.17677669, %v9654_v2  ;;  %v6246_v42 = vpop.f32.mrb[111].mxu0  ;;  %v6287_v0 = vsel %vm5345_vm9, %v6275_v49, -inf }
0x1a35   : > { %v6269_v35 = vmul.f32 0.17677669, %v6246_v42  ;;  %6291 = vmax.xlane.f32.xlu0 %v6290_v15 }
0x1a36   : > { %v6278_v10 = vsel %vm5326_vm13, %v6270_v60, %v10946_v21 }
0x1a37   : > { %v9657_v52 = vpop.f32.mrb[112].mxu0  ;;  %v6296_v56 = vsel %vm5345_vm9, %v6278_v10, -inf  ;;  %v6277_v55 = vsel %vm5325_vm14, %v6269_v35, %v10947_v3 }
0x1a38   : > { %v6272_v17 = vmul.f32 0.17677669, %v9657_v52  ;;  %6297 = vmax.xlane.f32.xlu1 %v6296_v56  ;;  %v6256_v45 = vpop.f32.mrb[113].mxu0  ;;  %v6293_v12 = vsel %vm5345_vm9, %v6277_v55, -inf }
0x1a39   : > { %v6271_v48 = vmul.f32 0.17677669, %v6256_v45  ;;  %6288 = vmax.xlane.f32.xlu0 %v6287_v0 }
0x1a3a   : > { %v6280_v28 = vsel %vm5328_vm15, %v6272_v17, %v10948_v4 }
0x1a3b   : > { %v6302_v38 = vsel %vm5345_vm9, %v6280_v28, -inf  ;;  %v6279_v25 = vsel %vm5327_vm0, %v6271_v48, %v10949_v13 }
0x1a3c   : > { %6303 = vmax.xlane.f32.xlu1 %v6302_v38  ;;  %v6299_v23 = vsel %vm5345_vm9, %v6279_v25, -inf }
0x1a3d   : > { %6294 = vmax.xlane.f32.xlu0 %v6293_v12 }
0x1a41   : > { %6300 = vmax.xlane.f32.xlu0 %v6299_v23 }
0x1abd   : > { %v6286_v32 = vpop.xlane.xlu1 %6285 }
0x1abe   : > { %v6306_v63 = vsub.f32 %v6274_v24, %v6286_v32  ;;  %v6283_v61 = vpop.xlane.xlu0 %6282 }
0x1abf   : > { %v6305_v50 = vsub.f32 %v6273_v6, %v6283_v61 }
0x1ac0   : > { %v6315_v19 = vmul.f32 1.442695, %v6306_v63 }
0x1ac1   : > { %v6313_v36 = vmul.f32 1.442695, %v6305_v50 }
0x1ac2   : > { %10790 = vpow2.f32 %v6315_v19  ;;  %v6292_v62 = vpop.xlane.xlu0 %6291 }
0x1ac3   : > { %10792 = vpow2.f32 %v6313_v36  ;;  %v6308_v44 = vsub.f32 %v6276_v18, %v6292_v62 }
0x1ac5   : > { %v6319_v11 = vmul.f32 1.442695, %v6308_v44  ;;  %v6298_v37 = vpop.xlane.xlu1 %6297 }
0x1ac6   : > { %v6310_v29 = vsub.f32 %v6278_v10, %v6298_v37  ;;  %v6289_v30 = vpop.xlane.xlu0 %6288  ;;  %v8740_v37 = vld [vmem:[%s14070_s7 + $0x60] sm:$0xff] }
0x1ac7   : > { %10794 = vpow2.f32 %v6319_v11  ;;  %v6307_v39 = vsub.f32 %v6275_v49, %v6289_v30 }
0x1ac8   : > { %v6323_v33 = vmul.f32 1.442695, %v6310_v29  ;;  %v8741_v29 = vld [vmem:[%s14070_s7 + $0x68] sm:$0xff] }
0x1ac9   : > { %v6317_v59 = vmul.f32 1.442695, %v6307_v39  ;;  %v6304_v34 = vpop.xlane.xlu1 %6303  ;;  %v10122_v30 = vpack.c.bf16 %v8741_v29, %v8740_v37  ;;  %v8742_v39 = vld [vmem:[%s14070_s7 + $0x70] sm:$0xff] }
0x1aca   : > { %10796 = vpow2.f32 %v6323_v33  ;;  %v6312_v1 = vsub.f32 %v6280_v28, %v6304_v34  ;;  %v6295_v24 = vpop.xlane.xlu0 %6294  ;;  %v8743_v33 = vld [vmem:[%s14070_s7 + $0x78] sm:$0xff] }
0x1acb   : > { %10798 = vpow2.f32 %v6317_v59  ;;  %v6309_v6 = vsub.f32 %v6277_v55, %v6295_v24  ;;  %10123 = vmatprep.subr.bf16.mxu0 %v10122_v30  ;;  %v10126_v59 = vpack.c.bf16 %v8743_v33, %v8742_v39 }
0x1acc   : > { %v10791_v7 = vpop.eup %10790  ;;  %v6327_v57 = vmul.f32 1.442695, %v6312_v1  ;;  %10125 = vmatpush3.bf16.msra.mxu0 %v10122_v30 }
0x1acd   : > { %v10793_v47 = vpop.eup %10792  ;;  %v6321_v2 = vmul.f32 1.442695, %v6309_v6  ;;  %v6332_v18 = vsel %vm5345_vm9, %v10791_v7, 0.0  ;;  %10127 = vmatprep.subr.bf16.mxu0 %v10126_v59 }
0x1ace   : > { %10800 = vpow2.f32 %v6327_v57  ;;  %6333 = vadd.xlane.f32.xlu1 %v6332_v18  ;;  %v6301_v15 = vpop.xlane.xlu0 %6300  ;;  %v6329_v60 = vsel %vm5345_vm9, %v10793_v47, 0.0 }
0x1acf   : > { %10802 = vpow2.f32 %v6321_v2  ;;  %v6311_v42 = vsub.f32 %v6279_v25, %v6301_v15  ;;  %6330 = vadd.xlane.f32.xlu0 %v6329_v60 }
0x1ad0   : > { %10129 = vmatpush3.bf16.msra.mxu0 %v10126_v59 }
0x1ad1   : > { %v10795_v35 = vpop.eup %10794  ;;  %v6325_v22 = vmul.f32 1.442695, %v6311_v42  ;;  %9726 = vmatprep.subr.mxu0 %v14153_v58 }
0x1ad2   : > { %v6338_v49 = vsel %vm5345_vm9, %v10795_v35, 0.0 }
0x1ad3   : > { %10804 = vpow2.f32 %v6325_v22  ;;  %6339 = vadd.xlane.f32.xlu1 %v6338_v49 }
0x1ad4   : > { %v13742_v21 = vpop.eup %10796 }
0x1ad5   : > { %v10799_v10 = vpop.eup %10798  ;;  %v6344_v52 = vsel %vm5345_vm9, %v13742_v21, 0.0 }
0x1ad6   : > { %v6335_v56 = vsel %vm5345_vm9, %v10799_v10, 0.0 }
0x1ad7   : > { %6345 = vadd.xlane.f32.xlu1 %v6344_v52  ;;  %6336 = vadd.xlane.f32.xlu0 %v6335_v56  ;;  %v8744_v52 = vld [vmem:[#allocation10 + $0x3] ss:$0 sm:$0xff] }
0x1ad8   : > { %v13747_v17 = vpop.eup %10800 }
0x1ad9   : > { %v10803_v45 = vpop.eup %10802  ;;  %v6350_v0 = vsel %vm5345_vm9, %v13747_v17, 0.0 }
0x1ada   : > { %v6341_v48 = vsel %vm5345_vm9, %v10803_v45, 0.0 }
0x1adb   : > { %6351 = vadd.xlane.f32.xlu1 %v6350_v0  ;;  %6342 = vadd.xlane.f32.xlu0 %v6341_v48 }
0x1add   : > { %v10805_v3 = vpop.eup %10804 }
0x1ade   : > { %v6347_v55 = vsel %vm5345_vm9, %v10805_v3, 0.0 }
0x1adf   : > { %6348 = vadd.xlane.f32.xlu0 %v6347_v55 }
0x1aec   : > { %6650 = vrot.lane.b32.xlu1 %v13663_v16, %s11185_s20 }
0x1af0   : > { %6652 = vrot.lane.b32.xlu1 %v13671_v43, %s11185_s20 }
0x1af4   : > { %6654 = vrot.lane.b32.xlu1 %v13673_v53, %s11185_s20 }
0x1af5   : > { %6648 = vrot.lane.b32.xlu0 %v13658_v46, %s11185_s20 }
0x1af8   : > { %6658 = vrot.lane.b32.xlu1 %v13683_v27, %s11185_s20 }
0x1af9   : > { %6656 = vrot.lane.b32.xlu0 %v13681_v14, %s11185_s20 }
0x1afc   : > { %6662 = vrot.lane.b32.xlu1 %v13693_v9, %s11185_s20 }
0x1afd   : > { %6660 = vrot.lane.b32.xlu0 %v13691_v40, %s11185_s20 }
0x1b00   : > { %6730 = vrot.lane.b32.xlu1 %v13663_v16, %s11186_s22 }
0x1b01   : > { %6728 = vrot.lane.b32.xlu0 %v13658_v46, %s11186_s22 }
0x1b04   : > { %6734 = vrot.lane.b32.xlu1 %v13673_v53, %s11186_s22 }
0x1b05   : > { %6732 = vrot.lane.b32.xlu0 %v13671_v43, %s11186_s22 }
0x1b08   : > { %6738 = vrot.lane.b32.xlu1 %v13683_v27, %s11186_s22 }
0x1b09   : > { %6736 = vrot.lane.b32.xlu0 %v13681_v14, %s11186_s22 }
0x1b0c   : > { %6742 = vrot.lane.b32.xlu1 %v13693_v9, %s11186_s22 }
0x1b0d   : > { %6740 = vrot.lane.b32.xlu0 %v13691_v40, %s11186_s22  ;;  %s666_s22 = scalar_lea.vmem %s14175_s19, %s8445_s17 }
0x1b5b   : > { %v6334_v16 = vpop.xlane.xlu1 %6333 }
0x1b5c   : > { %10806 = vrcp.f32 %v6334_v16  ;;  %v6331_v46 = vpop.xlane.xlu0 %6330 }
0x1b5d   : > { %10808 = vrcp.f32 %v6331_v46 }
0x1b60   : > { %v6340_v53 = vpop.xlane.xlu1 %6339 }
0x1b61   : > { %10810 = vrcp.f32 %v6340_v53 }
0x1b64   : > { %v6346_v4 = vpop.xlane.xlu1 %6345  ;;  %v6337_v28 = vpop.xlane.xlu0 %6336 }
0x1b65   : > { %10812 = vrcp.f32 %v6337_v28 }
0x1b66   : > { %v10807_v43 = vpop.eup %10806  ;;  %10814 = vrcp.f32 %v6346_v4 }
0x1b67   : > { %v10809_v27 = vpop.eup %10808  ;;  %v6362_v14 = vmul.f32 %v10807_v43, %v10791_v7 }
0x1b68   : > { %v6343_v38 = vpop.xlane.xlu0 %6342  ;;  %v6361_v12 = vmul.f32 %v10809_v27, %v10793_v47  ;;  %v6352_v13 = vpop.xlane.xlu1 %6351 }
0x1b69   : > { %10816 = vrcp.f32 %v6343_v38 }
0x1b6a   : > { %9674 = vmatprep.mubr.msk.f32.mxu1 %vm5345_vm9, %v6361_v12  ;;  %10818 = vrcp.f32 %v6352_v13 }
0x1b6b   : > { %9675 = vmatmul.mubr.msk.f32.vlgmr.msra.gmra.mrb[158].mxu1 %vm5345_vm9, %v6362_v14  ;;  %v10811_v9 = vpop.eup %10810 }
0x1b6c   : > { %v6349_v40 = vpop.xlane.xlu0 %6348  ;;  %v6364_v32 = vmul.f32 %v10811_v9, %v10795_v35 }
0x1b6d   : > { %10820 = vrcp.f32 %v6349_v40 }
0x1b6f   : > { %v10813_v25 = vpop.eup %10812 }
0x1b70   : > { %v6363_v23 = vmul.f32 %v10813_v25, %v10799_v10  ;;  %v10815_v63 = vpop.eup %10814  ;;  %v6651_v10 = vpop.permute.xlu1 %6650 }
0x1b71   : > { %v6366_v36 = vmul.f32 %v10815_v63, %v13742_v21 }
0x1b72   : > { %9677 = vmatprep.mubr.msk.f32.mxu1 %vm5345_vm9, %v6363_v23 }
0x1b73   : > { %v10817_v61 = vpop.eup %10816  ;;  %9678 = vmatmul.mubr.msk.f32.gmra.mrb[160].mxu1 %vm5345_vm9, %v6364_v32 }
0x1b74   : > { %v6365_v50 = vmul.f32 %v10817_v61, %v10803_v45  ;;  %v10819_v19 = vpop.eup %10818 }
0x1b75   : > { %v6368_v11 = vmul.f32 %v10819_v19, %v13747_v17  ;;  %v6653_v17 = vpop.permute.xlu1 %6652 }
0x1b76   : > { %9680 = vmatprep.mubr.msk.f32.mxu1 %vm5345_vm9, %v6365_v50 }
0x1b77   : > { %v10821_v62 = vpop.eup %10820  ;;  %9681 = vmatmul.mubr.msk.f32.gmra.mrb[162].mxu1 %vm5345_vm9, %v6366_v36 }
0x1b78   : > { %v6367_v44 = vmul.f32 %v10821_v62, %v10805_v3  ;;  %v6649_v3 = vpop.permute.xlu0 %6648 }
0x1b79   : > { %v6655_v4 = vpop.permute.xlu1 %6654 }
0x1b7a   : > { %9683 = vmatprep.mubr.msk.f32.mxu1 %vm5345_vm9, %v6367_v44 }
0x1b7b   : > { %9684 = vmatmul.mubr.msk.f32.gmra.mrb[164].mxu1 %vm5345_vm9, %v6368_v11  ;;  %vm8281_vm9 = vcmask 1046534  }
0x1b7c   : > { %v6657_v9 = vpop.permute.xlu0 %6656 }
0x1b7d   : > { %v6659_v14 = vpop.permute.xlu1 %6658 }
0x1b81   : > { %v6663_v39 = vpop.permute.xlu1 %6662 }
0x1c3e   : > { %v9676_v34 = vpop.f32.mrb[158].mxu1 }
0x1c3f   : > { %v6459_v1 = vpop.f32.mrb[159].mxu1 }
0x1c40   : > { %10822 = vtanh.f32 %v6459_v1  ;;  %v6661_v1 = vpop.permute.xlu0 %6660 }
0x1c41   : > { %10824 = vtanh.f32 %v9676_v34 }
0x1c46   : > { %v9679_v24 = vpop.f32.mrb[160].mxu1 }
0x1c47   : > { %v6469_v6 = vpop.f32.mrb[161].mxu1 }
0x1c48   : > { %10826 = vtanh.f32 %v6469_v6 }
0x1c49   : > { %10828 = vtanh.f32 %v9679_v24 }
0x1c4a   : > { %v10823_v7 = vpop.eup %10822  ;;  %v9682_v47 = vpop.f32.mrb[162].mxu1 }
0x1c4b   : > { %v10825_v57 = vpop.eup %10824  ;;  %9694 = vmatprep.mubr.msk.f32.mxu0 %vm941_vm2, %v10823_v7  ;;  %v6479_v2 = vpop.f32.mrb[163].mxu1 }
0x1c4c   : > { %9695 = vmatmul.mubr.msk.f32.vlgmr.msra.gmra.mrb[114].mxu0 %vm941_vm2, %v10825_v57  ;;  %10830 = vtanh.f32 %v6479_v2 }
0x1c4d   : > { %10832 = vtanh.f32 %v9682_v47 }
0x1c4e   : > { %v9685_v18 = vpop.f32.mrb[164].mxu1 }
0x1c4f   : > { %v6489_v15 = vpop.f32.mrb[165].mxu1 }
0x1c50   : > { %10834 = vtanh.f32 %v6489_v15 }
0x1c51   : > { %10836 = vtanh.f32 %v9685_v18 }
0x1c52   : > { %v10827_v60 = vpop.eup %10826 }
0x1c53   : > { %v10829_v42 = vpop.eup %10828  ;;  %9697 = vmatprep.mubr.msk.f32.mxu0 %vm941_vm2, %v10827_v60  ;;  %v6731_v60 = vpop.permute.xlu1 %6730 }
0x1c54   : > { %9698 = vmatmul.mubr.msk.f32.gmra.mrb[116].mxu0 %vm941_vm2, %v10829_v42 }
0x1c56   : > { %v10831_v35 = vpop.eup %10830 }
0x1c57   : > { %v10833_v22 = vpop.eup %10832  ;;  %9700 = vmatprep.mubr.msk.f32.mxu0 %vm941_vm2, %v10831_v35  ;;  %v6729_v35 = vpop.permute.xlu0 %6728 }
0x1c58   : > { %9701 = vmatmul.mubr.msk.f32.gmra.mrb[118].mxu0 %vm941_vm2, %v10833_v22 }
0x1c5a   : > { %v10835_v49 = vpop.eup %10834 }
0x1c5b   : > { %v10837_v21 = vpop.eup %10836  ;;  %9703 = vmatprep.mubr.msk.f32.mxu0 %vm941_vm2, %v10835_v49 }
0x1c5c   : > { %9704 = vmatmul.mubr.msk.f32.gmra.mrb[120].mxu0 %vm941_vm2, %v10837_v21 }
0x1c5d   : > { %9728 = vmatprep.mubr.msk.f32.mxu0 %vm11189_vm7, %v14153_v58 }
0x1d1f   : > { %v9696_v56 = vpop.f32.mrb[114].mxu0 }
0x1d20   : > { %v13818_v45 = vadd.f32 %v9696_v56, %v8744_v52  ;;  %v6609_v0 = vpop.f32.mrb[115].mxu0 }
0x1d21   : > { %v13820_v48 = vadd.f32 %v8744_v52, %v6609_v0 }
0x1d22   : > { %v6673_v55 = vadd.f32 %v6651_v10, %v13818_v45 }
0x1d23   : > { %v6672_v16 = vadd.f32 %v6649_v3, %v13820_v48 }
0x1d24   : > { %v8754_v46 = vmul.f32 -1.442695, %v6673_v55  ;;  %v6735_v55 = vpop.permute.xlu1 %6734 }
0x1d25   : > { %v8753_v53 = vmul.f32 -1.442695, %v6672_v16 }
0x1d26   : > { %10838 = vpow2.f32 %v8754_v46  ;;  %v6733_v46 = vpop.permute.xlu0 %6732 }
0x1d27   : > { %10840 = vpow2.f32 %v8753_v53  ;;  %v9699_v28 = vpop.f32.mrb[116].mxu0 }
0x1d28   : > { %v13824_v43 = vadd.f32 %v9699_v28, %v8744_v52  ;;  %v6619_v27 = vpop.f32.mrb[117].mxu0 }
0x1d29   : > { %v13826_v38 = vadd.f32 %v8744_v52, %v6619_v27 }
0x1d2a   : > { %v6675_v12 = vadd.f32 %v6655_v4, %v13824_v43 }
0x1d2b   : > { %v6674_v13 = vadd.f32 %v6653_v17, %v13826_v38  ;;  %v9702_v40 = vpop.f32.mrb[118].mxu0 }
0x1d2c   : > { %v8756_v25 = vmul.f32 -1.442695, %v6675_v12  ;;  %v13830_v23 = vadd.f32 %v9702_v40, %v8744_v52  ;;  %v6629_v32 = vpop.f32.mrb[119].mxu0  ;;  %v6739_v12 = vpop.permute.xlu1 %6738 }
0x1d2d   : > { %v8755_v63 = vmul.f32 -1.442695, %v6674_v13  ;;  %v13832_v61 = vadd.f32 %v8744_v52, %v6629_v32  ;;  %v6737_v13 = vpop.permute.xlu0 %6736 }
0x1d2e   : > { %10842 = vpow2.f32 %v8756_v25  ;;  %v6677_v50 = vadd.f32 %v6659_v14, %v13830_v23 }
0x1d2f   : > { %10844 = vpow2.f32 %v8755_v63  ;;  %v6676_v36 = vadd.f32 %v6657_v9, %v13832_v61  ;;  %v9705_v62 = vpop.f32.mrb[120].mxu0 }
0x1d30   : > { %v10839_v19 = vpop.eup %10838  ;;  %v8758_v37 = vmul.f32 -1.442695, %v6677_v50  ;;  %v13836_v29 = vadd.f32 %v9705_v62, %v8744_v52  ;;  %v6639_v30 = vpop.f32.mrb[121].mxu0 }
0x1d31   : > { %v10841_v44 = vpop.eup %10840  ;;  %v6705_v11 = vadd.f32 1.0, %v10839_v19  ;;  %v8757_v59 = vmul.f32 -1.442695, %v6676_v36  ;;  %v13838_v34 = vadd.f32 %v8744_v52, %v6639_v30  ;;  %v6743_v63 = vpop.permute.xlu1 %6742 }
0x1d32   : > { %v6704_v33 = vadd.f32 1.0, %v10841_v44  ;;  %v6679_v24 = vadd.f32 %v6663_v39, %v13836_v29  ;;  %v6741_v36 = vpop.permute.xlu0 %6740 }
0x1d33   : > { %10846 = vrcp.f32 %v6705_v11  ;;  %v6678_v6 = vadd.f32 %v6661_v1, %v13838_v34 }
0x1d34   : > { %10848 = vrcp.f32 %v6704_v33  ;;  %v8760_v7 = vmul.f32 -1.442695, %v6679_v24 }
0x1d35   : > { %10850 = vpow2.f32 %v8758_v37  ;;  %v8759_v57 = vmul.f32 -1.442695, %v6678_v6 }
0x1d36   : > { %10852 = vpow2.f32 %v8757_v59 }
0x1d37   : > { %10854 = vpow2.f32 %v8760_v7 }
0x1d38   : > { %10856 = vpow2.f32 %v8759_v57  ;;  %v10843_v47 = vpop.eup %10842 }
0x1d39   : > { %v10845_v2 = vpop.eup %10844  ;;  %v6707_v18 = vadd.f32 1.0, %v10843_v47 }
0x1d3a   : > { %v6706_v15 = vadd.f32 1.0, %v10845_v2 }
0x1d3b   : > { %10858 = vrcp.f32 %v6707_v18 }
0x1d3c   : > { %10860 = vrcp.f32 %v6706_v15 }
0x1d3d   : > { %v13842_v42 = vpop.eup %10846 }
0x1d3e   : > { %v13844_v22 = vpop.eup %10848  ;;  %v6753_v49 = vmul.f32 %v13842_v42, %v6731_v60 }
0x1d3f   : > { %v10851_v21 = vpop.eup %10850  ;;  %v6752_v10 = vmul.f32 %v13844_v22, %v6729_v35  ;;  %v6875_v35 = vld [vmem:[%s14074_s11 + $0x18] sm:$0xff] }
0x1d40   : > { %v10853_v52 = vpop.eup %10852  ;;  %v6709_v56 = vadd.f32 1.0, %v10851_v21  ;;  %6770 = vrot.lane.b32.xlu1 %v6753_v49, %s11187_s23 }
0x1d41   : > { %v10855_v17 = vpop.eup %10854  ;;  %v6708_v0 = vadd.f32 1.0, %v10853_v52  ;;  %6768 = vrot.lane.b32.xlu0 %v6752_v10, %s11187_s23 }
0x1d42   : > { %v10857_v3 = vpop.eup %10856  ;;  %10862 = vrcp.f32 %v6709_v56  ;;  %v6711_v16 = vadd.f32 1.0, %v10855_v17  ;;  %v6809_v17 = vsub.f32 1.0, %v13842_v42 }
0x1d43   : > { %10864 = vrcp.f32 %v6708_v0  ;;  %v6710_v53 = vadd.f32 1.0, %v10857_v3  ;;  %v6808_v3 = vsub.f32 1.0, %v13844_v22 }
0x1d44   : > { %10866 = vrcp.f32 %v6711_v16 }
0x1d45   : > { %10868 = vrcp.f32 %v6710_v53  ;;  %v13850_v4 = vpop.eup %10858  ;;  %v6856_v53 = vmul.f32 %v13844_v22, %v13596_v41 }
0x1d46   : > { %v13852_v28 = vpop.eup %10860  ;;  %v6755_v27 = vmul.f32 %v13850_v4, %v6735_v55  ;;  %v6857_v55 = vmul.f32 %v13842_v42, %v13602_v20  ;;  %v6859_v20 = vmul.f32 %v13850_v4, %v13614_v54 }
0x1d47   : > { %v6754_v14 = vmul.f32 %v13852_v28, %v6733_v46  ;;  %v6858_v41 = vmul.f32 %v13852_v28, %v13608_v51 }
0x1d48   : > { %6774 = vrot.lane.b32.xlu1 %v6755_v27, %s11187_s23 }
0x1d49   : > { %6772 = vrot.lane.b32.xlu0 %v6754_v14, %s11187_s23 }
0x1d4c   : > { %v13858_v40 = vpop.eup %10862 }
0x1d4d   : > { %v13860_v9 = vpop.eup %10864  ;;  %v6757_v25 = vmul.f32 %v13858_v40, %v6739_v12  ;;  %v6861_v54 = vmul.f32 %v13858_v40, %v13626_v31 }
0x1d4e   : > { %v13863_v32 = vpop.eup %10866  ;;  %v6756_v50 = vmul.f32 %v13860_v9, %v6737_v13  ;;  %v6811_v13 = vsub.f32 1.0, %v13850_v4  ;;  %v6860_v51 = vmul.f32 %v13860_v9, %v13620_v26 }
0x1d4f   : > { %v13866_v19 = vpop.eup %10868  ;;  %6778 = vrot.lane.b32.xlu1 %v6757_v25, %s11187_s23  ;;  %v6759_v62 = vmul.f32 %v13863_v32, %v6743_v63  ;;  %v6810_v63 = vsub.f32 1.0, %v13852_v28 }
0x1d50   : > { %6776 = vrot.lane.b32.xlu0 %v6756_v50, %s11187_s23  ;;  %v6758_v44 = vmul.f32 %v13866_v19, %v6741_v36 }
0x1d53   : > { %6782 = vrot.lane.b32.xlu1 %v6759_v62, %s11187_s23 }
0x1d54   : > { %6780 = vrot.lane.b32.xlu0 %v6758_v44, %s11187_s23  ;;  %v6813_v44 = vsub.f32 1.0, %v13858_v40  ;;  %v6862_v40 = vmul.f32 %v13866_v19, %v13632_v8 }
0x1db2   : > { %v6771_v11 = vpop.permute.xlu1 %6770 }
0x1db3   : > { %v6793_v37 = vadd.f32 %v6771_v11, %v13818_v45  ;;  %v6769_v30 = vpop.permute.xlu0 %6768 }
0x1db4   : > { %v6792_v39 = vadd.f32 %v6769_v30, %v13820_v48 }
0x1db5   : > { %10870 = vtanh.f32 %v6793_v37  ;;  %v6812_v37 = vsub.f32 1.0, %v13860_v9 }
0x1db6   : > { %10872 = vtanh.f32 %v6792_v39 }
0x1dba   : > { %v6775_v33 = vpop.permute.xlu1 %6774 }
0x1dbb   : > { %v6795_v59 = vadd.f32 %v6775_v33, %v13824_v43  ;;  %v6773_v1 = vpop.permute.xlu0 %6772  ;;  %v6815_v33 = vsub.f32 1.0, %v13863_v32 }
0x1dbc   : > { %v6794_v24 = vadd.f32 %v6773_v1, %v13826_v38 }
0x1dbd   : > { %10874 = vtanh.f32 %v6795_v59 }
0x1dbe   : > { %10876 = vtanh.f32 %v6794_v24  ;;  %v6814_v24 = vsub.f32 1.0, %v13866_v19 }
0x1dbf   : > { %v10871_v6 = vpop.eup %10870 }
0x1dc0   : > { %v10873_v7 = vpop.eup %10872  ;;  %6826 = vrot.lane.b32.xlu1 %v10871_v6, %s11185_s20  ;;  %v6863_v6 = vmul.f32 %v13863_v32, %v13638_v5 }
0x1dc1   : > { %v6779_v57 = vpop.permute.xlu1 %6778  ;;  %6824 = vrot.lane.b32.xlu0 %v10873_v7, %s11185_s20 }
0x1dc2   : > { %v6797_v45 = vadd.f32 %v6779_v57, %v13830_v23  ;;  %v6777_v48 = vpop.permute.xlu0 %6776  ;;  %v6872_v23 = vld [vmem:[%s14074_s11] sm:$0xff] }
0x1dc3   : > { %v6796_v47 = vadd.f32 %v6777_v48, %v13832_v61  ;;  %v6873_v61 = vld [vmem:[%s14074_s11 + $0x8] sm:$0xff] }
0x1dc4   : > { %10878 = vtanh.f32 %v6797_v45 }
0x1dc5   : > { %10880 = vtanh.f32 %v6796_v47  ;;  %v6783_v43 = vpop.permute.xlu1 %6782 }
0x1dc6   : > { %v6799_v2 = vadd.f32 %v6783_v43, %v13836_v29  ;;  %v6781_v38 = vpop.permute.xlu0 %6780  ;;  %v6874_v29 = vld [vmem:[%s14074_s11 + $0x10] sm:$0xff] }
0x1dc7   : > { %v6798_v18 = vadd.f32 %v6781_v38, %v13838_v34  ;;  %v10875_v15 = vpop.eup %10874  ;;  %v10130_v34 = vpack.c.bf16 %v6873_v61, %v6872_v23  ;;  %v10134_v49 = vpack.c.bf16 %v6875_v35, %v6874_v29 }
0x1dc8   : > { %10882 = vtanh.f32 %v6799_v2  ;;  %v10877_v60 = vpop.eup %10876  ;;  %6830 = vrot.lane.b32.xlu1 %v10875_v15, %s11185_s20  ;;  %v8761_v2 = vld [vmem:[#allocation13] ss:$0 sm:$0xff] }
0x1dc9   : > { %10884 = vtanh.f32 %v6798_v18  ;;  %6828 = vrot.lane.b32.xlu0 %v10877_v60, %s11185_s20  ;;  %10131 = vmatprep.subr.bf16.mxu1 %v10130_v34 }
0x1dca   : > { %10133 = vmatpush3.bf16.msra.mxu1 %v10130_v34 }
0x1dcb   : > { %10135 = vmatprep.subr.bf16.mxu1 %v10134_v49 }
0x1dce   : > { %v10879_v21 = vpop.eup %10878  ;;  %10137 = vmatpush3.bf16.msra.mxu1 %v10134_v49 }
0x1dcf   : > { %v10881_v10 = vpop.eup %10880  ;;  %6834 = vrot.lane.b32.xlu1 %v10879_v21, %s11185_s20  ;;  %9736 = vmatprep.subr.mxu1 %v14153_v58 }
0x1dd0   : > { %6832 = vrot.lane.b32.xlu0 %v10881_v10, %s11185_s20 }
0x1dd2   : > { %v10883_v52 = vpop.eup %10882 }
0x1dd3   : > { %v10885_v56 = vpop.eup %10884  ;;  %6838 = vrot.lane.b32.xlu1 %v10883_v52, %s11185_s20 }
0x1dd4   : > { %6836 = vrot.lane.b32.xlu0 %v10885_v56, %s11185_s20 }
0x1e32   : > { %v6827_v0 = vpop.permute.xlu1 %6826 }
0x1e33   : > { %v6849_v16 = vmul.f32 %v6827_v0, %v6809_v17  ;;  %v6825_v46 = vpop.permute.xlu0 %6824 }
0x1e34   : > { %v6848_v27 = vmul.f32 %v6825_v46, %v6808_v3 }
0x1e35   : > { %v6865_v12 = vadd.f32 %v6857_v55, %v6849_v16 }
0x1e36   : > { %v6864_v14 = vadd.f32 %v6856_v53, %v6848_v27 }
0x1e37   : > { %6893 = vrot.lane.b32.xlu1 %v6865_v12, %s11185_s20 }
0x1e38   : > { %6891 = vrot.lane.b32.xlu0 %v6864_v14, %s11185_s20 }
0x1e3a   : > { %v6831_v25 = vpop.permute.xlu1 %6830 }
0x1e3b   : > { %v6851_v42 = vmul.f32 %v6831_v25, %v6811_v13  ;;  %v6829_v50 = vpop.permute.xlu0 %6828 }
0x1e3c   : > { %v6850_v22 = vmul.f32 %v6829_v50, %v6810_v63 }
0x1e3d   : > { %v6867_v36 = vadd.f32 %v6859_v20, %v6851_v42 }
0x1e3e   : > { %v6866_v62 = vadd.f32 %v6858_v41, %v6850_v22 }
0x1e3f   : > { %6897 = vrot.lane.b32.xlu1 %v6867_v36, %s11185_s20 }
0x1e40   : > { %6895 = vrot.lane.b32.xlu0 %v6866_v62, %s11185_s20 }
0x1e41   : > { %v6835_v11 = vpop.permute.xlu1 %6834 }
0x1e42   : > { %v6853_v4 = vmul.f32 %v6835_v11, %v6813_v44  ;;  %v6833_v30 = vpop.permute.xlu0 %6832 }
0x1e43   : > { %v6852_v28 = vmul.f32 %v6833_v30, %v6812_v37 }
0x1e44   : > { %v6869_v39 = vadd.f32 %v6861_v54, %v6853_v4 }
0x1e45   : > { %v6868_v59 = vadd.f32 %v6860_v51, %v6852_v28  ;;  %v6839_v1 = vpop.permute.xlu1 %6838 }
0x1e46   : > { %v6855_v7 = vmul.f32 %v6839_v1, %v6815_v33  ;;  %6901 = vrot.lane.b32.xlu1 %v6869_v39, %s11185_s20  ;;  %v6837_v31 = vpop.permute.xlu0 %6836 }
0x1e47   : > { %v6854_v57 = vmul.f32 %v6837_v31, %v6814_v24  ;;  %6899 = vrot.lane.b32.xlu0 %v6868_v59, %s11185_s20 }
0x1e48   : > { %v6871_v26 = vadd.f32 %v6863_v6, %v6855_v7 }
0x1e49   : > { %v6870_v9 = vadd.f32 %v6862_v40, %v6854_v57 }
0x1e4a   : > { %6905 = vrot.lane.b32.xlu1 %v6871_v26, %s11185_s20 }
0x1e4b   : > { %6903 = vrot.lane.b32.xlu0 %v6870_v9, %s11185_s20 }
0x1ea9   : > { %v13935_v48 = vpop.permute.xlu1 %6893 }
0x1eaa   : > { %v6892_v45 = vpop.permute.xlu0 %6891 }
0x1eab   : > { %9714 = vmatprep.mubr.msk.f32.mxu1 %vm941_vm2, %v6892_v45  ;;  %9727 = vmatpush3.msra.mxu0 %v6892_v45 }
0x1eac   : > { %9715 = vmatmul.mubr.msk.f32.vlgmr.msra.gmra.mrb[166].mxu1 %vm941_vm2, %v13935_v48  ;;  %9731 = vmatprep.subr.mxu0 %v14153_v58 }
0x1eb1   : > { %v13941_v8 = vpop.permute.xlu1 %6897 }
0x1eb2   : > { %v6896_v5 = vpop.permute.xlu0 %6895 }
0x1eb3   : > { %9717 = vmatprep.mubr.msk.f32.mxu1 %vm941_vm2, %v6896_v5  ;;  %9737 = vmatpush3.msra.mxu1 %v6896_v5 }
0x1eb4   : > { %9718 = vmatmul.mubr.msk.f32.gmra.mrb[168].mxu1 %vm941_vm2, %v13941_v8  ;;  %9746 = vmatprep.subr.mxu1 %v14153_v58 }
0x1eb8   : > { %v13947_v32 = vpop.permute.xlu1 %6901 }
0x1eb9   : > { %v13949_v19 = vpop.permute.xlu0 %6899 }
0x1eba   : > { %9720 = vmatprep.mubr.msk.f32.mxu1 %vm941_vm2, %v13949_v19 }
0x1ebb   : > { %9721 = vmatmul.mubr.msk.f32.gmra.mrb[170].mxu1 %vm941_vm2, %v13947_v32 }
0x1ebc   : > { %v13957_v43 = vpop.permute.xlu1 %6905 }
0x1ebd   : > { %v13955_v47 = vpop.permute.xlu0 %6903 }
0x1ebe   : > { %9723 = vmatprep.mubr.msk.f32.mxu1 %vm941_vm2, %v13955_v47 }
0x1ebf   : > { %9724 = vmatmul.mubr.msk.f32.gmra.mrb[172].mxu1 %vm941_vm2, %v13957_v43 }
0x1ec0   : > { %9738 = vmatprep.mubr.msk.f32.mxu1 %vm11189_vm7, %v14153_v58 }
0x1f7f   : > { %v9716_v38 = vpop.f32.mrb[166].mxu1 }
0x1f80   : > { %v6995_v18 = vadd.f32 %v9716_v38, %v8761_v2  ;;  %v6989_v15 = vpop.f32.mrb[167].mxu1 }
0x1f81   : > { %v6990_v60 = vadd.f32 %v8761_v2, %v6989_v15 }
0x1f82   : > { %7060 = vxpose.xlu1.b32.start.end [1/1] (short) (narrow) %v6995_v18, 8 }
0x1f83   : > { %7028 = vxpose.xlu0.b32.start.end [1/1] (short) (narrow) %v6990_v60, 8 }
0x1f87   : > { %v9719_v23 = vpop.f32.mrb[168].mxu1 }
0x1f88   : > { %v7005_v61 = vadd.f32 %v9719_v23, %v8761_v2  ;;  %v6999_v29 = vpop.f32.mrb[169].mxu1 }
0x1f89   : > { %v7000_v34 = vadd.f32 %v8761_v2, %v6999_v29 }
0x1f8a   : > { %7124 = vxpose.xlu0.b32.start.end [1/1] (short) (narrow) %v7005_v61, 8 }
0x1f8e   : > { %v9722_v35 = vpop.f32.mrb[170].mxu1  ;;  %7092 = vxpose.xlu0.b32.start.end [1/1] (short) (narrow) %v7000_v34, 8 }
0x1f8f   : > { %v7009_v49 = vpop.f32.mrb[171].mxu1  ;;  %v7015_v21 = vadd.f32 %v9722_v35, %v8761_v2 }
0x1f90   : > { %v7010_v17 = vadd.f32 %v8761_v2, %v7009_v49 }
0x1f92   : > { %v9725_v10 = vpop.f32.mrb[172].mxu1  ;;  %7188 = vxpose.xlu0.b32.start.end [1/1] (short) (narrow) %v7015_v21, 8 }
0x1f93   : > { %v7019_v52 = vpop.f32.mrb[173].mxu1  ;;  %v7025_v0 = vadd.f32 %v9725_v10, %v8761_v2 }
0x1f94   : > { %v7020_v56 = vadd.f32 %v8761_v2, %v7019_v52 }
0x1f96   : > { %7220 = vxpose.xlu1.b32.start.end [1/1] (short) (narrow) %v7020_v56, 8  ;;  %7156 = vxpose.xlu0.b32.start.end [1/1] (short) (narrow) %v7010_v17, 8 }
0x1f9a   : > { %7252 = vxpose.xlu0.b32.start.end [1/1] (short) (narrow) %v7025_v0, 8 }
0x2002   : > { %v7076_v3 = vpop.trf.xlu1 }
0x2003   : > { %v7044_v55 = vpop.trf.xlu0  ;;  %v7288_v16 = vsel %vm7284_vm3, %v7076_v3, -inf }
0x2004   : > { %7289 = vmax.xlane.f32.xlu0 %v7288_v16  ;;  %v7285_v46 = vsel %vm7284_vm3, %v7044_v55, -inf }
0x2005   : > { %7286 = vmax.xlane.f32.xlu1 %v7285_v46 }
0x200a   : > { %v7140_v53 = vpop.trf.xlu0 }
0x200b   : > { %v7294_v27 = vsel %vm7284_vm3, %v7140_v53, -inf }
0x200c   : > { %7295 = vmax.xlane.f32.xlu1 %v7294_v27 }
0x200e   : > { %v7108_v12 = vpop.trf.xlu0 }
0x200f   : > { %v7291_v14 = vsel %vm7284_vm3, %v7108_v12, -inf }
0x2010   : > { %7292 = vmax.xlane.f32.xlu1 %v7291_v14 }
0x2012   : > { %v7204_v13 = vpop.trf.xlu0 }
0x2013   : > { %v7300_v25 = vsel %vm7284_vm3, %v7204_v13, -inf }
0x2014   : > { %7301 = vmax.xlane.f32.xlu1 %v7300_v25 }
0x2016   : > { %v7172_v63 = vpop.trf.xlu0  ;;  %v7236_v20 = vpop.trf.xlu1 }
0x2017   : > { %v7297_v42 = vsel %vm7284_vm3, %v7172_v63, -inf  ;;  %v7303_v50 = vsel %vm7284_vm3, %v7236_v20, -inf }
0x2018   : > { %7298 = vmax.xlane.f32.xlu0 %v7297_v42 }
0x201a   : > { %v7268_v41 = vpop.trf.xlu0 }
0x201b   : > { %v7306_v22 = vsel %vm7284_vm3, %v7268_v41, -inf }
0x201c   : > { %7304 = vmax.xlane.f32.xlu0 %v7303_v50  ;;  %7307 = vmax.xlane.f32.xlu1 %v7306_v22 }
0x2091   : > { %v7290_v36 = vpop.xlane.xlu0 %7289 }
0x2092   : > { %v7310_v62 = vsub.f32 %v7076_v3, %v7290_v36  ;;  %v7287_v44 = vpop.xlane.xlu1 %7286 }
0x2093   : > { %v7309_v11 = vsub.f32 %v7044_v55, %v7287_v44 }
0x2094   : > { %v7319_v37 = vmul.f32 1.442695, %v7310_v62 }
0x2095   : > { %v7317_v54 = vmul.f32 1.442695, %v7309_v11  ;;  %v7967_v11 = vld [vmem:[%s14076_s13 + $0x8] sm:$0xff] }
0x2096   : > { %10886 = vpow2.f32 %v7319_v37 }
0x2097   : > { %10888 = vpow2.f32 %v7317_v54 }
0x2099   : > { %v7296_v4 = vpop.xlane.xlu1 %7295 }
0x209a   : > { %v7312_v30 = vsub.f32 %v7140_v53, %v7296_v4 }
0x209c   : > { %v7323_v51 = vmul.f32 1.442695, %v7312_v30 }
0x209d   : > { %v7293_v28 = vpop.xlane.xlu1 %7292 }
0x209e   : > { %10890 = vpow2.f32 %v7323_v51  ;;  %v7311_v39 = vsub.f32 %v7108_v12, %v7293_v28 }
0x20a0   : > { %v10887_v33 = vpop.eup %10886  ;;  %v7321_v1 = vmul.f32 1.442695, %v7311_v39 }
0x20a1   : > { %v10889_v59 = vpop.eup %10888  ;;  %v7336_v24 = vsel %vm7284_vm3, %v10887_v33, 0.0  ;;  %v7302_v6 = vpop.xlane.xlu1 %7301 }
0x20a2   : > { %7337 = vadd.xlane.f32.xlu1 %v7336_v24  ;;  %v7333_v7 = vsel %vm7284_vm3, %v10889_v59, 0.0  ;;  %10892 = vpow2.f32 %v7321_v1  ;;  %v7314_v31 = vsub.f32 %v7204_v13, %v7302_v6 }
0x20a3   : > { %7334 = vadd.xlane.f32.xlu0 %v7333_v7 }
0x20a4   : > { %v7327_v40 = vmul.f32 1.442695, %v7314_v31 }
0x20a5   : > { %v7299_v57 = vpop.xlane.xlu0 %7298 }
0x20a6   : > { %10894 = vpow2.f32 %v7327_v40  ;;  %v7313_v26 = vsub.f32 %v7172_v63, %v7299_v57 }
0x20a8   : > { %v10891_v9 = vpop.eup %10890  ;;  %v7325_v45 = vmul.f32 1.442695, %v7313_v26 }
0x20a9   : > { %v7308_v5 = vpop.xlane.xlu1 %7307  ;;  %v7305_v2 = vpop.xlane.xlu0 %7304  ;;  %v7342_v38 = vsel %vm7284_vm3, %v10891_v9, 0.0 }
0x20aa   : > { %10896 = vpow2.f32 %v7325_v45  ;;  %v7316_v18 = vsub.f32 %v7268_v41, %v7308_v5  ;;  %v7315_v15 = vsub.f32 %v7236_v20, %v7305_v2  ;;  %7343 = vadd.xlane.f32.xlu1 %v7342_v38 }
0x20ac   : > { %v10893_v60 = vpop.eup %10892  ;;  %v7331_v23 = vmul.f32 1.442695, %v7316_v18  ;;  %v7329_v61 = vmul.f32 1.442695, %v7315_v15  ;;  %v8086_v18 = vld [vmem:[%s14078_s15] sm:$0xff]  ;;  %v8087_v15 = vld [vmem:[%s14078_s15 + $0x8] sm:$0xff] }
0x20ad   : > { %v7339_v29 = vsel %vm7284_vm3, %v10893_v60, 0.0 }
0x20ae   : > { %10898 = vpow2.f32 %v7331_v23  ;;  %7340 = vadd.xlane.f32.xlu0 %v7339_v29  ;;  %v8088_v23 = vld [vmem:[%s14078_s15 + $0x10] sm:$0xff] }
0x20af   : > { %10900 = vpow2.f32 %v7329_v61  ;;  %v8089_v61 = vld [vmem:[%s14078_s15 + $0x18] sm:$0xff] }
0x20b0   : > { %v10895_v34 = vpop.eup %10894  ;;  %v10150_v29 = vpack.c.bf16 %v8089_v61, %v8088_v23 }
0x20b1   : > { %v7348_v35 = vsel %vm7284_vm3, %v10895_v34, 0.0 }
0x20b2   : > { %7349 = vadd.xlane.f32.xlu1 %v7348_v35 }
0x20b4   : > { %v10897_v49 = vpop.eup %10896 }
0x20b5   : > { %v7345_v21 = vsel %vm7284_vm3, %v10897_v49, 0.0 }
0x20b6   : > { %7346 = vadd.xlane.f32.xlu0 %v7345_v21 }
0x20b8   : > { %v10899_v10 = vpop.eup %10898 }
0x20b9   : > { %v10901_v52 = vpop.eup %10900  ;;  %v7354_v56 = vsel %vm7284_vm3, %v10899_v10, 0.0 }
0x20ba   : > { %7355 = vadd.xlane.f32.xlu1 %v7354_v56  ;;  %v7351_v17 = vsel %vm7284_vm3, %v10901_v52, 0.0 }
0x20bb   : > { %7352 = vadd.xlane.f32.xlu0 %v7351_v17 }
0x212f   : > { %v7338_v0 = vpop.xlane.xlu1 %7337 }
0x2130   : > { %v7335_v3 = vpop.xlane.xlu0 %7334 }
0x2131   : > { %10902 = vrcp.f32 %v7335_v3 }
0x2132   : > { %10904 = vrcp.f32 %v7338_v0 }
0x2137   : > { %v7344_v55 = vpop.xlane.xlu1 %7343 }
0x2138   : > { %10906 = vrcp.f32 %v7344_v55 }
0x213b   : > { %v10903_v16 = vpop.eup %10902  ;;  %v7341_v53 = vpop.xlane.xlu0 %7340 }
0x213c   : > { %v7365_v46 = vmul.f32 %v10903_v16, %v10889_v59  ;;  %v10905_v27 = vpop.eup %10904  ;;  %10908 = vrcp.f32 %v7341_v53  ;;  %v8783_v53 = vld [vmem:[#allocation2] ss:$0 sm:$0xff] }
0x213d   : > { %v7366_v12 = vmul.f32 %v10905_v27, %v10887_v33 }
0x213e   : > { %9729 = vmatmul.mubr.msk.f32.vlgmr.msra.gmra.mrb[122].mxu0 %vm7374_vm1, %v7365_v46 }
0x213f   : > { %9732 = vmatpush3.msra.mxu0 %v13935_v48  ;;  %9733 = vmatprep.mubr.msk.f32.mxu0 %vm11189_vm7, %v14153_v58  ;;  %v7350_v14 = vpop.xlane.xlu1 %7349 }
0x2140   : > { %9741 = vmatprep.subr.mxu0 %v14153_v58  ;;  %10910 = vrcp.f32 %v7350_v14 }
0x2142   : > { %9734 = vmatmul.mubr.msk.f32.vlgmr.msra.gmra.mrb[124].mxu0 %vm7374_vm1, %v7366_v12  ;;  %v10907_v13 = vpop.eup %10906 }
0x2143   : > { %9742 = vmatpush3.msra.mxu0 %v13941_v8  ;;  %9743 = vmatprep.mubr.msk.f32.mxu0 %vm11189_vm7, %v14153_v58  ;;  %v7368_v25 = vmul.f32 %v10907_v13, %v10891_v9  ;;  %v7347_v63 = vpop.xlane.xlu0 %7346 }
0x2144   : > { %9751 = vmatprep.subr.mxu0 %v14153_v58  ;;  %10912 = vrcp.f32 %v7347_v63 }
0x2146   : > { %9744 = vmatmul.mubr.msk.f32.vlgmr.msra.gmra.mrb[126].mxu0 %vm7374_vm1, %v7368_v25  ;;  %v10909_v48 = vpop.eup %10908 }
0x2147   : > { %9752 = vmatpush3.msra.mxu0 %v13947_v32  ;;  %9753 = vmatprep.mubr.msk.f32.mxu0 %vm11189_vm7, %v14153_v58  ;;  %v7367_v20 = vmul.f32 %v10909_v48, %v10893_v60  ;;  %v7356_v42 = vpop.xlane.xlu1 %7355  ;;  %v10146_v60 = vpack.c.bf16 %v8087_v15, %v8086_v18 }
0x2148   : > { %9761 = vmatprep.subr.mxu0 %v14153_v58  ;;  %10914 = vrcp.f32 %v7356_v42  ;;  %v7353_v8 = vpop.xlane.xlu0 %7352 }
0x2149   : > { %10916 = vrcp.f32 %v7353_v8  ;;  %9739 = vmatmul.mubr.msk.f32.vlgmr.msra.gmra.mrb[174].mxu1 %vm7374_vm1, %v7367_v20 }
0x214a   : > { %v10911_v50 = vpop.eup %10910  ;;  %9747 = vmatpush3.msra.mxu1 %v13949_v19  ;;  %9748 = vmatprep.mubr.msk.f32.mxu1 %vm11189_vm7, %v14153_v58 }
0x214b   : > { %v7370_v41 = vmul.f32 %v10911_v50, %v10895_v34  ;;  %9756 = vmatprep.subr.mxu1 %v14153_v58  ;;  %v8778_v34 = vld [vmem:[%s14077_s14] ss:$0 sm:$0xff] }
0x214d   : > { %9754 = vmatmul.mubr.msk.f32.vlgmr.msra.gmra.mrb[128].mxu0 %vm7374_vm1, %v7370_v41 }
0x214e   : > { %v10913_v32 = vpop.eup %10912  ;;  %9762 = vmatpush3.msra.mxu0 %v13957_v43  ;;  %9763 = vmatprep.mubr.msk.f32.mxu0 %vm11189_vm7, %v14153_v58  ;;  %v7966_v43 = vld [vmem:[%s14076_s13] sm:$0xff] }
0x214f   : > { %v7369_v22 = vmul.f32 %v10913_v32, %v10897_v49  ;;  %v10138_v37 = vpack.c.bf16 %v7967_v11, %v7966_v43  ;;  %10147 = vmatprep.subr.bf16.mxu0 %v10146_v60 }
0x2151   : > { %9749 = vmatmul.mubr.msk.f32.vlgmr.msra.gmra.mrb[176].mxu1 %vm7374_vm1, %v7369_v22 }
0x2152   : > { %v10915_v36 = vpop.eup %10914  ;;  %9757 = vmatpush3.msra.mxu1 %v13955_v47  ;;  %9758 = vmatprep.mubr.msk.f32.mxu1 %vm11189_vm7, %v14153_v58  ;;  %v7968_v58 = vld [vmem:[%s14076_s13 + $0x10] sm:$0xff]  ;;  %v7969_v47 = vld [vmem:[%s14076_s13 + $0x18] sm:$0xff]  ;;  %vm8277_vm7 = vcmask 1044484  }
0x2153   : > { %v10917_v19 = vpop.eup %10916  ;;  %v7372_v62 = vmul.f32 %v10915_v36, %v10899_v10  ;;  %10139 = vmatprep.subr.bf16.mxu1 %v10138_v37  ;;  %v10142_v54 = vpack.c.bf16 %v7969_v47, %v7968_v58 }
0x2154   : > { %v7371_v44 = vmul.f32 %v10917_v19, %v10901_v52 }
0x2155   : > { %9764 = vmatmul.mubr.msk.f32.vlgmr.msra.gmra.mrb[130].mxu0 %vm7374_vm1, %v7372_v62 }
0x2156   : > { %9759 = vmatmul.mubr.msk.f32.vlgmr.msra.gmra.mrb[178].mxu1 %vm7374_vm1, %v7371_v44  ;;  %10149 = vmatpush3.bf16.msra.mxu0 %v10146_v60 }
0x2157   : > { %10141 = vmatpush3.bf16.msra.mxu1 %v10138_v37  ;;  %10151 = vmatprep.subr.bf16.mxu0 %v10150_v29 }
0x2158   : > { %10143 = vmatprep.subr.bf16.mxu1 %v10142_v54 }
0x215a   : > { %10153 = vmatpush3.bf16.msra.mxu0 %v10150_v29 }
0x215b   : > { %10145 = vmatpush3.bf16.msra.mxu1 %v10142_v54 }
0x2211   : > { %v7444_v4 = vpop.f32.mrb[122].mxu0 }
0x2212   : > { %v9730_v30 = vpop.f32.mrb[123].mxu0 }
0x2215   : > { %v7518_v51 = vpop.f32.mrb[124].mxu0 }
0x2216   : > { %v7985_v28 = vcombine.low %v7444_v4, %v7518_v51  ;;  %v9735_v39 = vpop.f32.mrb[125].mxu0 }
0x2218   : > { %9774 = vmatprep.mubr.msk.f32.mxu1 %vm941_vm2, %v7985_v28 }
0x2219   : > { %v7666_v33 = vpop.f32.mrb[126].mxu0 }
0x221a   : > { %v9745_v59 = vpop.f32.mrb[127].mxu0 }
0x221c   : > { %v7592_v1 = vpop.f32.mrb[174].mxu1 }
0x221d   : > { %v7986_v24 = vcombine.low %v7592_v1, %v7666_v33  ;;  %v9740_v6 = vpop.f32.mrb[175].mxu1 }
0x221f   : > { %9775 = vmatmul.mubr.msk.f32.vlgmr.msra.gmra.mrb[180].mxu1 %vm941_vm2, %v7986_v24 }
0x2220   : > { %v7814_v7 = vpop.f32.mrb[128].mxu0 }
0x2221   : > { %v9755_v31 = vpop.f32.mrb[129].mxu0 }
0x2224   : > { %v7740_v40 = vpop.f32.mrb[176].mxu1 }
0x2225   : > { %v7987_v57 = vcombine.low %v7740_v40, %v7814_v7  ;;  %v9750_v26 = vpop.f32.mrb[177].mxu1 }
0x2227   : > { %9777 = vmatprep.mubr.msk.f32.mxu1 %vm941_vm2, %v7987_v57 }
0x2228   : > { %v7962_v9 = vpop.f32.mrb[130].mxu0 }
0x2229   : > { %v7888_v45 = vpop.f32.mrb[178].mxu1  ;;  %v9765_v5 = vpop.f32.mrb[131].mxu0 }
0x222a   : > { %v7988_v2 = vcombine.low %v7888_v45, %v7962_v9  ;;  %v9760_v38 = vpop.f32.mrb[179].mxu1 }
0x222c   : > { %9778 = vmatmul.mubr.msk.f32.gmra.mrb[182].mxu1 %vm941_vm2, %v7988_v2 }
0x22f2   : > { %v9776_v35 = vpop.f32.mrb[180].mxu1 }
0x22f3   : > { %v8069_v49 = vadd.f32 %v9776_v35, %v8778_v34  ;;  %v8063_v21 = vpop.f32.mrb[181].mxu1 }
0x22f4   : > { %v8064_v10 = vadd.f32 %v8778_v34, %v8063_v21 }
0x22f6   : > { %10918 = vtanh.f32 %v8064_v10 }
0x22f7   : > { %10920 = vtanh.f32 %v8069_v49 }
0x22ff   : > { %v9779_v52 = vpop.f32.mrb[182].mxu1 }
0x2300   : > { %v10919_v56 = vpop.eup %10918  ;;  %v8079_v17 = vadd.f32 %v9779_v52, %v8778_v34  ;;  %v8073_v0 = vpop.f32.mrb[183].mxu1 }
0x2301   : > { %v10921_v3 = vpop.eup %10920  ;;  %v8074_v55 = vadd.f32 %v8778_v34, %v8073_v0  ;;  %9788 = vmatprep.mubr.msk.f32.mxu0 %vm941_vm2, %v10919_v56 }
0x2302   : > { %9789 = vmatmul.mubr.msk.f32.vlgmr.msra.gmra.mrb[132].mxu0 %vm941_vm2, %v10921_v3 }
0x2303   : > { %10922 = vtanh.f32 %v8074_v55 }
0x2304   : > { %10924 = vtanh.f32 %v8079_v17 }
0x230d   : > { %v10923_v16 = vpop.eup %10922 }
0x230e   : > { %v10925_v46 = vpop.eup %10924  ;;  %9791 = vmatprep.mubr.msk.f32.mxu0 %vm941_vm2, %v10923_v16 }
0x230f   : > { %9792 = vmatmul.mubr.msk.f32.gmra.mrb[134].mxu0 %vm941_vm2, %v10925_v46  ;;  %vm8271_vm2 = vcmask 1041409  }
0x23d5   : > { %v9790_v27 = vpop.f32.mrb[132].mxu0 }
0x23d6   : > { %v8181_v12 = vadd.f32 %v9790_v27, %v8783_v53  ;;  %v8175_v14 = vpop.f32.mrb[133].mxu0 }
0x23d7   : > { %v8176_v13 = vadd.f32 %v8783_v53, %v8175_v14 }
0x23d8   : > { %v8199_v25 = vcombine.high %v8181_v12, %v8181_v12  ;;  %v8221_v63 = vsel %vm8206_vm4, %v8181_v12, 0.0 }
0x23d9   : > { %v8222_v48 = vrot.slane %v8221_v63, 4  ;;  %v8198_v20 = vcombine.high %v8176_v13, %v8176_v13  ;;  %v8207_v42 = vsel %vm8206_vm4, %v8176_v13, 0.0 }
0x23da   : > { %v8228_v8 = vsel %vm8206_vm4, %v8199_v25, 0.0  ;;  %v8208_v50 = vrot.slane %v8207_v42, 4 }
0x23db   : > { %v8223_v41 = vadd.f32 %v8222_v48, %v8221_v63  ;;  %v8229_v32 = vrot.slane %v8228_v8, 4  ;;  %v8214_v22 = vsel %vm8206_vm4, %v8198_v20, 0.0 }
0x23dc   : > { %v8209_v36 = vadd.f32 %v8208_v50, %v8207_v42  ;;  %v8215_v19 = vrot.slane %v8214_v22, 4 }
0x23dd   : > { %v8224_v62 = vrot.slane %v8223_v41, 2  ;;  %v8230_v44 = vadd.f32 %v8229_v32, %v8228_v8 }
0x23de   : > { %v8210_v43 = vrot.slane %v8209_v36, 2  ;;  %v8216_v11 = vadd.f32 %v8215_v19, %v8214_v22 }
0x23df   : > { %v8225_v37 = vadd.f32 %v8224_v62, %v8223_v41  ;;  %v8231_v58 = vrot.slane %v8230_v44, 2 }
0x23e0   : > { %v8211_v47 = vadd.f32 %v8210_v43, %v8209_v36  ;;  %v8217_v54 = vrot.slane %v8216_v11, 2 }
0x23e1   : > { %v8232_v4 = vadd.f32 %v8231_v58, %v8230_v44  ;;  %v8226_v39 = vrot.slane %v8225_v37, 1 }
0x23e2   : > { %v8212_v30 = vrot.slane %v8211_v47, 1  ;;  %v8218_v51 = vadd.f32 %v8217_v54, %v8216_v11  ;;  %v9793_v28 = vpop.f32.mrb[134].mxu0 }
0x23e3   : > { %v8233_v33 = vrot.slane %v8232_v4, 1  ;;  %v8191_v59 = vadd.f32 %v9793_v28, %v8783_v53  ;;  %v8185_v1 = vpop.f32.mrb[135].mxu0  ;;  %v8227_v5 = vadd.f32 %v8226_v39, %v8225_v37 }
0x23e4   : > { %v8219_v24 = vrot.slane %v8218_v51, 1  ;;  %v8186_v6 = vadd.f32 %v8783_v53, %v8185_v1  ;;  %v8213_v7 = vadd.f32 %v8212_v30, %v8211_v47 }
0x23e5   : > { %v8201_v31 = vcombine.high %v8191_v59, %v8191_v59  ;;  %v8249_v40 = vsel %vm8206_vm4, %v8191_v59, 0.0  ;;  %v8234_v2 = vadd.f32 %v8233_v33, %v8232_v4 }
0x23e6   : > { %v8220_v57 = vadd.f32 %v8219_v24, %v8218_v51  ;;  %v8250_v26 = vrot.slane %v8249_v40, 4  ;;  %v8200_v9 = vcombine.high %v8186_v6, %v8186_v6  ;;  %v8235_v45 = vsel %vm8206_vm4, %v8186_v6, 0.0 }
0x23e7   : > { %v8256_v38 = vsel %vm8206_vm4, %v8201_v31, 0.0  ;;  %v8236_v18 = vrot.slane %v8235_v45, 4 }
0x23e8   : > { %v8272_v15 = vsel %vm8271_vm2, %v8220_v57, %v8213_v7  ;;  %v8251_v60 = vadd.f32 %v8250_v26, %v8249_v40  ;;  %v8257_v23 = vrot.slane %v8256_v38, 4  ;;  %v8242_v61 = vsel %vm8206_vm4, %v8200_v9, 0.0 }
0x23e9   : > { %v8274_v29 = vsel %vm8273_vm5, %v8227_v5, %v8272_v15  ;;  %v8237_v34 = vadd.f32 %v8236_v18, %v8235_v45  ;;  %v8243_v35 = vrot.slane %v8242_v61, 4 }
0x23ea   : > { %v8252_v49 = vrot.slane %v8251_v60, 2  ;;  %v8258_v21 = vadd.f32 %v8257_v23, %v8256_v38  ;;  %v8276_v10 = vsel %vm8275_vm6, %v8234_v2, %v8274_v29 }
0x23eb   : > { %v8238_v52 = vrot.slane %v8237_v34, 2  ;;  %v8244_v56 = vadd.f32 %v8243_v35, %v8242_v61 }
0x23ec   : > { %v8253_v17 = vadd.f32 %v8252_v49, %v8251_v60  ;;  %v8259_v0 = vrot.slane %v8258_v21, 2 }
0x23ed   : > { %v8239_v3 = vadd.f32 %v8238_v52, %v8237_v34  ;;  %v8245_v55 = vrot.slane %v8244_v56, 2 }
0x23ee   : > { %v8260_v16 = vadd.f32 %v8259_v0, %v8258_v21  ;;  %v8254_v27 = vrot.slane %v8253_v17, 1 }
0x23ef   : > { %v8240_v46 = vrot.slane %v8239_v3, 1  ;;  %v8246_v53 = vadd.f32 %v8245_v55, %v8244_v56 }
0x23f0   : > { %v8261_v12 = vrot.slane %v8260_v16, 1  ;;  %v8255_v48 = vadd.f32 %v8254_v27, %v8253_v17 }
0x23f1   : > { %v8241_v14 = vadd.f32 %v8240_v46, %v8239_v3  ;;  %v8247_v13 = vrot.slane %v8246_v53, 1 }
0x23f2   : > { %v8262_v20 = vadd.f32 %v8261_v12, %v8260_v16 }
0x23f3   : > { %v8248_v25 = vadd.f32 %v8247_v13, %v8246_v53  ;;  %v8278_v63 = vsel %vm8277_vm7, %v8241_v14, %v8276_v10 }
0x23f5   : > { %v8280_v42 = vsel %vm8279_vm8, %v8248_v25, %v8278_v63 }
0x23f6   : > { %v8282_v8 = vsel %vm8281_vm9, %v8255_v48, %v8280_v42 }
0x23f7   : > { %v8284_v50 = vsel %vm8283_vm10, %v8262_v20, %v8282_v8 }
0x23f8   : > { %8287 = vst.msk [vmem:[%s666_s22] sm:$0xff] %vm8286_vm11, %v8284_v50 }
0x23f9 PF: > { %s14176_s28 = sld [smem:[#allocation18_spill]] }
0x23ff   : > { %s33_s26 = sadd.s32 1, %s14176_s28  }
0x2400   : > { %p30_p10 = scmp.ge.s32.totalorder %s33_s26, 4  }
0x2402   :  { %32 = sbr.rel (!%p30_p10) target bundleno = 11 (0xb), region = 162 }
0x2409   :  { %8307 = vsyncpa [#allocation4], 1 }
0x240a   :  { %8309 = vsyncpa [#allocation4 + $0x1], 1 }
0x240b   :  { %8310 = vsyncpa [#allocation6], 1 }
0x240c   :  { %8311 = vsyncpa [#allocation9], 1 }
0x240d   :  { %8312 = vsyncpa [#allocation12], 1 }

</bundles_post_ra>
